<compile_context>
chip_gen: v7x
topology: tpu7x:2x2x1
jax: 0.10.0
libtpu: 0.0.40
codegen_flags: <defaults>
</compile_context>

<pallas_src>
import functools

import jax
import jax.numpy as jnp
from jax.experimental import pallas as pl
from jax.experimental.pallas import tpu as pltpu

EPS = 1e-5            # PyTorch BatchNorm2d default eps
LANE = 128            # TPU lane width
DEFAULT_TILE_M = 512  # measured ~85% of HBM roofline at 512 on v6e


def _round_up(x, m):
    return (x + m - 1) // m * m


def _vmem_limit_bytes(block_bytes):
    """Scoped-VMEM request sized from the actual block footprint (+ headroom)
    instead of a blanket large number (v7x only has 64 MiB per TensorCore)."""
    return int(min(100 * 1024 * 1024,
                   max(16 * 1024 * 1024, block_bytes + 8 * 1024 * 1024)))


# ----------------------------------------------------------------------------
# Pallas kernels
# ----------------------------------------------------------------------------
def _matmul_bias_act_kernel(p_ref, w_ref, b_ref, o_ref, *, act):
    """One M-tile: out = act(patches_bf16 @ w_bf16 + bias), f32 accumulate."""
    acc = jnp.dot(p_ref[...], w_ref[...], preferred_element_type=jnp.float32)
    acc = acc + b_ref[...]
    if act == "relu":
        acc = jnp.maximum(acc, 0.0)
    elif act == "leaky":              # LeakyReLU default negative_slope = 0.01
        acc = jnp.maximum(acc, 0.01 * acc)
    o_ref[...] = acc.astype(o_ref.dtype)


def _matmul_bias_relu_mask_kernel(p_ref, w_ref, b_ref, m_ref, op_ref, of_ref):
    """conv6 epilogue fused with the mask multiply: two outputs per tile."""
    acc = jnp.dot(p_ref[...], w_ref[...], preferred_element_type=jnp.float32)
    acc = jnp.maximum(acc + b_ref[...], 0.0)
    op_ref[...] = acc.astype(op_ref.dtype)
    of_ref[...] = (acc * m_ref[...]).astype(of_ref.dtype)


def _resnet_stack_kernel(h_ref, w_ref, b_ref, m_ref, o_ref, *, wp, n_blocks):
    """Five BasicBlocks fused into one kernel (one image per grid step).

    h_ref : (Mr, 128) f32            activation in flattened zero-padded
                                     (hp*wp rows, halo rows zero) layout
    w_ref : (10, 9*128, 128) bf16    per-stage weights, the 9 taps stacked on
                                     the contraction axis (BN scale folded in)
    b_ref : (10, 1, 128) f32         folded BN biases
    m_ref : (Mr, 1) f32              1.0 on interior rows, 0.0 on halo/pad rows
    """
    mr, c = h_ref.shape
    offs = tuple(dy * wp + dx for dy in (-1, 0, 1) for dx in (-1, 0, 1))
    # Hoisted: JAX does not CSE broadcast_in_dim, so broadcast (Mr,1)->(Mr,C)
    # once instead of twice per block.
    mask_b = jnp.broadcast_to(m_ref[...], (mr, c))

    def conv3x3(x, stage):
        # ONE MXU pass per conv: the 9 shifted taps are concatenated on the
        # lane axis into a (Mr, 9*C) LHS and contracted against the stage's
        # (9*C, C) weight slab (K = 1152 feeds the 256-deep MXU efficiently,
        # no per-tap f32 accumulate adds).
        # TODO(synk): rolling a pre-cast bf16 activation would halve XLU roll
        #             traffic, but packed (16-bit) sublane rotates are not
        #             reliably lowered, so rolls stay f32 and the bf16 cast
        #             happens once on the concatenated LHS.
        taps = [x if off == 0 else pltpu.roll(x, (-off) % mr, axis=0)
                for off in offs]
        lhs = jnp.concatenate(taps, axis=-1).astype(jnp.bfloat16)
        return (jnp.dot(lhs, w_ref[stage], preferred_element_type=jnp.float32)
                + b_ref[stage])

    def block_body(blk, h):
        t1 = jnp.maximum(conv3x3(h, 2 * blk), 0.0) * mask_b     # conv1+bn1+relu
        t2 = conv3x3(t1, 2 * blk + 1)                           # conv2+bn2
        return jnp.maximum(t2 + h, 0.0) * mask_b                # +identity, relu

    # fori_loop bounds live ranges per block while keeping the tap structure
    # inside each stage fully visible to the scheduler.
    o_ref[...] = jax.lax.fori_loop(0, n_blocks, block_body, h_ref[...])


# ----------------------------------------------------------------------------
# Kernel wrappers
# ----------------------------------------------------------------------------
def fused_conv_matmul(patches, w, bias, act="none", mask=None,
                      out_dtype=jnp.float32):
    """act(patches @ w + bias): M-tiled grid, bf16 MXU inputs, resident
    (constant-block-index) weights/bias, K and C_out padded to lane multiples.

    If `mask` (shape (M, 1)) is given: activation is ReLU and the call returns
    (out_prev, out_prev * mask) from a single kernel (used for conv6)."""
    M, K = patches.shape
    cout = w.shape[1]
    coutp = _round_up(cout, LANE)          # lane-dense output stores
    Kp = _round_up(K, LANE)                # lane-dense LHS / clean K cadence

    # Big tiles amortize the ~0.35us/step overhead, but keep >=2 grid steps
    # when M is large enough so both v7x TensorCores get work.
    if M >= 2 * DEFAULT_TILE_M:
        tile_m = DEFAULT_TILE_M
    elif M >= 256:
        tile_m = _round_up(-(-M // 2), 16)
    else:
        tile_m = _round_up(M, 16)
    Mp = _round_up(M, tile_m)

    patches_bf = patches.astype(jnp.bfloat16)
    if Mp != M or Kp != K:
        patches_bf = jnp.pad(patches_bf, ((0, Mp - M), (0, Kp - K)))
    if Kp != K or coutp != cout:
        w = jnp.pad(w, ((0, Kp - K), (0, coutp - cout)))
        bias = jnp.pad(bias, (0, coutp - cout))
    w_bf = w.astype(jnp.bfloat16)
    bias2 = bias.reshape(1, coutp).astype(jnp.float32)

    grid = (Mp // tile_m,)
    p_spec = pl.BlockSpec((tile_m, Kp), lambda i: (i, 0))
    w_spec = pl.BlockSpec((Kp, coutp), lambda i: (0, 0))    # resident weights
    b_spec = pl.BlockSpec((1, coutp), lambda i: (0, 0))     # resident bias
    o_spec = pl.BlockSpec((tile_m, coutp), lambda i: (i, 0))

    out_isz = jnp.dtype(out_dtype).itemsize
    n_out = 1 if mask is None else 2
    block_bytes = 2 * (tile_m * Kp * 2 + Kp * coutp * 2 + coutp * 4
                       + n_out * tile_m * coutp * out_isz
                       + (0 if mask is None else tile_m * 4))
    cparams = pltpu.CompilerParams(
        dimension_semantics=("parallel",),
        vmem_limit_bytes=_vmem_limit_bytes(block_bytes),
    )

    if mask is None:
        out = pl.pallas_call(
            functools.partial(_matmul_bias_act_kernel, act=act),
            grid=grid,
            in_specs=[p_spec, w_spec, b_spec],
            out_specs=o_spec,
            out_shape=jax.ShapeDtypeStruct((Mp, coutp), out_dtype),
            compiler_params=cparams,
        )(patches_bf, w_bf, bias2)
        return out[:M, :cout]

    if Mp != M:
        mask = jnp.pad(mask, ((0, Mp - M), (0, 0)))
    m_spec = pl.BlockSpec((tile_m, 1), lambda i: (i, 0))
    out_prev, out_final = pl.pallas_call(
        _matmul_bias_relu_mask_kernel,
        grid=grid,
        in_specs=[p_spec, w_spec, b_spec, m_spec],
        out_specs=(o_spec, o_spec),
        out_shape=(jax.ShapeDtypeStruct((Mp, coutp), out_dtype),
                   jax.ShapeDtypeStruct((Mp, coutp), out_dtype)),
        compiler_params=cparams,
    )(patches_bf, w_bf, bias2, mask.astype(jnp.float32))
    return out_prev[:M, :cout], out_final[:M, :cout]


def resnet_stack(h_nhwc, w_all_bf16, b_all, n_blocks=5):
    """Run the fused 5-BasicBlock kernel.  Grid over the batch: each program
    owns ONE image's padded rows (keeps a single image VMEM-resident and lets
    both v7x TensorCores work in parallel; a no-op on v5e/v6e)."""
    n, hq, wq, c = h_nhwc.shape
    hp, wp = hq + 2, wq + 2
    rows_img = hp * wp
    mr = _round_up(rows_img, 8)

    padded = jnp.pad(h_nhwc.astype(jnp.float32),
                     ((0, 0), (1, 1), (1, 1), (0, 0)))        # (n, hp, wp, c)
    flat = padded.reshape(n, rows_img, c)
    if mr != rows_img:
        flat = jnp.pad(flat, ((0, 0), (0, mr - rows_img), (0, 0)))

    interior = jnp.zeros((hp, wp, 1), jnp.float32).at[1:-1, 1:-1, :].set(1.0)
    mask = interior.reshape(rows_img, 1)
    if mr != rows_img:
        mask = jnp.pad(mask, ((0, mr - rows_img), (0, 0)))

    n_stage = 2 * n_blocks
    block_bytes = (4 * mr * c * 4                      # in+out act (double-buf)
                   + 2 * n_stage * 9 * c * c * 2       # resident bf16 weights
                   + 2 * n_stage * c * 4 + 2 * mr * 4  # biases + mask
                   + mr * 9 * c * (4 + 2)              # f32 tap concat + bf16 LHS
                   + 8 * mr * c * 4)                   # h / t1 / t2 / mask_b
    # TODO(synk): for large H*W, additionally tile the stack spatially (1-row
    #             halos) so one image's rows stay under v7x's 64 MiB VMEM.
    out = pl.pallas_call(
        functools.partial(_resnet_stack_kernel, wp=wp, n_blocks=n_blocks),
        grid=(n,),
        in_specs=[
            pl.BlockSpec((None, mr, c), lambda b: (b, 0, 0)),          # per-image
            pl.BlockSpec((n_stage, 9 * c, c), lambda b: (0, 0, 0)),    # resident W
            pl.BlockSpec((n_stage, 1, c), lambda b: (0, 0, 0)),        # resident b
            pl.BlockSpec((mr, 1), lambda b: (0, 0)),                   # resident mask
        ],
        out_specs=pl.BlockSpec((None, mr, c), lambda b: (b, 0, 0)),
        out_shape=jax.ShapeDtypeStruct((n, mr, c), jnp.float32),
        compiler_params=pltpu.CompilerParams(
            dimension_semantics=("parallel",),
            vmem_limit_bytes=_vmem_limit_bytes(block_bytes),
        ),
    )(flat, w_all_bf16, b_all, mask)

    return out[:, :rows_img].reshape(n, hp, wp, c)[:, 1:-1, 1:-1, :]


# ----------------------------------------------------------------------------
# Plain-JAX glue: im2col, phase-decomposed transposed conv, parameter folding
# ----------------------------------------------------------------------------
def im2col(x, kh, kw, stride, pad):
    """x: (N, H, W, C) -> patches (N*H_out*W_out, kh*kw*C), output spatial dims."""
    if pad > 0:
        x = jnp.pad(x, ((0, 0), (pad, pad), (pad, pad), (0, 0)))
    n, hp, wp, c = x.shape
    h_out = (hp - kh) // stride + 1
    w_out = (wp - kw) // stride + 1
    cols = []
    for i in range(kh):
        for j in range(kw):
            cols.append(x[:, i::stride, j::stride, :][:, :h_out, :w_out, :])
    p = jnp.concatenate(cols, axis=-1)  # (N, H_out, W_out, kh*kw*C)
    return p.reshape(n * h_out * w_out, kh * kw * c), (n, h_out, w_out)
# TODO(synk): for large H/W the 9x9 layers (c1, c6) and the strided 3x3 layers
#             (c2, c3) should build patch rows in-kernel from halo-DMA'd NHWC
#             rows instead of materializing the 9x/81x-amplified im2col matrix
#             in HBM.


def transposed_conv_phase(h, w, scale, bias, act, out_dtype):
    """ConvTranspose2d(k=3, s=2, p=1, output_padding=1) + folded BN + act.

    Sub-pixel phase decomposition: instead of zero-dilating the input (where
    ~75% of im2col rows / MXU MACs multiply zeros), each of the 4 output
    phases (py, px) only needs a 2x2 neighbourhood of the *undilated* input.
    All 4 phases are folded into ONE matmul with a (4*Cin, 4*Cout)
    block-structured weight (the structural zeros live in the tiny resident
    weight, not in the activations); the phases are interleaved afterwards
    with a cheap reshape/transpose.  Weights are consumed in the equivalent
    direct-conv form (see init_params TODO)."""
    n, H, W, cin = h.shape
    cout = w.shape[1]
    w_f = (w * scale[None, :]).reshape(3, 3, cin, cout)   # (ky, kx, cin, cout)

    # For output phase p and input offset d, the contributing kernel index:
    #   p=0: d=0 -> k=1 ;  p=1: d=0 -> k=0, d=1 -> k=2 ;  otherwise no tap.
    kidx = {(0, 0): 1, (1, 0): 0, (1, 1): 2}
    zeros = jnp.zeros((cin, cout), jnp.float32)

    def block(dy, dx, py, px):
        if (py, dy) in kidx and (px, dx) in kidx:
            return w_f[kidx[(py, dy)], kidx[(px, dx)]]
        return zeros

    # rows: (dy, dx) tap blocks ; cols: (py, px) output-phase blocks
    w_ph = jnp.concatenate(
        [jnp.concatenate([block(dy, dx, py, px)
                          for py in (0, 1) for px in (0, 1)], axis=1)
         for dy in (0, 1) for dx in (0, 1)], axis=0)          # (4*cin, 4*cout)
    bias4 = jnp.tile(bias, 4)

    xp = jnp.pad(h.astype(jnp.bfloat16), ((0, 0), (0, 1), (0, 1), (0, 0)))
    taps = [xp[:, dy:dy + H, dx:dx + W, :] for dy in (0, 1) for dx in (0, 1)]
    patches = jnp.concatenate(taps, axis=-1).reshape(n * H * W, 4 * cin)

    out = fused_conv_matmul(patches, w_ph, bias4, act=act, out_dtype=out_dtype)
    out = out.reshape(n, H, W, 2, 2, cout)                    # (.., py, px, c)
    out = out.transpose(0, 1, 3, 2, 4, 5).reshape(n, 2 * H, 2 * W, cout)
    return out


def fold_bn(gamma, beta, mean, var, conv_bias=None):
    """Fold eval-mode BatchNorm (and the preceding conv bias) into scale/bias."""
    scale = gamma / jnp.sqrt(var + EPS)
    bias = beta - mean * scale
    if conv_bias is not None:
        bias = bias + conv_bias * scale
    return scale, bias


# ----------------------------------------------------------------------------
# Deterministic parameter initialization (synthetic; shapes match the module)
# ----------------------------------------------------------------------------
def _conv_weight(key, kh, kw, cin, cout, bias=True):
    kw_, kb_ = jax.random.split(key)
    fan_in = kh * kw * cin
    bound = 1.0 / jnp.sqrt(float(fan_in))
    w = jax.random.uniform(kw_, (fan_in, cout), jnp.float32, -bound, bound)
    b = (
        jax.random.uniform(kb_, (cout,), jnp.float32, -bound, bound)
        if bias
        else None
    )
    return w, b


def _bn_params(key, c):
    k1, k2, k3, k4 = jax.random.split(key, 4)
    gamma = 1.0 + 0.1 * jax.random.normal(k1, (c,), jnp.float32)
    beta = 0.1 * jax.random.normal(k2, (c,), jnp.float32)
    mean = 0.1 * jax.random.normal(k3, (c,), jnp.float32)
    var = jax.random.uniform(k4, (c,), jnp.float32, 0.5, 1.5)
    return gamma, beta, mean, var


def init_params(key, input_dim=4, output_dim=3):
    keys = jax.random.split(key, 32)
    p = {}
    p["c1_w"], p["c1_b"] = _conv_weight(keys[0], 9, 9, input_dim, 32)
    p["c1_bn"] = _bn_params(keys[1], 32)
    p["c2_w"], p["c2_b"] = _conv_weight(keys[2], 3, 3, 32, 64)
    p["c2_bn"] = _bn_params(keys[3], 64)
    p["c3_w"], p["c3_b"] = _conv_weight(keys[4], 3, 3, 64, 128)
    p["c3_bn"] = _bn_params(keys[5], 128)
    for r in range(5):
        kb = 6 + 4 * r
        p[f"rn{r}_w1"], _ = _conv_weight(keys[kb], 3, 3, 128, 128, bias=False)
        p[f"rn{r}_bn1"] = _bn_params(keys[kb + 1], 128)
        p[f"rn{r}_w2"], _ = _conv_weight(keys[kb + 2], 3, 3, 128, 128, bias=False)
        p[f"rn{r}_bn2"] = _bn_params(keys[kb + 3], 128)
    # ConvTranspose weights are stored directly in the equivalent direct-conv form.
    # TODO(synk): real PyTorch ConvTranspose2d weights would need spatial flip +
    #             in/out channel transpose before being used here.
    p["c4_w"], p["c4_b"] = _conv_weight(keys[26], 3, 3, 128, 64)
    p["c4_bn"] = _bn_params(keys[27], 64)
    p["c5_w"], p["c5_b"] = _conv_weight(keys[28], 3, 3, 64, 32)
    p["c5_bn"] = _bn_params(keys[29], 32)
    p["c6_w"], p["c6_b"] = _conv_weight(keys[30], 9, 9, 32, output_dim)
    return p


# ----------------------------------------------------------------------------
# Forward pass (inference mode: Dropout = identity, BN uses running stats)
# ----------------------------------------------------------------------------
def encoder_decoder_forward(params, x_nchw):
    x = jnp.transpose(x_nchw, (0, 2, 3, 1)).astype(jnp.float32)  # NHWC
    feat = x[..., :4]
    mask = x[..., 4:5]

    def conv_block(h, w, scale, bias, k, stride, pad, act, out_dtype):
        w_folded = w * scale[None, :]                     # fold BN scale into W
        patches, (n_, ho, wo) = im2col(h.astype(jnp.bfloat16), k, k, stride, pad)
        out = fused_conv_matmul(patches, w_folded, bias, act=act,
                                out_dtype=out_dtype)
        return out.reshape(n_, ho, wo, -1)

    # ---- encoder (bf16 outputs feed the next bf16 im2col directly) ----------
    s, b = fold_bn(*params["c1_bn"], params["c1_b"])
    h = conv_block(feat, params["c1_w"], s, b, 9, 1, 4, "leaky", jnp.bfloat16)
    s, b = fold_bn(*params["c2_bn"], params["c2_b"])
    h = conv_block(h, params["c2_w"], s, b, 3, 2, 1, "leaky", jnp.bfloat16)
    s, b = fold_bn(*params["c3_bn"], params["c3_b"])
    h = conv_block(h, params["c3_w"], s, b, 3, 2, 1, "leaky", jnp.float32)

    # ---- 5 residual BasicBlocks fused in ONE pallas_call --------------------
    w_stack, b_stack = [], []
    for r in range(5):
        for j in (1, 2):
            s_, b_ = fold_bn(*params[f"rn{r}_bn{j}"])
            w_stack.append(params[f"rn{r}_w{j}"] * s_[None, :])   # (9*128, 128)
            b_stack.append(b_.reshape(1, 128))
    w_all = jnp.stack(w_stack, axis=0).astype(jnp.bfloat16)   # (10, 1152, 128)
    b_all = jnp.stack(b_stack, axis=0).astype(jnp.float32)    # (10, 1, 128)
    h = resnet_stack(h, w_all, b_all, n_blocks=5)

    # ---- decoder: ConvTranspose2d(k=3, s=2, p=1, out_pad=1) via phases ------
    s, b = fold_bn(*params["c4_bn"], params["c4_b"])
    h = transposed_conv_phase(h, params["c4_w"], s, b, "relu", jnp.bfloat16)
    s, b = fold_bn(*params["c5_bn"], params["c5_b"])
    h = transposed_conv_phase(h, params["c5_w"], s, b, "relu", jnp.bfloat16)

    # ---- conv6 + ReLU (no BN) fused with the final mask multiply ------------
    cout6 = params["c6_w"].shape[1]
    patches, (n_, ho, wo) = im2col(h, 9, 9, 1, 4)      # h is already bf16
    m_flat = mask.reshape(n_ * ho * wo, 1)
    out_prev_f, out_final_f = fused_conv_matmul(
        patches, params["c6_w"], params["c6_b"], act="relu", mask=m_flat,
        out_dtype=jnp.float32)
    out_prev = out_prev_f.reshape(n_, ho, wo, cout6)
    out_final = out_final_f.reshape(n_, ho, wo, cout6)

    to_nchw = lambda t: jnp.transpose(t, (0, 3, 1, 2))
    return to_nchw(out_final), to_nchw(out_prev)


# TODO(synk): training-mode stochastic Dropout / batch-stat BN are not
#             reproduced (eval-mode semantics only).

# ----------------------------------------------------------------------------
if __name__ == "__main__":
    key = jax.random.PRNGKey(0)
    k_param, k_x = jax.random.split(key)

    INPUT_DIM, OUTPUT_DIM = 4, 3
    N, H, W = 2, 16, 16
    # Input needs inputDim + 1 = 5 channels (x[:, :4] features, x[:, 4:5] mask).
    x = jax.random.normal(k_x, (N, INPUT_DIM + 1, H, W), jnp.float32)

    params = init_params(k_param, INPUT_DIM, OUTPUT_DIM)

    fwd = jax.jit(encoder_decoder_forward)
    out_final, out_prev = fwd(params, x)
    jax.block_until_ready((out_final, out_prev))

    assert out_final.shape == (N, OUTPUT_DIM, H, W)
    assert out_prev.shape == (N, OUTPUT_DIM, H, W)
    assert bool(jnp.all(jnp.isfinite(out_final)))
    assert bool(jnp.all(jnp.isfinite(out_prev)))

    print("KERNEL_OK")
</pallas_src>

<mosaic_0001>
module attributes {stable_mosaic.version = 11 : i64} {
  func.func @_matmul_bias_act_kernel(%arg0: i32, %arg1: memref<256x384xbf16, #tpu.memory_space<vmem>>, %arg2: memref<384x128xbf16, #tpu.memory_space<vmem>>, %arg3: memref<1x128xf32, #tpu.memory_space<vmem>>, %arg4: memref<256x128xbf16, #tpu.memory_space<vmem>>) attributes {dimension_semantics = [#tpu.dimension_semantics<parallel>], iteration_bounds = array<i64: 2>, scalar_prefetch = 0 : i64, scratch_operands = 0 : i64, tpu.core_type = #tpu.core_type<tc>, window_params = [{transform_indices = @transform_0, window_bounds = array<i64: 256, 384>}, {pipeline_mode = #tpu.pipeline_mode<synchronous>, transform_indices = @transform_1, window_bounds = array<i64: 384, 128>}, {pipeline_mode = #tpu.pipeline_mode<synchronous>, transform_indices = @transform_2, window_bounds = array<i64: 1, 128>}, {transform_indices = @transform_3, window_bounds = array<i64: 256, 128>}]} {
    %c0 = arith.constant 0 : index
    %c0_0 = arith.constant 0 : index
    %0 = vector.load %arg1[%c0, %c0_0] : memref<256x384xbf16, #tpu.memory_space<vmem>>, vector<256x384xbf16>
    %c0_1 = arith.constant 0 : index
    %c0_2 = arith.constant 0 : index
    %1 = vector.load %arg2[%c0_1, %c0_2] : memref<384x128xbf16, #tpu.memory_space<vmem>>, vector<384x128xbf16>
    %cst = arith.constant dense<0.000000e+00> : vector<256x128xf32>
    %2 = tpu.matmul %0, %1, %cst {dimension_numbers = #tpu.dot_dimension_numbers<[1], [0], [0], [1], [0, 0, 1, 1], [], []>} : vector<256x384xbf16>, vector<384x128xbf16>, vector<256x128xf32> -> vector<256x128xf32>
    %c0_3 = arith.constant 0 : index
    %c0_4 = arith.constant 0 : index
    %3 = vector.load %arg3[%c0_3, %c0_4] : memref<1x128xf32, #tpu.memory_space<vmem>>, vector<1x128xf32>
    %4 = vector.broadcast %3 : vector<1x128xf32> to vector<256x128xf32>
    %5 = arith.addf %2, %4 : vector<256x128xf32>
    %cst_5 = arith.constant 0.00999999977 : f32
    %6 = vector.broadcast %cst_5 : f32 to vector<256x128xf32>
    %7 = arith.mulf %6, %5 : vector<256x128xf32>
    %8 = arith.maximumf %5, %7 : vector<256x128xf32>
    %9 = arith.truncf %8 : vector<256x128xf32> to vector<256x128xbf16>
    %c0_6 = arith.constant 0 : index
    %c0_7 = arith.constant 0 : index
    %10 = vector.load %arg4[%c0_6, %c0_7] : memref<256x128xbf16, #tpu.memory_space<vmem>>, vector<256x128xbf16>
    tpu.vector_store %arg4[%c0_6, %c0_7], %9 {strides = array<i32>} : memref<256x128xbf16, #tpu.memory_space<vmem>>, vector<256x128xbf16>,
    return
  }
  func.func @transform_0(%arg0: i32) -> (i32, i32) {
    %c0_i32 = arith.constant 0 : i32
    %c0_i32_0 = arith.constant 0 : i32
    return %arg0, %c0_i32 : i32, i32
  }
  func.func @transform_1(%arg0: i32) -> (i32, i32) {
    %c0_i32 = arith.constant 0 : i32
    %c0_i32_0 = arith.constant 0 : i32
    %c0_i32_1 = arith.constant 0 : i32
    return %c0_i32, %c0_i32_0 : i32, i32
  }
  func.func @transform_2(%arg0: i32) -> (i32, i32) {
    %c0_i32 = arith.constant 0 : i32
    %c0_i32_0 = arith.constant 0 : i32
    %c0_i32_1 = arith.constant 0 : i32
    return %c0_i32, %c0_i32_0 : i32, i32
  }
  func.func @transform_3(%arg0: i32) -> (i32, i32) {
    %c0_i32 = arith.constant 0 : i32
    %c0_i32_0 = arith.constant 0 : i32
    return %arg0, %c0_i32 : i32, i32
  }
}

module attributes {stable_mosaic.version = 11 : i64} {
  func.func @_matmul_bias_act_kernel(%arg0: i32, %arg1: memref<128x384xbf16, #tpu.memory_space<vmem>>, %arg2: memref<384x128xbf16, #tpu.memory_space<vmem>>, %arg3: memref<1x128xf32, #tpu.memory_space<vmem>>, %arg4: memref<128x128xbf16, #tpu.memory_space<vmem>>) attributes {dimension_semantics = [#tpu.dimension_semantics<parallel>], iteration_bounds = array<i64: 1>, scalar_prefetch = 0 : i64, scratch_operands = 0 : i64, tpu.core_type = #tpu.core_type<tc>, window_params = [{transform_indices = @transform_0, window_bounds = array<i64: 128, 384>}, {pipeline_mode = #tpu.pipeline_mode<synchronous>, transform_indices = @transform_1, window_bounds = array<i64: 384, 128>}, {pipeline_mode = #tpu.pipeline_mode<synchronous>, transform_indices = @transform_2, window_bounds = array<i64: 1, 128>}, {transform_indices = @transform_3, window_bounds = array<i64: 128, 128>}]} {
    %c0 = arith.constant 0 : index
    %c0_0 = arith.constant 0 : index
    %0 = vector.load %arg1[%c0, %c0_0] : memref<128x384xbf16, #tpu.memory_space<vmem>>, vector<128x384xbf16>
    %c0_1 = arith.constant 0 : index
    %c0_2 = arith.constant 0 : index
    %1 = vector.load %arg2[%c0_1, %c0_2] : memref<384x128xbf16, #tpu.memory_space<vmem>>, vector<384x128xbf16>
    %cst = arith.constant dense<0.000000e+00> : vector<128x128xf32>
    %2 = tpu.matmul %0, %1, %cst {dimension_numbers = #tpu.dot_dimension_numbers<[1], [0], [0], [1], [0, 0, 1, 1], [], []>} : vector<128x384xbf16>, vector<384x128xbf16>, vector<128x128xf32> -> vector<128x128xf32>
    %c0_3 = arith.constant 0 : index
    %c0_4 = arith.constant 0 : index
    %3 = vector.load %arg3[%c0_3, %c0_4] : memref<1x128xf32, #tpu.memory_space<vmem>>, vector<1x128xf32>
    %4 = vector.broadcast %3 : vector<1x128xf32> to vector<128x128xf32>
    %5 = arith.addf %2, %4 : vector<128x128xf32>
    %cst_5 = arith.constant 0.00999999977 : f32
    %6 = vector.broadcast %cst_5 : f32 to vector<128x128xf32>
    %7 = arith.mulf %6, %5 : vector<128x128xf32>
    %8 = arith.maximumf %5, %7 : vector<128x128xf32>
    %9 = arith.truncf %8 : vector<128x128xf32> to vector<128x128xbf16>
    %c0_6 = arith.constant 0 : index
    %c0_7 = arith.constant 0 : index
    %10 = vector.load %arg4[%c0_6, %c0_7] : memref<128x128xbf16, #tpu.memory_space<vmem>>, vector<128x128xbf16>
    tpu.vector_store %arg4[%c0_6, %c0_7], %9 {strides = array<i32>} : memref<128x128xbf16, #tpu.memory_space<vmem>>, vector<128x128xbf16>,
    return
  }
  func.func @transform_0(%arg0: i32) -> (i32, i32) {
    %c0_i32 = arith.constant 0 : i32
    %c0_i32_0 = arith.constant 0 : i32
    return %arg0, %c0_i32 : i32, i32
  }
  func.func @transform_1(%arg0: i32) -> (i32, i32) {
    %c0_i32 = arith.constant 0 : i32
    %c0_i32_0 = arith.constant 0 : i32
    %c0_i32_1 = arith.constant 0 : i32
    return %c0_i32, %c0_i32_0 : i32, i32
  }
  func.func @transform_2(%arg0: i32) -> (i32, i32) {
    %c0_i32 = arith.constant 0 : i32
    %c0_i32_0 = arith.constant 0 : i32
    %c0_i32_1 = arith.constant 0 : i32
    return %c0_i32, %c0_i32_0 : i32, i32
  }
  func.func @transform_3(%arg0: i32) -> (i32, i32) {
    %c0_i32 = arith.constant 0 : i32
    %c0_i32_0 = arith.constant 0 : i32
    return %arg0, %c0_i32 : i32, i32
  }
}

module attributes {stable_mosaic.version = 11 : i64} {
  func.func @_matmul_bias_act_kernel(%arg0: i32, %arg1: memref<32x640xbf16, #tpu.memory_space<vmem>>, %arg2: memref<640x128xbf16, #tpu.memory_space<vmem>>, %arg3: memref<1x128xf32, #tpu.memory_space<vmem>>, %arg4: memref<32x128xf32, #tpu.memory_space<vmem>>) attributes {dimension_semantics = [#tpu.dimension_semantics<parallel>], iteration_bounds = array<i64: 1>, scalar_prefetch = 0 : i64, scratch_operands = 0 : i64, tpu.core_type = #tpu.core_type<tc>, window_params = [{transform_indices = @transform_0, window_bounds = array<i64: 32, 640>}, {pipeline_mode = #tpu.pipeline_mode<synchronous>, transform_indices = @transform_1, window_bounds = array<i64: 640, 128>}, {pipeline_mode = #tpu.pipeline_mode<synchronous>, transform_indices = @transform_2, window_bounds = array<i64: 1, 128>}, {transform_indices = @transform_3, window_bounds = array<i64: 32, 128>}]} {
    %c0 = arith.constant 0 : index
    %c0_0 = arith.constant 0 : index
    %0 = vector.load %arg1[%c0, %c0_0] : memref<32x640xbf16, #tpu.memory_space<vmem>>, vector<32x640xbf16>
    %c0_1 = arith.constant 0 : index
    %c0_2 = arith.constant 0 : index
    %1 = vector.load %arg2[%c0_1, %c0_2] : memref<640x128xbf16, #tpu.memory_space<vmem>>, vector<640x128xbf16>
    %cst = arith.constant dense<0.000000e+00> : vector<32x128xf32>
    %2 = tpu.matmul %0, %1, %cst {dimension_numbers = #tpu.dot_dimension_numbers<[1], [0], [0], [1], [0, 0, 1, 1], [], []>} : vector<32x640xbf16>, vector<640x128xbf16>, vector<32x128xf32> -> vector<32x128xf32>
    %c0_3 = arith.constant 0 : index
    %c0_4 = arith.constant 0 : index
    %3 = vector.load %arg3[%c0_3, %c0_4] : memref<1x128xf32, #tpu.memory_space<vmem>>, vector<1x128xf32>
    %4 = vector.broadcast %3 : vector<1x128xf32> to vector<32x128xf32>
    %5 = arith.addf %2, %4 : vector<32x128xf32>
    %cst_5 = arith.constant 0.00999999977 : f32
    %6 = vector.broadcast %cst_5 : f32 to vector<32x128xf32>
    %7 = arith.mulf %6, %5 : vector<32x128xf32>
    %8 = arith.maximumf %5, %7 : vector<32x128xf32>
    %c0_6 = arith.constant 0 : index
    %c0_7 = arith.constant 0 : index
    %9 = vector.load %arg4[%c0_6, %c0_7] : memref<32x128xf32, #tpu.memory_space<vmem>>, vector<32x128xf32>
    tpu.vector_store %arg4[%c0_6, %c0_7], %8 {strides = array<i32>} : memref<32x128xf32, #tpu.memory_space<vmem>>, vector<32x128xf32>,
    return
  }
  func.func @transform_0(%arg0: i32) -> (i32, i32) {
    %c0_i32 = arith.constant 0 : i32
    %c0_i32_0 = arith.constant 0 : i32
    return %arg0, %c0_i32 : i32, i32
  }
  func.func @transform_1(%arg0: i32) -> (i32, i32) {
    %c0_i32 = arith.constant 0 : i32
    %c0_i32_0 = arith.constant 0 : i32
    %c0_i32_1 = arith.constant 0 : i32
    return %c0_i32, %c0_i32_0 : i32, i32
  }
  func.func @transform_2(%arg0: i32) -> (i32, i32) {
    %c0_i32 = arith.constant 0 : i32
    %c0_i32_0 = arith.constant 0 : i32
    %c0_i32_1 = arith.constant 0 : i32
    return %c0_i32, %c0_i32_0 : i32, i32
  }
  func.func @transform_3(%arg0: i32) -> (i32, i32) {
    %c0_i32 = arith.constant 0 : i32
    %c0_i32_0 = arith.constant 0 : i32
    return %arg0, %c0_i32 : i32, i32
  }
}

module attributes {stable_mosaic.version = 11 : i64} {
  func.func @_resnet_stack_kernel(%arg0: i32, %arg1: memref<1x40x128xf32, #tpu.memory_space<vmem>>, %arg2: memref<10x1152x128xbf16, #tpu.memory_space<vmem>>, %arg3: memref<10x1x128xf32, #tpu.memory_space<vmem>>, %arg4: memref<40x1xf32, #tpu.memory_space<vmem>>, %arg5: memref<1x40x128xf32, #tpu.memory_space<vmem>>) attributes {dimension_semantics = [#tpu.dimension_semantics<parallel>], iteration_bounds = array<i64: 2>, scalar_prefetch = 0 : i64, scratch_operands = 0 : i64, tpu.core_type = #tpu.core_type<tc>, window_params = [{transform_indices = @transform_0, window_bounds = array<i64: 1, 40, 128>}, {pipeline_mode = #tpu.pipeline_mode<synchronous>, transform_indices = @transform_1, window_bounds = array<i64: 10, 1152, 128>}, {pipeline_mode = #tpu.pipeline_mode<synchronous>, transform_indices = @transform_2, window_bounds = array<i64: 10, 1, 128>}, {pipeline_mode = #tpu.pipeline_mode<synchronous>, transform_indices = @transform_3, window_bounds = array<i64: 40, 1>}, {transform_indices = @transform_4, window_bounds = array<i64: 1, 40, 128>}]} {
    %c0 = arith.constant 0 : index
    %c0_0 = arith.constant 0 : index
    %0 = vector.load %arg4[%c0, %c0_0] : memref<40x1xf32, #tpu.memory_space<vmem>>, vector<40x1xf32>
    %1 = vector.shape_cast %0 : vector<40x1xf32> to vector<40x1xf32>
    %2 = vector.broadcast %1 : vector<40x1xf32> to vector<40x128xf32>
    %c0_1 = arith.constant 0 : index
    %c0_2 = arith.constant 0 : index
    %c0_3 = arith.constant 0 : index
    %3 = vector.load %arg1[%c0_1, %c0_2, %c0_3] : memref<1x40x128xf32, #tpu.memory_space<vmem>>, vector<1x40x128xf32>
    %4 = vector.shape_cast %3 : vector<1x40x128xf32> to vector<40x128xf32>
    %c0_i32 = arith.constant 0 : i32
    %c5_i32 = arith.constant 5 : i32
    %5 = arith.addi %c0_i32, %c5_i32 : i32
    %c1_i32 = arith.constant 1 : i32
    %6 = scf.for %arg6 = %c0_i32 to %5 step %c1_i32 iter_args(%arg7 = %4) -> (vector<40x128xf32>)  : i32 {
      %c2_i32 = arith.constant 2 : i32
      %10 = arith.muli %c2_i32, %arg6 : i32
      %c7_i32 = arith.constant 7 : i32
      %11 = tpu.dynamic_rotate %arg7 by %c7_i32 dim 0 : vector<40x128xf32>, i32 -> vector<40x128xf32>
      %c6_i32 = arith.constant 6 : i32
      %12 = tpu.dynamic_rotate %arg7 by %c6_i32 dim 0 : vector<40x128xf32>, i32 -> vector<40x128xf32>
      %c5_i32_8 = arith.constant 5 : i32
      %13 = tpu.dynamic_rotate %arg7 by %c5_i32_8 dim 0 : vector<40x128xf32>, i32 -> vector<40x128xf32>
      %c1_i32_9 = arith.constant 1 : i32
      %14 = tpu.dynamic_rotate %arg7 by %c1_i32_9 dim 0 : vector<40x128xf32>, i32 -> vector<40x128xf32>
      %c39_i32 = arith.constant 39 : i32
      %15 = tpu.dynamic_rotate %arg7 by %c39_i32 dim 0 : vector<40x128xf32>, i32 -> vector<40x128xf32>
      %c35_i32 = arith.constant 35 : i32
      %16 = tpu.dynamic_rotate %arg7 by %c35_i32 dim 0 : vector<40x128xf32>, i32 -> vector<40x128xf32>
      %c34_i32 = arith.constant 34 : i32
      %17 = tpu.dynamic_rotate %arg7 by %c34_i32 dim 0 : vector<40x128xf32>, i32 -> vector<40x128xf32>
      %c33_i32 = arith.constant 33 : i32
      %18 = tpu.dynamic_rotate %arg7 by %c33_i32 dim 0 : vector<40x128xf32>, i32 -> vector<40x128xf32>
      %19 = tpu.concatenate %11, %12, %13, %14, %arg7, %15, %16, %17, %18 in 1 : vector<40x128xf32>, vector<40x128xf32>, vector<40x128xf32>, vector<40x128xf32>, vector<40x128xf32>, vector<40x128xf32>, vector<40x128xf32>, vector<40x128xf32>, vector<40x128xf32> -> vector<40x1152xf32>
      %20 = arith.truncf %19 : vector<40x1152xf32> to vector<40x1152xbf16>
      %21 = arith.index_cast %10 : i32 to index
      %c0_10 = arith.constant 0 : index
      %c0_11 = arith.constant 0 : index
      %22 = vector.load %arg2[%21, %c0_10, %c0_11] : memref<10x1152x128xbf16, #tpu.memory_space<vmem>>, vector<1x1152x128xbf16>
      %23 = vector.shape_cast %22 : vector<1x1152x128xbf16> to vector<1152x128xbf16>
      %cst = arith.constant dense<0.000000e+00> : vector<40x128xf32>
      %24 = tpu.matmul %20, %23, %cst {dimension_numbers = #tpu.dot_dimension_numbers<[1], [0], [0], [1], [0, 0, 1, 1], [], []>} : vector<40x1152xbf16>, vector<1152x128xbf16>, vector<40x128xf32> -> vector<40x128xf32>
      %25 = arith.index_cast %10 : i32 to index
      %c0_12 = arith.constant 0 : index
      %c0_13 = arith.constant 0 : index
      %26 = vector.load %arg3[%25, %c0_12, %c0_13] : memref<10x1x128xf32, #tpu.memory_space<vmem>>, vector<1x1x128xf32>
      %27 = vector.shape_cast %26 : vector<1x1x128xf32> to vector<1x128xf32>
      %28 = vector.broadcast %27 : vector<1x128xf32> to vector<40x128xf32>
      %29 = arith.addf %24, %28 : vector<40x128xf32>
      %cst_14 = arith.constant 0.000000e+00 : f32
      %30 = vector.broadcast %cst_14 : f32 to vector<40x128xf32>
      %31 = arith.maximumf %29, %30 : vector<40x128xf32>
      %32 = arith.mulf %31, %2 : vector<40x128xf32>
      %c2_i32_15 = arith.constant 2 : i32
      %33 = arith.muli %c2_i32_15, %arg6 : i32
      %c1_i32_16 = arith.constant 1 : i32
      %34 = arith.addi %33, %c1_i32_16 : i32
      %c7_i32_17 = arith.constant 7 : i32
      %35 = tpu.dynamic_rotate %32 by %c7_i32_17 dim 0 : vector<40x128xf32>, i32 -> vector<40x128xf32>
      %c6_i32_18 = arith.constant 6 : i32
      %36 = tpu.dynamic_rotate %32 by %c6_i32_18 dim 0 : vector<40x128xf32>, i32 -> vector<40x128xf32>
      %c5_i32_19 = arith.constant 5 : i32
      %37 = tpu.dynamic_rotate %32 by %c5_i32_19 dim 0 : vector<40x128xf32>, i32 -> vector<40x128xf32>
      %c1_i32_20 = arith.constant 1 : i32
      %38 = tpu.dynamic_rotate %32 by %c1_i32_20 dim 0 : vector<40x128xf32>, i32 -> vector<40x128xf32>
      %c39_i32_21 = arith.constant 39 : i32
      %39 = tpu.dynamic_rotate %32 by %c39_i32_21 dim 0 : vector<40x128xf32>, i32 -> vector<40x128xf32>
      %c35_i32_22 = arith.constant 35 : i32
      %40 = tpu.dynamic_rotate %32 by %c35_i32_22 dim 0 : vector<40x128xf32>, i32 -> vector<40x128xf32>
      %c34_i32_23 = arith.constant 34 : i32
      %41 = tpu.dynamic_rotate %32 by %c34_i32_23 dim 0 : vector<40x128xf32>, i32 -> vector<40x128xf32>
      %c33_i32_24 = arith.constant 33 : i32
      %42 = tpu.dynamic_rotate %32 by %c33_i32_24 dim 0 : vector<40x128xf32>, i32 -> vector<40x128xf32>
      %43 = tpu.concatenate %35, %36, %37, %38, %32, %39, %40, %41, %42 in 1 : vector<40x128xf32>, vector<40x128xf32>, vector<40x128xf32>, vector<40x128xf32>, vector<40x128xf32>, vector<40x128xf32>, vector<40x128xf32>, vector<40x128xf32>, vector<40x128xf32> -> vector<40x1152xf32>
      %44 = arith.truncf %43 : vector<40x1152xf32> to vector<40x1152xbf16>
      %45 = arith.index_cast %34 : i32 to index
      %c0_25 = arith.constant 0 : index
      %c0_26 = arith.constant 0 : index
      %46 = vector.load %arg2[%45, %c0_25, %c0_26] : memref<10x1152x128xbf16, #tpu.memory_space<vmem>>, vector<1x1152x128xbf16>
      %47 = vector.shape_cast %46 : vector<1x1152x128xbf16> to vector<1152x128xbf16>
      %cst_27 = arith.constant dense<0.000000e+00> : vector<40x128xf32>
      %48 = tpu.matmul %44, %47, %cst_27 {dimension_numbers = #tpu.dot_dimension_numbers<[1], [0], [0], [1], [0, 0, 1, 1], [], []>} : vector<40x1152xbf16>, vector<1152x128xbf16>, vector<40x128xf32> -> vector<40x128xf32>
      %49 = arith.index_cast %34 : i32 to index
      %c0_28 = arith.constant 0 : index
      %c0_29 = arith.constant 0 : index
      %50 = vector.load %arg3[%49, %c0_28, %c0_29] : memref<10x1x128xf32, #tpu.memory_space<vmem>>, vector<1x1x128xf32>
      %51 = vector.shape_cast %50 : vector<1x1x128xf32> to vector<1x128xf32>
      %52 = vector.broadcast %51 : vector<1x128xf32> to vector<40x128xf32>
      %53 = arith.addf %48, %52 : vector<40x128xf32>
      %54 = arith.addf %53, %arg7 : vector<40x128xf32>
      %cst_30 = arith.constant 0.000000e+00 : f32
      %55 = vector.broadcast %cst_30 : f32 to vector<40x128xf32>
      %56 = arith.maximumf %54, %55 : vector<40x128xf32>
      %57 = arith.mulf %56, %2 : vector<40x128xf32>
      scf.yield %57 : vector<40x128xf32>
    }
    %c5_i32_4 = arith.constant 5 : i32
    %c0_5 = arith.constant 0 : index
    %c0_6 = arith.constant 0 : index
    %c0_7 = arith.constant 0 : index
    %7 = vector.load %arg5[%c0_5, %c0_6, %c0_7] : memref<1x40x128xf32, #tpu.memory_space<vmem>>, vector<1x40x128xf32>
    %8 = vector.shape_cast %7 : vector<1x40x128xf32> to vector<40x128xf32>
    %9 = vector.shape_cast %6 : vector<40x128xf32> to vector<1x40x128xf32>
    tpu.vector_store %arg5[%c0_5, %c0_6, %c0_7], %9 {strides = array<i32>} : memref<1x40x128xf32, #tpu.memory_space<vmem>>, vector<1x40x128xf32>,
    return
  }
  func.func @transform_0(%arg0: i32) -> (i32, i32, i32) {
    %c0_i32 = arith.constant 0 : i32
    %c0_i32_0 = arith.constant 0 : i32
    %c0_i32_1 = arith.constant 0 : i32
    return %arg0, %c0_i32, %c0_i32_0 : i32, i32, i32
  }
  func.func @transform_1(%arg0: i32) -> (i32, i32, i32) {
    %c0_i32 = arith.constant 0 : i32
    %c0_i32_0 = arith.constant 0 : i32
    %c0_i32_1 = arith.constant 0 : i32
    %c0_i32_2 = arith.constant 0 : i32
    return %c0_i32, %c0_i32_0, %c0_i32_1 : i32, i32, i32
  }
  func.func @transform_2(%arg0: i32) -> (i32, i32, i32) {
    %c0_i32 = arith.constant 0 : i32
    %c0_i32_0 = arith.constant 0 : i32
    %c0_i32_1 = arith.constant 0 : i32
    %c0_i32_2 = arith.constant 0 : i32
    return %c0_i32, %c0_i32_0, %c0_i32_1 : i32, i32, i32
  }
  func.func @transform_3(%arg0: i32) -> (i32, i32) {
    %c0_i32 = arith.constant 0 : i32
    %c0_i32_0 = arith.constant 0 : i32
    %c0_i32_1 = arith.constant 0 : i32
    return %c0_i32, %c0_i32_0 : i32, i32
  }
  func.func @transform_4(%arg0: i32) -> (i32, i32, i32) {
    %c0_i32 = arith.constant 0 : i32
    %c0_i32_0 = arith.constant 0 : i32
    %c0_i32_1 = arith.constant 0 : i32
    return %arg0, %c0_i32, %c0_i32_0 : i32, i32, i32
  }
}

module attributes {stable_mosaic.version = 11 : i64} {
  func.func @_matmul_bias_act_kernel(%arg0: i32, %arg1: memref<32x512xbf16, #tpu.memory_space<vmem>>, %arg2: memref<512x256xbf16, #tpu.memory_space<vmem>>, %arg3: memref<1x256xf32, #tpu.memory_space<vmem>>, %arg4: memref<32x256xbf16, #tpu.memory_space<vmem>>) attributes {dimension_semantics = [#tpu.dimension_semantics<parallel>], iteration_bounds = array<i64: 1>, scalar_prefetch = 0 : i64, scratch_operands = 0 : i64, tpu.core_type = #tpu.core_type<tc>, window_params = [{transform_indices = @transform_0, window_bounds = array<i64: 32, 512>}, {pipeline_mode = #tpu.pipeline_mode<synchronous>, transform_indices = @transform_1, window_bounds = array<i64: 512, 256>}, {pipeline_mode = #tpu.pipeline_mode<synchronous>, transform_indices = @transform_2, window_bounds = array<i64: 1, 256>}, {transform_indices = @transform_3, window_bounds = array<i64: 32, 256>}]} {
    %c0 = arith.constant 0 : index
    %c0_0 = arith.constant 0 : index
    %0 = vector.load %arg1[%c0, %c0_0] : memref<32x512xbf16, #tpu.memory_space<vmem>>, vector<32x512xbf16>
    %c0_1 = arith.constant 0 : index
    %c0_2 = arith.constant 0 : index
    %1 = vector.load %arg2[%c0_1, %c0_2] : memref<512x256xbf16, #tpu.memory_space<vmem>>, vector<512x256xbf16>
    %cst = arith.constant dense<0.000000e+00> : vector<32x256xf32>
    %2 = tpu.matmul %0, %1, %cst {dimension_numbers = #tpu.dot_dimension_numbers<[1], [0], [0], [1], [0, 0, 1, 1], [], []>} : vector<32x512xbf16>, vector<512x256xbf16>, vector<32x256xf32> -> vector<32x256xf32>
    %c0_3 = arith.constant 0 : index
    %c0_4 = arith.constant 0 : index
    %3 = vector.load %arg3[%c0_3, %c0_4] : memref<1x256xf32, #tpu.memory_space<vmem>>, vector<1x256xf32>
    %4 = vector.broadcast %3 : vector<1x256xf32> to vector<32x256xf32>
    %5 = arith.addf %2, %4 : vector<32x256xf32>
    %cst_5 = arith.constant 0.000000e+00 : f32
    %6 = vector.broadcast %cst_5 : f32 to vector<32x256xf32>
    %7 = arith.maximumf %5, %6 : vector<32x256xf32>
    %8 = arith.truncf %7 : vector<32x256xf32> to vector<32x256xbf16>
    %c0_6 = arith.constant 0 : index
    %c0_7 = arith.constant 0 : index
    %9 = vector.load %arg4[%c0_6, %c0_7] : memref<32x256xbf16, #tpu.memory_space<vmem>>, vector<32x256xbf16>
    tpu.vector_store %arg4[%c0_6, %c0_7], %8 {strides = array<i32>} : memref<32x256xbf16, #tpu.memory_space<vmem>>, vector<32x256xbf16>,
    return
  }
  func.func @transform_0(%arg0: i32) -> (i32, i32) {
    %c0_i32 = arith.constant 0 : i32
    %c0_i32_0 = arith.constant 0 : i32
    return %arg0, %c0_i32 : i32, i32
  }
  func.func @transform_1(%arg0: i32) -> (i32, i32) {
    %c0_i32 = arith.constant 0 : i32
    %c0_i32_0 = arith.constant 0 : i32
    %c0_i32_1 = arith.constant 0 : i32
    return %c0_i32, %c0_i32_0 : i32, i32
  }
  func.func @transform_2(%arg0: i32) -> (i32, i32) {
    %c0_i32 = arith.constant 0 : i32
    %c0_i32_0 = arith.constant 0 : i32
    %c0_i32_1 = arith.constant 0 : i32
    return %c0_i32, %c0_i32_0 : i32, i32
  }
  func.func @transform_3(%arg0: i32) -> (i32, i32) {
    %c0_i32 = arith.constant 0 : i32
    %c0_i32_0 = arith.constant 0 : i32
    return %arg0, %c0_i32 : i32, i32
  }
}

module attributes {stable_mosaic.version = 11 : i64} {
  func.func @_matmul_bias_act_kernel(%arg0: i32, %arg1: memref<128x256xbf16, #tpu.memory_space<vmem>>, %arg2: memref<256x128xbf16, #tpu.memory_space<vmem>>, %arg3: memref<1x128xf32, #tpu.memory_space<vmem>>, %arg4: memref<128x128xbf16, #tpu.memory_space<vmem>>) attributes {dimension_semantics = [#tpu.dimension_semantics<parallel>], iteration_bounds = array<i64: 1>, scalar_prefetch = 0 : i64, scratch_operands = 0 : i64, tpu.core_type = #tpu.core_type<tc>, window_params = [{transform_indices = @transform_0, window_bounds = array<i64: 128, 256>}, {pipeline_mode = #tpu.pipeline_mode<synchronous>, transform_indices = @transform_1, window_bounds = array<i64: 256, 128>}, {pipeline_mode = #tpu.pipeline_mode<synchronous>, transform_indices = @transform_2, window_bounds = array<i64: 1, 128>}, {transform_indices = @transform_3, window_bounds = array<i64: 128, 128>}]} {
    %c0 = arith.constant 0 : index
    %c0_0 = arith.constant 0 : index
    %0 = vector.load %arg1[%c0, %c0_0] : memref<128x256xbf16, #tpu.memory_space<vmem>>, vector<128x256xbf16>
    %c0_1 = arith.constant 0 : index
    %c0_2 = arith.constant 0 : index
    %1 = vector.load %arg2[%c0_1, %c0_2] : memref<256x128xbf16, #tpu.memory_space<vmem>>, vector<256x128xbf16>
    %cst = arith.constant dense<0.000000e+00> : vector<128x128xf32>
    %2 = tpu.matmul %0, %1, %cst {dimension_numbers = #tpu.dot_dimension_numbers<[1], [0], [0], [1], [0, 0, 1, 1], [], []>} : vector<128x256xbf16>, vector<256x128xbf16>, vector<128x128xf32> -> vector<128x128xf32>
    %c0_3 = arith.constant 0 : index
    %c0_4 = arith.constant 0 : index
    %3 = vector.load %arg3[%c0_3, %c0_4] : memref<1x128xf32, #tpu.memory_space<vmem>>, vector<1x128xf32>
    %4 = vector.broadcast %3 : vector<1x128xf32> to vector<128x128xf32>
    %5 = arith.addf %2, %4 : vector<128x128xf32>
    %cst_5 = arith.constant 0.000000e+00 : f32
    %6 = vector.broadcast %cst_5 : f32 to vector<128x128xf32>
    %7 = arith.maximumf %5, %6 : vector<128x128xf32>
    %8 = arith.truncf %7 : vector<128x128xf32> to vector<128x128xbf16>
    %c0_6 = arith.constant 0 : index
    %c0_7 = arith.constant 0 : index
    %9 = vector.load %arg4[%c0_6, %c0_7] : memref<128x128xbf16, #tpu.memory_space<vmem>>, vector<128x128xbf16>
    tpu.vector_store %arg4[%c0_6, %c0_7], %8 {strides = array<i32>} : memref<128x128xbf16, #tpu.memory_space<vmem>>, vector<128x128xbf16>,
    return
  }
  func.func @transform_0(%arg0: i32) -> (i32, i32) {
    %c0_i32 = arith.constant 0 : i32
    %c0_i32_0 = arith.constant 0 : i32
    return %arg0, %c0_i32 : i32, i32
  }
  func.func @transform_1(%arg0: i32) -> (i32, i32) {
    %c0_i32 = arith.constant 0 : i32
    %c0_i32_0 = arith.constant 0 : i32
    %c0_i32_1 = arith.constant 0 : i32
    return %c0_i32, %c0_i32_0 : i32, i32
  }
  func.func @transform_2(%arg0: i32) -> (i32, i32) {
    %c0_i32 = arith.constant 0 : i32
    %c0_i32_0 = arith.constant 0 : i32
    %c0_i32_1 = arith.constant 0 : i32
    return %c0_i32, %c0_i32_0 : i32, i32
  }
  func.func @transform_3(%arg0: i32) -> (i32, i32) {
    %c0_i32 = arith.constant 0 : i32
    %c0_i32_0 = arith.constant 0 : i32
    return %arg0, %c0_i32 : i32, i32
  }
}

module attributes {stable_mosaic.version = 11 : i64} {
  func.func @_matmul_bias_relu_mask_kernel(%arg0: i32, %arg1: memref<256x2688xbf16, #tpu.memory_space<vmem>>, %arg2: memref<2688x128xbf16, #tpu.memory_space<vmem>>, %arg3: memref<1x128xf32, #tpu.memory_space<vmem>>, %arg4: memref<256x1xf32, #tpu.memory_space<vmem>>, %arg5: memref<256x128xf32, #tpu.memory_space<vmem>>, %arg6: memref<256x128xf32, #tpu.memory_space<vmem>>) attributes {dimension_semantics = [#tpu.dimension_semantics<parallel>], iteration_bounds = array<i64: 2>, scalar_prefetch = 0 : i64, scratch_operands = 0 : i64, tpu.core_type = #tpu.core_type<tc>, window_params = [{transform_indices = @transform_0, window_bounds = array<i64: 256, 2688>}, {pipeline_mode = #tpu.pipeline_mode<synchronous>, transform_indices = @transform_1, window_bounds = array<i64: 2688, 128>}, {pipeline_mode = #tpu.pipeline_mode<synchronous>, transform_indices = @transform_2, window_bounds = array<i64: 1, 128>}, {transform_indices = @transform_3, window_bounds = array<i64: 256, 1>}, {transform_indices = @transform_4, window_bounds = array<i64: 256, 128>}, {transform_indices = @transform_5, window_bounds = array<i64: 256, 128>}]} {
    %c0 = arith.constant 0 : index
    %c0_0 = arith.constant 0 : index
    %0 = vector.load %arg1[%c0, %c0_0] : memref<256x2688xbf16, #tpu.memory_space<vmem>>, vector<256x2688xbf16>
    %c0_1 = arith.constant 0 : index
    %c0_2 = arith.constant 0 : index
    %1 = vector.load %arg2[%c0_1, %c0_2] : memref<2688x128xbf16, #tpu.memory_space<vmem>>, vector<2688x128xbf16>
    %cst = arith.constant dense<0.000000e+00> : vector<256x128xf32>
    %2 = tpu.matmul %0, %1, %cst {dimension_numbers = #tpu.dot_dimension_numbers<[1], [0], [0], [1], [0, 0, 1, 1], [], []>} : vector<256x2688xbf16>, vector<2688x128xbf16>, vector<256x128xf32> -> vector<256x128xf32>
    %c0_3 = arith.constant 0 : index
    %c0_4 = arith.constant 0 : index
    %3 = vector.load %arg3[%c0_3, %c0_4] : memref<1x128xf32, #tpu.memory_space<vmem>>, vector<1x128xf32>
    %4 = vector.broadcast %3 : vector<1x128xf32> to vector<256x128xf32>
    %5 = arith.addf %2, %4 : vector<256x128xf32>
    %cst_5 = arith.constant 0.000000e+00 : f32
    %6 = vector.broadcast %cst_5 : f32 to vector<256x128xf32>
    %7 = arith.maximumf %5, %6 : vector<256x128xf32>
    %c0_6 = arith.constant 0 : index
    %c0_7 = arith.constant 0 : index
    %8 = vector.load %arg5[%c0_6, %c0_7] : memref<256x128xf32, #tpu.memory_space<vmem>>, vector<256x128xf32>
    tpu.vector_store %arg5[%c0_6, %c0_7], %7 {strides = array<i32>} : memref<256x128xf32, #tpu.memory_space<vmem>>, vector<256x128xf32>,
    %c0_8 = arith.constant 0 : index
    %c0_9 = arith.constant 0 : index
    %9 = vector.load %arg4[%c0_8, %c0_9] : memref<256x1xf32, #tpu.memory_space<vmem>>, vector<256x1xf32>
    %10 = vector.broadcast %9 : vector<256x1xf32> to vector<256x128xf32>
    %11 = arith.mulf %7, %10 : vector<256x128xf32>
    %c0_10 = arith.constant 0 : index
    %c0_11 = arith.constant 0 : index
    %12 = vector.load %arg6[%c0_10, %c0_11] : memref<256x128xf32, #tpu.memory_space<vmem>>, vector<256x128xf32>
    tpu.vector_store %arg6[%c0_10, %c0_11], %11 {strides = array<i32>} : memref<256x128xf32, #tpu.memory_space<vmem>>, vector<256x128xf32>,
    return
  }
  func.func @transform_0(%arg0: i32) -> (i32, i32) {
    %c0_i32 = arith.constant 0 : i32
    %c0_i32_0 = arith.constant 0 : i32
    return %arg0, %c0_i32 : i32, i32
  }
  func.func @transform_1(%arg0: i32) -> (i32, i32) {
    %c0_i32 = arith.constant 0 : i32
    %c0_i32_0 = arith.constant 0 : i32
    %c0_i32_1 = arith.constant 0 : i32
    return %c0_i32, %c0_i32_0 : i32, i32
  }
  func.func @transform_2(%arg0: i32) -> (i32, i32) {
    %c0_i32 = arith.constant 0 : i32
    %c0_i32_0 = arith.constant 0 : i32
    %c0_i32_1 = arith.constant 0 : i32
    return %c0_i32, %c0_i32_0 : i32, i32
  }
  func.func @transform_3(%arg0: i32) -> (i32, i32) {
    %c0_i32 = arith.constant 0 : i32
    %c0_i32_0 = arith.constant 0 : i32
    return %arg0, %c0_i32 : i32, i32
  }
  func.func @transform_4(%arg0: i32) -> (i32, i32) {
    %c0_i32 = arith.constant 0 : i32
    %c0_i32_0 = arith.constant 0 : i32
    return %arg0, %c0_i32 : i32, i32
  }
  func.func @transform_5(%arg0: i32) -> (i32, i32) {
    %c0_i32 = arith.constant 0 : i32
    %c0_i32_0 = arith.constant 0 : i32
    return %arg0, %c0_i32 : i32, i32
  }
}

</mosaic_0001>

<bundles_post_ra>
// kernel: encoder_decoder_forward.7
= control target key start
LH: loop header
LB: loop body
LE: loop exit
PB: predicated region body
PF: predicated region fallthrough
CT: control target
= control target key end

     0   :  { %s1867_s12 = smov 0   ;;  %s2095_s0 = inlined_call_operand.vmem [shape: bf16[512,384], index: 0, kind: input, shape index: {}]   ;;  %s2096_s1 = inlined_call_operand.vmem [shape: bf16[384,128], index: 1, kind: input, shape index: {}]   ;;  %s2097_s2 = inlined_call_operand.vmem [shape: f32[1,128], index: 2, kind: input, shape index: {}]   ;;  %s2098_s3 = inlined_call_operand.vmem [shape: bf16[512,128], index: 3, kind: output, shape index: {}]  }
   0x1 LB: > { %s1299_s13 = sadd.s32 4294967295, %s1845_s12   ;;  %p1303_p0 = scmp.ge.s32.totalorder %s1845_s12, 1  ;;  %s1845_s12 = sphi %s1867_s12, %s13_s12  }
   0x2   : > { %p139_p1 = scmp.lt.s32.totalorder %s1845_s12, 3 }
   0x4   : > { %p140_p2 = pnand %p1303_p0, %p139_p1 }
   0x5   : > { %v1751_v0 = vld [vmem:[%s2096_s1 + $0x40] sm:$0xff] (!%p140_p2)   ;;  %s1304_s16 = sshll.u32 (!%p140_p2), %s1299_s13, 5  ;;  %v1753_v2 = vld [vmem:[%s2096_s1 + $0x48] sm:$0xff] (!%p140_p2)   ;;  %v1755_v4 = vld [vmem:[%s2096_s1 + $0x50] sm:$0xff] (!%p140_p2)  }
   0x6   : > { %143 = sbr.rel (%p140_p2) target bundleno = 354 (0x162), region = 32  ;;  %v1752_v1 = vld [vmem:[%s2096_s1] sm:$0xff] (!%p140_p2)   ;;  %1542 = vmatprep.subr.bf16.mxu0 (!%p140_p2), %v1751_v0  ;;  %1726 = vmatprep.subr.bf16.mxu1 (!%p140_p2), %v1751_v0  ;;  %p165_p3 = scmp.lt.s32.totalorder (!%p140_p2), %s1304_s16, 63  ;;  %v1754_v3 = vld [vmem:[%s2096_s1 + $0x8] sm:$0xff] (!%p140_p2)   ;;  %v1756_v5 = vld [vmem:[%s2096_s1 + $0x10] sm:$0xff] (!%p140_p2)  }
   0x7   : > { %1543 = vmatpush3.bf16.msra.mxu0 (!%p140_p2), %v1752_v1  ;;  %1734 = vmatpush3.bf16.msra.mxu1 (!%p140_p2), %v1752_v1  ;;  %v1757_v6 = vld [vmem:[%s2096_s1 + $0x58] sm:$0xff] (!%p140_p2)   ;;  %v1759_v8 = vld [vmem:[%s2096_s1 + $0x60] sm:$0xff] (!%p140_p2)   ;;  %v1761_v10 = vld [vmem:[%s2096_s1 + $0x68] sm:$0xff] (!%p140_p2)  }
   0x8   : > { %1544 = vmatprep.subr.bf16.mxu0 (!%p140_p2), %v1753_v2  ;;  %1727 = vmatprep.subr.bf16.mxu1 (!%p140_p2), %v1753_v2  ;;  %v1758_v7 = vld [vmem:[%s2096_s1 + $0x18] sm:$0xff] (!%p140_p2)   ;;  %v1760_v9 = vld [vmem:[%s2096_s1 + $0x20] sm:$0xff] (!%p140_p2)   ;;  %v1762_v13 = vld [vmem:[%s2096_s1 + $0x28] sm:$0xff] (!%p140_p2)  }
   0x9   : > { %v1763_v14 = vld [vmem:[%s2096_s1 + $0x70] sm:$0xff] (!%p140_p2)   ;;  %v1765_v16 = vld [vmem:[%s2096_s1 + $0x78] sm:$0xff] (!%p140_p2)   ;;  %v1773_v18 = vld [vmem:[%s2096_s1 + $0x80] sm:$0xff] (!%p140_p2)  }
   0xa   : > { %v1764_v15 = vld [vmem:[%s2096_s1 + $0x30] sm:$0xff] (!%p140_p2)   ;;  %v1766_v17 = vld [vmem:[%s2096_s1 + $0x38] sm:$0xff] (!%p140_p2)   ;;  %v1774_v22 = vld [vmem:[%s2096_s1 + $0x88] sm:$0xff] (!%p140_p2)  }
   0xb   : > { %1545 = vmatpush3.bf16.msra.mxu0 (!%p140_p2), %v1754_v3  ;;  %1735 = vmatpush3.bf16.msra.mxu1 (!%p140_p2), %v1754_v3  ;;  %v1781_v25 = vld [vmem:[%s2096_s1 + $0x90] sm:$0xff] (!%p140_p2)   ;;  %v1782_v27 = vld [vmem:[%s2096_s1 + $0x98] sm:$0xff] (!%p140_p2)   ;;  %v1789_v30 = vld [vmem:[%s2096_s1 + $0xa0] sm:$0xff] (!%p140_p2)  }
   0xc   : > { %1546 = vmatprep.subr.bf16.mxu0 (!%p140_p2), %v1755_v4  ;;  %1728 = vmatprep.subr.bf16.mxu1 (!%p140_p2), %v1755_v4  ;;  %v1790_v33 = vld [vmem:[%s2096_s1 + $0xa8] sm:$0xff] (!%p140_p2)   ;;  %v1797_v36 = vld [vmem:[%s2096_s1 + $0xb0] sm:$0xff] (!%p140_p2)   ;;  %v1798_v40 = vld [vmem:[%s2096_s1 + $0xb8] sm:$0xff] (!%p140_p2)  }
   0xd   : > { %s2100_s16 = smov (!%p165_p3, %s1304_s16), 63 }
   0xe   : > { %s1742_s29 = smul.u32 12, %s2100_s16  ;;  %s1307_s19 = sshll.u32 %s2100_s16, 2 }
   0xf   : > { %1547 = vmatpush3.bf16.msra.mxu0 %v1756_v5  ;;  %1736 = vmatpush3.bf16.msra.mxu1 %v1756_v5  ;;  %s2033_s22 = scalar_lea.vmem %s2098_s3, %s1307_s19 }
  0x10   : > { %1548 = vmatprep.subr.bf16.mxu0 %v1757_v6  ;;  %1729 = vmatprep.subr.bf16.mxu1 %v1757_v6  ;;  %s1908_s9 = scalar_lea.vmem %s2095_s0, %s1742_s29 }
  0x11   : > { %v1769_v11 = vld [vmem:[%s1908_s9 + $0x4] ss:$12 sps:$4 sm:$0xff]   ;;  %v1767_v19 = vld [vmem:[%s1908_s9] ss:$12 sps:$4 sm:$0xff]   ;;  %v1775_v21 = vld [vmem:[%s1908_s9 + $0x1c] ss:$12 sps:$4 sm:$0xff]  }
  0x12   : > { %v1772_v12 = vld [vmem:[%s1908_s9 + $0x124] ss:$12 sps:$4 sm:$0xff]   ;;  %729 = vmatprep.mubr.bf16.mxu0 %v1769_v11  ;;  %v1770_v20 = vld [vmem:[%s1908_s9 + $0x120] ss:$12 sps:$4 sm:$0xff]   ;;  %v1777_v23 = vld [vmem:[%s1908_s9 + $0x13c] ss:$12 sps:$4 sm:$0xff]  }
  0x13   : > { %1549 = vmatpush3.bf16.msra.mxu0 %v1758_v7  ;;  %1737 = vmatpush3.bf16.msra.mxu1 %v1758_v7  ;;  %v1779_v24 = vld [vmem:[%s1908_s9 + $0x18] ss:$12 sps:$4 sm:$0xff]   ;;  %v1783_v28 = vld [vmem:[%s1908_s9 + $0x34] ss:$12 sps:$4 sm:$0xff]   ;;  %v1787_v31 = vld [vmem:[%s1908_s9 + $0x30] ss:$12 sps:$4 sm:$0xff]  }
  0x14   : > { %1550 = vmatprep.subr.bf16.mxu0 %v1759_v8  ;;  %1730 = vmatprep.subr.bf16.mxu1 %v1759_v8  ;;  %v1780_v26 = vld [vmem:[%s1908_s9 + $0x138] ss:$12 sps:$4 sm:$0xff]   ;;  %v1785_v29 = vld [vmem:[%s1908_s9 + $0x154] ss:$12 sps:$4 sm:$0xff]   ;;  %v1788_v32 = vld [vmem:[%s1908_s9 + $0x150] ss:$12 sps:$4 sm:$0xff]  }
  0x15   : > { %825 = vmatprep.mubr.bf16.mxu1 %v1772_v12  ;;  %v1791_v34 = vld [vmem:[%s1908_s9 + $0x4c] ss:$12 sps:$4 sm:$0xff]   ;;  %v1795_v37 = vld [vmem:[%s1908_s9 + $0x48] ss:$12 sps:$4 sm:$0xff]   ;;  %v1799_v39 = vld [vmem:[%s1908_s9 + $0x64] ss:$12 sps:$4 sm:$0xff]  }
  0x16   : > { %v1793_v35 = vld [vmem:[%s1908_s9 + $0x16c] ss:$12 sps:$4 sm:$0xff]   ;;  %v1796_v38 = vld [vmem:[%s1908_s9 + $0x168] ss:$12 sps:$4 sm:$0xff]   ;;  %v1808_v47 = vld [vmem:[%s1908_s9 + $0x50] ss:$12 sps:$4 sm:$0xff]  }
  0x17   : > { %1551 = vmatpush3.bf16.msra.mxu0 %v1760_v9  ;;  %1738 = vmatpush3.bf16.msra.mxu1 %v1760_v9  ;;  %v1801_v41 = vld [vmem:[%s1908_s9 + $0x8] ss:$12 sps:$4 sm:$0xff]   ;;  %v1802_v42 = vld [vmem:[%s1908_s9 + $0x60] ss:$12 sps:$4 sm:$0xff]   ;;  %v1806_v45 = vld [vmem:[%s1908_s9 + $0x38] ss:$12 sps:$4 sm:$0xff]  }
  0x18   : > { %1552 = vmatprep.subr.bf16.mxu0 %v1761_v10  ;;  %1731 = vmatprep.subr.bf16.mxu1 %v1761_v10  ;;  %v1803_v43 = vld [vmem:[%s1908_s9 + $0x20] ss:$12 sps:$4 sm:$0xff]   ;;  %v1804_v44 = vld [vmem:[%s1908_s9 + $0x7c] ss:$12 sps:$4 sm:$0xff]   ;;  %v1807_v46 = vld [vmem:[%s1908_s9 + $0x78] ss:$12 sps:$4 sm:$0xff]  }
  0x19   : > { %v1809_v48 = vld [vmem:[%s1908_s9 + $0x94] ss:$12 sps:$4 sm:$0xff]   ;;  %v1812_v50 = vld [vmem:[%s1908_s9 + $0x90] ss:$12 sps:$4 sm:$0xff]   ;;  %v1814_v52 = vld [vmem:[%s1908_s9 + $0xac] ss:$12 sps:$4 sm:$0xff]  }
  0x1a   : > { %v1811_v49 = vld [vmem:[%s1908_s9 + $0x68] ss:$12 sps:$4 sm:$0xff]   ;;  %v1813_v51 = vld [vmem:[%s1908_s9 + $0x80] ss:$12 sps:$4 sm:$0xff]   ;;  %v1816_v53 = vld [vmem:[%s1908_s9 + $0x98] ss:$12 sps:$4 sm:$0xff]  }
  0x1b   : > { %1553 = vmatpush3.bf16.msra.mxu0 %v1762_v13  ;;  %1739 = vmatpush3.bf16.msra.mxu1 %v1762_v13  ;;  %v1817_v54 = vld [vmem:[%s1908_s9 + $0xa8] ss:$12 sps:$4 sm:$0xff]   ;;  %v1818_v55 = vld [vmem:[%s1908_s9 + $0xb0] ss:$12 sps:$4 sm:$0xff]   ;;  %v1822_v58 = vld [vmem:[%s1908_s9 + $0xc0] ss:$12 sps:$4 sm:$0xff]  }
  0x1c   : > { %1554 = vmatprep.subr.bf16.mxu0 %v1763_v14  ;;  %1732 = vmatprep.subr.bf16.mxu1 %v1763_v14  ;;  %v1819_v56 = vld [vmem:[%s1908_s9 + $0xc4] ss:$12 sps:$4 sm:$0xff]   ;;  %v1821_v57 = vld [vmem:[%s1908_s9 + $0xc8] ss:$12 sps:$4 sm:$0xff]   ;;  %v1823_v59 = vld [vmem:[%s1908_s9 + $0xe0] ss:$12 sps:$4 sm:$0xff]  }
  0x1d   : > { %v1824_v60 = vld [vmem:[%s1908_s9 + $0xdc] ss:$12 sps:$4 sm:$0xff]   ;;  %v1826_v61 = vld [vmem:[%s1908_s9 + $0xf8] ss:$12 sps:$4 sm:$0xff]   ;;  %v1829_v0 = vld [vmem:[%s1908_s9 + $0xf4] ss:$12 sps:$4 sm:$0xff]  }
  0x1e   : > { %v1827_v62 = vld [vmem:[%s1908_s9 + $0xd8] ss:$12 sps:$4 sm:$0xff]   ;;  %v1828_v63 = vld [vmem:[%s1908_s9 + $0x110] ss:$12 sps:$4 sm:$0xff]   ;;  %v1831_v1 = vld [vmem:[%s1908_s9 + $0x128] ss:$12 sps:$4 sm:$0xff]  }
  0x1f   : > { %1555 = vmatpush3.bf16.msra.mxu0 %v1764_v15  ;;  %1740 = vmatpush3.bf16.msra.mxu1 %v1764_v15  ;;  %v1832_v2 = vld [vmem:[%s1908_s9 + $0xf0] ss:$12 sps:$4 sm:$0xff]   ;;  %v1833_v3 = vld [vmem:[%s1908_s9 + $0x140] ss:$12 sps:$4 sm:$0xff]   ;;  %v1836_v5 = vld [vmem:[%s1908_s9 + $0x158] ss:$12 sps:$4 sm:$0xff]  }
  0x20   : > { %1556 = vmatprep.subr.bf16.mxu0 %v1765_v16  ;;  %1733 = vmatprep.subr.bf16.mxu1 %v1765_v16  ;;  %v1834_v4 = vld [vmem:[%s1908_s9 + $0x10c] ss:$12 sps:$4 sm:$0xff]   ;;  %v1837_v6 = vld [vmem:[%s1908_s9 + $0x108] ss:$12 sps:$4 sm:$0xff]   ;;  %v1838_v7 = vld [vmem:[%s1908_s9 + $0x170] ss:$12 sps:$4 sm:$0xff]  }
  0x23   : > { %1557 = vmatpush3.bf16.msra.mxu0 %v1766_v17  ;;  %1741 = vmatpush3.bf16.msra.mxu1 %v1766_v17 }
  0x24   : > { %1678 = vmatprep.subr.bf16.mxu1 %v1773_v18 }
  0x26   : > { %730 = vmatmul.mubr.bf16.vlgmr.msra.gmra.mrb[0].mxu0 %v1767_v19  ;;  %826 = vmatmul.mubr.bf16.vlgmr.msra.gmra.mrb[0].mxu1 %v1770_v20 }
  0x27   : > { %1679 = vmatpush3.bf16.msra.mxu1 %v1773_v18  ;;  %737 = vmatprep.mubr.bf16.mxu0 %v1775_v21 }
  0x28   : > { %1680 = vmatprep.subr.bf16.mxu1 %v1774_v22  ;;  %833 = vmatprep.mubr.bf16.mxu1 %v1777_v23 }
  0x2b   : > { %1681 = vmatpush3.bf16.msra.mxu1 %v1774_v22 }
  0x2c   : > { %1682 = vmatprep.subr.bf16.mxu1 %v1781_v25 }
  0x2e   : > { %738 = vmatmul.mubr.bf16.gmra.mrb[4].mxu0 %v1779_v24  ;;  %834 = vmatmul.mubr.bf16.gmra.mrb[4].mxu1 %v1780_v26 }
  0x2f   : > { %1683 = vmatpush3.bf16.msra.mxu1 %v1781_v25  ;;  %745 = vmatprep.mubr.bf16.mxu0 %v1783_v28 }
  0x30   : > { %1684 = vmatprep.subr.bf16.mxu1 %v1782_v27  ;;  %841 = vmatprep.mubr.bf16.mxu1 %v1785_v29 }
  0x33   : > { %1685 = vmatpush3.bf16.msra.mxu1 %v1782_v27 }
  0x34   : > { %1686 = vmatprep.subr.bf16.mxu1 %v1789_v30 }
  0x36   : > { %746 = vmatmul.mubr.bf16.gmra.mrb[8].mxu0 %v1787_v31  ;;  %842 = vmatmul.mubr.bf16.gmra.mrb[8].mxu1 %v1788_v32 }
  0x37   : > { %1687 = vmatpush3.bf16.msra.mxu1 %v1789_v30  ;;  %753 = vmatprep.mubr.bf16.mxu0 %v1791_v34 }
  0x38   : > { %1688 = vmatprep.subr.bf16.mxu1 %v1790_v33  ;;  %849 = vmatprep.mubr.bf16.mxu1 %v1793_v35 }
  0x3b   : > { %1689 = vmatpush3.bf16.msra.mxu1 %v1790_v33 }
  0x3c   : > { %1690 = vmatprep.subr.bf16.mxu1 %v1797_v36 }
  0x3e   : > { %754 = vmatmul.mubr.bf16.gmra.mrb[12].mxu0 %v1795_v37  ;;  %850 = vmatmul.mubr.bf16.gmra.mrb[12].mxu1 %v1796_v38 }
  0x3f   : > { %1691 = vmatpush3.bf16.msra.mxu1 %v1797_v36  ;;  %761 = vmatprep.mubr.bf16.mxu0 %v1799_v39 }
  0x40   : > { %1692 = vmatprep.subr.bf16.mxu1 %v1798_v40  ;;  %1694 = vmatprep.mubr.bf16.mxu1 %v1801_v41 }
  0x43   : > { %1693 = vmatpush3.bf16.msra.mxu1 %v1798_v40 }
  0x46   : > { %762 = vmatmul.mubr.bf16.gmra.mrb[16].mxu0 %v1802_v42  ;;  %1695 = vmatmul.mubr.bf16.vlgmr.msra.gmra.mrb[16].mxu1 %v1803_v43 }
  0x47   : > { %769 = vmatprep.mubr.bf16.mxu0 %v1804_v44  ;;  %1698 = vmatprep.mubr.bf16.mxu1 %v1806_v45 }
  0x4e   : > { %770 = vmatmul.mubr.bf16.gmra.mrb[20].mxu0 %v1807_v46  ;;  %1699 = vmatmul.mubr.bf16.gmra.mrb[20].mxu1 %v1808_v47 }
  0x4f   : > { %777 = vmatprep.mubr.bf16.mxu0 %v1809_v48  ;;  %1702 = vmatprep.mubr.bf16.mxu1 %v1811_v49 }
  0x56   : > { %778 = vmatmul.mubr.bf16.gmra.mrb[24].mxu0 %v1812_v50  ;;  %1703 = vmatmul.mubr.bf16.gmra.mrb[24].mxu1 %v1813_v51 }
  0x57   : > { %785 = vmatprep.mubr.bf16.mxu0 %v1814_v52  ;;  %1706 = vmatprep.mubr.bf16.mxu1 %v1816_v53 }
  0x5e   : > { %786 = vmatmul.mubr.bf16.gmra.mrb[28].mxu0 %v1817_v54  ;;  %1707 = vmatmul.mubr.bf16.gmra.mrb[28].mxu1 %v1818_v55 }
  0x5f   : > { %793 = vmatprep.mubr.bf16.mxu0 %v1819_v56  ;;  %1710 = vmatprep.mubr.bf16.mxu1 %v1821_v57  ;;  %v2022_v56 = vld [vmem:[%s2097_s2] ss:$0 sm:$0xff] }
  0x66   : > { %794 = vmatmul.mubr.bf16.gmra.mrb[32].mxu0 %v1822_v58  ;;  %1711 = vmatmul.mubr.bf16.gmra.mrb[32].mxu1 %v1823_v59 }
  0x67   : > { %801 = vmatprep.mubr.bf16.mxu0 %v1824_v60  ;;  %1714 = vmatprep.mubr.bf16.mxu1 %v1826_v61 }
  0x6e   : > { %802 = vmatmul.mubr.bf16.gmra.mrb[36].mxu0 %v1827_v62  ;;  %1715 = vmatmul.mubr.bf16.gmra.mrb[36].mxu1 %v1828_v63 }
  0x6f   : > { %809 = vmatprep.mubr.bf16.mxu0 %v1829_v0  ;;  %1718 = vmatprep.mubr.bf16.mxu1 %v1831_v1 }
  0x76   : > { %810 = vmatmul.mubr.bf16.gmra.mrb[40].mxu0 %v1832_v2  ;;  %1719 = vmatmul.mubr.bf16.gmra.mrb[40].mxu1 %v1833_v3 }
  0x77   : > { %817 = vmatprep.mubr.bf16.mxu0 %v1834_v4  ;;  %1722 = vmatprep.mubr.bf16.mxu1 %v1836_v5 }
  0x7e   : > { %818 = vmatmul.mubr.bf16.gmra.mrb[44].mxu0 %v1837_v6  ;;  %1723 = vmatmul.mubr.bf16.gmra.mrb[44].mxu1 %v1838_v7 }
  0xf9   : > { %v1558_v8 = vpop.f32.mrb[0].mxu0  ;;  %v1630_v9 = vpop.f32.mrb[0].mxu1 }
  0xfa   : > { %v1559_v10 = vpop.f32.mrb[1].mxu0  ;;  %v1631_v11 = vpop.f32.mrb[1].mxu1 }
  0xfb   : > { %v1560_v12 = vadd.f32 %v1559_v10, %v1558_v8  ;;  %v1561_v13 = vpop.f32.mrb[2].mxu0  ;;  %v2003_v14 = vadd.f32 %v1631_v11, %v1630_v9  ;;  %v1633_v15 = vpop.f32.mrb[2].mxu1 }
  0xfc   : > { %v1562_v16 = vpop.f32.mrb[3].mxu0  ;;  %v1634_v17 = vpop.f32.mrb[3].mxu1 }
  0xfd   : > { %v1563_v18 = vadd.f32 %v1562_v16, %v1561_v13  ;;  %v2005_v19 = vadd.f32 %v1634_v17, %v1633_v15  ;;  %v732_v60 = vadd.f32 %v1560_v12, %v2022_v56 }
  0xff   : > { %v735_v5 = vadd.f32 %v1563_v18, %v2022_v56 }
 0x101   : > { %v1564_v20 = vpop.f32.mrb[4].mxu0  ;;  %v1636_v21 = vpop.f32.mrb[4].mxu1 }
 0x102   : > { %v1565_v22 = vpop.f32.mrb[5].mxu0  ;;  %v1637_v23 = vpop.f32.mrb[5].mxu1 }
 0x103   : > { %v1566_v24 = vadd.f32 %v1565_v22, %v1564_v20  ;;  %v1567_v25 = vpop.f32.mrb[6].mxu0  ;;  %v2007_v26 = vadd.f32 %v1637_v23, %v1636_v21  ;;  %v1639_v27 = vpop.f32.mrb[6].mxu1 }
 0x104   : > { %v1568_v28 = vpop.f32.mrb[7].mxu0  ;;  %v1640_v29 = vpop.f32.mrb[7].mxu1 }
 0x105   : > { %v1569_v30 = vadd.f32 %v1568_v28, %v1567_v25  ;;  %v2009_v31 = vadd.f32 %v1640_v29, %v1639_v27  ;;  %v740_v57 = vadd.f32 %v1566_v24, %v2022_v56 }
 0x107   : > { %v743_v0 = vadd.f32 %v1569_v30, %v2022_v56 }
 0x109   : > { %v1570_v32 = vpop.f32.mrb[8].mxu0  ;;  %v1642_v33 = vpop.f32.mrb[8].mxu1 }
 0x10a   : > { %v1571_v34 = vpop.f32.mrb[9].mxu0  ;;  %v1643_v35 = vpop.f32.mrb[9].mxu1 }
 0x10b   : > { %v1572_v36 = vadd.f32 %v1571_v34, %v1570_v32  ;;  %v1573_v37 = vpop.f32.mrb[10].mxu0  ;;  %v2011_v38 = vadd.f32 %v1643_v35, %v1642_v33  ;;  %v1645_v39 = vpop.f32.mrb[10].mxu1 }
 0x10c   : > { %v1574_v40 = vpop.f32.mrb[11].mxu0  ;;  %v1646_v41 = vpop.f32.mrb[11].mxu1 }
 0x10d   : > { %v1575_v42 = vadd.f32 %v1574_v40, %v1573_v37  ;;  %v2013_v43 = vadd.f32 %v1646_v41, %v1645_v39  ;;  %v748_v24 = vadd.f32 %v1572_v36, %v2022_v56 }
 0x10f   : > { %v751_v39 = vadd.f32 %v1575_v42, %v2022_v56 }
 0x111   : > { %v1576_v44 = vpop.f32.mrb[12].mxu0  ;;  %v1648_v45 = vpop.f32.mrb[12].mxu1 }
 0x112   : > { %v1577_v46 = vpop.f32.mrb[13].mxu0  ;;  %v1649_v47 = vpop.f32.mrb[13].mxu1 }
 0x113   : > { %v1578_v48 = vadd.f32 %v1577_v46, %v1576_v44  ;;  %v1579_v49 = vpop.f32.mrb[14].mxu0  ;;  %v2015_v50 = vadd.f32 %v1649_v47, %v1648_v45  ;;  %v1651_v51 = vpop.f32.mrb[14].mxu1 }
 0x114   : > { %v1580_v52 = vpop.f32.mrb[15].mxu0  ;;  %v1652_v53 = vpop.f32.mrb[15].mxu1 }
 0x115   : > { %v1581_v54 = vadd.f32 %v1580_v52, %v1579_v49  ;;  %v2017_v55 = vadd.f32 %v1652_v53, %v1651_v51  ;;  %v756_v20 = vadd.f32 %v1578_v48, %v2022_v56 }
 0x117   : > { %v759_v30 = vadd.f32 %v1581_v54, %v2022_v56 }
 0x119   : > { %v1582_v58 = vpop.f32.mrb[16].mxu0  ;;  %v1696_v59 = vpop.f32.mrb[16].mxu1 }
 0x11a   : > { %v901_v61 = vadd.f32 %v1696_v59, %v740_v57  ;;  %v1583_v62 = vpop.f32.mrb[17].mxu0  ;;  %v892_v63 = vpop.f32.mrb[17].mxu1 }
 0x11b   : > { %v1584_v1 = vadd.f32 %v1583_v62, %v1582_v58  ;;  %v893_v2 = vadd.f32 %v892_v63, %v732_v60  ;;  %v1585_v3 = vpop.f32.mrb[18].mxu0  ;;  %v1697_v4 = vpop.f32.mrb[18].mxu1 }
 0x11c   : > { %v1021_v6 = vmul.f32 0.01, %v901_v61  ;;  %v904_v7 = vadd.f32 %v1697_v4, %v743_v0  ;;  %v1586_v8 = vpop.f32.mrb[19].mxu0  ;;  %v895_v9 = vpop.f32.mrb[19].mxu1 }
 0x11d   : > { %v1019_v10 = vmul.f32 0.01, %v893_v2  ;;  %v1587_v11 = vadd.f32 %v1586_v8, %v1585_v3  ;;  %v896_v13 = vadd.f32 %v895_v9, %v735_v5  ;;  %v764_v59 = vadd.f32 %v1584_v1, %v2022_v56 }
 0x11e   : > { %v1022_v12 = vmul.f32 0.01, %v904_v7  ;;  %v1053_v16 = vmax.f32 %v901_v61, %v1021_v6 }
 0x11f   : > { %v1020_v15 = vmul.f32 0.01, %v896_v13  ;;  %v1051_v21 = vmax.f32 %v893_v2, %v1019_v10 }
 0x120   : > { %v1054_v17 = vmax.f32 %v904_v7, %v1022_v12  ;;  %v767_v7 = vadd.f32 %v1587_v11, %v2022_v56 }
 0x121   : > { %v1052_v18 = vmax.f32 %v896_v13, %v1020_v15  ;;  %v1588_v22 = vpop.f32.mrb[20].mxu0  ;;  %v1700_v23 = vpop.f32.mrb[20].mxu1 }
 0x122   : > { %v1455_v25 = vpack.c.bf16 %v1054_v17, %v1053_v16  ;;  %v917_v27 = vadd.f32 %v1700_v23, %v756_v20  ;;  %v1589_v28 = vpop.f32.mrb[21].mxu0  ;;  %v908_v29 = vpop.f32.mrb[21].mxu1 }
 0x123   : > { %v1450_v32 = vpack.c.bf16 %v1052_v18, %v1051_v21  ;;  %v1590_v33 = vadd.f32 %v1589_v28, %v1588_v22  ;;  %v909_v34 = vadd.f32 %v908_v29, %v748_v24  ;;  %v1591_v35 = vpop.f32.mrb[22].mxu0  ;;  %v1701_v37 = vpop.f32.mrb[22].mxu1 }
 0x124   : > { %1527 = vst [vmem:[%s2033_s22 + $0x8] sm:$0xff] %v1455_v25   ;;  %v1025_v40 = vmul.f32 0.01, %v917_v27  ;;  %v920_v41 = vadd.f32 %v1701_v37, %v759_v30  ;;  %v1592_v44 = vpop.f32.mrb[23].mxu0  ;;  %v911_v45 = vpop.f32.mrb[23].mxu1 }
 0x125   : > { %1451 = vst [vmem:[%s2033_s22] sm:$0xff] %v1450_v32   ;;  %v1023_v36 = vmul.f32 0.01, %v909_v34  ;;  %v1593_v46 = vadd.f32 %v1592_v44, %v1591_v35  ;;  %v912_v47 = vadd.f32 %v911_v45, %v751_v39  ;;  %v772_v53 = vadd.f32 %v1590_v33, %v2022_v56 }
 0x126   : > { %v1026_v48 = vmul.f32 0.01, %v920_v41  ;;  %v1057_v51 = vmax.f32 %v917_v27, %v1025_v40 }
 0x127   : > { %v1024_v49 = vmul.f32 0.01, %v912_v47  ;;  %v1055_v54 = vmax.f32 %v909_v34, %v1023_v36  ;;  %v775_v0 = vadd.f32 %v1593_v46, %v2022_v56 }
 0x128   : > { %v1058_v52 = vmax.f32 %v920_v41, %v1026_v48 }
 0x129   : > { %v1056_v57 = vmax.f32 %v912_v47, %v1024_v49  ;;  %v1594_v58 = vpop.f32.mrb[24].mxu0  ;;  %v1704_v42 = vpop.f32.mrb[24].mxu1 }
 0x12a   : > { %v1465_v60 = vpack.c.bf16 %v1058_v52, %v1057_v51  ;;  %v933_v61 = vadd.f32 %v1704_v42, %v772_v53  ;;  %v1595_v62 = vpop.f32.mrb[25].mxu0  ;;  %v924_v63 = vpop.f32.mrb[25].mxu1 }
 0x12b   : > { %v1460_v2 = vpack.c.bf16 %v1056_v57, %v1055_v54  ;;  %v1596_v3 = vadd.f32 %v1595_v62, %v1594_v58  ;;  %v925_v4 = vadd.f32 %v924_v63, %v764_v59  ;;  %v1597_v5 = vpop.f32.mrb[26].mxu0  ;;  %v1705_v6 = vpop.f32.mrb[26].mxu1 }
 0x12c   : > { %1529 = vst [vmem:[%s2033_s22 + $0x18] sm:$0xff] %v1465_v60   ;;  %v1029_v8 = vmul.f32 0.01, %v933_v61  ;;  %v936_v9 = vadd.f32 %v1705_v6, %v775_v0  ;;  %v1598_v10 = vpop.f32.mrb[27].mxu0  ;;  %v927_v13 = vpop.f32.mrb[27].mxu1 }
 0x12d   : > { %1528 = vst [vmem:[%s2033_s22 + $0x10] sm:$0xff] %v1460_v2   ;;  %v1027_v1 = vmul.f32 0.01, %v925_v4  ;;  %v1599_v12 = vadd.f32 %v1598_v10, %v1597_v5  ;;  %v928_v15 = vadd.f32 %v927_v13, %v767_v7  ;;  %v780_v11 = vadd.f32 %v1596_v3, %v2022_v56 }
 0x12e   : > { %v1030_v16 = vmul.f32 0.01, %v936_v9  ;;  %v1061_v20 = vmax.f32 %v933_v61, %v1029_v8 }
 0x12f   : > { %v1028_v17 = vmul.f32 0.01, %v928_v15  ;;  %v1059_v18 = vmax.f32 %v925_v4, %v1027_v1  ;;  %v783_v35 = vadd.f32 %v1599_v12, %v2022_v56 }
 0x130   : > { %v1062_v21 = vmax.f32 %v936_v9, %v1030_v16 }
 0x131   : > { %v1060_v22 = vmax.f32 %v928_v15, %v1028_v17  ;;  %v1600_v23 = vpop.f32.mrb[28].mxu0  ;;  %v1708_v24 = vpop.f32.mrb[28].mxu1 }
 0x132   : > { %v1475_v25 = vpack.c.bf16 %v1062_v21, %v1061_v20  ;;  %v1601_v27 = vpop.f32.mrb[29].mxu0  ;;  %v940_v28 = vpop.f32.mrb[29].mxu1 }
 0x133   : > { %v1470_v29 = vpack.c.bf16 %v1060_v22, %v1059_v18  ;;  %v1602_v30 = vadd.f32 %v1601_v27, %v1600_v23  ;;  %v941_v32 = vadd.f32 %v940_v28, %v780_v11  ;;  %v1603_v33 = vpop.f32.mrb[30].mxu0  ;;  %v1709_v34 = vpop.f32.mrb[30].mxu1 }
 0x134   : > { %1531 = vst [vmem:[%s2033_s22 + $0x28] sm:$0xff] %v1475_v25   ;;  %v1604_v37 = vpop.f32.mrb[31].mxu0  ;;  %v943_v39 = vpop.f32.mrb[31].mxu1 }
 0x135   : > { %1530 = vst [vmem:[%s2033_s22 + $0x20] sm:$0xff] %v1470_v29   ;;  %v788_v40 = vadd.f32 %v1602_v30, %v2022_v56  ;;  %v1031_v41 = vmul.f32 0.01, %v941_v32  ;;  %v1605_v44 = vadd.f32 %v1604_v37, %v1603_v33  ;;  %v944_v45 = vadd.f32 %v943_v39, %v783_v35 }
 0x136   : > { %v836_v30 = vadd.f32 %v2007_v26, %v2022_v56  ;;  %v828_v37 = vadd.f32 %v2003_v14, %v2022_v56 }
 0x137   : > { %v949_v36 = vadd.f32 %v1708_v24, %v788_v40  ;;  %v791_v46 = vadd.f32 %v1605_v44, %v2022_v56  ;;  %v1032_v47 = vmul.f32 0.01, %v944_v45  ;;  %v1063_v49 = vmax.f32 %v941_v32, %v1031_v41 }
 0x138   : > { %v839_v44 = vadd.f32 %v2009_v31, %v2022_v56 }
 0x139   : > { %v1033_v48 = vmul.f32 0.01, %v949_v36  ;;  %v952_v51 = vadd.f32 %v1709_v34, %v791_v46  ;;  %v1064_v52 = vmax.f32 %v944_v45, %v1032_v47  ;;  %v1606_v53 = vpop.f32.mrb[32].mxu0  ;;  %v1712_v54 = vpop.f32.mrb[32].mxu1 }
 0x13a   : > { %v1607_v57 = vpop.f32.mrb[33].mxu0  ;;  %v956_v58 = vpop.f32.mrb[33].mxu1 }
 0x13b   : > { %v1034_v42 = vmul.f32 0.01, %v952_v51  ;;  %v1480_v59 = vpack.c.bf16 %v1064_v52, %v1063_v49  ;;  %v1608_v60 = vadd.f32 %v1607_v57, %v1606_v53  ;;  %v1609_v61 = vpop.f32.mrb[34].mxu0  ;;  %v1713_v62 = vpop.f32.mrb[34].mxu1  ;;  %v1065_v2 = vmax.f32 %v949_v36, %v1033_v48 }
 0x13c   : > { %v1610_v63 = vpop.f32.mrb[35].mxu0  ;;  %v959_v0 = vpop.f32.mrb[35].mxu1  ;;  %v831_v52 = vadd.f32 %v2005_v19, %v2022_v56  ;;  %v852_v19 = vadd.f32 %v2015_v50, %v2022_v56 }
 0x13d   : > { %v1066_v3 = vmax.f32 %v952_v51, %v1034_v42  ;;  %1532 = vst [vmem:[%s2033_s22 + $0x30] sm:$0xff] %v1480_v59   ;;  %v796_v4 = vadd.f32 %v1608_v60, %v2022_v56  ;;  %v1611_v5 = vadd.f32 %v1610_v63, %v1609_v61 }
 0x13f   : > { %v1485_v6 = vpack.c.bf16 %v1066_v3, %v1065_v2  ;;  %v957_v7 = vadd.f32 %v956_v58, %v796_v4  ;;  %v799_v8 = vadd.f32 %v1611_v5, %v2022_v56 }
 0x141   : > { %1533 = vst [vmem:[%s2033_s22 + $0x38] sm:$0xff] %v1485_v6   ;;  %v1035_v9 = vmul.f32 0.01, %v957_v7  ;;  %v960_v10 = vadd.f32 %v959_v0, %v799_v8  ;;  %v1612_v13 = vpop.f32.mrb[36].mxu0  ;;  %v2056_v1 = vpop.f32.mrb[36].mxu1  ;;  %v855_v8 = vadd.f32 %v2017_v55, %v2022_v56  ;;  %v847_v55 = vadd.f32 %v2013_v43, %v2022_v56 }
 0x142   : > { %v1613_v12 = vpop.f32.mrb[37].mxu0  ;;  %v972_v15 = vpop.f32.mrb[37].mxu1 }
 0x143   : > { %v1036_v16 = vmul.f32 0.01, %v960_v10  ;;  %v1614_v17 = vadd.f32 %v1613_v12, %v1612_v13  ;;  %v1615_v20 = vpop.f32.mrb[38].mxu0  ;;  %v2058_v21 = vpop.f32.mrb[38].mxu1  ;;  %v1067_v23 = vmax.f32 %v957_v7, %v1035_v9  ;;  %v844_v7 = vadd.f32 %v2011_v38, %v2022_v56 }
 0x144   : > { %v1616_v18 = vpop.f32.mrb[39].mxu0  ;;  %v975_v22 = vpop.f32.mrb[39].mxu1 }
 0x145   : > { %v1068_v24 = vmax.f32 %v960_v10, %v1036_v16  ;;  %v804_v11 = vadd.f32 %v1614_v17, %v2022_v56  ;;  %v1617_v25 = vadd.f32 %v1616_v18, %v1615_v20 }
 0x147   : > { %v1490_v27 = vpack.c.bf16 %v1068_v24, %v1067_v23  ;;  %v965_v28 = vadd.f32 %v1712_v54, %v804_v11  ;;  %v807_v29 = vadd.f32 %v1617_v25, %v2022_v56 }
 0x149   : > { %1534 = vst [vmem:[%s2033_s22 + $0x40] sm:$0xff] %v1490_v27   ;;  %v1037_v32 = vmul.f32 0.01, %v965_v28  ;;  %v968_v33 = vadd.f32 %v1713_v62, %v807_v29  ;;  %v1618_v34 = vpop.f32.mrb[40].mxu0  ;;  %v1720_v35 = vpop.f32.mrb[40].mxu1 }
 0x14a   : > { %v997_v39 = vadd.f32 %v1720_v35, %v836_v30  ;;  %v1619_v40 = vpop.f32.mrb[41].mxu0  ;;  %v988_v41 = vpop.f32.mrb[41].mxu1 }
 0x14b   : > { %v1038_v45 = vmul.f32 0.01, %v968_v33  ;;  %v1620_v36 = vadd.f32 %v1619_v40, %v1618_v34  ;;  %v989_v46 = vadd.f32 %v988_v41, %v828_v37  ;;  %v1621_v47 = vpop.f32.mrb[42].mxu0  ;;  %v1721_v48 = vpop.f32.mrb[42].mxu1  ;;  %v1069_v14 = vmax.f32 %v965_v28, %v1037_v32 }
 0x14c   : > { %v1045_v26 = vmul.f32 0.01, %v997_v39  ;;  %v1000_v49 = vadd.f32 %v1721_v48, %v839_v44  ;;  %v1622_v51 = vpop.f32.mrb[43].mxu0  ;;  %v991_v53 = vpop.f32.mrb[43].mxu1 }
 0x14d   : > { %v1070_v54 = vmax.f32 %v968_v33, %v1038_v45  ;;  %v812_v57 = vadd.f32 %v1620_v36, %v2022_v56  ;;  %v1623_v58 = vadd.f32 %v1622_v51, %v1621_v47  ;;  %v1043_v42 = vmul.f32 0.01, %v989_v46 }
 0x14e   : > { %v1046_v31 = vmul.f32 0.01, %v1000_v49  ;;  %v992_v59 = vadd.f32 %v991_v53, %v831_v52  ;;  %v1077_v63 = vmax.f32 %v997_v39, %v1045_v26 }
 0x14f   : > { %v1495_v60 = vpack.c.bf16 %v1070_v54, %v1069_v14  ;;  %v973_v61 = vadd.f32 %v972_v15, %v812_v57  ;;  %v815_v62 = vadd.f32 %v1623_v58, %v2022_v56  ;;  %v1075_v9 = vmax.f32 %v989_v46, %v1043_v42 }
 0x150   : > { %v1078_v0 = vmax.f32 %v1000_v49, %v1046_v31  ;;  %v1044_v2 = vmul.f32 0.01, %v992_v59 }
 0x151   : > { %1535 = vst [vmem:[%s2033_s22 + $0x48] sm:$0xff] %v1495_v60   ;;  %v1039_v3 = vmul.f32 0.01, %v973_v61  ;;  %v976_v4 = vadd.f32 %v975_v22, %v815_v62  ;;  %v1624_v5 = vpop.f32.mrb[44].mxu0  ;;  %v1724_v6 = vpop.f32.mrb[44].mxu1 }
 0x152   : > { %v1515_v10 = vpack.c.bf16 %v1078_v0, %v1077_v63  ;;  %v1076_v13 = vmax.f32 %v992_v59, %v1044_v2  ;;  %v1013_v12 = vadd.f32 %v1724_v6, %v852_v19  ;;  %v1625_v15 = vpop.f32.mrb[45].mxu0  ;;  %v1004_v16 = vpop.f32.mrb[45].mxu1 }
 0x153   : > { %v1040_v17 = vmul.f32 0.01, %v976_v4  ;;  %v1626_v50 = vadd.f32 %v1625_v15, %v1624_v5  ;;  %v1005_v20 = vadd.f32 %v1004_v16, %v844_v7  ;;  %v1627_v18 = vpop.f32.mrb[46].mxu0  ;;  %v1725_v22 = vpop.f32.mrb[46].mxu1  ;;  %v1071_v27 = vmax.f32 %v973_v61, %v1039_v3 }
 0x154   : > { %1539 = vst [vmem:[%s2033_s22 + $0x68] sm:$0xff] %v1515_v10   ;;  %v1510_v23 = vpack.c.bf16 %v1076_v13, %v1075_v9  ;;  %v1049_v24 = vmul.f32 0.01, %v1013_v12  ;;  %v1016_v11 = vadd.f32 %v1725_v22, %v855_v8  ;;  %v1628_v38 = vpop.f32.mrb[47].mxu0  ;;  %v1007_v25 = vpop.f32.mrb[47].mxu1 }
 0x155   : > { %v1072_v28 = vmax.f32 %v976_v4, %v1040_v17  ;;  %v820_v29 = vadd.f32 %v1626_v50, %v2022_v56  ;;  %v1629_v30 = vadd.f32 %v1628_v38, %v1627_v18  ;;  %v1047_v32 = vmul.f32 0.01, %v1005_v20 }
 0x156   : > { %1538 = vst [vmem:[%s2033_s22 + $0x60] sm:$0xff] %v1510_v23   ;;  %v1050_v33 = vmul.f32 0.01, %v1016_v11  ;;  %v1008_v34 = vadd.f32 %v1007_v25, %v847_v55  ;;  %v1081_v40 = vmax.f32 %v1013_v12, %v1049_v24 }
 0x157   : > { %v1500_v35 = vpack.c.bf16 %v1072_v28, %v1071_v27  ;;  %v981_v37 = vadd.f32 %v2056_v1, %v820_v29  ;;  %v823_v39 = vadd.f32 %v1629_v30, %v2022_v56  ;;  %v1079_v36 = vmax.f32 %v1005_v20, %v1047_v32 }
 0x158   : > { %v1082_v43 = vmax.f32 %v1016_v11, %v1050_v33  ;;  %v1048_v41 = vmul.f32 0.01, %v1008_v34 }
 0x159   : > { %1536 = vst [vmem:[%s2033_s22 + $0x50] sm:$0xff] %v1500_v35   ;;  %v1041_v44 = vmul.f32 0.01, %v981_v37  ;;  %v984_v45 = vadd.f32 %v2058_v21, %v823_v39 }
 0x15a   : > { %v1525_v46 = vpack.c.bf16 %v1082_v43, %v1081_v40  ;;  %v1080_v47 = vmax.f32 %v1008_v34, %v1048_v41 }
 0x15b   : > { %v1042_v48 = vmul.f32 0.01, %v984_v45  ;;  %v1073_v49 = vmax.f32 %v981_v37, %v1041_v44 }
 0x15c   : > { %1541 = vst [vmem:[%s2033_s22 + $0x78] sm:$0xff] %v1525_v46   ;;  %v1520_v26 = vpack.c.bf16 %v1080_v47, %v1079_v36 }
 0x15d   : > { %v1074_v51 = vmax.f32 %v984_v45, %v1042_v48 }
 0x15e   : > { %1540 = vst [vmem:[%s2033_s22 + $0x70] sm:$0xff] %v1520_v26  }
 0x15f   : > { %v1505_v1 = vpack.c.bf16 %v1074_v51, %v1073_v49 }
 0x161   : > { %1537 = vst [vmem:[%s2033_s22 + $0x58] sm:$0xff] %v1505_v1  }
 0x162 PF: > { %s13_s12 = sadd.s32 1, %s1845_s12  }
 0x163   : > { %p10_p4 = scmp.ge.s32.totalorder %s13_s12, 4  }
 0x165   :  { %12 = sbr.rel (!%p10_p4) target bundleno = 1 (0x1), region = 62 }

// kernel: encoder_decoder_forward.8
= control target key start
LH: loop header
LB: loop body
LE: loop exit
PB: predicated region body
PF: predicated region fallthrough
CT: control target
= control target key end

     0   :  { %s1195_s1 = inlined_call_operand.vmem [shape: bf16[384,128], index: 1, kind: input, shape index: {}]   ;;  %s1196_s0 = inlined_call_operand.vmem [shape: bf16[128,384], index: 0, kind: input, shape index: {}]   ;;  %s1197_s2 = inlined_call_operand.vmem [shape: f32[1,128], index: 2, kind: input, shape index: {}]   ;;  %s1198_s3 = inlined_call_operand.vmem [shape: bf16[128,128], index: 3, kind: output, shape index: {}]  }
   0x1   :  { %v924_v0 = vld [vmem:[%s1195_s1 + $0x40] sm:$0xff]   ;;  %v926_v2 = vld [vmem:[%s1195_s1 + $0x48] sm:$0xff]   ;;  %v929_v5 = vld [vmem:[%s1195_s1 + $0x50] sm:$0xff]  }
   0x2   :  { %v925_v1 = vld [vmem:[%s1195_s1] sm:$0xff]   ;;  %812 = vmatprep.subr.bf16.mxu0 %v924_v0  ;;  %v928_v4 = vld [vmem:[%s1195_s1 + $0x8] sm:$0xff]   ;;  %v931_v7 = vld [vmem:[%s1195_s1 + $0x10] sm:$0xff]  }
   0x3   :  { %813 = vmatpush3.bf16.msra.mxu0 %v925_v1  ;;  %v927_v3 = vld [vmem:[%s1195_s1 + $0x80] sm:$0xff]   ;;  %v930_v6 = vld [vmem:[%s1195_s1 + $0x88] sm:$0xff]   ;;  %v932_v8 = vld [vmem:[%s1195_s1 + $0x58] sm:$0xff]  }
   0x4   :  { %814 = vmatprep.subr.bf16.mxu0 %v926_v2  ;;  %892 = vmatprep.subr.bf16.mxu1 %v927_v3  ;;  %v933_v9 = vld [vmem:[%s1195_s1 + $0x90] sm:$0xff]   ;;  %v934_v10 = vld [vmem:[%s1195_s1 + $0x18] sm:$0xff]   ;;  %v935_v11 = vld [vmem:[%s1195_s1 + $0x60] sm:$0xff]  }
   0x5   :  { %893 = vmatpush3.bf16.msra.mxu1 %v927_v3  ;;  %v936_v12 = vld [vmem:[%s1195_s1 + $0x98] sm:$0xff]   ;;  %v937_v13 = vld [vmem:[%s1195_s1 + $0x20] sm:$0xff]   ;;  %v938_v15 = vld [vmem:[%s1195_s1 + $0x68] sm:$0xff]  }
   0x6   :  { %894 = vmatprep.subr.bf16.mxu1 %v930_v6  ;;  %v939_v14 = vld [vmem:[%s1195_s1 + $0xa0] sm:$0xff]   ;;  %v940_v16 = vld [vmem:[%s1195_s1 + $0x28] sm:$0xff]   ;;  %v941_v18 = vld [vmem:[%s1195_s1 + $0x70] sm:$0xff]  }
   0x7   :  { %815 = vmatpush3.bf16.msra.mxu0 %v928_v4  ;;  %v942_v17 = vld [vmem:[%s1195_s1 + $0xa8] sm:$0xff]   ;;  %v943_v19 = vld [vmem:[%s1195_s1 + $0x30] sm:$0xff]   ;;  %v944_v20 = vld [vmem:[%s1195_s1 + $0x78] sm:$0xff]  }
   0x8   :  { %816 = vmatprep.subr.bf16.mxu0 %v929_v5  ;;  %v945_v21 = vld [vmem:[%s1195_s1 + $0xb0] sm:$0xff]   ;;  %v946_v23 = vld [vmem:[%s1195_s1 + $0x38] sm:$0xff]   ;;  %v947_v26 = vld [vmem:[%s1196_s0] ss:$12 sps:$4 sm:$0xff]  }
   0x9   :  { %895 = vmatpush3.bf16.msra.mxu1 %v930_v6  ;;  %v949_v22 = vld [vmem:[%s1196_s0 + $0x4] ss:$12 sps:$4 sm:$0xff]   ;;  %v951_v24 = vld [vmem:[%s1196_s0 + $0x8] ss:$12 sps:$4 sm:$0xff]   ;;  %v950_v25 = vld [vmem:[%s1195_s1 + $0xb8] sm:$0xff]  }
   0xa   :  { %896 = vmatprep.subr.bf16.mxu1 %v933_v9  ;;  %406 = vmatprep.mubr.bf16.mxu0 %v949_v22  ;;  %v953_v27 = vld [vmem:[%s1196_s0 + $0x1c] ss:$12 sps:$4 sm:$0xff]   ;;  %v952_v28 = vld [vmem:[%s1196_s0 + $0x20] ss:$12 sps:$4 sm:$0xff]   ;;  %v959_v29 = vld [vmem:[%s1196_s0 + $0x38] ss:$12 sps:$4 sm:$0xff]  }
   0xb   :  { %817 = vmatpush3.bf16.msra.mxu0 %v931_v7  ;;  %908 = vmatprep.mubr.bf16.mxu1 %v951_v24  ;;  %v955_v30 = vld [vmem:[%s1196_s0 + $0x18] ss:$12 sps:$4 sm:$0xff]   ;;  %v956_v31 = vld [vmem:[%s1196_s0 + $0x34] ss:$12 sps:$4 sm:$0xff]   ;;  %v960_v32 = vld [vmem:[%s1196_s0 + $0x50] ss:$12 sps:$4 sm:$0xff]  }
   0xc   :  { %818 = vmatprep.subr.bf16.mxu0 %v932_v8  ;;  %v967_v33 = vld [vmem:[%s1196_s0 + $0x68] ss:$12 sps:$4 sm:$0xff]   ;;  %v958_v34 = vld [vmem:[%s1196_s0 + $0x30] ss:$12 sps:$4 sm:$0xff]   ;;  %v961_v35 = vld [vmem:[%s1196_s0 + $0x4c] ss:$12 sps:$4 sm:$0xff]  }
   0xd   :  { %897 = vmatpush3.bf16.msra.mxu1 %v933_v9  ;;  %v968_v36 = vld [vmem:[%s1196_s0 + $0x80] ss:$12 sps:$4 sm:$0xff]   ;;  %v975_v37 = vld [vmem:[%s1196_s0 + $0x98] ss:$12 sps:$4 sm:$0xff]   ;;  %v963_v38 = vld [vmem:[%s1196_s0 + $0x48] ss:$12 sps:$4 sm:$0xff]  }
   0xe   :  { %898 = vmatprep.subr.bf16.mxu1 %v936_v12  ;;  %v964_v39 = vld [vmem:[%s1196_s0 + $0x64] ss:$12 sps:$4 sm:$0xff]   ;;  %v966_v41 = vld [vmem:[%s1196_s0 + $0x60] ss:$12 sps:$4 sm:$0xff]   ;;  %v969_v42 = vld [vmem:[%s1196_s0 + $0x7c] ss:$12 sps:$4 sm:$0xff]  }
   0xf   :  { %819 = vmatpush3.bf16.msra.mxu0 %v934_v10  ;;  %v976_v40 = vld [vmem:[%s1196_s0 + $0xb0] ss:$12 sps:$4 sm:$0xff]   ;;  %v971_v43 = vld [vmem:[%s1196_s0 + $0x78] ss:$12 sps:$4 sm:$0xff]   ;;  %v972_v44 = vld [vmem:[%s1196_s0 + $0x94] ss:$12 sps:$4 sm:$0xff]  }
  0x10   :  { %820 = vmatprep.subr.bf16.mxu0 %v935_v11  ;;  %v974_v45 = vld [vmem:[%s1196_s0 + $0x90] ss:$12 sps:$4 sm:$0xff]   ;;  %v977_v46 = vld [vmem:[%s1196_s0 + $0xac] ss:$12 sps:$4 sm:$0xff]   ;;  %v979_v47 = vld [vmem:[%s1196_s0 + $0xa8] ss:$12 sps:$4 sm:$0xff]  }
  0x11   :  { %899 = vmatpush3.bf16.msra.mxu1 %v936_v12  ;;  %v1147_v50 = vld [vmem:[%s1197_s2] ss:$0 sm:$0xff] }
  0x12   :  { %900 = vmatprep.subr.bf16.mxu1 %v939_v14 }
  0x13   :  { %821 = vmatpush3.bf16.msra.mxu0 %v937_v13 }
  0x14   :  { %822 = vmatprep.subr.bf16.mxu0 %v938_v15 }
  0x15   :  { %901 = vmatpush3.bf16.msra.mxu1 %v939_v14 }
  0x16   :  { %902 = vmatprep.subr.bf16.mxu1 %v942_v17 }
  0x17   :  { %823 = vmatpush3.bf16.msra.mxu0 %v940_v16 }
  0x18   :  { %824 = vmatprep.subr.bf16.mxu0 %v941_v18 }
  0x19   :  { %903 = vmatpush3.bf16.msra.mxu1 %v942_v17 }
  0x1a   :  { %904 = vmatprep.subr.bf16.mxu1 %v945_v21 }
  0x1b   :  { %825 = vmatpush3.bf16.msra.mxu0 %v943_v19 }
  0x1c   :  { %826 = vmatprep.subr.bf16.mxu0 %v944_v20 }
  0x1d   :  { %905 = vmatpush3.bf16.msra.mxu1 %v945_v21 }
  0x1e   :  { %906 = vmatprep.subr.bf16.mxu1 %v950_v25 }
  0x1f   :  { %827 = vmatpush3.bf16.msra.mxu0 %v946_v23 }
  0x21   :  { %907 = vmatpush3.bf16.msra.mxu1 %v950_v25 }
  0x22   :  { %407 = vmatmul.mubr.bf16.vlgmr.msra.gmra.mrb[0].mxu0 %v947_v26 }
  0x23   :  { %414 = vmatprep.mubr.bf16.mxu0 %v953_v27 }
  0x24   :  { %909 = vmatmul.mubr.bf16.vlgmr.msra.gmra.mrb[0].mxu1 %v952_v28 }
  0x25   :  { %912 = vmatprep.mubr.bf16.mxu1 %v959_v29 }
  0x2a   :  { %415 = vmatmul.mubr.bf16.gmra.mrb[4].mxu0 %v955_v30 }
  0x2b   :  { %422 = vmatprep.mubr.bf16.mxu0 %v956_v31 }
  0x2c   :  { %913 = vmatmul.mubr.bf16.gmra.mrb[4].mxu1 %v960_v32 }
  0x2d   :  { %916 = vmatprep.mubr.bf16.mxu1 %v967_v33 }
  0x32   :  { %423 = vmatmul.mubr.bf16.gmra.mrb[8].mxu0 %v958_v34 }
  0x33   :  { %430 = vmatprep.mubr.bf16.mxu0 %v961_v35 }
  0x34   :  { %917 = vmatmul.mubr.bf16.gmra.mrb[8].mxu1 %v968_v36 }
  0x35   :  { %920 = vmatprep.mubr.bf16.mxu1 %v975_v37 }
  0x3a   :  { %431 = vmatmul.mubr.bf16.gmra.mrb[12].mxu0 %v963_v38 }
  0x3b   :  { %438 = vmatprep.mubr.bf16.mxu0 %v964_v39 }
  0x3c   :  { %921 = vmatmul.mubr.bf16.gmra.mrb[12].mxu1 %v976_v40 }
  0x42   :  { %439 = vmatmul.mubr.bf16.gmra.mrb[16].mxu0 %v966_v41 }
  0x43   :  { %446 = vmatprep.mubr.bf16.mxu0 %v969_v42 }
  0x4a   :  { %447 = vmatmul.mubr.bf16.gmra.mrb[20].mxu0 %v971_v43 }
  0x4b   :  { %454 = vmatprep.mubr.bf16.mxu0 %v972_v44 }
  0x52   :  { %455 = vmatmul.mubr.bf16.gmra.mrb[24].mxu0 %v974_v45 }
  0x53   :  { %462 = vmatprep.mubr.bf16.mxu0 %v977_v46 }
  0x5a   :  { %463 = vmatmul.mubr.bf16.gmra.mrb[28].mxu0 %v979_v47 }
  0xf5   :  { %v828_v48 = vpop.f32.mrb[0].mxu0 }
  0xf6   :  { %v829_v49 = vpop.f32.mrb[1].mxu0 }
  0xf7   :  { %v830_v51 = vadd.f32 %v829_v49, %v828_v48  ;;  %v831_v52 = vpop.f32.mrb[2].mxu0  ;;  %v910_v54 = vpop.f32.mrb[0].mxu1 }
  0xf8   :  { %v832_v53 = vpop.f32.mrb[3].mxu0  ;;  %v505_v57 = vpop.f32.mrb[1].mxu1 }
  0xf9   :  { %v833_v55 = vadd.f32 %v832_v53, %v831_v52  ;;  %v409_v56 = vadd.f32 %v830_v51, %v1147_v50  ;;  %v911_v58 = vpop.f32.mrb[2].mxu1 }
  0xfa   :  { %v508_v61 = vpop.f32.mrb[3].mxu1 }
  0xfb   :  { %v506_v59 = vadd.f32 %v505_v57, %v409_v56  ;;  %v412_v60 = vadd.f32 %v833_v55, %v1147_v50 }
  0xfd   :  { %v568_v62 = vmul.f32 0.01, %v506_v59  ;;  %v509_v63 = vadd.f32 %v508_v61, %v412_v60  ;;  %v834_v0 = vpop.f32.mrb[4].mxu0 }
  0xfe   :  { %v835_v1 = vpop.f32.mrb[5].mxu0 }
  0xff   :  { %v569_v2 = vmul.f32 0.01, %v509_v63  ;;  %v836_v3 = vadd.f32 %v835_v1, %v834_v0  ;;  %v837_v4 = vpop.f32.mrb[6].mxu0  ;;  %v914_v6 = vpop.f32.mrb[4].mxu1  ;;  %v584_v7 = vmax.f32 %v506_v59, %v568_v62 }
 0x100   :  { %v838_v5 = vpop.f32.mrb[7].mxu0  ;;  %v521_v11 = vpop.f32.mrb[5].mxu1 }
 0x101   :  { %v585_v8 = vmax.f32 %v509_v63, %v569_v2  ;;  %v417_v9 = vadd.f32 %v836_v3, %v1147_v50  ;;  %v839_v10 = vadd.f32 %v838_v5, %v837_v4  ;;  %v915_v12 = vpop.f32.mrb[6].mxu1 }
 0x102   :  { %v524_v16 = vpop.f32.mrb[7].mxu1 }
 0x103   :  { %v768_v13 = vpack.c.bf16 %v585_v8, %v584_v7  ;;  %v514_v14 = vadd.f32 %v910_v54, %v417_v9  ;;  %v420_v15 = vadd.f32 %v839_v10, %v1147_v50 }
 0x105   :  { %769 = vst [vmem:[%s1198_s3] sm:$0xff] %v768_v13   ;;  %v570_v17 = vmul.f32 0.01, %v514_v14  ;;  %v517_v18 = vadd.f32 %v911_v58, %v420_v15  ;;  %v840_v19 = vpop.f32.mrb[8].mxu0 }
 0x106   :  { %v841_v20 = vpop.f32.mrb[9].mxu0 }
 0x107   :  { %v571_v21 = vmul.f32 0.01, %v517_v18  ;;  %v842_v22 = vadd.f32 %v841_v20, %v840_v19  ;;  %v843_v23 = vpop.f32.mrb[10].mxu0  ;;  %v918_v25 = vpop.f32.mrb[8].mxu1  ;;  %v586_v26 = vmax.f32 %v514_v14, %v570_v17 }
 0x108   :  { %v844_v24 = vpop.f32.mrb[11].mxu0  ;;  %v537_v30 = vpop.f32.mrb[9].mxu1 }
 0x109   :  { %v587_v27 = vmax.f32 %v517_v18, %v571_v21  ;;  %v845_v28 = vadd.f32 %v844_v24, %v843_v23  ;;  %v425_v29 = vadd.f32 %v842_v22, %v1147_v50  ;;  %v919_v31 = vpop.f32.mrb[10].mxu1 }
 0x10a   :  { %v540_v35 = vpop.f32.mrb[11].mxu1 }
 0x10b   :  { %v773_v32 = vpack.c.bf16 %v587_v27, %v586_v26  ;;  %v522_v33 = vadd.f32 %v521_v11, %v425_v29  ;;  %v428_v34 = vadd.f32 %v845_v28, %v1147_v50 }
 0x10d   :  { %805 = vst [vmem:[%s1198_s3 + $0x8] sm:$0xff] %v773_v32   ;;  %v572_v36 = vmul.f32 0.01, %v522_v33  ;;  %v525_v37 = vadd.f32 %v524_v16, %v428_v34  ;;  %v846_v38 = vpop.f32.mrb[12].mxu0 }
 0x10e   :  { %v847_v39 = vpop.f32.mrb[13].mxu0 }
 0x10f   :  { %v573_v40 = vmul.f32 0.01, %v525_v37  ;;  %v848_v41 = vadd.f32 %v847_v39, %v846_v38  ;;  %v849_v42 = vpop.f32.mrb[14].mxu0  ;;  %v1161_v44 = vpop.f32.mrb[12].mxu1  ;;  %v588_v45 = vmax.f32 %v522_v33, %v572_v36 }
 0x110   :  { %v850_v43 = vpop.f32.mrb[15].mxu0  ;;  %v553_v49 = vpop.f32.mrb[13].mxu1 }
 0x111   :  { %v589_v46 = vmax.f32 %v525_v37, %v573_v40  ;;  %v433_v47 = vadd.f32 %v848_v41, %v1147_v50  ;;  %v851_v48 = vadd.f32 %v850_v43, %v849_v42  ;;  %v1164_v51 = vpop.f32.mrb[14].mxu1 }
 0x112   :  { %v556_v55 = vpop.f32.mrb[15].mxu1 }
 0x113   :  { %v778_v52 = vpack.c.bf16 %v589_v46, %v588_v45  ;;  %v530_v53 = vadd.f32 %v914_v6, %v433_v47  ;;  %v436_v54 = vadd.f32 %v851_v48, %v1147_v50 }
 0x115   :  { %806 = vst [vmem:[%s1198_s3 + $0x10] sm:$0xff] %v778_v52   ;;  %v574_v56 = vmul.f32 0.01, %v530_v53  ;;  %v533_v57 = vadd.f32 %v915_v12, %v436_v54  ;;  %v852_v58 = vpop.f32.mrb[16].mxu0 }
 0x116   :  { %v853_v59 = vpop.f32.mrb[17].mxu0 }
 0x117   :  { %v575_v60 = vmul.f32 0.01, %v533_v57  ;;  %v854_v61 = vadd.f32 %v853_v59, %v852_v58  ;;  %v855_v62 = vpop.f32.mrb[18].mxu0  ;;  %v590_v0 = vmax.f32 %v530_v53, %v574_v56 }
 0x118   :  { %v856_v63 = vpop.f32.mrb[19].mxu0 }
 0x119   :  { %v591_v1 = vmax.f32 %v533_v57, %v575_v60  ;;  %v857_v2 = vadd.f32 %v856_v63, %v855_v62  ;;  %v441_v3 = vadd.f32 %v854_v61, %v1147_v50 }
 0x11b   :  { %v783_v4 = vpack.c.bf16 %v591_v1, %v590_v0  ;;  %v538_v5 = vadd.f32 %v537_v30, %v441_v3  ;;  %v444_v6 = vadd.f32 %v857_v2, %v1147_v50 }
 0x11d   :  { %807 = vst [vmem:[%s1198_s3 + $0x18] sm:$0xff] %v783_v4   ;;  %v576_v7 = vmul.f32 0.01, %v538_v5  ;;  %v541_v8 = vadd.f32 %v540_v35, %v444_v6  ;;  %v858_v9 = vpop.f32.mrb[20].mxu0 }
 0x11e   :  { %v859_v10 = vpop.f32.mrb[21].mxu0 }
 0x11f   :  { %v577_v11 = vmul.f32 0.01, %v541_v8  ;;  %v860_v12 = vadd.f32 %v859_v10, %v858_v9  ;;  %v861_v13 = vpop.f32.mrb[22].mxu0  ;;  %v592_v15 = vmax.f32 %v538_v5, %v576_v7 }
 0x120   :  { %v862_v14 = vpop.f32.mrb[23].mxu0 }
 0x121   :  { %v593_v16 = vmax.f32 %v541_v8, %v577_v11  ;;  %v449_v17 = vadd.f32 %v860_v12, %v1147_v50  ;;  %v863_v18 = vadd.f32 %v862_v14, %v861_v13 }
 0x123   :  { %v788_v19 = vpack.c.bf16 %v593_v16, %v592_v15  ;;  %v546_v20 = vadd.f32 %v918_v25, %v449_v17  ;;  %v452_v21 = vadd.f32 %v863_v18, %v1147_v50 }
 0x125   :  { %808 = vst [vmem:[%s1198_s3 + $0x20] sm:$0xff] %v788_v19   ;;  %v578_v22 = vmul.f32 0.01, %v546_v20  ;;  %v549_v23 = vadd.f32 %v919_v31, %v452_v21  ;;  %v864_v24 = vpop.f32.mrb[24].mxu0 }
 0x126   :  { %v865_v26 = vpop.f32.mrb[25].mxu0 }
 0x127   :  { %v579_v27 = vmul.f32 0.01, %v549_v23  ;;  %v866_v28 = vadd.f32 %v865_v26, %v864_v24  ;;  %v867_v29 = vpop.f32.mrb[26].mxu0  ;;  %v594_v32 = vmax.f32 %v546_v20, %v578_v22 }
 0x128   :  { %v868_v30 = vpop.f32.mrb[27].mxu0 }
 0x129   :  { %v595_v33 = vmax.f32 %v549_v23, %v579_v27  ;;  %v869_v34 = vadd.f32 %v868_v30, %v867_v29  ;;  %v457_v35 = vadd.f32 %v866_v28, %v1147_v50 }
 0x12b   :  { %v793_v25 = vpack.c.bf16 %v595_v33, %v594_v32  ;;  %v554_v36 = vadd.f32 %v553_v49, %v457_v35  ;;  %v460_v37 = vadd.f32 %v869_v34, %v1147_v50 }
 0x12d   :  { %809 = vst [vmem:[%s1198_s3 + $0x28] sm:$0xff] %v793_v25   ;;  %v580_v31 = vmul.f32 0.01, %v554_v36  ;;  %v557_v38 = vadd.f32 %v556_v55, %v460_v37  ;;  %v870_v39 = vpop.f32.mrb[28].mxu0 }
 0x12e   :  { %v871_v40 = vpop.f32.mrb[29].mxu0 }
 0x12f   :  { %v581_v41 = vmul.f32 0.01, %v557_v38  ;;  %v872_v42 = vadd.f32 %v871_v40, %v870_v39  ;;  %v873_v43 = vpop.f32.mrb[30].mxu0  ;;  %v596_v46 = vmax.f32 %v554_v36, %v580_v31 }
 0x130   :  { %v874_v45 = vpop.f32.mrb[31].mxu0 }
 0x131   :  { %v597_v47 = vmax.f32 %v557_v38, %v581_v41  ;;  %v465_v48 = vadd.f32 %v872_v42, %v1147_v50  ;;  %v875_v52 = vadd.f32 %v874_v45, %v873_v43 }
 0x133   :  { %v798_v49 = vpack.c.bf16 %v597_v47, %v596_v46  ;;  %v562_v53 = vadd.f32 %v1161_v44, %v465_v48  ;;  %v468_v54 = vadd.f32 %v875_v52, %v1147_v50 }
 0x135   :  { %810 = vst [vmem:[%s1198_s3 + $0x30] sm:$0xff] %v798_v49   ;;  %v582_v55 = vmul.f32 0.01, %v562_v53  ;;  %v565_v56 = vadd.f32 %v1164_v51, %v468_v54 }
 0x137   :  { %v583_v57 = vmul.f32 0.01, %v565_v56  ;;  %v598_v58 = vmax.f32 %v562_v53, %v582_v55 }
 0x139   :  { %v599_v59 = vmax.f32 %v565_v56, %v583_v57 }
 0x13b   :  { %v803_v60 = vpack.c.bf16 %v599_v59, %v598_v58 }
 0x13d   :  { %811 = vst [vmem:[%s1198_s3 + $0x38] sm:$0xff] %v803_v60  }

// kernel: encoder_decoder_forward.9
= control target key start
LH: loop header
LB: loop body
LE: loop exit
PB: predicated region body
PF: predicated region fallthrough
CT: control target
= control target key end

     0   :  { %s945_s1 = inlined_call_operand.vmem [shape: bf16[640,128], index: 1, kind: input, shape index: {}]   ;;  %s946_s0 = inlined_call_operand.vmem [shape: bf16[32,640], index: 0, kind: input, shape index: {}]   ;;  %s947_s2 = inlined_call_operand.vmem [shape: f32[1,128], index: 2, kind: input, shape index: {}]   ;;  %s948_s3 = inlined_call_operand.vmem [shape: f32[32,128], index: 3, kind: output, shape index: {}]  }
   0x1   :  { %v706_v0 = vld [vmem:[%s945_s1 + $0x40] sm:$0xff]   ;;  %v710_v4 = vld [vmem:[%s945_s1 + $0x48] sm:$0xff]   ;;  %v714_v8 = vld [vmem:[%s945_s1 + $0x50] sm:$0xff]  }
   0x2   :  { %v707_v1 = vld [vmem:[%s945_s1] sm:$0xff]   ;;  %620 = vmatprep.subr.bf16.mxu0 %v706_v0  ;;  %v711_v5 = vld [vmem:[%s945_s1 + $0x8] sm:$0xff]   ;;  %v715_v9 = vld [vmem:[%s945_s1 + $0x10] sm:$0xff]  }
   0x3   :  { %v708_v2 = vld [vmem:[%s945_s1 + $0xc0] sm:$0xff]   ;;  %621 = vmatpush3.bf16.msra.mxu0 %v707_v1  ;;  %v712_v6 = vld [vmem:[%s945_s1 + $0xc8] sm:$0xff]   ;;  %v716_v10 = vld [vmem:[%s945_s1 + $0xd0] sm:$0xff]  }
   0x4   :  { %v709_v3 = vld [vmem:[%s945_s1 + $0x80] sm:$0xff]   ;;  %648 = vmatprep.subr.bf16.mxu1 %v708_v2  ;;  %622 = vmatprep.subr.bf16.mxu0 %v710_v4  ;;  %v713_v7 = vld [vmem:[%s945_s1 + $0x88] sm:$0xff]   ;;  %v717_v11 = vld [vmem:[%s945_s1 + $0x90] sm:$0xff]  }
   0x5   :  { %649 = vmatpush3.bf16.msra.mxu1 %v709_v3  ;;  %v718_v12 = vld [vmem:[%s945_s1 + $0x58] sm:$0xff]   ;;  %v722_v16 = vld [vmem:[%s945_s1 + $0x60] sm:$0xff]   ;;  %v726_v20 = vld [vmem:[%s945_s1 + $0x68] sm:$0xff]  }
   0x6   :  { %650 = vmatprep.subr.bf16.mxu1 %v712_v6  ;;  %v719_v13 = vld [vmem:[%s945_s1 + $0x18] sm:$0xff]   ;;  %v723_v17 = vld [vmem:[%s945_s1 + $0x20] sm:$0xff]   ;;  %v727_v21 = vld [vmem:[%s945_s1 + $0x28] sm:$0xff]  }
   0x7   :  { %623 = vmatpush3.bf16.msra.mxu0 %v711_v5  ;;  %v720_v14 = vld [vmem:[%s945_s1 + $0xd8] sm:$0xff]   ;;  %v724_v18 = vld [vmem:[%s945_s1 + $0xe0] sm:$0xff]   ;;  %v728_v22 = vld [vmem:[%s945_s1 + $0xe8] sm:$0xff]  }
   0x8   :  { %624 = vmatprep.subr.bf16.mxu0 %v714_v8  ;;  %v721_v15 = vld [vmem:[%s945_s1 + $0x98] sm:$0xff]   ;;  %v725_v19 = vld [vmem:[%s945_s1 + $0xa0] sm:$0xff]   ;;  %v729_v23 = vld [vmem:[%s945_s1 + $0xa8] sm:$0xff]  }
   0x9   :  { %651 = vmatpush3.bf16.msra.mxu1 %v713_v7  ;;  %v730_v24 = vld [vmem:[%s945_s1 + $0x70] sm:$0xff]   ;;  %v734_v28 = vld [vmem:[%s945_s1 + $0x78] sm:$0xff]   ;;  %v741_v34 = vld [vmem:[%s945_s1 + $0x100] sm:$0xff]  }
   0xa   :  { %652 = vmatprep.subr.bf16.mxu1 %v716_v10  ;;  %v731_v25 = vld [vmem:[%s945_s1 + $0x30] sm:$0xff]   ;;  %v735_v29 = vld [vmem:[%s945_s1 + $0x38] sm:$0xff]   ;;  %v744_v36 = vld [vmem:[%s946_s0 + $0xc] ss:$20 sps:$4 sm:$0xff]  }
   0xb   :  { %625 = vmatpush3.bf16.msra.mxu0 %v715_v9  ;;  %v732_v26 = vld [vmem:[%s945_s1 + $0xf0] sm:$0xff]   ;;  %v736_v30 = vld [vmem:[%s945_s1 + $0xf8] sm:$0xff]   ;;  %v745_v37 = vld [vmem:[%s945_s1 + $0x108] sm:$0xff]   ;;  %487 = vmatprep.mubr.bf16.mxu1 %v744_v36 }
   0xc   :  { %626 = vmatprep.subr.bf16.mxu0 %v718_v12  ;;  %v733_v27 = vld [vmem:[%s945_s1 + $0xb0] sm:$0xff]   ;;  %v739_v32 = vld [vmem:[%s946_s0 + $0x4] ss:$20 sps:$4 sm:$0xff]   ;;  %v742_v35 = vld [vmem:[%s946_s0 + $0x8] ss:$20 sps:$4 sm:$0xff]  }
   0xd   :  { %653 = vmatpush3.bf16.msra.mxu1 %v717_v11  ;;  %v737_v31 = vld [vmem:[%s946_s0] ss:$20 sps:$4 sm:$0xff]   ;;  %v740_v33 = vld [vmem:[%s945_s1 + $0xb8] sm:$0xff]   ;;  %438 = vmatprep.mubr.bf16.mxu0 %v739_v32  ;;  %v755_v43 = vld [vmem:[%s946_s0 + $0x30] ss:$20 sps:$4 sm:$0xff]  }
   0xe   :  { %654 = vmatprep.subr.bf16.mxu1 %v720_v14  ;;  %v746_v38 = vld [vmem:[%s945_s1 + $0x110] sm:$0xff]   ;;  %v749_v39 = vld [vmem:[%s946_s0 + $0x2c] ss:$20 sps:$4 sm:$0xff]   ;;  %v747_v40 = vld [vmem:[%s945_s1 + $0x118] sm:$0xff]  }
   0xf   :  { %627 = vmatpush3.bf16.msra.mxu0 %v719_v13  ;;  %v752_v41 = vld [vmem:[%s946_s0 + $0x28] ss:$20 sps:$4 sm:$0xff]   ;;  %v748_v44 = vld [vmem:[%s945_s1 + $0x120] sm:$0xff]   ;;  %v756_v47 = vld [vmem:[%s945_s1 + $0x130] sm:$0xff]  }
  0x10   :  { %628 = vmatprep.subr.bf16.mxu0 %v722_v16  ;;  %v753_v42 = vld [vmem:[%s946_s0 + $0x34] ss:$20 sps:$4 sm:$0xff]   ;;  %v758_v45 = vld [vmem:[%s946_s0 + $0x10] ss:$20 sps:$4 sm:$0xff]   ;;  %v757_v48 = vld [vmem:[%s945_s1 + $0x138] sm:$0xff]  }
  0x11   :  { %655 = vmatpush3.bf16.msra.mxu1 %v721_v15  ;;  %v751_v46 = vld [vmem:[%s945_s1 + $0x128] sm:$0xff]   ;;  %v569_v51 = vld [vmem:[%s947_s2] ss:$0 sm:$0xff] }
  0x12   :  { %656 = vmatprep.subr.bf16.mxu1 %v724_v18  ;;  %v759_v49 = vld [vmem:[%s946_s0 + $0x38] ss:$20 sps:$4 sm:$0xff]  }
  0x13   :  { %629 = vmatpush3.bf16.msra.mxu0 %v723_v17 }
  0x14   :  { %630 = vmatprep.subr.bf16.mxu0 %v726_v20 }
  0x15   :  { %657 = vmatpush3.bf16.msra.mxu1 %v725_v19 }
  0x16   :  { %658 = vmatprep.subr.bf16.mxu1 %v728_v22 }
  0x17   :  { %631 = vmatpush3.bf16.msra.mxu0 %v727_v21 }
  0x18   :  { %632 = vmatprep.subr.bf16.mxu0 %v730_v24 }
  0x19   :  { %659 = vmatpush3.bf16.msra.mxu1 %v729_v23 }
  0x1a   :  { %660 = vmatprep.subr.bf16.mxu1 %v732_v26 }
  0x1b   :  { %633 = vmatpush3.bf16.msra.mxu0 %v731_v25 }
  0x1c   :  { %634 = vmatprep.subr.bf16.mxu0 %v734_v28 }
  0x1d   :  { %661 = vmatpush3.bf16.msra.mxu1 %v733_v27 }
  0x1e   :  { %662 = vmatprep.subr.bf16.mxu1 %v736_v30 }
  0x1f   :  { %635 = vmatpush3.bf16.msra.mxu0 %v735_v29 }
  0x20   :  { %686 = vmatprep.subr.bf16.mxu0 %v741_v34 }
  0x21   :  { %663 = vmatpush3.bf16.msra.mxu1 %v740_v33 }
  0x22   :  { %439 = vmatmul.mubr.bf16.vlgmr.msra.gmra.mrb[0].mxu0 %v737_v31 }
  0x23   :  { %687 = vmatpush3.bf16.msra.mxu0 %v741_v34  ;;  %446 = vmatprep.mubr.bf16.mxu0 %v749_v39 }
  0x24   :  { %488 = vmatmul.mubr.bf16.vlgmr.msra.gmra.mrb[0].mxu1 %v742_v35  ;;  %688 = vmatprep.subr.bf16.mxu0 %v745_v37 }
  0x25   :  { %495 = vmatprep.mubr.bf16.mxu1 %v753_v42 }
  0x27   :  { %689 = vmatpush3.bf16.msra.mxu0 %v745_v37 }
  0x28   :  { %690 = vmatprep.subr.bf16.mxu0 %v746_v38 }
  0x2a   :  { %447 = vmatmul.mubr.bf16.gmra.mrb[4].mxu0 %v752_v41 }
  0x2b   :  { %691 = vmatpush3.bf16.msra.mxu0 %v746_v38  ;;  %702 = vmatprep.mubr.bf16.mxu0 %v758_v45 }
  0x2c   :  { %692 = vmatprep.subr.bf16.mxu0 %v747_v40  ;;  %496 = vmatmul.mubr.bf16.gmra.mrb[4].mxu1 %v755_v43 }
  0x2f   :  { %693 = vmatpush3.bf16.msra.mxu0 %v747_v40 }
  0x30   :  { %694 = vmatprep.subr.bf16.mxu0 %v748_v44 }
  0x33   :  { %695 = vmatpush3.bf16.msra.mxu0 %v748_v44 }
  0x34   :  { %696 = vmatprep.subr.bf16.mxu0 %v751_v46 }
  0x37   :  { %697 = vmatpush3.bf16.msra.mxu0 %v751_v46 }
  0x38   :  { %698 = vmatprep.subr.bf16.mxu0 %v756_v47 }
  0x3b   :  { %699 = vmatpush3.bf16.msra.mxu0 %v756_v47 }
  0x3c   :  { %700 = vmatprep.subr.bf16.mxu0 %v757_v48 }
  0x3f   :  { %701 = vmatpush3.bf16.msra.mxu0 %v757_v48 }
  0x42   :  { %703 = vmatmul.mubr.bf16.vlgmr.msra.gmra.mrb[8].mxu0 %v759_v49 }
  0xf5   :  { %v636_v50 = vpop.f32.mrb[0].mxu0 }
  0xf6   :  { %v637_v52 = vpop.f32.mrb[1].mxu0 }
  0xf7   :  { %v638_v53 = vadd.f32 %v637_v52, %v636_v50  ;;  %v639_v54 = vpop.f32.mrb[2].mxu0  ;;  %v664_v55 = vpop.f32.mrb[0].mxu1 }
  0xf8   :  { %v640_v56 = vpop.f32.mrb[3].mxu0  ;;  %v665_v59 = vpop.f32.mrb[1].mxu1 }
  0xf9   :  { %v441_v57 = vadd.f32 %v638_v53, %v569_v51  ;;  %v641_v58 = vadd.f32 %v640_v56, %v639_v54  ;;  %v666_v60 = vadd.f32 %v665_v59, %v664_v55  ;;  %v667_v61 = vpop.f32.mrb[2].mxu1 }
  0xfa   :  { %v668_v63 = vpop.f32.mrb[3].mxu1 }
  0xfb   :  { %v444_v62 = vadd.f32 %v641_v58, %v569_v51  ;;  %v669_v0 = vadd.f32 %v668_v63, %v667_v61  ;;  %v490_v1 = vadd.f32 %v666_v60, %v441_v57 }
  0xfd   :  { %v642_v2 = vpop.f32.mrb[4].mxu0  ;;  %v493_v4 = vadd.f32 %v669_v0, %v444_v62 }
  0xfe   :  { %v643_v3 = vpop.f32.mrb[5].mxu0 }
  0xff   :  { %v644_v5 = vadd.f32 %v643_v3, %v642_v2  ;;  %v645_v6 = vpop.f32.mrb[6].mxu0  ;;  %v670_v7 = vpop.f32.mrb[4].mxu1 }
 0x100   :  { %v646_v8 = vpop.f32.mrb[7].mxu0  ;;  %v671_v11 = vpop.f32.mrb[5].mxu1 }
 0x101   :  { %v449_v9 = vadd.f32 %v644_v5, %v569_v51  ;;  %v647_v10 = vadd.f32 %v646_v8, %v645_v6  ;;  %v672_v12 = vadd.f32 %v671_v11, %v670_v7  ;;  %v673_v13 = vpop.f32.mrb[6].mxu1 }
 0x102   :  { %v674_v15 = vpop.f32.mrb[7].mxu1 }
 0x103   :  { %v452_v14 = vadd.f32 %v647_v10, %v569_v51  ;;  %v675_v16 = vadd.f32 %v674_v15, %v673_v13  ;;  %v498_v17 = vadd.f32 %v672_v12, %v449_v9 }
 0x105   :  { %v501_v18 = vadd.f32 %v675_v16, %v452_v14 }
 0x115   :  { %v704_v19 = vpop.f32.mrb[8].mxu0 }
 0x116   :  { %v547_v20 = vadd.f32 %v704_v19, %v498_v17  ;;  %v538_v21 = vpop.f32.mrb[9].mxu0 }
 0x117   :  { %v539_v22 = vadd.f32 %v538_v21, %v490_v1  ;;  %v705_v23 = vpop.f32.mrb[10].mxu0 }
 0x118   :  { %v555_v24 = vmul.f32 0.01, %v547_v20  ;;  %v550_v25 = vadd.f32 %v705_v23, %v501_v18  ;;  %v541_v26 = vpop.f32.mrb[11].mxu0 }
 0x119   :  { %v553_v27 = vmul.f32 0.01, %v539_v22  ;;  %v542_v28 = vadd.f32 %v541_v26, %v493_v4 }
 0x11a   :  { %v559_v29 = vmax.f32 %v547_v20, %v555_v24  ;;  %v556_v30 = vmul.f32 0.01, %v550_v25 }
 0x11b   :  { %v557_v31 = vmax.f32 %v539_v22, %v553_v27  ;;  %v554_v32 = vmul.f32 0.01, %v542_v28 }
 0x11c   :  { %563 = vst [vmem:[%s948_s3 + $0x10] sm:$0xff] %v559_v29  ;;  %v560_v33 = vmax.f32 %v550_v25, %v556_v30 }
 0x11d   :  { %561 = vst [vmem:[%s948_s3] sm:$0xff] %v557_v31  ;;  %v558_v34 = vmax.f32 %v542_v28, %v554_v32 }
 0x11e   :  { %564 = vst [vmem:[%s948_s3 + $0x18] sm:$0xff] %v560_v33 }
 0x11f   :  { %562 = vst [vmem:[%s948_s3 + $0x8] sm:$0xff] %v558_v34 }

// kernel: tile.13
= control target key start
LH: loop header
LB: loop body
LE: loop exit
PB: predicated region body
PF: predicated region fallthrough
CT: control target
= control target key end

     0   :  { %s22_s0 = inlined_call_operand.vmem [shape: f32[64], index: 0, kind: input, shape index: {}]   ;;  %s23_s1 = inlined_call_operand.vmem [shape: f32[4,64], index: 1, kind: output, shape index: {}]  }
   0x1   :  { %v4_v0 = vld [vmem:[%s22_s0] ss:$0 sm:$0xff] }
   0x2   :  { %5 = vst [vmem:[%s23_s1] sm:$0xf] %v4_v0 }

// kernel: tile.14
= control target key start
LH: loop header
LB: loop body
LE: loop exit
PB: predicated region body
PF: predicated region fallthrough
CT: control target
= control target key end

     0   :  { %s6_s8 = smov 3  ;;  %vm8_vm0 = vcmask 523264   ;;  %s30_s9 = smov 64   ;;  %vm15_vm1 = vcmask 1048064   ;;  %s50_s0 = inlined_call_operand.vmem [shape: f32[4,64], index: 0, kind: input, shape index: {}]   ;;  %s51_s1 = inlined_call_operand.vmem [shape: f32[1,256], index: 1, kind: output, shape index: {}]  }
   0x1   :  { %v4_v0 = vld [vmem:[%s50_s0] sm:$0xf]  ;;  %s11_s0 = smov 3 }
   0x2   :  { %5 = vst [vmem:[#allocation1] sm:$0xf] %v4_v0 }
   0x9   :  { %v12_v1 = vld [vmem:[#allocation1 + $0x1] ss:$2 sm:%s11_s0]   ;;  %v7_v2 = vld [vmem:[#allocation1] ss:$2 sm:%s6_s8]  }
   0xa   :  { %13 = vrot.lane.b32.xlu0 %v12_v1, %s30_s9  ;;  %9 = vst.msk [vmem:[#allocation0] ss:$8 sm:$0x3] %vm8_vm0, %v7_v2  }
  0x7c   :  { %v14_v3 = vpop.permute.xlu0 %13  }
  0x7d   :  { %16 = vst.msk [vmem:[#allocation0] ss:$8 sm:$0x3] %vm15_vm1, %v14_v3  }
  0x84   :  { %v20_v4 = vld [vmem:[#allocation0] sm:$0x1]  ;;  %v24_v5 = vld [vmem:[#allocation0 + $0x8] sm:$0x1] }
  0x85   :  { %22 = vst [vmem:[%s51_s1] sm:$0x1] %v20_v4  ;;  %28 = vst [vmem:[%s51_s1 + $0x1] sm:$0x1] %v24_v5 }

// kernel: encoder_decoder_forward.10
= control target key start
LH: loop header
LB: loop body
LE: loop exit
PB: predicated region body
PF: predicated region fallthrough
CT: control target
= control target key end

     0   :  { %s3226_s15 = smov 0   ;;  %s3965_s0 = inlined_call_operand.vmem [shape: f32[2,40,128], index: 0, kind: input, shape index: {}]   ;;  %s3966_s1 = inlined_call_operand.vmem [shape: bf16[10,1152,128], index: 1, kind: input, shape index: {}]   ;;  %s3967_s2 = inlined_call_operand.vmem [shape: f32[10,1,128], index: 2, kind: input, shape index: {}]   ;;  %s3968_s3 = inlined_call_operand.vmem [shape: f32[40,1], index: 3, kind: input, shape index: {}]   ;;  %s3969_s4 = inlined_call_operand.vmem [shape: f32[2,40,128], index: 4, kind: output, shape index: {}]  }
   0x1 LB: > { %s2279_s16 = sadd.s32 4294967295, %s3172_s15   ;;  %p2283_p0 = scmp.ge.s32.totalorder %s3172_s15, 1  ;;  %s3172_s15 = sphi %s3226_s15, %s14_s15  }
   0x2   : > { %p162_p1 = scmp.lt.s32.totalorder %s3172_s15, 3 }
   0x4   : > { %p163_p2 = pnand %p2283_p0, %p162_p1 }
   0x5   : > { %v201_v0 = vld [vmem:[%s3968_s3 + $0x10] sm:$0xff] (!%p163_p2)  ;;  %v199_v1 = vld [vmem:[%s3968_s3] sm:$0xff] (!%p163_p2)  ;;  %v3198_v2 = vmov (!%p163_p2), 0   ;;  %p188_p3 = scmp.lt.s32.totalorder (!%p163_p2), %s2279_s16, 1  ;;  %v202_v3 = vld [vmem:[%s3968_s3 + $0x18] sm:$0xff] (!%p163_p2)  ;;  %s3277_s8 = smov (!%p163_p2), 0  }
   0x6   : > { %166 = sbr.rel (%p163_p2) target bundleno = 785 (0x311), region = 36  ;;  %2997 = vset.pattern.permute.xlu1 (!%p163_p2), %v3198_v2  ;;  %2996 = vset.pattern.permute.xlu0 (!%p163_p2), %v3198_v2  ;;  %v200_v4 = vld [vmem:[%s3968_s3 + $0x8] sm:$0xff] (!%p163_p2)  ;;  %v203_v5 = vld [vmem:[%s3968_s3 + $0x20] sm:$0xff] (!%p163_p2) }
   0x7   : > { %216 = vperm.xlu1 (!%p163_p2), %2997, %v201_v0   ;;  %206 = vperm.xlu0 (!%p163_p2), %2996, %v199_v1  }
   0xb   : > { %221 = vperm.xlu1 (!%p163_p2), %2997, %v202_v3   ;;  %211 = vperm.xlu0 (!%p163_p2), %2996, %v200_v4  }
   0xd   : > { %s3977_s16 = smov (!%p188_p3, %s2279_s16), 1 }
   0xe   : > { %s2936_s25 = smul.u32 40, %s3977_s16 }
   0xf   : > { %226 = vperm.xlu0 %2996, %v203_v5  }
  0x10   : > { %s192_s30 = scalar_lea.vmem %s3965_s0, %s2936_s25  ;;  %s3255_s7 = scalar_lea.vmem %s3969_s4, %s2936_s25 }
  0x11   : > { %v229_v6 = vld [vmem:[%s192_s30] sm:$0xff]   ;;  %v230_v7 = vld [vmem:[%s192_s30 + $0x8] sm:$0xff]   ;;  %v231_v8 = vld [vmem:[%s192_s30 + $0x10] sm:$0xff]  }
  0x12   : > { %v232_v9 = vld [vmem:[%s192_s30 + $0x18] sm:$0xff]   ;;  %v233_v10 = vld [vmem:[%s192_s30 + $0x20] sm:$0xff]  }
  0x86   : > { %v3257_v11 = vpop.permute.xlu1 %216  ;;  %v3259_v12 = vpop.permute.xlu0 %206 }
  0x8a   : > { %v3261_v13 = vpop.permute.xlu1 %221  ;;  %v3263_v14 = vpop.permute.xlu0 %211 }
  0x8e   : > { %v3265_v15 = vpop.permute.xlu0 %226 }
  0x8f LB: >> { %v251_v16 = vlaneseq  ;;  %s2585_s9 = smul.u32 1152, %s3196_s8  ;;  %v259_v18 = vrot.slane %v3192_v6, 2  ;;  %v260_v19 = vrot.slane %v3188_v7, 2  ;;  %v263_v20 = vrot.slane %v3176_v10, 2  ;;  %s2286_s13 = sshll.u32 %s3196_s8, 1  ;;  %s3196_s8 = sphi %s3277_s8, %s239_s8   ;;  %v3192_v6 = vphi %v229_v6, %v3975_v6   ;;  %v3188_v7 = vphi %v230_v7, %v3974_v7   ;;  %v3184_v8 = vphi %v231_v8, %v3973_v8   ;;  %v3180_v9 = vphi %v232_v9, %v3972_v9   ;;  %v3176_v10 = vphi %v233_v10, %v3971_v10  }
  0x90   : >> { %v281_v21 = vrot.slane %v3192_v6, 7  ;;  %v282_v25 = vrot.slane %v3188_v7, 7  ;;  %v285_v29 = vrot.slane %v3176_v10, 7  ;;  %v246_v46 = vrot.slane %v3192_v6, 1  ;;  %s3615_s17 = scalar_lea.vmem %s3967_s2, %s2286_s13  ;;  %s239_s8 = sadd.s32 1, %s3196_s8  }
  0x91   : >> { %v3298_v17 = vshrl.u32 %v251_v16, 7  ;;  %s3306_s12 = scalar_lea.vmem %s3966_s1, %s2585_s9  ;;  %v247_v48 = vrot.slane %v3188_v7, 1  ;;  %v250_v50 = vrot.slane %v3176_v10, 1  ;;  %v283_v53 = vrot.slane %v3184_v8, 7  ;;  %p236_p4 = scmp.ge.s32.totalorder %s239_s8, 5  }
  0x92   : >> { %v2998_v22 = vld [vmem:[%s3306_s12 + $0x40] sm:$0xff]   ;;  %v3002_v31 = vld [vmem:[%s3306_s12 + $0x48] sm:$0xff]   ;;  %v3006_v38 = vld [vmem:[%s3306_s12 + $0x50] sm:$0xff]   ;;  %v270_v55 = vrot.slane %v3192_v6, 3  ;;  %v271_v57 = vrot.slane %v3188_v7, 3  ;;  %v274_v59 = vrot.slane %v3176_v10, 3 }
  0x93   : >> { %vm264_vm0 = vcmp.lt.s32.totalorder %v3298_v17, 6  ;;  %v2999_v26 = vld [vmem:[%s3306_s12] sm:$0xff]   ;;  %2586 = vmatprep.subr.bf16.mxu0 %v2998_v22  ;;  %vm286_vm1 = vcmp.lt.s32.totalorder %v3298_v17, 1  ;;  %v3003_v34 = vld [vmem:[%s3306_s12 + $0x8] sm:$0xff]   ;;  %v3007_v39 = vld [vmem:[%s3306_s12 + $0x10] sm:$0xff]   ;;  %vm253_vm2 = vcmp.lt.s32.totalorder %v3298_v17, 7 }
  0x94   : >> { %v268_v23 = vsel %vm264_vm0, %v259_v18, %v260_v19  ;;  %v269_v24 = vsel %vm264_vm0, %v263_v20, %v259_v18  ;;  %v3000_v28 = vld [vmem:[%s3306_s12 + $0xc0] sm:$0xff]   ;;  %2587 = vmatpush3.bf16.msra.mxu0 %v2999_v26  ;;  %v3330_v32 = vsel %vm286_vm1, %v281_v21, %v282_v25  ;;  %v3336_v33 = vsel %vm286_vm1, %v285_v29, %v281_v21  ;;  %v3004_v36 = vld [vmem:[%s3306_s12 + $0xc8] sm:$0xff]   ;;  %v3008_v40 = vld [vmem:[%s3306_s12 + $0xd0] sm:$0xff]  }
  0x95   : >> { %v315_v27 = vpack.c.bf16 %v268_v23, %v269_v24  ;;  %v3001_v30 = vld [vmem:[%s3306_s12 + $0x80] sm:$0xff]   ;;  %2620 = vmatprep.subr.bf16.mxu1 %v3000_v28  ;;  %v317_v35 = vpack.c.bf16 %v3330_v32, %v3336_v33  ;;  %2588 = vmatprep.subr.bf16.mxu0 %v3002_v31  ;;  %v3005_v37 = vld [vmem:[%s3306_s12 + $0x88] sm:$0xff]   ;;  %v3009_v41 = vld [vmem:[%s3306_s12 + $0x90] sm:$0xff]   ;;  %v261_v61 = vrot.slane %v3184_v8, 2  ;;  %v262_v63 = vrot.slane %v3180_v9, 2 }
  0x96   : >> { %2621 = vmatpush3.bf16.msra.mxu1 %v3001_v30  ;;  %v3010_v42 = vld [vmem:[%s3306_s12 + $0x58] sm:$0xff]   ;;  %v3014_v47 = vld [vmem:[%s3306_s12 + $0x60] sm:$0xff]   ;;  %v3018_v54 = vld [vmem:[%s3306_s12 + $0x68] sm:$0xff]   ;;  %vm275_vm3 = vcmp.lt.s32.totalorder %v3298_v17, 5  ;;  %v284_v2 = vrot.slane %v3180_v9, 7  ;;  %v3379_v4 = vsel %vm253_vm2, %v246_v46, %v247_v48  ;;  %v3385_v5 = vsel %vm253_vm2, %v250_v50, %v246_v46 }
  0x97   : >> { %960 = vmatprep.mubr.bf16.mxu0 %v315_v27  ;;  %1016 = vmatprep.mubr.bf16.mxu1 %v317_v35  ;;  %v3011_v43 = vld [vmem:[%s3306_s12 + $0x18] sm:$0xff]   ;;  %v3015_v49 = vld [vmem:[%s3306_s12 + $0x20] sm:$0xff]   ;;  %v3019_v56 = vld [vmem:[%s3306_s12 + $0x28] sm:$0xff]   ;;  %v266_v18 = vsel %vm264_vm0, %v261_v61, %v262_v63  ;;  %v267_v21 = vsel %vm264_vm0, %v260_v19, %v261_v61  ;;  %v279_v23 = vsel %vm275_vm3, %v270_v55, %v271_v57  ;;  %v248_v28 = vrot.slane %v3184_v8, 1 }
  0x98   : >> { %2589 = vmatpush3.bf16.msra.mxu0 %v3003_v34  ;;  %2622 = vmatprep.subr.bf16.mxu1 %v3004_v36  ;;  %v3012_v44 = vld [vmem:[%s3306_s12 + $0xd8] sm:$0xff]   ;;  %v3016_v51 = vld [vmem:[%s3306_s12 + $0xe0] sm:$0xff]   ;;  %v3020_v58 = vld [vmem:[%s3306_s12 + $0xe8] sm:$0xff]   ;;  %v280_v24 = vsel %vm275_vm3, %v274_v59, %v270_v55  ;;  %v314_v27 = vpack.c.bf16 %v3379_v4, %v3385_v5  ;;  %v3410_v19 = vsel %vm286_vm1, %v282_v25, %v283_v53  ;;  %v249_v35 = vrot.slane %v3180_v9, 1 }
  0x99   : >> { %2590 = vmatprep.subr.bf16.mxu0 %v3006_v38  ;;  %v3013_v45 = vld [vmem:[%s3306_s12 + $0x98] sm:$0xff]   ;;  %v3017_v52 = vld [vmem:[%s3306_s12 + $0xa0] sm:$0xff]   ;;  %v3021_v60 = vld [vmem:[%s3306_s12 + $0xa8] sm:$0xff]   ;;  %v3415_v30 = vsel %vm286_vm1, %v283_v53, %v284_v2  ;;  %v324_v34 = vpack.c.bf16 %v266_v18, %v267_v21  ;;  %v272_v25 = vrot.slane %v3184_v8, 3  ;;  %v265_v46 = vsel %vm264_vm0, %v262_v63, %v263_v20 }
  0x9a   : >> { %2623 = vmatpush3.bf16.msra.mxu1 %v3005_v37  ;;  %v3022_v62 = vld [vmem:[%s3306_s12 + $0x70] sm:$0xff]   ;;  %v3026_v16 = vld [vmem:[%s3306_s12 + $0x78] sm:$0xff]   ;;  %v3030_v36 = vld [vmem:[%s3306_s12 + $0x140] sm:$0xff]   ;;  %v316_v37 = vpack.c.bf16 %v279_v23, %v280_v24  ;;  %v3453_v20 = vsel %vm286_vm1, %v284_v2, %v285_v29  ;;  %v304_v61 = vrot.slane %v3188_v7, 6  ;;  %vm308_vm4 = vcmp.lt.s32.totalorder %v3298_v17, 2 }
  0x9b   : >> { %2624 = vmatprep.subr.bf16.mxu1 %v3008_v40  ;;  %v3023_v0 = vld [vmem:[%s3306_s12 + $0x30] sm:$0xff]   ;;  %v3027_v22 = vld [vmem:[%s3306_s12 + $0x38] sm:$0xff]   ;;  %v3031_v38 = vld [vmem:[%s3306_s12 + $0x100] sm:$0xff]   ;;  %v273_v40 = vrot.slane %v3180_v9, 3  ;;  %vm297_vm5 = vcmp.lt.s32.totalorder %v3298_v17, 3  ;;  %vm3200_vm6 = vmmov 0  }
  0x9c   : >> { %2591 = vmatpush3.bf16.msra.mxu0 %v3007_v39  ;;  %v3024_v1 = vld [vmem:[%s3306_s12 + $0xf0] sm:$0xff]   ;;  %v3028_v26 = vld [vmem:[%s3306_s12 + $0xf8] sm:$0xff]   ;;  %v326_v39 = vpack.c.bf16 %v3415_v30, %v3410_v19  ;;  %v3037_v53 = vld [vmem:[%s3306_s12 + $0x188] sm:$0xff]  }
  0x9d   : >> { %2592 = vmatprep.subr.bf16.mxu0 %v3010_v42  ;;  %v3025_v3 = vld [vmem:[%s3306_s12 + $0xb0] sm:$0xff]   ;;  %v3029_v31 = vld [vmem:[%s3306_s12 + $0xb8] sm:$0xff]   ;;  %v3033_v42 = vld [vmem:[%s3306_s12 + $0x180] sm:$0xff]  }
  0x9e   : >> { %2625 = vmatpush3.bf16.msra.mxu1 %v3009_v41  ;;  %v3032_v41 = vld [vmem:[%s3306_s12 + $0x1c0] sm:$0xff]   ;;  %v3038_v55 = vld [vmem:[%s3306_s12 + $0x150] sm:$0xff]   ;;  %v3043_v2 = vld [vmem:[%s3306_s12 + $0x118] sm:$0xff]  }
  0x9f   : >> { %2626 = vmatprep.subr.bf16.mxu1 %v3012_v44  ;;  %v256_v44 = vsel %vm253_vm2, %v247_v48, %v248_v28  ;;  %v278_v48 = vsel %vm275_vm3, %v271_v57, %v272_v25  ;;  %v303_v57 = vrot.slane %v3192_v6, 6  ;;  %v3040_v29 = vld [vmem:[%s3306_s12 + $0x1d0] sm:$0xff]   ;;  %v3046_v23 = vld [vmem:[%s3306_s12 + $0x160] sm:$0xff]  }
  0xa0   : >> { %2593 = vmatpush3.bf16.msra.mxu0 %v3011_v43  ;;  %v3429_v43 = vsel %vm253_vm2, %v248_v28, %v249_v35  ;;  %v3041_v63 = vld [vmem:[%s3306_s12 + $0x190] sm:$0xff]   ;;  %v3048_v28 = vld [vmem:[%s3306_s12 + $0x1e0] sm:$0xff]  }
  0xa1   : >> { %2594 = vmatprep.subr.bf16.mxu0 %v3014_v47  ;;  %v3035_v47 = vld [vmem:[%s3306_s12 + $0x108] sm:$0xff]   ;;  %v312_v21 = vsel %vm308_vm4, %v303_v57, %v304_v61 }
  0xa2   : >> { %2627 = vmatpush3.bf16.msra.mxu1 %v3013_v45  ;;  %v3034_v45 = vld [vmem:[%s3306_s12 + $0x148] sm:$0xff]  }
  0xa3   : >> { %2628 = vmatprep.subr.bf16.mxu1 %v3016_v51  ;;  %v3036_v51 = vld [vmem:[%s3306_s12 + $0x1c8] sm:$0xff]  }
  0xa4   : >> { %2595 = vmatpush3.bf16.msra.mxu0 %v3015_v49  ;;  %v277_v49 = vsel %vm275_vm3, %v272_v25, %v273_v40  ;;  %v3053_v25 = vld [vmem:[%s3306_s12 + $0x1a8] sm:$0xff]  }
  0xa5   : >> { %2596 = vmatprep.subr.bf16.mxu0 %v3018_v54  ;;  %v333_v54 = vpack.c.bf16 %v265_v46, %v265_v46  ;;  %v3058_v46 = vld [vmem:[%s3306_s12 + $0x178] sm:$0xff]  }
  0xa6   : >> { %2629 = vmatpush3.bf16.msra.mxu1 %v3017_v52  ;;  %v323_v52 = vpack.c.bf16 %v3429_v43, %v256_v44 }
  0xa7   : >> { %2630 = vmatprep.subr.bf16.mxu1 %v3020_v58  ;;  %v3039_v58 = vld [vmem:[%s3306_s12 + $0x110] sm:$0xff]  }
  0xa8   : >> { %2597 = vmatpush3.bf16.msra.mxu0 %v3019_v56  ;;  %v325_v56 = vpack.c.bf16 %v277_v49, %v278_v48 }
  0xa9   : >> { %2598 = vmatprep.subr.bf16.mxu0 %v3022_v62  ;;  %v305_v62 = vrot.slane %v3184_v8, 6 }
  0xaa   : >> { %2631 = vmatpush3.bf16.msra.mxu1 %v3021_v60  ;;  %v335_v60 = vpack.c.bf16 %v3453_v20, %v3453_v20 }
  0xab   : >> { %2632 = vmatprep.subr.bf16.mxu1 %v3024_v1  ;;  %v3042_v1 = vld [vmem:[%s3306_s12 + $0x158] sm:$0xff]   ;;  %v311_v18 = vsel %vm308_vm4, %v304_v61, %v305_v62 }
  0xac   : >> { %2599 = vmatpush3.bf16.msra.mxu0 %v3023_v0  ;;  %v3469_v0 = vsel %vm253_vm2, %v249_v35, %v250_v50  ;;  %v292_v35 = vrot.slane %v3192_v6, 5 }
  0xad   : >> { %2600 = vmatprep.subr.bf16.mxu0 %v3026_v16  ;;  %v3044_v16 = vld [vmem:[%s3306_s12 + $0x1d8] sm:$0xff]   ;;  %v332_v50 = vpack.c.bf16 %v3469_v0, %v3469_v0 }
  0xae   : >> { %2633 = vmatpush3.bf16.msra.mxu1 %v3025_v3  ;;  %v276_v3 = vsel %vm275_vm3, %v273_v40, %v274_v59  ;;  %v3045_v59 = vld [vmem:[%s3306_s12 + $0x198] sm:$0xff]   ;;  %v3055_v40 = vld [vmem:[%s3306_s12 + $0x130] sm:$0xff]  }
  0xaf   : >> { %2634 = vmatprep.subr.bf16.mxu1 %v3028_v26  ;;  %v334_v24 = vpack.c.bf16 %v276_v3, %v276_v3  ;;  %v3047_v26 = vld [vmem:[%s3306_s12 + $0x120] sm:$0xff]  }
  0xb0   : >> { %2601 = vmatpush3.bf16.msra.mxu0 %v3027_v22  ;;  %v319_v22 = vpack.c.bf16 %v256_v44, %v3379_v4  ;;  %v3051_v4 = vld [vmem:[%s3306_s12 + $0x128] sm:$0xff]   ;;  %v307_v44 = vrot.slane %v3176_v10, 6 }
  0xb1   : >> { %2654 = vmatprep.subr.bf16.mxu0 %v3030_v36  ;;  %v3052_v36 = vld [vmem:[%s3306_s12 + $0x1e8] sm:$0xff]  }
  0xb2   : >> { %2635 = vmatpush3.bf16.msra.mxu1 %v3029_v31  ;;  %v3049_v31 = vld [vmem:[%s3306_s12 + $0x1a0] sm:$0xff]   ;;  %v313_v3 = vsel %vm308_vm4, %v307_v44, %v303_v57 }
  0xb3   : >> { %961 = vmatmul.mubr.bf16.vlgmr.msra.gmra.mrb[0].mxu0 %v314_v27  ;;  %2688 = vmatprep.subr.bf16.mxu1 %v3032_v41  ;;  %v321_v27 = vpack.c.bf16 %v311_v18, %v312_v21  ;;  %v306_v41 = vrot.slane %v3180_v9, 6  ;;  %v3065_v21 = vld [vmem:[%s3306_s12 + $0x218] sm:$0xff]   ;;  %v3066_v57 = vld [vmem:[%s3306_s12 + $0x220] sm:$0xff]  }
  0xb4   : >> { %2655 = vmatpush3.bf16.msra.mxu0 %v3031_v38  ;;  %968 = vmatprep.mubr.bf16.mxu0 %v324_v34  ;;  %v3050_v34 = vld [vmem:[%s3306_s12 + $0x168] sm:$0xff]   ;;  %v294_v38 = vrot.slane %v3184_v8, 5 }
  0xb5   : >> { %1017 = vmatmul.mubr.bf16.vlgmr.msra.gmra.mrb[0].mxu1 %v316_v37  ;;  %2656 = vmatprep.subr.bf16.mxu0 %v3034_v45  ;;  %v293_v37 = vrot.slane %v3188_v7, 5  ;;  %v3057_v45 = vld [vmem:[%s3306_s12 + $0x1b0] sm:$0xff]  }
  0xb6   : >> { %2689 = vmatpush3.bf16.msra.mxu1 %v3033_v42  ;;  %1024 = vmatprep.mubr.bf16.mxu1 %v326_v39  ;;  %v3054_v39 = vld [vmem:[%s3306_s12 + $0x170] sm:$0xff]  }
  0xb7   : >> { %2690 = vmatprep.subr.bf16.mxu1 %v3036_v51  ;;  %v3056_v42 = vld [vmem:[%s3306_s12 + $0x1f0] sm:$0xff]   ;;  %v300_v49 = vsel %vm297_vm5, %v293_v37, %v294_v38  ;;  %v301_v48 = vsel %vm297_vm5, %v292_v35, %v293_v37  ;;  %v3060_v51 = vld [vmem:[%s3306_s12 + $0x1f8] sm:$0xff]  }
  0xb8   : >> { %2657 = vmatpush3.bf16.msra.mxu0 %v3035_v47  ;;  %v3059_v47 = vld [vmem:[%s3306_s12 + $0x138] sm:$0xff]   ;;  %v320_v61 = vpack.c.bf16 %v300_v49, %v301_v48  ;;  %v3078_v37 = vld [vmem:[%s3306_s12 + $0x290] sm:$0xff]   ;;  %v3089_v49 = vld [vmem:[%s3306_s12 + $0x2e0] sm:$0xff]  }
  0xb9   : >> { %2658 = vmatprep.subr.bf16.mxu0 %v3038_v55  ;;  %v3061_v55 = vld [vmem:[%s3306_s12 + $0x1b8] sm:$0xff]   ;;  %v3090_v48 = vld [vmem:[%s3306_s12 + $0x2a8] sm:$0xff]  }
  0xba   : >> { %2691 = vmatpush3.bf16.msra.mxu1 %v3037_v53  ;;  %v309_v53 = vsel %vm308_vm4, %v306_v41, %v307_v44  ;;  %v3085_v44 = vld [vmem:[%s3306_s12 + $0x2d8] sm:$0xff]  }
  0xbb   : >> { %969 = vmatmul.mubr.bf16.gmra.mrb[4].mxu0 %v323_v52  ;;  %2692 = vmatprep.subr.bf16.mxu1 %v3040_v29  ;;  %v318_v52 = vpack.c.bf16 %v3188_v7, %v3192_v6 }
  0xbc   : >> { %2659 = vmatpush3.bf16.msra.mxu0 %v3039_v58  ;;  %976 = vmatprep.mubr.bf16.mxu0 %v333_v54  ;;  %v310_v54 = vsel %vm308_vm4, %v305_v62, %v306_v41  ;;  %v3199_v58 = vmov 0.0   ;;  %v3063_v62 = vld [vmem:[%s3306_s12 + $0x208] sm:$0xff]   ;;  %v3083_v41 = vld [vmem:[%s3306_s12 + $0x318] sm:$0xff]  }
  0xbd   : >> { %1025 = vmatmul.mubr.bf16.gmra.mrb[4].mxu1 %v325_v56  ;;  %2660 = vmatprep.subr.bf16.mxu0 %v3042_v1  ;;  %v328_v56 = vpack.c.bf16 %v3469_v0, %v3429_v43  ;;  %v330_v29 = vpack.c.bf16 %v309_v53, %v310_v54  ;;  %v296_v1 = vrot.slane %v3176_v10, 5  ;;  %v3093_v53 = vld [vmem:[%s3306_s12 + $0x2e8] sm:$0xff]   ;;  %v3094_v54 = vld [vmem:[%s3306_s12 + $0x2b0] sm:$0xff]  }
  0xbe   : >> { %2693 = vmatpush3.bf16.msra.mxu1 %v3041_v63  ;;  %1032 = vmatprep.mubr.bf16.mxu1 %v335_v60  ;;  %v3062_v60 = vld [vmem:[%s3306_s12 + $0x200] sm:$0xff]   ;;  %v295_v63 = vrot.slane %v3180_v9, 5 }
  0xbf   : >> { %2694 = vmatprep.subr.bf16.mxu1 %v3044_v16  ;;  %v3064_v16 = vld [vmem:[%s3306_s12 + $0x210] sm:$0xff]  }
  0xc0   : >> { %2661 = vmatpush3.bf16.msra.mxu0 %v3043_v2  ;;  %v298_v43 = vsel %vm297_vm5, %v295_v63, %v296_v1  ;;  %v299_v0 = vsel %vm297_vm5, %v294_v38, %v295_v63  ;;  %v327_v2 = vpack.c.bf16 %v3180_v9, %v3184_v8  ;;  %v3080_v38 = vld [vmem:[%s3306_s12 + $0x250] sm:$0xff]   ;;  %v3100_v63 = vld [vmem:[%s3306_s12 + $0x278] sm:$0xff]  }
  0xc1   : >> { %2662 = vmatprep.subr.bf16.mxu0 %v3046_v23  ;;  %v329_v18 = vpack.c.bf16 %v298_v43, %v299_v0  ;;  %v3103_v43 = vld [vmem:[%s3306_s12 + $0x400] sm:$0xff]  }
  0xc2   : >> { %2695 = vmatpush3.bf16.msra.mxu1 %v3045_v59  ;;  %v339_v59 = vpack.c.bf16 %v313_v3, %v313_v3 }
  0xc3   : >> { %977 = vmatmul.mubr.bf16.gmra.mrb[8].mxu0 %v332_v50  ;;  %2696 = vmatprep.subr.bf16.mxu1 %v3048_v28  ;;  %v337_v50 = vpack.c.bf16 %v3385_v5, %v3385_v5  ;;  %v302_v5 = vsel %vm297_vm5, %v296_v1, %v292_v35  ;;  %v322_v28 = vpack.c.bf16 %v3410_v19, %v3330_v32  ;;  %v3070_v32 = vld [vmem:[%s3306_s12 + $0x280] sm:$0xff]   ;;  %v3101_v1 = vld [vmem:[%s3306_s12 + $0x2f8] sm:$0xff]  }
  0xc4   : >> { %2663 = vmatpush3.bf16.msra.mxu0 %v3047_v26  ;;  %1072 = vmatprep.mubr.bf16.mxu0 %v319_v22  ;;  %v336_v22 = vpack.c.bf16 %v3176_v10, %v3176_v10  ;;  %v338_v23 = vpack.c.bf16 %v302_v5, %v302_v5  ;;  %v3068_v26 = vld [vmem:[%s3306_s12 + $0x230] sm:$0xff]   ;;  %v3071_v19 = vld [vmem:[%s3306_s12 + $0x300] sm:$0xff]  }
  0xc5   : >> { %1033 = vmatmul.mubr.bf16.gmra.mrb[8].mxu1 %v334_v24  ;;  %2664 = vmatprep.subr.bf16.mxu0 %v3050_v34  ;;  %v3067_v24 = vld [vmem:[%s3306_s12 + $0x228] sm:$0xff]   ;;  %v340_v34 = vpack.c.bf16 %v3336_v33, %v3336_v33  ;;  %v3073_v35 = vld [vmem:[%s3306_s12 + $0x2c0] sm:$0xff]  }
  0xc6   : >> { %2697 = vmatpush3.bf16.msra.mxu1 %v3049_v31  ;;  %1128 = vmatprep.mubr.bf16.mxu1 %v321_v27  ;;  %v3069_v27 = vld [vmem:[%s3306_s12 + $0x238] sm:$0xff]   ;;  %v331_v31 = vpack.c.bf16 %v3453_v20, %v3415_v30  ;;  %v3074_v30 = vld [vmem:[%s3306_s12 + $0x288] sm:$0xff]  }
  0xc7   : >> { %2698 = vmatprep.subr.bf16.mxu1 %v3052_v36  ;;  %v3075_v20 = vld [vmem:[%s3306_s12 + $0x308] sm:$0xff]  }
  0xc8   : >> { %2665 = vmatpush3.bf16.msra.mxu0 %v3051_v4  ;;  %v3072_v4 = vld [vmem:[%s3306_s12 + $0x240] sm:$0xff]   ;;  %v3076_v36 = vld [vmem:[%s3306_s12 + $0x248] sm:$0xff]  }
  0xc9   : >> { %2666 = vmatprep.subr.bf16.mxu0 %v3054_v39  ;;  %v3077_v33 = vld [vmem:[%s3306_s12 + $0x2c8] sm:$0xff]   ;;  %v3081_v39 = vld [vmem:[%s3306_s12 + $0x2d0] sm:$0xff]  }
  0xca   : >> { %2699 = vmatpush3.bf16.msra.mxu1 %v3053_v25  ;;  %v3079_v25 = vld [vmem:[%s3306_s12 + $0x310] sm:$0xff]  }
  0xcb   : >> { %2700 = vmatprep.subr.bf16.mxu1 %v3056_v42  ;;  %v3084_v42 = vld [vmem:[%s3306_s12 + $0x258] sm:$0xff]  }
  0xcc   : >> { %2667 = vmatpush3.bf16.msra.mxu0 %v3055_v40  ;;  %v3082_v40 = vld [vmem:[%s3306_s12 + $0x298] sm:$0xff]  }
  0xcd   : >> { %2668 = vmatprep.subr.bf16.mxu0 %v3058_v46  ;;  %v3087_v46 = vld [vmem:[%s3306_s12 + $0x320] sm:$0xff]  }
  0xce   : >> { %2701 = vmatpush3.bf16.msra.mxu1 %v3057_v45  ;;  %v3086_v45 = vld [vmem:[%s3306_s12 + $0x2a0] sm:$0xff]  }
  0xcf   : >> { %2702 = vmatprep.subr.bf16.mxu1 %v3060_v51  ;;  %v3091_v51 = vld [vmem:[%s3306_s12 + $0x328] sm:$0xff]  }
  0xd0   : >> { %2669 = vmatpush3.bf16.msra.mxu0 %v3059_v47  ;;  %v3088_v47 = vld [vmem:[%s3306_s12 + $0x260] sm:$0xff]  }
  0xd1   : >> { %2880 = vmatprep.subr.bf16.mxu0 %v3199_v58 }
  0xd2   : >> { %2703 = vmatpush3.bf16.msra.mxu1 %v3061_v55  ;;  %v3095_v55 = vld [vmem:[%s3306_s12 + $0x330] sm:$0xff]  }
  0xd3   : >> { %1073 = vmatmul.mubr.bf16.vlgmr.msra.gmra.mrb[12].mxu0 %v318_v52  ;;  %2733 = vmatprep.subr.bf16.mxu1 %v3070_v32  ;;  %v3092_v52 = vld [vmem:[%s3306_s12 + $0x268] sm:$0xff]  }
  0xd4   : >> { %2881 = vmatpush3.bf16.msra.mxu0 %v3062_v60  ;;  %1080 = vmatprep.mubr.bf16.mxu0 %v328_v56  ;;  %v3096_v56 = vld [vmem:[%s3306_s12 + $0x270] sm:$0xff]  }
  0xd5   : >> { %1129 = vmatmul.mubr.bf16.vlgmr.msra.gmra.mrb[12].mxu1 %v320_v61  ;;  %2882 = vmatprep.subr.bf16.mxu0 %v3199_v58  ;;  %v3097_v60 = vld [vmem:[%s3306_s12 + $0x2f0] sm:$0xff]   ;;  %v3098_v61 = vld [vmem:[%s3306_s12 + $0x2b8] sm:$0xff]  }
  0xd6   : >> { %1136 = vmatprep.mubr.bf16.mxu1 %v330_v29  ;;  %2734 = vmatpush3.bf16.msra.mxu1 %v3072_v4  ;;  %v3099_v29 = vld [vmem:[%s3306_s12 + $0x338] sm:$0xff]  }
  0xd7   : >> { %2735 = vmatprep.subr.bf16.mxu1 %v3074_v30 }
  0xd8   : >> { %2883 = vmatpush3.bf16.msra.mxu0 %v3063_v62  ;;  %v3102_v62 = vld [vmem:[%s3306_s12 + $0x380] sm:$0xff]  }
  0xd9   : >> { %2884 = vmatprep.subr.bf16.mxu0 %v3199_v58 }
  0xda   : >> { %2736 = vmatpush3.bf16.msra.mxu1 %v3076_v36 }
  0xdb   : >> { %1081 = vmatmul.mubr.bf16.gmra.mrb[16].mxu0 %v327_v2  ;;  %2737 = vmatprep.subr.bf16.mxu1 %v3078_v37  ;;  %v2289_v2 = vld [vmem:[%s3615_s17] ss:$0 sm:$0xff] }
  0xdc   : >> { %2885 = vmatpush3.bf16.msra.mxu0 %v3064_v16  ;;  %1088 = vmatprep.mubr.bf16.mxu0 %v337_v50 }
  0xdd   : >> { %1137 = vmatmul.mubr.bf16.gmra.mrb[16].mxu1 %v329_v18  ;;  %2886 = vmatprep.subr.bf16.mxu0 %v3199_v58 }
  0xde   : >> { %1144 = vmatprep.mubr.bf16.mxu1 %v339_v59  ;;  %2738 = vmatpush3.bf16.msra.mxu1 %v3080_v38 }
  0xdf   : >> { %2739 = vmatprep.subr.bf16.mxu1 %v3082_v40 }
  0xe0   : >> { %2887 = vmatpush3.bf16.msra.mxu0 %v3065_v21 }
  0xe1   : >> { %2888 = vmatprep.subr.bf16.mxu0 %v3199_v58 }
  0xe2   : >> { %2740 = vmatpush3.bf16.msra.mxu1 %v3084_v42 }
  0xe3   : >> { %1089 = vmatmul.mubr.bf16.gmra.mrb[20].mxu0 %v336_v22  ;;  %2741 = vmatprep.subr.bf16.mxu1 %v3086_v45 }
  0xe4   : >> { %2889 = vmatpush3.bf16.msra.mxu0 %v3066_v57  ;;  %2896 = vmatprep.mubr.msk.bf16.mxu0 %vm3200_vm6, %v3199_v58 }
  0xe5   : >> { %1145 = vmatmul.mubr.bf16.gmra.mrb[20].mxu1 %v338_v23  ;;  %2890 = vmatprep.subr.bf16.mxu0 %v3199_v58 }
  0xe6   : >> { %2742 = vmatpush3.bf16.msra.mxu1 %v3088_v47 }
  0xe7   : >> { %2743 = vmatprep.subr.bf16.mxu1 %v3090_v48 }
  0xe8   : >> { %2891 = vmatpush3.bf16.msra.mxu0 %v3067_v24 }
  0xe9   : >> { %2892 = vmatprep.subr.bf16.mxu0 %v3199_v58 }
  0xea   : >> { %2744 = vmatpush3.bf16.msra.mxu1 %v3092_v52 }
  0xeb   : >> { %2745 = vmatprep.subr.bf16.mxu1 %v3094_v54 }
  0xec   : >> { %2893 = vmatpush3.bf16.msra.mxu0 %v3068_v26 }
  0xed   : >> { %2894 = vmatprep.subr.bf16.mxu0 %v3199_v58 }
  0xee   : >> { %2746 = vmatpush3.bf16.msra.mxu1 %v3096_v56 }
  0xef   : >> { %2747 = vmatprep.subr.bf16.mxu1 %v3098_v61 }
  0xf0   : >> { %2895 = vmatpush3.bf16.msra.mxu0 %v3069_v27 }
  0xf1   : >> { %2767 = vmatprep.subr.bf16.mxu0 %v3071_v19 }
  0xf2   : >> { %2748 = vmatpush3.bf16.msra.mxu1 %v3100_v63 }
  0xf3   : >> { %2897 = vmatmul.mubr.bf16.vlgmr.msra.gmra.mrb[24].mxu0 %v322_v28  ;;  %2801 = vmatprep.subr.bf16.mxu1 %v3102_v62 }
  0xf4   : >> { %2900 = vmatprep.mubr.msk.bf16.mxu0 %vm3200_vm6, %v3199_v58  ;;  %2768 = vmatpush3.bf16.msra.mxu0 %v3073_v35 }
  0xf5   : >> { %2769 = vmatprep.subr.bf16.mxu0 %v3075_v20 }
  0xf8   : >> { %2770 = vmatpush3.bf16.msra.mxu0 %v3077_v33 }
  0xf9   : >> { %2771 = vmatprep.subr.bf16.mxu0 %v3079_v25 }
  0xfb   : >> { %2901 = vmatmul.mubr.bf16.gmra.mrb[28].mxu0 %v331_v31 }
  0xfc   : >> { %2904 = vmatprep.mubr.msk.bf16.mxu0 %vm3200_vm6, %v3199_v58  ;;  %2772 = vmatpush3.bf16.msra.mxu0 %v3081_v39 }
  0xfd   : >> { %2773 = vmatprep.subr.bf16.mxu0 %v3083_v41 }
 0x100   : >> { %2774 = vmatpush3.bf16.msra.mxu0 %v3085_v44 }
 0x101   : >> { %2775 = vmatprep.subr.bf16.mxu0 %v3087_v46 }
 0x103   : >> { %2905 = vmatmul.mubr.bf16.gmra.mrb[32].mxu0 %v340_v34 }
 0x104   : >> { %2776 = vmatpush3.bf16.msra.mxu0 %v3089_v49 }
 0x105   : >> { %2777 = vmatprep.subr.bf16.mxu0 %v3091_v51 }
 0x108   : >> { %2778 = vmatpush3.bf16.msra.mxu0 %v3093_v53 }
 0x109   : >> { %2779 = vmatprep.subr.bf16.mxu0 %v3095_v55 }
 0x10c   : >> { %2780 = vmatpush3.bf16.msra.mxu0 %v3097_v60 }
 0x10d   : >> { %2781 = vmatprep.subr.bf16.mxu0 %v3099_v29 }
 0x110   : >> { %2782 = vmatpush3.bf16.msra.mxu0 %v3101_v1 }
 0x111   : >> { %2835 = vmatprep.subr.bf16.mxu0 %v3103_v43 }
 0x186   : >> { %v2602_v0 = vpop.f32.mrb[0].mxu0 }
 0x187   : >> { %v2603_v3 = vpop.f32.mrb[1].mxu0 }
 0x188   : >> { %v2604_v16 = vadd.f32 %v2603_v3, %v2602_v0  ;;  %v2605_v50 = vpop.f32.mrb[2].mxu0  ;;  %v2636_v18 = vpop.f32.mrb[0].mxu1 }
 0x189   : >> { %v2606_v21 = vpop.f32.mrb[3].mxu0  ;;  %v2637_v59 = vpop.f32.mrb[1].mxu1 }
 0x18a   : >> { %v963_v57 = vadd.f32 %v2604_v16, %v2289_v2  ;;  %v2607_v5 = vadd.f32 %v2606_v21, %v2605_v50  ;;  %v2638_v22 = vadd.f32 %v2637_v59, %v2636_v18  ;;  %v2639_v23 = vpop.f32.mrb[2].mxu1 }
 0x18b   : >> { %v2640_v24 = vpop.f32.mrb[3].mxu1 }
 0x18c   : >> { %v966_v26 = vadd.f32 %v2607_v5, %v2289_v2  ;;  %v1019_v27 = vadd.f32 %v2638_v22, %v963_v57  ;;  %v2641_v28 = vadd.f32 %v2640_v24, %v2639_v23 }
 0x18e   : >> { %v1022_v31 = vadd.f32 %v2641_v28, %v966_v26  ;;  %v2608_v34 = vpop.f32.mrb[4].mxu0 }
 0x18f   : >> { %v2609_v32 = vpop.f32.mrb[5].mxu0 }
 0x190   : >> { %v2610_v19 = vadd.f32 %v2609_v32, %v2608_v34  ;;  %v2611_v4 = vpop.f32.mrb[6].mxu0  ;;  %v2642_v35 = vpop.f32.mrb[4].mxu1 }
 0x191   : >> { %v2612_v30 = vpop.f32.mrb[7].mxu0  ;;  %v2643_v20 = vpop.f32.mrb[5].mxu1 }
 0x192   : >> { %v971_v36 = vadd.f32 %v2610_v19, %v2289_v2  ;;  %v2613_v33 = vadd.f32 %v2612_v30, %v2611_v4  ;;  %v2644_v37 = vadd.f32 %v2643_v20, %v2642_v35  ;;  %v2645_v25 = vpop.f32.mrb[6].mxu1 }
 0x193   : >> { %v2646_v38 = vpop.f32.mrb[7].mxu1 }
 0x194   : >> { %v974_v39 = vadd.f32 %v2613_v33, %v2289_v2  ;;  %v1027_v40 = vadd.f32 %v2644_v37, %v971_v36  ;;  %v2647_v41 = vadd.f32 %v2646_v38, %v2645_v25 }
 0x196   : >> { %v1030_v42 = vadd.f32 %v2647_v41, %v974_v39  ;;  %v2614_v44 = vpop.f32.mrb[8].mxu0 }
 0x197   : >> { %v2615_v45 = vpop.f32.mrb[9].mxu0 }
 0x198   : >> { %v2616_v46 = vadd.f32 %v2615_v45, %v2614_v44  ;;  %v2617_v47 = vpop.f32.mrb[10].mxu0  ;;  %v2648_v49 = vpop.f32.mrb[8].mxu1 }
 0x199   : >> { %v2618_v48 = vpop.f32.mrb[11].mxu0  ;;  %v2649_v51 = vpop.f32.mrb[9].mxu1 }
 0x19a   : >> { %v979_v52 = vadd.f32 %v2616_v46, %v2289_v2  ;;  %v2650_v53 = vadd.f32 %v2649_v51, %v2648_v49  ;;  %v2651_v54 = vpop.f32.mrb[10].mxu1 }
 0x19b   : >> { %v2652_v55 = vpop.f32.mrb[11].mxu1 }
 0x19c   : >> { %v1035_v56 = vadd.f32 %v2650_v53, %v979_v52 }
 0x1a6   : >> { %v2670_v60 = vpop.f32.mrb[12].mxu0 }
 0x1a7   : >> { %v2671_v61 = vpop.f32.mrb[13].mxu0 }
 0x1a8   : >> { %v2672_v29 = vadd.f32 %v2671_v61, %v2670_v60  ;;  %v2673_v63 = vpop.f32.mrb[14].mxu0  ;;  %v2704_v1 = vpop.f32.mrb[12].mxu1 }
 0x1a9   : >> { %v2674_v62 = vpop.f32.mrb[15].mxu0  ;;  %v2705_v43 = vpop.f32.mrb[13].mxu1 }
 0x1aa   : >> { %v1075_v0 = vadd.f32 %v2672_v29, %v1019_v27  ;;  %v2675_v3 = vadd.f32 %v2674_v62, %v2673_v63  ;;  %v2706_v16 = vadd.f32 %v2705_v43, %v2704_v1  ;;  %v2707_v50 = vpop.f32.mrb[14].mxu1 }
 0x1ab   : >> { %v2708_v18 = vpop.f32.mrb[15].mxu1 }
 0x1ac   : >> { %v1078_v21 = vadd.f32 %v2675_v3, %v1022_v31  ;;  %v2709_v59 = vadd.f32 %v2708_v18, %v2707_v50  ;;  %v1131_v57 = vadd.f32 %v2706_v16, %v1075_v0 }
 0x1ae   : >> { %v2676_v2 = vpop.f32.mrb[16].mxu0  ;;  %v1134_v5 = vadd.f32 %v2709_v59, %v1078_v21 }
 0x1af   : >> { %v2677_v22 = vpop.f32.mrb[17].mxu0 }
 0x1b0   : >> { %v2678_v23 = vadd.f32 %v2677_v22, %v2676_v2  ;;  %v2679_v24 = vpop.f32.mrb[18].mxu0  ;;  %v2710_v26 = vpop.f32.mrb[16].mxu1 }
 0x1b1   : >> { %v2680_v28 = vpop.f32.mrb[19].mxu0  ;;  %v2711_v34 = vpop.f32.mrb[17].mxu1 }
 0x1b2   : >> { %v1083_v32 = vadd.f32 %v2678_v23, %v1027_v40  ;;  %v2681_v19 = vadd.f32 %v2680_v28, %v2679_v24  ;;  %v2712_v4 = vadd.f32 %v2711_v34, %v2710_v26  ;;  %v2713_v35 = vpop.f32.mrb[18].mxu1 }
 0x1b3   : >> { %v2714_v27 = vpop.f32.mrb[19].mxu1 }
 0x1b4   : >> { %v1086_v30 = vadd.f32 %v2681_v19, %v1030_v42  ;;  %v2715_v20 = vadd.f32 %v2714_v27, %v2713_v35  ;;  %v1139_v36 = vadd.f32 %v2712_v4, %v1083_v32 }
 0x1b6   : >> { %v2682_v33 = vpop.f32.mrb[20].mxu0  ;;  %v1142_v31 = vadd.f32 %v2715_v20, %v1086_v30 }
 0x1b7   : >> { %v2683_v37 = vpop.f32.mrb[21].mxu0 }
 0x1b8   : >> { %v2684_v25 = vadd.f32 %v2683_v37, %v2682_v33  ;;  %v2716_v38 = vpop.f32.mrb[20].mxu1  ;;  %v2685_v39 = vpop.f32.mrb[22].mxu0 }
 0x1b9   : >> { %v2717_v41 = vpop.f32.mrb[21].mxu1  ;;  %v2686_v44 = vpop.f32.mrb[23].mxu0 }
 0x1ba   : >> { %v1091_v45 = vadd.f32 %v2684_v25, %v1035_v56  ;;  %v2718_v46 = vadd.f32 %v2717_v41, %v2716_v38  ;;  %v2719_v47 = vpop.f32.mrb[22].mxu1 }
 0x1bb   : >> { %v2720_v49 = vpop.f32.mrb[23].mxu1 }
 0x1bc   : >> { %v1147_v40 = vadd.f32 %v2718_v46, %v1091_v45 }
 0x1c6   : >> { %v1186_v48 = vpop.f32.mrb[24].mxu0 }
 0x1c7   : >> { %v1187_v51 = vadd.f32 %v1186_v48, %v1131_v57  ;;  %v2898_v52 = vpop.f32.mrb[25].mxu0 }
 0x1c8   : >> { %v1189_v53 = vpop.f32.mrb[26].mxu0 }
 0x1c9   : >> { %v1208_v42 = vmax.f32 %v1187_v51, 0.0  ;;  %v1190_v54 = vadd.f32 %v1189_v53, %v1134_v5  ;;  %v2899_v55 = vpop.f32.mrb[27].mxu0 }
 0x1cb   : >> { %v3619_v60 = vmul.f32 %v1208_v42, %v3259_v12  ;;  %v1209_v61 = vmax.f32 %v1190_v54, 0.0 }
 0x1cd   : >> { %v3622_v29 = vmul.f32 %v1209_v61, %v3263_v14  ;;  %v1229_v56 = vrot.slane %v3619_v60, 2  ;;  %v1249_v63 = vrot.slane %v3619_v60, 7  ;;  %v1219_v62 = vrot.slane %v3619_v60, 1 }
 0x1ce   : >> { %v1194_v1 = vpop.f32.mrb[28].mxu0  ;;  %v1239_v43 = vrot.slane %v3619_v60, 3  ;;  %v1269_v0 = vrot.slane %v3619_v60, 6  ;;  %v1259_v3 = vrot.slane %v3619_v60, 5 }
 0x1cf   : >> { %v1195_v16 = vadd.f32 %v1194_v1, %v1139_v36  ;;  %v2902_v50 = vpop.f32.mrb[29].mxu0  ;;  %v1230_v18 = vrot.slane %v3622_v29, 2  ;;  %v1250_v21 = vrot.slane %v3622_v29, 7  ;;  %v1220_v59 = vrot.slane %v3622_v29, 1 }
 0x1d0   : >> { %v1197_v57 = vpop.f32.mrb[30].mxu0  ;;  %v1240_v2 = vrot.slane %v3622_v29, 3  ;;  %v1270_v5 = vrot.slane %v3622_v29, 6  ;;  %v1283_v22 = vpack.c.bf16 %v3622_v29, %v3619_v60  ;;  %v1260_v23 = vrot.slane %v3622_v29, 5  ;;  %v3136_v60 = vld [vmem:[%s3306_s12 + $0x450] sm:$0xff]  }
 0x1d1   : >> { %v1210_v24 = vmax.f32 %v1195_v16, 0.0  ;;  %v1198_v26 = vadd.f32 %v1197_v57, %v1142_v31  ;;  %v2903_v28 = vpop.f32.mrb[31].mxu0  ;;  %v3642_v34 = vsel %vm264_vm0, %v1229_v56, %v1230_v18  ;;  %v3648_v32 = vsel %vm286_vm1, %v1249_v63, %v1250_v21 }
 0x1d2   : >> { %v3654_v19 = vsel %vm253_vm2, %v1219_v62, %v1220_v59  ;;  %v3660_v4 = vsel %vm275_vm3, %v1239_v43, %v1240_v2  ;;  %v3666_v35 = vsel %vm308_vm4, %v1269_v0, %v1270_v5  ;;  %v3672_v27 = vsel %vm297_vm5, %v1259_v3, %v1260_v23 }
 0x1d3   : >> { %v3675_v30 = vmul.f32 %v1210_v24, %v3257_v11  ;;  %v1211_v20 = vmax.f32 %v1198_v26, 0.0 }
 0x1d5   : >> { %v3678_v36 = vmul.f32 %v1211_v20, %v3261_v13  ;;  %v1231_v33 = vrot.slane %v3675_v30, 2  ;;  %v1251_v31 = vrot.slane %v3675_v30, 7  ;;  %v1221_v37 = vrot.slane %v3675_v30, 1 }
 0x1d6   : >> { %v1202_v25 = vpop.f32.mrb[32].mxu0  ;;  %v1241_v38 = vrot.slane %v3675_v30, 3  ;;  %v1271_v39 = vrot.slane %v3675_v30, 6  ;;  %v1261_v41 = vrot.slane %v3675_v30, 5 }
 0x1d7   : >> { %v1203_v44 = vadd.f32 %v1202_v25, %v1147_v40  ;;  %v2906_v45 = vpop.f32.mrb[33].mxu0  ;;  %v1232_v46 = vrot.slane %v3678_v36, 2  ;;  %v3689_v47 = vsel %vm264_vm0, %v1230_v18, %v1231_v33  ;;  %v1252_v49 = vrot.slane %v3678_v36, 7 }
 0x1d8   : >> { %v1205_v48 = vpop.f32.mrb[34].mxu0  ;;  %v3694_v51 = vsel %vm286_vm1, %v1250_v21, %v1251_v31  ;;  %v1222_v52 = vrot.slane %v3678_v36, 1  ;;  %v3699_v53 = vsel %vm253_vm2, %v1220_v59, %v1221_v37  ;;  %v1242_v40 = vrot.slane %v3678_v36, 3 }
 0x1d9   : >> { %v1212_v42 = vmax.f32 %v1203_v44, 0.0  ;;  %v2907_v54 = vpop.f32.mrb[35].mxu0  ;;  %v1235_v55 = vsel %vm264_vm0, %v1231_v33, %v1232_v46  ;;  %v3706_v61 = vsel %vm286_vm1, %v1251_v31, %v1252_v49  ;;  %v3728_v24 = vsel %vm275_vm3, %v1240_v2, %v1241_v38 }
 0x1da   : >> { %v1289_v16 = vpack.c.bf16 %v1235_v55, %v3689_v47  ;;  %v1291_v50 = vpack.c.bf16 %v3706_v61, %v3694_v51  ;;  %v3715_v18 = vsel %vm253_vm2, %v1221_v37, %v1222_v52  ;;  %v3719_v21 = vsel %vm275_vm3, %v1241_v38, %v1242_v40 }
 0x1db   : >> { %v3722_v59 = vmul.f32 %v1212_v42, %v3265_v15  ;;  %v1288_v57 = vpack.c.bf16 %v3715_v18, %v3699_v53  ;;  %v1284_v26 = vpack.c.bf16 %v3699_v53, %v3654_v19  ;;  %v1290_v28 = vpack.c.bf16 %v3719_v21, %v3728_v24  ;;  %v3104_v21 = vld [vmem:[%s3306_s12 + $0x340] sm:$0xff]   ;;  %v3133_v53 = vld [vmem:[%s3306_s12 + $0x3f8] sm:$0xff]  }
 0x1dc   : >> { %v3736_v20 = vsel %vm308_vm4, %v1270_v5, %v1271_v39  ;;  %v3742_v33 = vsel %vm297_vm5, %v1260_v23, %v1261_v41  ;;  %v1272_v31 = vrot.slane %v3678_v36, 6  ;;  %v3105_v24 = vld [vmem:[%s3306_s12 + $0x3c0] sm:$0xff]  }
 0x1dd   : >> { %v1233_v2 = vrot.slane %v3722_v59, 2  ;;  %v1253_v37 = vrot.slane %v3722_v59, 7  ;;  %v1223_v25 = vrot.slane %v3722_v59, 1  ;;  %v1243_v38 = vrot.slane %v3722_v59, 3 }
 0x1de   : >> { %v1286_v5 = vpack.c.bf16 %v3736_v20, %v3666_v35  ;;  %v1285_v44 = vpack.c.bf16 %v3742_v33, %v3672_v27  ;;  %v1273_v23 = vrot.slane %v3722_v59, 6  ;;  %v3756_v45 = vsel %vm308_vm4, %v1271_v39, %v1272_v31  ;;  %v3132_v35 = vld [vmem:[%s3306_s12 + $0x378] sm:$0xff]   ;;  %v3135_v20 = vld [vmem:[%s3306_s12 + $0x448] sm:$0xff]  }
 0x1df   : >> { %v1238_v47 = vsel %vm264_vm0, %v1233_v2, %v1229_v56  ;;  %v3766_v48 = vsel %vm286_vm1, %v1253_v37, %v1249_v63  ;;  %v3772_v42 = vsel %vm253_vm2, %v1223_v25, %v1219_v62  ;;  %v1248_v39 = vsel %vm275_vm3, %v1243_v38, %v1239_v43  ;;  %v3137_v27 = vld [vmem:[%s3306_s12 + $0x458] sm:$0xff]   ;;  %v3139_v33 = vld [vmem:[%s3306_s12 + $0x468] sm:$0xff]  }
 0x1e0   : >> { %v1280_v56 = vpack.c.bf16 %v3642_v34, %v1238_v47  ;;  %v1282_v54 = vpack.c.bf16 %v3648_v32, %v3766_v48  ;;  %v1279_v63 = vpack.c.bf16 %v3654_v19, %v3772_v42  ;;  %v1281_v55 = vpack.c.bf16 %v3660_v4, %v1248_v39  ;;  %v3106_v4 = vld [vmem:[%s3306_s12 + $0x388] sm:$0xff]   ;;  %v3110_v39 = vld [vmem:[%s3306_s12 + $0x390] sm:$0xff]   ;;  %v3131_v19 = vld [vmem:[%s3306_s12 + $0x438] sm:$0xff]  }
 0x1e1   : >> { %v1234_v62 = vsel %vm264_vm0, %v1232_v46, %v1233_v2  ;;  %v3790_v1 = vsel %vm286_vm1, %v1252_v49, %v1253_v37  ;;  %v3794_v43 = vsel %vm253_vm2, %v1222_v52, %v1223_v25  ;;  %v1244_v34 = vsel %vm275_vm3, %v1242_v40, %v1243_v38  ;;  %v3107_v47 = vld [vmem:[%s3306_s12 + $0x408] sm:$0xff]  }
 0x1e2   : >> { %1925 = vmatprep.mubr.bf16.mxu1 %v1280_v56  ;;  %1981 = vmatprep.mubr.bf16.mxu0 %v1282_v54  ;;  %v1262_v46 = vrot.slane %v3678_v36, 5  ;;  %v1293_v49 = vpack.c.bf16 %v3794_v43, %v3715_v18  ;;  %v3805_v52 = vsel %vm308_vm4, %v1272_v31, %v1273_v23  ;;  %v1263_v2 = vrot.slane %v3722_v59, 5  ;;  %v3108_v40 = vld [vmem:[%s3306_s12 + $0x348] sm:$0xff]   ;;  %v3111_v56 = vld [vmem:[%s3306_s12 + $0x410] sm:$0xff]  }
 0x1e3   : >> { %1926 = vmatmul.mubr.bf16.vlgmr.msra.gmra.mrb[24].mxu1 %v1279_v63  ;;  %1982 = vmatmul.mubr.bf16.vlgmr.msra.gmra.mrb[36].mxu0 %v1281_v55  ;;  %v3109_v37 = vld [vmem:[%s3306_s12 + $0x3c8] sm:$0xff]   ;;  %v1295_v25 = vpack.c.bf16 %v3805_v52, %v3756_v45  ;;  %v1292_v38 = vpack.c.bf16 %v3678_v36, %v3675_v30  ;;  %v3830_v63 = vsel %vm308_vm4, %v1273_v23, %v1269_v0  ;;  %v3112_v0 = vld [vmem:[%s3306_s12 + $0x350] sm:$0xff]   ;;  %v3114_v55 = vld [vmem:[%s3306_s12 + $0x398] sm:$0xff]  }
 0x1e4   : >> { %2802 = vmatpush3.bf16.msra.mxu1 %v3104_v21  ;;  %2836 = vmatpush3.bf16.msra.mxu0 %v3105_v24  ;;  %v3818_v31 = vsel %vm297_vm5, %v1261_v41, %v1262_v46  ;;  %v3824_v54 = vsel %vm297_vm5, %v1262_v46, %v1263_v2  ;;  %v3113_v23 = vld [vmem:[%s3306_s12 + $0x3d0] sm:$0xff]   ;;  %v3115_v21 = vld [vmem:[%s3306_s12 + $0x418] sm:$0xff]   ;;  %v1298_v17 = vpack.c.bf16 %v1234_v62, %v1234_v62  ;;  %v3119_v46 = vld [vmem:[%s3306_s12 + $0x420] sm:$0xff]  }
 0x1e5   : >> { %1933 = vmatprep.mubr.bf16.mxu1 %v1289_v16  ;;  %1989 = vmatprep.mubr.bf16.mxu0 %v1291_v50  ;;  %v1294_v41 = vpack.c.bf16 %v3824_v54, %v3818_v31  ;;  %v3838_v16 = vsel %vm297_vm5, %v1263_v2, %v1259_v3  ;;  %v1296_v50 = vpack.c.bf16 %v3790_v1, %v3706_v61  ;;  %v3116_v24 = vld [vmem:[%s3306_s12 + $0x358] sm:$0xff]   ;;  %v3138_v36 = vld [vmem:[%s3306_s12 + $0x460] sm:$0xff]  }
 0x1e6   : >> { %2803 = vmatprep.subr.bf16.mxu1 %v3106_v4  ;;  %2837 = vmatprep.subr.bf16.mxu0 %v3107_v47  ;;  %v1300_v3 = vpack.c.bf16 %v3790_v1, %v3790_v1  ;;  %v3117_v4 = vld [vmem:[%s3306_s12 + $0x3d8] sm:$0xff]   ;;  %v3118_v47 = vld [vmem:[%s3306_s12 + $0x3a0] sm:$0xff]   ;;  %v1297_v62 = vpack.c.bf16 %v3794_v43, %v3794_v43  ;;  %v1299_v2 = vpack.c.bf16 %v1244_v34, %v1244_v34  ;;  %v3126_v34 = vld [vmem:[%s3306_s12 + $0x3b0] sm:$0xff]  }
 0x1e7   : >> { %v1302_v29 = vpack.c.bf16 %v3772_v42, %v3772_v42  ;;  %v1301_v18 = vpack.c.bf16 %v3722_v59, %v3722_v59  ;;  %v1303_v30 = vpack.c.bf16 %v3838_v16, %v3838_v16  ;;  %v3141_v59 = vld [vmem:[%s3306_s12 + $0x478] sm:$0xff]   ;;  %v1305_v45 = vpack.c.bf16 %v3766_v48, %v3766_v48 }
 0x1e8   : >> { %2804 = vmatpush3.bf16.msra.mxu1 %v3108_v40  ;;  %2838 = vmatpush3.bf16.msra.mxu0 %v3109_v37  ;;  %v3122_v40 = vld [vmem:[%s3306_s12 + $0x3a8] sm:$0xff]  }
 0x1e9   : >> { %2805 = vmatprep.subr.bf16.mxu1 %v3110_v39  ;;  %2839 = vmatprep.subr.bf16.mxu0 %v3111_v56  ;;  %v3123_v37 = vld [vmem:[%s3306_s12 + $0x428] sm:$0xff]  }
 0x1ea   : >> { %v3124_v39 = vld [vmem:[%s3306_s12 + $0x368] sm:$0xff]  }
 0x1eb   : >> { %1934 = vmatmul.mubr.bf16.gmra.mrb[28].mxu1 %v1288_v57  ;;  %1990 = vmatmul.mubr.bf16.gmra.mrb[40].mxu0 %v1290_v28  ;;  %v3120_v57 = vld [vmem:[%s3306_s12 + $0x360] sm:$0xff]   ;;  %v3125_v56 = vld [vmem:[%s3306_s12 + $0x3e8] sm:$0xff]  }
 0x1ec   : >> { %2806 = vmatpush3.bf16.msra.mxu1 %v3112_v0  ;;  %2840 = vmatpush3.bf16.msra.mxu0 %v3113_v23  ;;  %v3121_v28 = vld [vmem:[%s3306_s12 + $0x3e0] sm:$0xff]   ;;  %v3127_v0 = vld [vmem:[%s3306_s12 + $0x430] sm:$0xff]  }
 0x1ed   : >> { %1941 = vmatprep.mubr.bf16.mxu1 %v1298_v17  ;;  %1997 = vmatprep.mubr.bf16.mxu0 %v1300_v3  ;;  %v3128_v23 = vld [vmem:[%s3306_s12 + $0x370] sm:$0xff]  }
 0x1ee   : >> { %2807 = vmatprep.subr.bf16.mxu1 %v3114_v55  ;;  %2841 = vmatprep.subr.bf16.mxu0 %v3115_v21  ;;  %v3129_v55 = vld [vmem:[%s3306_s12 + $0x3f0] sm:$0xff]   ;;  %v3130_v21 = vld [vmem:[%s3306_s12 + $0x3b8] sm:$0xff]  }
 0x1f0   : >> { %2808 = vmatpush3.bf16.msra.mxu1 %v3116_v24  ;;  %2842 = vmatpush3.bf16.msra.mxu0 %v3117_v4 }
 0x1f1   : >> { %2809 = vmatprep.subr.bf16.mxu1 %v3118_v47  ;;  %2843 = vmatprep.subr.bf16.mxu0 %v3119_v46 }
 0x1f3   : >> { %1942 = vmatmul.mubr.bf16.gmra.mrb[32].mxu1 %v1297_v62  ;;  %1998 = vmatmul.mubr.bf16.gmra.mrb[44].mxu0 %v1299_v2 }
 0x1f4   : >> { %2810 = vmatpush3.bf16.msra.mxu1 %v3120_v57  ;;  %2844 = vmatpush3.bf16.msra.mxu0 %v3121_v28 }
 0x1f5   : >> { %2037 = vmatprep.mubr.bf16.mxu1 %v1284_v26  ;;  %2093 = vmatprep.mubr.bf16.mxu0 %v1286_v5  ;;  %v3134_v26 = vld [vmem:[%s3306_s12 + $0x440] sm:$0xff]   ;;  %v3140_v5 = vld [vmem:[%s3306_s12 + $0x470] sm:$0xff]  }
 0x1f6   : >> { %2811 = vmatprep.subr.bf16.mxu1 %v3122_v40  ;;  %2845 = vmatprep.subr.bf16.mxu0 %v3123_v37 }
 0x1f8   : >> { %2812 = vmatpush3.bf16.msra.mxu1 %v3124_v39  ;;  %2846 = vmatpush3.bf16.msra.mxu0 %v3125_v56 }
 0x1f9   : >> { %2813 = vmatprep.subr.bf16.mxu1 %v3126_v34  ;;  %2847 = vmatprep.subr.bf16.mxu0 %v3127_v0 }
 0x1fc   : >> { %2814 = vmatpush3.bf16.msra.mxu1 %v3128_v23  ;;  %2848 = vmatpush3.bf16.msra.mxu0 %v3129_v55 }
 0x1fd   : >> { %2815 = vmatprep.subr.bf16.mxu1 %v3130_v21  ;;  %2849 = vmatprep.subr.bf16.mxu0 %v3131_v19 }
 0x200   : >> { %2816 = vmatpush3.bf16.msra.mxu1 %v3132_v35  ;;  %2850 = vmatpush3.bf16.msra.mxu0 %v3133_v53 }
 0x201   : >> { %2908 = vmatprep.subr.bf16.mxu1 %v3199_v58 }
 0x203   : >> { %2038 = vmatmul.mubr.bf16.vlgmr.msra.gmra.mrb[36].mxu1 %v1283_v22  ;;  %2094 = vmatmul.mubr.bf16.vlgmr.msra.gmra.mrb[48].mxu0 %v1285_v44  ;;  %v1304_v22 = vpack.c.bf16 %v3830_v63, %v3830_v63  ;;  %v3970_v44 = vpack.c.bf16 %v3694_v51, %v3648_v32 }
 0x204   : >> { %2045 = vmatprep.mubr.bf16.mxu1 %v1293_v49  ;;  %2101 = vmatprep.mubr.bf16.mxu0 %v1295_v25  ;;  %v2510_v49 = vld [vmem:[%s3615_s17 + $0x1] ss:$0 sm:$0xff] }
 0x205   : >> { %2909 = vmatpush3.bf16.msra.mxu1 %v3134_v26 }
 0x206   : >> { %2910 = vmatprep.subr.bf16.mxu1 %v3199_v58 }
 0x209   : >> { %2911 = vmatpush3.bf16.msra.mxu1 %v3135_v20 }
 0x20a   : >> { %2912 = vmatprep.subr.bf16.mxu1 %v3199_v58 }
 0x20b   : >> { %2046 = vmatmul.mubr.bf16.gmra.mrb[40].mxu1 %v1292_v38  ;;  %2102 = vmatmul.mubr.bf16.gmra.mrb[52].mxu0 %v1294_v41 }
 0x20c   : >> { %2053 = vmatprep.mubr.bf16.mxu1 %v1302_v29  ;;  %2109 = vmatprep.mubr.bf16.mxu0 %v1304_v22 }
 0x20d   : >> { %2913 = vmatpush3.bf16.msra.mxu1 %v3136_v60 }
 0x20e   : >> { %2914 = vmatprep.subr.bf16.mxu1 %v3199_v58 }
 0x211   : >> { %2915 = vmatpush3.bf16.msra.mxu1 %v3137_v27 }
 0x212   : >> { %2916 = vmatprep.subr.bf16.mxu1 %v3199_v58 }
 0x213   : >> { %2054 = vmatmul.mubr.bf16.gmra.mrb[44].mxu1 %v1301_v18  ;;  %2110 = vmatmul.mubr.bf16.gmra.mrb[56].mxu0 %v1303_v30 }
 0x214   : >> { %2924 = vmatprep.mubr.msk.bf16.mxu1 %vm3200_vm6, %v3199_v58 }
 0x215   : >> { %2917 = vmatpush3.bf16.msra.mxu1 %v3138_v36 }
 0x216   : >> { %2918 = vmatprep.subr.bf16.mxu1 %v3199_v58 }
 0x219   : >> { %2919 = vmatpush3.bf16.msra.mxu1 %v3139_v33 }
 0x21a   : >> { %2920 = vmatprep.subr.bf16.mxu1 %v3199_v58 }
 0x21d   : >> { %2921 = vmatpush3.bf16.msra.mxu1 %v3140_v5 }
 0x21e   : >> { %2922 = vmatprep.subr.bf16.mxu1 %v3199_v58 }
 0x221   : >> { %2923 = vmatpush3.bf16.msra.mxu1 %v3141_v59 }
 0x224   : >> { %2925 = vmatmul.mubr.bf16.vlgmr.msra.gmra.mrb[48].mxu1 %v3970_v44 }
 0x225   : >> { %2928 = vmatprep.mubr.msk.bf16.mxu1 %vm3200_vm6, %v3199_v58 }
 0x22c   : >> { %2929 = vmatmul.mubr.bf16.gmra.mrb[52].mxu1 %v1296_v50 }
 0x22d   : >> { %2932 = vmatprep.mubr.msk.bf16.mxu1 %vm3200_vm6, %v3199_v58 }
 0x234   : >> { %2933 = vmatmul.mubr.bf16.gmra.mrb[56].mxu1 %v1305_v45 }
 0x2b6   : >> { %v2749_v42 = vpop.f32.mrb[24].mxu1  ;;  %v2783_v43 = vpop.f32.mrb[36].mxu0 }
 0x2b7   : >> { %v2750_v52 = vpop.f32.mrb[25].mxu1  ;;  %v2784_v32 = vpop.f32.mrb[37].mxu0 }
 0x2b8   : >> { %v2751_v51 = vadd.f32 %v2750_v52, %v2749_v42  ;;  %v2785_v25 = vadd.f32 %v2784_v32, %v2783_v43  ;;  %v2752_v38 = vpop.f32.mrb[26].mxu1  ;;  %v2786_v31 = vpop.f32.mrb[38].mxu0 }
 0x2b9   : >> { %v2753_v54 = vpop.f32.mrb[27].mxu1  ;;  %v2787_v63 = vpop.f32.mrb[39].mxu0 }
 0x2ba   : >> { %v1928_v61 = vadd.f32 %v2751_v51, %v2510_v49  ;;  %v2754_v1 = vadd.f32 %v2753_v54, %v2752_v38  ;;  %v2788_v41 = vadd.f32 %v2787_v63, %v2786_v31 }
 0x2bc   : >> { %v1984_v16 = vadd.f32 %v2785_v25, %v1928_v61  ;;  %v1931_v58 = vadd.f32 %v2754_v1, %v2510_v49 }
 0x2be   : >> { %v1987_v50 = vadd.f32 %v2788_v41, %v1931_v58  ;;  %v2755_v17 = vpop.f32.mrb[28].mxu1  ;;  %v2789_v48 = vpop.f32.mrb[40].mxu0 }
 0x2bf   : >> { %v2756_v3 = vpop.f32.mrb[29].mxu1  ;;  %v2790_v24 = vpop.f32.mrb[41].mxu0 }
 0x2c0   : >> { %v2757_v4 = vadd.f32 %v2756_v3, %v2755_v17  ;;  %v2791_v47 = vadd.f32 %v2790_v24, %v2789_v48  ;;  %v2758_v46 = vpop.f32.mrb[30].mxu1  ;;  %v2792_v57 = vpop.f32.mrb[42].mxu0 }
 0x2c1   : >> { %v2759_v28 = vpop.f32.mrb[31].mxu1  ;;  %v2793_v62 = vpop.f32.mrb[43].mxu0 }
 0x2c2   : >> { %v1936_v2 = vadd.f32 %v2757_v4, %v2510_v49  ;;  %v2760_v40 = vadd.f32 %v2759_v28, %v2758_v46  ;;  %v2794_v37 = vadd.f32 %v2793_v62, %v2792_v57 }
 0x2c4   : >> { %v1992_v39 = vadd.f32 %v2791_v47, %v1936_v2  ;;  %v1939_v56 = vadd.f32 %v2760_v40, %v2510_v49 }
 0x2c6   : >> { %v1995_v34 = vadd.f32 %v2794_v37, %v1939_v56  ;;  %v2761_v0 = vpop.f32.mrb[32].mxu1  ;;  %v2795_v23 = vpop.f32.mrb[44].mxu0 }
 0x2c7   : >> { %v2762_v55 = vpop.f32.mrb[33].mxu1  ;;  %v2796_v21 = vpop.f32.mrb[45].mxu0 }
 0x2c8   : >> { %v2763_v19 = vadd.f32 %v2762_v55, %v2761_v0  ;;  %v2797_v35 = vadd.f32 %v2796_v21, %v2795_v23  ;;  %v2764_v53 = vpop.f32.mrb[34].mxu1  ;;  %v2798_v26 = vpop.f32.mrb[46].mxu0 }
 0x2c9   : >> { %v2765_v20 = vpop.f32.mrb[35].mxu1  ;;  %v2799_v60 = vpop.f32.mrb[47].mxu0 }
 0x2ca   : >> { %v1944_v29 = vadd.f32 %v2763_v19, %v2510_v49 }
 0x2cc   : >> { %v2000_v22 = vadd.f32 %v2797_v35, %v1944_v29 }
 0x2d6   : >> { %v2817_v27 = vpop.f32.mrb[36].mxu1  ;;  %v2851_v18 = vpop.f32.mrb[48].mxu0 }
 0x2d7   : >> { %v2818_v30 = vpop.f32.mrb[37].mxu1  ;;  %v2852_v36 = vpop.f32.mrb[49].mxu0 }
 0x2d8   : >> { %v2819_v33 = vadd.f32 %v2818_v30, %v2817_v27  ;;  %v2853_v5 = vadd.f32 %v2852_v36, %v2851_v18  ;;  %v2820_v59 = vpop.f32.mrb[38].mxu1  ;;  %v2854_v44 = vpop.f32.mrb[50].mxu0 }
 0x2d9   : >> { %v2821_v45 = vpop.f32.mrb[39].mxu1  ;;  %v2855_v42 = vpop.f32.mrb[51].mxu0 }
 0x2da   : >> { %v2040_v43 = vadd.f32 %v2819_v33, %v1984_v16  ;;  %v2822_v52 = vadd.f32 %v2821_v45, %v2820_v59  ;;  %v2856_v32 = vadd.f32 %v2855_v42, %v2854_v44 }
 0x2dc   : >> { %v2043_v51 = vadd.f32 %v2822_v52, %v1987_v50  ;;  %v2096_v25 = vadd.f32 %v2853_v5, %v2040_v43 }
 0x2de   : >> { %v2823_v38 = vpop.f32.mrb[40].mxu1  ;;  %v2857_v31 = vpop.f32.mrb[52].mxu0  ;;  %v2099_v54 = vadd.f32 %v2856_v32, %v2043_v51 }
 0x2df   : >> { %v2824_v49 = vpop.f32.mrb[41].mxu1  ;;  %v2858_v63 = vpop.f32.mrb[53].mxu0 }
 0x2e0   : >> { %v2825_v61 = vadd.f32 %v2824_v49, %v2823_v38  ;;  %v2859_v1 = vadd.f32 %v2858_v63, %v2857_v31  ;;  %v2826_v41 = vpop.f32.mrb[42].mxu1  ;;  %v2860_v58 = vpop.f32.mrb[54].mxu0 }
 0x2e1   : >> { %v2827_v17 = vpop.f32.mrb[43].mxu1  ;;  %v2861_v48 = vpop.f32.mrb[55].mxu0 }
 0x2e2   : >> { %v2048_v3 = vadd.f32 %v2825_v61, %v1992_v39  ;;  %v2828_v24 = vadd.f32 %v2827_v17, %v2826_v41  ;;  %v2862_v4 = vadd.f32 %v2861_v48, %v2860_v58 }
 0x2e4   : >> { %v2051_v47 = vadd.f32 %v2828_v24, %v1995_v34  ;;  %v2104_v16 = vadd.f32 %v2859_v1, %v2048_v3 }
 0x2e6   : >> { %v2829_v46 = vpop.f32.mrb[44].mxu1  ;;  %v2863_v57 = vpop.f32.mrb[56].mxu0  ;;  %v2107_v50 = vadd.f32 %v2862_v4, %v2051_v47 }
 0x2e7   : >> { %v2830_v28 = vpop.f32.mrb[45].mxu1  ;;  %v2864_v62 = vpop.f32.mrb[57].mxu0 }
 0x2e8   : >> { %v2831_v2 = vadd.f32 %v2830_v28, %v2829_v46  ;;  %v2865_v40 = vadd.f32 %v2864_v62, %v2863_v57  ;;  %v2832_v37 = vpop.f32.mrb[46].mxu1  ;;  %v2866_v56 = vpop.f32.mrb[58].mxu0 }
 0x2e9   : >> { %v2833_v0 = vpop.f32.mrb[47].mxu1  ;;  %v2867_v23 = vpop.f32.mrb[59].mxu0 }
 0x2ea   : >> { %v2056_v55 = vadd.f32 %v2831_v2, %v2000_v22 }
 0x2ec   : >> { %v2112_v21 = vadd.f32 %v2865_v40, %v2056_v55 }
 0x2f7   : >> { %v2151_v19 = vpop.f32.mrb[48].mxu1 }
 0x2f8   : >> { %v2152_v35 = vadd.f32 %v2151_v19, %v2096_v25  ;;  %v2926_v39 = vpop.f32.mrb[49].mxu1 }
 0x2f9   : >> { %v2154_v53 = vpop.f32.mrb[50].mxu1 }
 0x2fa   : >> { %v2173_v34 = vadd.f32 %v3192_v6, %v2152_v35  ;;  %v2155_v26 = vadd.f32 %v2154_v53, %v2099_v54  ;;  %v2927_v20 = vpop.f32.mrb[51].mxu1 }
 0x2fc   : >> { %v2178_v60 = vmax.f32 %v2173_v34, 0.0  ;;  %v2174_v29 = vadd.f32 %v3188_v7, %v2155_v26 }
 0x2fe   : >> { %v2183_v27 = vmul.f32 %v2178_v60, %v3259_v12   ;;  %v2179_v18 = vmax.f32 %v2174_v29, 0.0 }
 0x2ff   : >> { %v2159_v30 = vpop.f32.mrb[52].mxu1 }
 0x300   : >> { %v2184_v36 = vmul.f32 %v2179_v18, %v3263_v14   ;;  %v2160_v33 = vadd.f32 %v2159_v30, %v2104_v16  ;;  %v2930_v22 = vpop.f32.mrb[53].mxu1  ;;  %2188 = vst [vmem:[%s3255_s7] sm:$0xff] (%p236_p4), %v2183_v27 }
 0x301   : >> { %v2162_v5 = vpop.f32.mrb[54].mxu1 }
 0x302   : >> { %v2175_v59 = vadd.f32 %v3184_v8, %v2160_v33  ;;  %v2163_v44 = vadd.f32 %v2162_v5, %v2107_v50  ;;  %v2931_v45 = vpop.f32.mrb[55].mxu1  ;;  %2189 = vst [vmem:[%s3255_s7 + $0x8] sm:$0xff] (%p236_p4), %v2184_v36 }
 0x304   : >> { %v2180_v42 = vmax.f32 %v2175_v59, 0.0  ;;  %v2176_v6 = vadd.f32 %v3180_v9, %v2163_v44 }
 0x306   : >> { %v2185_v43 = vmul.f32 %v2180_v42, %v3257_v11   ;;  %v2181_v52 = vmax.f32 %v2176_v6, 0.0  ;;  %v3975_v6 = vmov %v2183_v27 }
 0x307   : >> { %v2167_v7 = vpop.f32.mrb[56].mxu1 }
 0x308   : >> { %v2186_v32 = vmul.f32 %v2181_v52, %v3261_v13   ;;  %v2168_v51 = vadd.f32 %v2167_v7, %v2112_v21  ;;  %v2934_v25 = vpop.f32.mrb[57].mxu1  ;;  %v3973_v8 = vmov %v2185_v43  ;;  %v3974_v7 = vmov %v2184_v36  ;;  %2190 = vst [vmem:[%s3255_s7 + $0x10] sm:$0xff] (%p236_p4), %v2185_v43 }
 0x309   : >> { %v2170_v38 = vpop.f32.mrb[58].mxu1 }
 0x30a   : >> { %v2177_v31 = vadd.f32 %v3176_v10, %v2168_v51  ;;  %v2935_v54 = vpop.f32.mrb[59].mxu1  ;;  %v3972_v9 = vmov %v2186_v32  ;;  %238 = sbr.rel (!%p236_p4) target bundleno = 143 (0x8f), region = 77  ;;  %2191 = vst [vmem:[%s3255_s7 + $0x18] sm:$0xff] (%p236_p4), %v2186_v32 }
 0x30c   : >> { %v2182_v49 = vmax.f32 %v2177_v31, 0.0 }
 0x30e   : >> { %v2187_v63 = vmul.f32 %v2182_v49, %v3265_v15  }
 0x310   : >> { %v3971_v10 = vmov %v2187_v63  ;;  %2192 = vst [vmem:[%s3255_s7 + $0x20] sm:$0xff] (%p236_p4), %v2187_v63 }
 0x311 PF: > { %s14_s15 = sadd.s32 1, %s3172_s15  }
 0x312   : > { %p11_p5 = scmp.ge.s32.totalorder %s14_s15, 4  }
 0x314   :  { %13 = sbr.rel (!%p11_p5) target bundleno = 1 (0x1), region = 88 }

// kernel: encoder_decoder_forward.11
= control target key start
LH: loop header
LB: loop body
LE: loop exit
PB: predicated region body
PF: predicated region fallthrough
CT: control target
= control target key end

     0   :  { %s1059_s1 = inlined_call_operand.vmem [shape: bf16[512,256], index: 1, kind: input, shape index: {}]   ;;  %s1060_s0 = inlined_call_operand.vmem [shape: bf16[32,512], index: 0, kind: input, shape index: {}]   ;;  %s1061_s2 = inlined_call_operand.vmem [shape: f32[1,256], index: 2, kind: input, shape index: {}]   ;;  %s1062_s3 = inlined_call_operand.vmem [shape: bf16[32,256], index: 3, kind: output, shape index: {}]  }
   0x1   :  { %v700_v0 = vld [vmem:[%s1059_s1 + $0x4] ss:$8 sps:$4 sm:$0xff]   ;;  %v704_v2 = vld [vmem:[%s1059_s1] ss:$8 sps:$4 sm:$0xff]   ;;  %v706_v4 = vld [vmem:[%s1059_s1 + $0x14] ss:$8 sps:$4 sm:$0xff]  }
   0x2   :  { %v702_v1 = vld [vmem:[%s1059_s1 + $0x104] ss:$8 sps:$4 sm:$0xff]   ;;  %458 = vmatprep.subr.bf16.mxu1 %v700_v0  ;;  %v705_v3 = vld [vmem:[%s1059_s1 + $0x100] ss:$8 sps:$4 sm:$0xff]   ;;  %v708_v5 = vld [vmem:[%s1059_s1 + $0x114] ss:$8 sps:$4 sm:$0xff]  }
   0x3   :  { %511 = vmatprep.subr.bf16.mxu0 %v702_v1  ;;  %459 = vmatpush1.bf16.msra.mxu1 %v704_v2  ;;  %v710_v6 = vld [vmem:[%s1059_s1 + $0x10] ss:$8 sps:$4 sm:$0xff]   ;;  %v712_v8 = vld [vmem:[%s1059_s1 + $0x24] ss:$8 sps:$4 sm:$0xff]   ;;  %v716_v10 = vld [vmem:[%s1059_s1 + $0x20] ss:$8 sps:$4 sm:$0xff]  }
   0x4   :  { %512 = vmatpush1.bf16.msra.mxu0 %v705_v3  ;;  %460 = vmatprep.subr.bf16.mxu1 %v706_v4  ;;  %v711_v7 = vld [vmem:[%s1059_s1 + $0x110] ss:$8 sps:$4 sm:$0xff]   ;;  %v714_v9 = vld [vmem:[%s1059_s1 + $0x124] ss:$8 sps:$4 sm:$0xff]   ;;  %v717_v11 = vld [vmem:[%s1059_s1 + $0x120] ss:$8 sps:$4 sm:$0xff]  }
   0x5   :  { %513 = vmatprep.subr.bf16.mxu0 %v708_v5  ;;  %v718_v12 = vld [vmem:[%s1059_s1 + $0x34] ss:$8 sps:$4 sm:$0xff]   ;;  %v722_v14 = vld [vmem:[%s1059_s1 + $0x30] ss:$8 sps:$4 sm:$0xff]   ;;  %v724_v16 = vld [vmem:[%s1059_s1 + $0x44] ss:$8 sps:$4 sm:$0xff]  }
   0x6   :  { %v720_v13 = vld [vmem:[%s1059_s1 + $0x134] ss:$8 sps:$4 sm:$0xff]   ;;  %v723_v15 = vld [vmem:[%s1059_s1 + $0x130] ss:$8 sps:$4 sm:$0xff]   ;;  %v726_v17 = vld [vmem:[%s1059_s1 + $0x144] ss:$8 sps:$4 sm:$0xff]  }
   0x7   :  { %461 = vmatpush1.bf16.msra.mxu1 %v710_v6  ;;  %v728_v18 = vld [vmem:[%s1059_s1 + $0x40] ss:$8 sps:$4 sm:$0xff]   ;;  %v730_v20 = vld [vmem:[%s1059_s1 + $0x54] ss:$8 sps:$4 sm:$0xff]   ;;  %v734_v22 = vld [vmem:[%s1059_s1 + $0x50] ss:$8 sps:$4 sm:$0xff]  }
   0x8   :  { %514 = vmatpush1.bf16.msra.mxu0 %v711_v7  ;;  %462 = vmatprep.subr.bf16.mxu1 %v712_v8  ;;  %v729_v19 = vld [vmem:[%s1059_s1 + $0x140] ss:$8 sps:$4 sm:$0xff]   ;;  %v732_v21 = vld [vmem:[%s1059_s1 + $0x154] ss:$8 sps:$4 sm:$0xff]   ;;  %v735_v23 = vld [vmem:[%s1059_s1 + $0x150] ss:$8 sps:$4 sm:$0xff]   ;;  %v88_v8 = vlaneseq }
   0x9   :  { %515 = vmatprep.subr.bf16.mxu0 %v714_v9  ;;  %v736_v24 = vld [vmem:[%s1059_s1 + $0x64] ss:$8 sps:$4 sm:$0xff]   ;;  %v740_v26 = vld [vmem:[%s1059_s1 + $0x60] ss:$8 sps:$4 sm:$0xff]   ;;  %v742_v28 = vld [vmem:[%s1059_s1 + $0x74] ss:$8 sps:$4 sm:$0xff]  }
   0xa   :  { %v738_v25 = vld [vmem:[%s1059_s1 + $0x164] ss:$8 sps:$4 sm:$0xff]   ;;  %v741_v27 = vld [vmem:[%s1059_s1 + $0x160] ss:$8 sps:$4 sm:$0xff]   ;;  %v744_v29 = vld [vmem:[%s1059_s1 + $0x174] ss:$8 sps:$4 sm:$0xff]  }
   0xb   :  { %463 = vmatpush1.bf16.msra.mxu1 %v716_v10  ;;  %v746_v30 = vld [vmem:[%s1059_s1 + $0x70] ss:$8 sps:$4 sm:$0xff]   ;;  %v748_v32 = vld [vmem:[%s1059_s1 + $0x84] ss:$8 sps:$4 sm:$0xff]   ;;  %v752_v34 = vld [vmem:[%s1059_s1 + $0x80] ss:$8 sps:$4 sm:$0xff]  }
   0xc   :  { %516 = vmatpush1.bf16.msra.mxu0 %v717_v11  ;;  %464 = vmatprep.subr.bf16.mxu1 %v718_v12  ;;  %v747_v31 = vld [vmem:[%s1059_s1 + $0x170] ss:$8 sps:$4 sm:$0xff]   ;;  %v750_v33 = vld [vmem:[%s1059_s1 + $0x184] ss:$8 sps:$4 sm:$0xff]   ;;  %v753_v35 = vld [vmem:[%s1059_s1 + $0x180] ss:$8 sps:$4 sm:$0xff]  }
   0xd   :  { %517 = vmatprep.subr.bf16.mxu0 %v720_v13  ;;  %v754_v36 = vld [vmem:[%s1059_s1 + $0x94] ss:$8 sps:$4 sm:$0xff]   ;;  %v758_v38 = vld [vmem:[%s1059_s1 + $0x90] ss:$8 sps:$4 sm:$0xff]   ;;  %v760_v40 = vld [vmem:[%s1059_s1 + $0xa4] ss:$8 sps:$4 sm:$0xff]  }
   0xe   :  { %v756_v37 = vld [vmem:[%s1059_s1 + $0x194] ss:$8 sps:$4 sm:$0xff]   ;;  %v759_v39 = vld [vmem:[%s1059_s1 + $0x190] ss:$8 sps:$4 sm:$0xff]   ;;  %v762_v41 = vld [vmem:[%s1059_s1 + $0x1a4] ss:$8 sps:$4 sm:$0xff]  }
   0xf   :  { %465 = vmatpush1.bf16.msra.mxu1 %v722_v14  ;;  %v764_v42 = vld [vmem:[%s1059_s1 + $0xa0] ss:$8 sps:$4 sm:$0xff]   ;;  %v766_v44 = vld [vmem:[%s1059_s1 + $0xb4] ss:$8 sps:$4 sm:$0xff]   ;;  %v770_v46 = vld [vmem:[%s1059_s1 + $0xb0] ss:$8 sps:$4 sm:$0xff]  }
  0x10   :  { %518 = vmatpush1.bf16.msra.mxu0 %v723_v15  ;;  %466 = vmatprep.subr.bf16.mxu1 %v724_v16  ;;  %v765_v43 = vld [vmem:[%s1059_s1 + $0x1a0] ss:$8 sps:$4 sm:$0xff]   ;;  %v768_v45 = vld [vmem:[%s1059_s1 + $0x1b4] ss:$8 sps:$4 sm:$0xff]   ;;  %v771_v47 = vld [vmem:[%s1059_s1 + $0x1b0] ss:$8 sps:$4 sm:$0xff]  }
  0x11   :  { %519 = vmatprep.subr.bf16.mxu0 %v726_v17  ;;  %v772_v48 = vld [vmem:[%s1059_s1 + $0xc4] ss:$8 sps:$4 sm:$0xff]   ;;  %v776_v52 = vld [vmem:[%s1059_s1 + $0xc0] ss:$8 sps:$4 sm:$0xff]   ;;  %v778_v54 = vld [vmem:[%s1059_s1 + $0xd4] ss:$8 sps:$4 sm:$0xff]  }
  0x12   :  { %v798_v49 = vld [vmem:[%s1060_s0 + $0x4] ss:$16 sps:$4 sm:$0xff]   ;;  %v801_v51 = vld [vmem:[%s1060_s0 + $0xc] ss:$16 sps:$4 sm:$0xff]   ;;  %v777_v53 = vld [vmem:[%s1059_s1 + $0x1c0] ss:$8 sps:$4 sm:$0xff]  }
  0x13   :  { %467 = vmatpush1.bf16.msra.mxu1 %v728_v18  ;;  %v774_v50 = vld [vmem:[%s1059_s1 + $0x1c4] ss:$8 sps:$4 sm:$0xff]   ;;  %490 = vmatprep.mubr.bf16.mxu1 %v798_v49  ;;  %v780_v55 = vld [vmem:[%s1059_s1 + $0x1d4] ss:$8 sps:$4 sm:$0xff]   ;;  %v782_v56 = vld [vmem:[%s1059_s1 + $0xd0] ss:$8 sps:$4 sm:$0xff]  }
  0x14   :  { %520 = vmatpush1.bf16.msra.mxu0 %v729_v19  ;;  %468 = vmatprep.subr.bf16.mxu1 %v730_v20  ;;  %v783_v57 = vld [vmem:[%s1059_s1 + $0x1d0] ss:$8 sps:$4 sm:$0xff]   ;;  %v784_v58 = vld [vmem:[%s1059_s1 + $0xe4] ss:$8 sps:$4 sm:$0xff]   ;;  %v788_v60 = vld [vmem:[%s1059_s1 + $0xe0] ss:$8 sps:$4 sm:$0xff]  }
  0x15   :  { %521 = vmatprep.subr.bf16.mxu0 %v732_v21  ;;  %543 = vmatprep.mubr.bf16.mxu0 %v801_v51  ;;  %v786_v59 = vld [vmem:[%s1059_s1 + $0x1e4] ss:$8 sps:$4 sm:$0xff]   ;;  %v789_v61 = vld [vmem:[%s1059_s1 + $0x1e0] ss:$8 sps:$4 sm:$0xff]   ;;  %v790_v62 = vld [vmem:[%s1059_s1 + $0xf4] ss:$8 sps:$4 sm:$0xff]  }
  0x16   :  { %v792_v63 = vld [vmem:[%s1059_s1 + $0x1f4] ss:$8 sps:$4 sm:$0xff]   ;;  %v794_v0 = vld [vmem:[%s1059_s1 + $0xf0] ss:$8 sps:$4 sm:$0xff]   ;;  %v89_v9 = vshrl.u32 %v88_v8, 7 }
  0x17   :  { %469 = vmatpush1.bf16.msra.mxu1 %v734_v22  ;;  %v795_v1 = vld [vmem:[%s1059_s1 + $0x1f0] ss:$8 sps:$4 sm:$0xff]   ;;  %v802_v4 = vld [vmem:[%s1060_s0 + $0x24] ss:$16 sps:$4 sm:$0xff]   ;;  %v804_v5 = vld [vmem:[%s1060_s0 + $0x2c] ss:$16 sps:$4 sm:$0xff]  }
  0x18   :  { %522 = vmatpush1.bf16.msra.mxu0 %v735_v23  ;;  %470 = vmatprep.subr.bf16.mxu1 %v736_v24  ;;  %v796_v2 = vld [vmem:[%s1060_s0] ss:$16 sps:$4 sm:$0xff]   ;;  %v799_v3 = vld [vmem:[%s1060_s0 + $0x8] ss:$16 sps:$4 sm:$0xff]   ;;  %v90_v10 = vsub.s32 0, %v89_v9  ;;  %v94_v12 = vsub.s32 1, %v89_v9 }
  0x19   :  { %523 = vmatprep.subr.bf16.mxu0 %v738_v25  ;;  %v806_v6 = vld [vmem:[%s1060_s0 + $0x20] ss:$16 sps:$4 sm:$0xff]   ;;  %v807_v7 = vld [vmem:[%s1060_s0 + $0x28] ss:$16 sps:$4 sm:$0xff]  }
  0x1a   :  { %v86_v11 = vld [vmem:[%s1061_s2] sm:$0x3] }
  0x1b   :  { %471 = vmatpush1.bf16.msra.mxu1 %v740_v26  ;;  %v91_v13 = vrot.slane %v86_v11, %v90_v10  ;;  %v95_v14 = vrot.slane %v86_v11, %v94_v12 }
  0x1c   :  { %524 = vmatpush1.bf16.msra.mxu0 %v741_v27  ;;  %472 = vmatprep.subr.bf16.mxu1 %v742_v28 }
  0x1d   :  { %525 = vmatprep.subr.bf16.mxu0 %v744_v29 }
  0x1f   :  { %473 = vmatpush1.bf16.msra.mxu1 %v746_v30 }
  0x20   :  { %526 = vmatpush1.bf16.msra.mxu0 %v747_v31  ;;  %474 = vmatprep.subr.bf16.mxu1 %v748_v32 }
  0x21   :  { %527 = vmatprep.subr.bf16.mxu0 %v750_v33 }
  0x23   :  { %475 = vmatpush1.bf16.msra.mxu1 %v752_v34 }
  0x24   :  { %528 = vmatpush1.bf16.msra.mxu0 %v753_v35  ;;  %476 = vmatprep.subr.bf16.mxu1 %v754_v36 }
  0x25   :  { %529 = vmatprep.subr.bf16.mxu0 %v756_v37 }
  0x27   :  { %477 = vmatpush1.bf16.msra.mxu1 %v758_v38 }
  0x28   :  { %530 = vmatpush1.bf16.msra.mxu0 %v759_v39  ;;  %478 = vmatprep.subr.bf16.mxu1 %v760_v40 }
  0x29   :  { %531 = vmatprep.subr.bf16.mxu0 %v762_v41 }
  0x2b   :  { %479 = vmatpush1.bf16.msra.mxu1 %v764_v42 }
  0x2c   :  { %532 = vmatpush1.bf16.msra.mxu0 %v765_v43  ;;  %480 = vmatprep.subr.bf16.mxu1 %v766_v44 }
  0x2d   :  { %533 = vmatprep.subr.bf16.mxu0 %v768_v45 }
  0x2f   :  { %481 = vmatpush1.bf16.msra.mxu1 %v770_v46 }
  0x30   :  { %534 = vmatpush1.bf16.msra.mxu0 %v771_v47  ;;  %482 = vmatprep.subr.bf16.mxu1 %v772_v48 }
  0x31   :  { %535 = vmatprep.subr.bf16.mxu0 %v774_v50 }
  0x33   :  { %483 = vmatpush1.bf16.msra.mxu1 %v776_v52 }
  0x34   :  { %536 = vmatpush1.bf16.msra.mxu0 %v777_v53  ;;  %484 = vmatprep.subr.bf16.mxu1 %v778_v54 }
  0x35   :  { %537 = vmatprep.subr.bf16.mxu0 %v780_v55 }
  0x37   :  { %485 = vmatpush1.bf16.msra.mxu1 %v782_v56 }
  0x38   :  { %538 = vmatpush1.bf16.msra.mxu0 %v783_v57  ;;  %486 = vmatprep.subr.bf16.mxu1 %v784_v58 }
  0x39   :  { %539 = vmatprep.subr.bf16.mxu0 %v786_v59 }
  0x3b   :  { %487 = vmatpush1.bf16.msra.mxu1 %v788_v60 }
  0x3c   :  { %540 = vmatpush1.bf16.msra.mxu0 %v789_v61  ;;  %488 = vmatprep.subr.bf16.mxu1 %v790_v62 }
  0x3d   :  { %541 = vmatprep.subr.bf16.mxu0 %v792_v63 }
  0x3f   :  { %489 = vmatpush1.bf16.msra.mxu1 %v794_v0 }
  0x40   :  { %542 = vmatpush1.bf16.msra.mxu0 %v795_v1 }
  0x42   :  { %491 = vmatmul.mubr.bf16.vlgmr.msra.gmra.mrb[0].mxu1 %v796_v2 }
  0x43   :  { %544 = vmatmul.mubr.bf16.vlgmr.msra.gmra.mrb[0].mxu0 %v799_v3  ;;  %500 = vmatprep.mubr.bf16.mxu1 %v802_v4 }
  0x44   :  { %553 = vmatprep.mubr.bf16.mxu0 %v804_v5 }
  0x4a   :  { %501 = vmatmul.mubr.bf16.gmra.mrb[4].mxu1 %v806_v6 }
  0x4b   :  { %554 = vmatmul.mubr.bf16.gmra.mrb[4].mxu0 %v807_v7 }
 0x115   :  { %v492_v15 = vpop.f32.mrb[0].mxu1 }
 0x116   :  { %v545_v16 = vpop.f32.mrb[0].mxu0  ;;  %v493_v17 = vadd.f32 %v492_v15, %v91_v13  ;;  %v494_v18 = vpop.f32.mrb[1].mxu1 }
 0x117   :  { %v547_v19 = vpop.f32.mrb[1].mxu0  ;;  %v495_v20 = vadd.f32 %v494_v18, %v95_v14  ;;  %v496_v21 = vpop.f32.mrb[2].mxu1 }
 0x118   :  { %v549_v22 = vpop.f32.mrb[2].mxu0  ;;  %v546_v23 = vadd.f32 %v545_v16, %v493_v17  ;;  %v497_v24 = vadd.f32 %v496_v21, %v91_v13  ;;  %v498_v25 = vpop.f32.mrb[3].mxu1 }
 0x119   :  { %v551_v26 = vpop.f32.mrb[3].mxu0  ;;  %v548_v27 = vadd.f32 %v547_v19, %v495_v20  ;;  %v499_v28 = vadd.f32 %v498_v25, %v95_v14 }
 0x11a   :  { %v564_v29 = vmax.f32 %v546_v23, 0.0  ;;  %v550_v30 = vadd.f32 %v549_v22, %v497_v24 }
 0x11b   :  { %v565_v31 = vmax.f32 %v548_v27, 0.0  ;;  %v552_v32 = vadd.f32 %v551_v26, %v499_v28 }
 0x11c   :  { %v566_v33 = vmax.f32 %v550_v30, 0.0 }
 0x11d   :  { %v680_v34 = vpack.c.bf16 %v565_v31, %v564_v29  ;;  %v567_v35 = vmax.f32 %v552_v32, 0.0  ;;  %v502_v36 = vpop.f32.mrb[4].mxu1 }
 0x11e   :  { %v555_v37 = vpop.f32.mrb[4].mxu0  ;;  %v503_v38 = vadd.f32 %v502_v36, %v91_v13  ;;  %v504_v39 = vpop.f32.mrb[5].mxu1 }
 0x11f   :  { %v557_v40 = vpop.f32.mrb[5].mxu0  ;;  %596 = vst [vmem:[%s1062_s3] sm:$0xff] %v680_v34  ;;  %v681_v41 = vpack.c.bf16 %v567_v35, %v566_v33  ;;  %v505_v42 = vadd.f32 %v504_v39, %v95_v14  ;;  %v506_v43 = vpop.f32.mrb[6].mxu1 }
 0x120   :  { %v559_v44 = vpop.f32.mrb[6].mxu0  ;;  %v556_v45 = vadd.f32 %v555_v37, %v503_v38  ;;  %v507_v46 = vadd.f32 %v506_v43, %v91_v13  ;;  %v508_v47 = vpop.f32.mrb[7].mxu1 }
 0x121   :  { %v561_v48 = vpop.f32.mrb[7].mxu0  ;;  %597 = vst [vmem:[%s1062_s3 + $0x8] sm:$0xff] %v681_v41  ;;  %v558_v49 = vadd.f32 %v557_v40, %v505_v42  ;;  %v509_v50 = vadd.f32 %v508_v47, %v95_v14 }
 0x122   :  { %v568_v51 = vmax.f32 %v556_v45, 0.0  ;;  %v560_v52 = vadd.f32 %v559_v44, %v507_v46 }
 0x123   :  { %v569_v53 = vmax.f32 %v558_v49, 0.0  ;;  %v562_v54 = vadd.f32 %v561_v48, %v509_v50 }
 0x124   :  { %v570_v55 = vmax.f32 %v560_v52, 0.0 }
 0x125   :  { %v682_v56 = vpack.c.bf16 %v569_v53, %v568_v51  ;;  %v571_v57 = vmax.f32 %v562_v54, 0.0 }
 0x127   :  { %598 = vst [vmem:[%s1062_s3 + $0x10] sm:$0xff] %v682_v56  ;;  %v683_v58 = vpack.c.bf16 %v571_v57, %v570_v55 }
 0x129   :  { %599 = vst [vmem:[%s1062_s3 + $0x18] sm:$0xff] %v683_v58 }

// kernel: tile.18
= control target key start
LH: loop header
LB: loop body
LE: loop exit
PB: predicated region body
PF: predicated region fallthrough
CT: control target
= control target key end

     0   :  { %s22_s0 = inlined_call_operand.vmem [shape: f32[32], index: 0, kind: input, shape index: {}]   ;;  %s23_s1 = inlined_call_operand.vmem [shape: f32[4,32], index: 1, kind: output, shape index: {}]  }
   0x1   :  { %v4_v0 = vld [vmem:[%s22_s0] ss:$0 sm:$0xff] }
   0x2   :  { %5 = vst [vmem:[%s23_s1] sm:$0xf] %v4_v0 }

// kernel: tile.19
= control target key start
LH: loop header
LB: loop body
LE: loop exit
PB: predicated region body
PF: predicated region fallthrough
CT: control target
= control target key end

     0   :  { %vm7_vm0 = vcmask 261120   ;;  %s37_s8 = smov 32   ;;  %s38_s9 = smov 64   ;;  %vm13_vm1 = vcmask 1048320   ;;  %vm19_vm2 = vcmask 785920   ;;  %vm25_vm3 = vcmask 523520   ;;  %s55_s0 = inlined_call_operand.vmem [shape: f32[4,32], index: 0, kind: input, shape index: {}]   ;;  %s56_s1 = inlined_call_operand.vmem [shape: f32[1,128], index: 1, kind: output, shape index: {}]  }
   0x1   :  { %v4_v0 = vld [vmem:[%s55_s0] sm:$0xf]  ;;  %s36_s0 = smov 96  }
   0x2   :  { %5 = vst [vmem:[#allocation1] sm:$0xf] %v4_v0 }
   0x9   :  { %v10_v1 = vld [vmem:[#allocation1 + $0x3] sm:$0x1]   ;;  %v22_v2 = vld [vmem:[#allocation1 + $0x1] sm:$0x1]   ;;  %v6_v3 = vld [vmem:[#allocation1] sm:$0x1]  }
   0xa   :  { %11 = vrot.lane.b32.xlu0 %v10_v1, %s36_s0  ;;  %23 = vrot.lane.b32.xlu1 %v22_v2, %s37_s8  ;;  %v16_v4 = vld [vmem:[#allocation1 + $0x2] sm:$0x1]   ;;  %8 = vst.msk [vmem:[#allocation0] sm:$0x1] %vm7_vm0, %v6_v3  }
   0xe   :  { %17 = vrot.lane.b32.xlu0 %v16_v4, %s38_s9 }
  0x7c   :  { %v12_v5 = vpop.permute.xlu0 %11   ;;  %v24_v6 = vpop.permute.xlu1 %23  }
  0x7d   :  { %14 = vst.msk [vmem:[#allocation0] sm:$0x1] %vm13_vm1, %v12_v5  }
  0x80   :  { %v18_v7 = vpop.permute.xlu0 %17  }
  0x81   :  { %20 = vst.msk [vmem:[#allocation0] sm:$0x1] %vm19_vm2, %v18_v7  }
  0x82   :  { %26 = vst.msk [vmem:[#allocation0] sm:$0x1] %vm25_vm3, %v24_v6  }
  0x89   :  { %v30_v8 = vld [vmem:[#allocation0] sm:$0x1] }
  0x8a   :  { %32 = vst [vmem:[%s56_s1] sm:$0x1] %v30_v8 }

// kernel: encoder_decoder_forward.12
= control target key start
LH: loop header
LB: loop body
LE: loop exit
PB: predicated region body
PF: predicated region fallthrough
CT: control target
= control target key end

     0   :  { %s836_s1 = inlined_call_operand.vmem [shape: bf16[256,128], index: 1, kind: input, shape index: {}]   ;;  %s837_s0 = inlined_call_operand.vmem [shape: bf16[128,256], index: 0, kind: input, shape index: {}]   ;;  %s838_s2 = inlined_call_operand.vmem [shape: f32[1,128], index: 2, kind: input, shape index: {}]   ;;  %s839_s3 = inlined_call_operand.vmem [shape: bf16[128,128], index: 3, kind: output, shape index: {}]  }
   0x1   :  { %v635_v0 = vld [vmem:[%s836_s1 + $0x40] sm:$0xff]   ;;  %v637_v2 = vld [vmem:[%s836_s1 + $0x48] sm:$0xff]   ;;  %v639_v4 = vld [vmem:[%s836_s1 + $0x50] sm:$0xff]  }
   0x2   :  { %v636_v1 = vld [vmem:[%s836_s1] sm:$0xff]   ;;  %555 = vmatprep.subr.bf16.mxu0 %v635_v0  ;;  %619 = vmatprep.subr.bf16.mxu1 %v635_v0  ;;  %v638_v3 = vld [vmem:[%s836_s1 + $0x8] sm:$0xff]   ;;  %v640_v5 = vld [vmem:[%s836_s1 + $0x10] sm:$0xff]  }
   0x3   :  { %556 = vmatpush3.bf16.msra.mxu0 %v636_v1  ;;  %627 = vmatpush3.bf16.msra.mxu1 %v636_v1  ;;  %v641_v6 = vld [vmem:[%s836_s1 + $0x58] sm:$0xff]   ;;  %v643_v8 = vld [vmem:[%s836_s1 + $0x60] sm:$0xff]   ;;  %v645_v10 = vld [vmem:[%s836_s1 + $0x68] sm:$0xff]  }
   0x4   :  { %557 = vmatprep.subr.bf16.mxu0 %v637_v2  ;;  %620 = vmatprep.subr.bf16.mxu1 %v637_v2  ;;  %v642_v7 = vld [vmem:[%s836_s1 + $0x18] sm:$0xff]   ;;  %v644_v9 = vld [vmem:[%s836_s1 + $0x20] sm:$0xff]   ;;  %v646_v13 = vld [vmem:[%s836_s1 + $0x28] sm:$0xff]  }
   0x5   :  { %v653_v11 = vld [vmem:[%s837_s0 + $0x4] ss:$8 sps:$4 sm:$0xff]   ;;  %v647_v14 = vld [vmem:[%s836_s1 + $0x70] sm:$0xff]   ;;  %v649_v16 = vld [vmem:[%s836_s1 + $0x78] sm:$0xff]  }
   0x6   :  { %v656_v12 = vld [vmem:[%s837_s0 + $0x44] ss:$8 sps:$4 sm:$0xff]   ;;  %278 = vmatprep.mubr.bf16.mxu0 %v653_v11  ;;  %v648_v15 = vld [vmem:[%s836_s1 + $0x30] sm:$0xff]   ;;  %v650_v17 = vld [vmem:[%s836_s1 + $0x38] sm:$0xff]  }
   0x7   :  { %558 = vmatpush3.bf16.msra.mxu0 %v638_v3  ;;  %628 = vmatpush3.bf16.msra.mxu1 %v638_v3  ;;  %v651_v18 = vld [vmem:[%s837_s0] ss:$8 sps:$4 sm:$0xff]   ;;  %v657_v20 = vld [vmem:[%s837_s0 + $0x14] ss:$8 sps:$4 sm:$0xff]   ;;  %v661_v22 = vld [vmem:[%s837_s0 + $0x10] ss:$8 sps:$4 sm:$0xff]  }
   0x8   :  { %559 = vmatprep.subr.bf16.mxu0 %v639_v4  ;;  %621 = vmatprep.subr.bf16.mxu1 %v639_v4  ;;  %v654_v19 = vld [vmem:[%s837_s0 + $0x40] ss:$8 sps:$4 sm:$0xff]   ;;  %v659_v21 = vld [vmem:[%s837_s0 + $0x54] ss:$8 sps:$4 sm:$0xff]   ;;  %v662_v23 = vld [vmem:[%s837_s0 + $0x50] ss:$8 sps:$4 sm:$0xff]  }
   0x9   :  { %310 = vmatprep.mubr.bf16.mxu1 %v656_v12  ;;  %v663_v24 = vld [vmem:[%s837_s0 + $0x24] ss:$8 sps:$4 sm:$0xff]   ;;  %v667_v26 = vld [vmem:[%s837_s0 + $0x20] ss:$8 sps:$4 sm:$0xff]   ;;  %v669_v28 = vld [vmem:[%s837_s0 + $0x34] ss:$8 sps:$4 sm:$0xff]  }
   0xa   :  { %v665_v25 = vld [vmem:[%s837_s0 + $0x64] ss:$8 sps:$4 sm:$0xff]   ;;  %v668_v27 = vld [vmem:[%s837_s0 + $0x60] ss:$8 sps:$4 sm:$0xff]   ;;  %v671_v29 = vld [vmem:[%s837_s0 + $0x74] ss:$8 sps:$4 sm:$0xff]  }
   0xb   :  { %560 = vmatpush3.bf16.msra.mxu0 %v640_v5  ;;  %629 = vmatpush3.bf16.msra.mxu1 %v640_v5  ;;  %v673_v30 = vld [vmem:[%s837_s0 + $0x30] ss:$8 sps:$4 sm:$0xff]   ;;  %v794_v34 = vld [vmem:[%s838_s2] ss:$0 sm:$0xff] }
   0xc   :  { %561 = vmatprep.subr.bf16.mxu0 %v641_v6  ;;  %622 = vmatprep.subr.bf16.mxu1 %v641_v6  ;;  %v674_v31 = vld [vmem:[%s837_s0 + $0x70] ss:$8 sps:$4 sm:$0xff]  }
   0xf   :  { %562 = vmatpush3.bf16.msra.mxu0 %v642_v7  ;;  %630 = vmatpush3.bf16.msra.mxu1 %v642_v7 }
  0x10   :  { %563 = vmatprep.subr.bf16.mxu0 %v643_v8  ;;  %623 = vmatprep.subr.bf16.mxu1 %v643_v8 }
  0x13   :  { %564 = vmatpush3.bf16.msra.mxu0 %v644_v9  ;;  %631 = vmatpush3.bf16.msra.mxu1 %v644_v9 }
  0x14   :  { %565 = vmatprep.subr.bf16.mxu0 %v645_v10  ;;  %624 = vmatprep.subr.bf16.mxu1 %v645_v10 }
  0x17   :  { %566 = vmatpush3.bf16.msra.mxu0 %v646_v13  ;;  %632 = vmatpush3.bf16.msra.mxu1 %v646_v13 }
  0x18   :  { %567 = vmatprep.subr.bf16.mxu0 %v647_v14  ;;  %625 = vmatprep.subr.bf16.mxu1 %v647_v14 }
  0x1b   :  { %568 = vmatpush3.bf16.msra.mxu0 %v648_v15  ;;  %633 = vmatpush3.bf16.msra.mxu1 %v648_v15 }
  0x1c   :  { %569 = vmatprep.subr.bf16.mxu0 %v649_v16  ;;  %626 = vmatprep.subr.bf16.mxu1 %v649_v16 }
  0x1f   :  { %570 = vmatpush3.bf16.msra.mxu0 %v650_v17  ;;  %634 = vmatpush3.bf16.msra.mxu1 %v650_v17 }
  0x22   :  { %279 = vmatmul.mubr.bf16.vlgmr.msra.gmra.mrb[0].mxu0 %v651_v18  ;;  %311 = vmatmul.mubr.bf16.vlgmr.msra.gmra.mrb[0].mxu1 %v654_v19 }
  0x23   :  { %286 = vmatprep.mubr.bf16.mxu0 %v657_v20  ;;  %318 = vmatprep.mubr.bf16.mxu1 %v659_v21 }
  0x2a   :  { %287 = vmatmul.mubr.bf16.gmra.mrb[4].mxu0 %v661_v22  ;;  %319 = vmatmul.mubr.bf16.gmra.mrb[4].mxu1 %v662_v23 }
  0x2b   :  { %294 = vmatprep.mubr.bf16.mxu0 %v663_v24  ;;  %326 = vmatprep.mubr.bf16.mxu1 %v665_v25 }
  0x32   :  { %295 = vmatmul.mubr.bf16.gmra.mrb[8].mxu0 %v667_v26  ;;  %327 = vmatmul.mubr.bf16.gmra.mrb[8].mxu1 %v668_v27 }
  0x33   :  { %302 = vmatprep.mubr.bf16.mxu0 %v669_v28  ;;  %334 = vmatprep.mubr.bf16.mxu1 %v671_v29 }
  0x3a   :  { %303 = vmatmul.mubr.bf16.gmra.mrb[12].mxu0 %v673_v30  ;;  %335 = vmatmul.mubr.bf16.gmra.mrb[12].mxu1 %v674_v31 }
  0xf5   :  { %v571_v32 = vpop.f32.mrb[0].mxu0  ;;  %v595_v33 = vpop.f32.mrb[0].mxu1 }
  0xf6   :  { %v572_v35 = vpop.f32.mrb[1].mxu0  ;;  %v596_v36 = vpop.f32.mrb[1].mxu1 }
  0xf7   :  { %v573_v37 = vadd.f32 %v572_v35, %v571_v32  ;;  %v597_v38 = vadd.f32 %v596_v36, %v595_v33  ;;  %v574_v39 = vpop.f32.mrb[2].mxu0  ;;  %v598_v40 = vpop.f32.mrb[2].mxu1 }
  0xf8   :  { %v575_v41 = vpop.f32.mrb[3].mxu0  ;;  %v599_v42 = vpop.f32.mrb[3].mxu1 }
  0xf9   :  { %v281_v43 = vadd.f32 %v573_v37, %v794_v34  ;;  %v313_v44 = vadd.f32 %v597_v38, %v794_v34  ;;  %v576_v45 = vadd.f32 %v575_v41, %v574_v39  ;;  %v600_v46 = vadd.f32 %v599_v42, %v598_v40 }
  0xfb   :  { %v284_v47 = vadd.f32 %v576_v45, %v794_v34  ;;  %v316_v48 = vadd.f32 %v600_v46, %v794_v34  ;;  %v343_v49 = vmax.f32 %v281_v43, 0.0  ;;  %v351_v50 = vmax.f32 %v313_v44, 0.0 }
  0xfd   :  { %v344_v51 = vmax.f32 %v284_v47, 0.0  ;;  %v352_v52 = vmax.f32 %v316_v48, 0.0  ;;  %v577_v53 = vpop.f32.mrb[4].mxu0  ;;  %v601_v54 = vpop.f32.mrb[4].mxu1 }
  0xfe   :  { %v578_v55 = vpop.f32.mrb[5].mxu0  ;;  %v602_v56 = vpop.f32.mrb[5].mxu1 }
  0xff   :  { %v511_v57 = vpack.c.bf16 %v344_v51, %v343_v49  ;;  %v531_v58 = vpack.c.bf16 %v352_v52, %v351_v50  ;;  %v579_v59 = vadd.f32 %v578_v55, %v577_v53  ;;  %v603_v60 = vadd.f32 %v602_v56, %v601_v54  ;;  %v580_v61 = vpop.f32.mrb[6].mxu0  ;;  %v604_v62 = vpop.f32.mrb[6].mxu1 }
 0x100   :  { %v581_v63 = vpop.f32.mrb[7].mxu0  ;;  %v605_v0 = vpop.f32.mrb[7].mxu1 }
 0x101   :  { %512 = vst [vmem:[%s839_s3] sm:$0xff] %v511_v57   ;;  %551 = vst [vmem:[%s839_s3 + $0x20] sm:$0xff] %v531_v58   ;;  %v289_v1 = vadd.f32 %v579_v59, %v794_v34  ;;  %v321_v2 = vadd.f32 %v603_v60, %v794_v34  ;;  %v582_v3 = vadd.f32 %v581_v63, %v580_v61 }
 0x102   :  { %v606_v4 = vadd.f32 %v605_v0, %v604_v62 }
 0x103   :  { %v292_v5 = vadd.f32 %v582_v3, %v794_v34  ;;  %v345_v7 = vmax.f32 %v289_v1, 0.0  ;;  %v353_v8 = vmax.f32 %v321_v2, 0.0 }
 0x104   :  { %v324_v6 = vadd.f32 %v606_v4, %v794_v34 }
 0x105   :  { %v346_v9 = vmax.f32 %v292_v5, 0.0  ;;  %v583_v11 = vpop.f32.mrb[8].mxu0  ;;  %v607_v12 = vpop.f32.mrb[8].mxu1 }
 0x106   :  { %v354_v10 = vmax.f32 %v324_v6, 0.0  ;;  %v584_v13 = vpop.f32.mrb[9].mxu0  ;;  %v608_v14 = vpop.f32.mrb[9].mxu1 }
 0x107   :  { %v516_v15 = vpack.c.bf16 %v346_v9, %v345_v7  ;;  %v585_v17 = vadd.f32 %v584_v13, %v583_v11  ;;  %v609_v18 = vadd.f32 %v608_v14, %v607_v12  ;;  %v586_v19 = vpop.f32.mrb[10].mxu0  ;;  %v610_v20 = vpop.f32.mrb[10].mxu1 }
 0x108   :  { %v536_v16 = vpack.c.bf16 %v354_v10, %v353_v8  ;;  %v587_v21 = vpop.f32.mrb[11].mxu0  ;;  %v611_v22 = vpop.f32.mrb[11].mxu1 }
 0x109   :  { %548 = vst [vmem:[%s839_s3 + $0x8] sm:$0xff] %v516_v15   ;;  %v297_v23 = vadd.f32 %v585_v17, %v794_v34  ;;  %v329_v24 = vadd.f32 %v609_v18, %v794_v34  ;;  %v588_v25 = vadd.f32 %v587_v21, %v586_v19  ;;  %v612_v26 = vadd.f32 %v611_v22, %v610_v20 }
 0x10a   :  { %552 = vst [vmem:[%s839_s3 + $0x28] sm:$0xff] %v536_v16  }
 0x10b   :  { %v300_v27 = vadd.f32 %v588_v25, %v794_v34  ;;  %v332_v28 = vadd.f32 %v612_v26, %v794_v34  ;;  %v347_v29 = vmax.f32 %v297_v23, 0.0  ;;  %v355_v30 = vmax.f32 %v329_v24, 0.0 }
 0x10d   :  { %v348_v31 = vmax.f32 %v300_v27, 0.0  ;;  %v356_v32 = vmax.f32 %v332_v28, 0.0  ;;  %v589_v33 = vpop.f32.mrb[12].mxu0  ;;  %v613_v35 = vpop.f32.mrb[12].mxu1 }
 0x10e   :  { %v590_v36 = vpop.f32.mrb[13].mxu0  ;;  %v614_v37 = vpop.f32.mrb[13].mxu1 }
 0x10f   :  { %v521_v38 = vpack.c.bf16 %v348_v31, %v347_v29  ;;  %v541_v39 = vpack.c.bf16 %v356_v32, %v355_v30  ;;  %v591_v40 = vadd.f32 %v590_v36, %v589_v33  ;;  %v615_v41 = vadd.f32 %v614_v37, %v613_v35  ;;  %v592_v42 = vpop.f32.mrb[14].mxu0  ;;  %v616_v43 = vpop.f32.mrb[14].mxu1 }
 0x110   :  { %v593_v44 = vpop.f32.mrb[15].mxu0  ;;  %v617_v45 = vpop.f32.mrb[15].mxu1 }
 0x111   :  { %549 = vst [vmem:[%s839_s3 + $0x10] sm:$0xff] %v521_v38   ;;  %553 = vst [vmem:[%s839_s3 + $0x30] sm:$0xff] %v541_v39   ;;  %v305_v46 = vadd.f32 %v591_v40, %v794_v34  ;;  %v337_v47 = vadd.f32 %v615_v41, %v794_v34  ;;  %v594_v48 = vadd.f32 %v593_v44, %v592_v42 }
 0x112   :  { %v618_v49 = vadd.f32 %v617_v45, %v616_v43 }
 0x113   :  { %v308_v50 = vadd.f32 %v594_v48, %v794_v34  ;;  %v349_v52 = vmax.f32 %v305_v46, 0.0  ;;  %v357_v53 = vmax.f32 %v337_v47, 0.0 }
 0x114   :  { %v340_v51 = vadd.f32 %v618_v49, %v794_v34 }
 0x115   :  { %v350_v54 = vmax.f32 %v308_v50, 0.0 }
 0x116   :  { %v358_v55 = vmax.f32 %v340_v51, 0.0 }
 0x117   :  { %v526_v56 = vpack.c.bf16 %v350_v54, %v349_v52 }
 0x118   :  { %v546_v57 = vpack.c.bf16 %v358_v55, %v357_v53 }
 0x119   :  { %550 = vst [vmem:[%s839_s3 + $0x18] sm:$0xff] %v526_v56  }
 0x11a   :  { %554 = vst [vmem:[%s839_s3 + $0x38] sm:$0xff] %v546_v57  }

// kernel: encoder_decoder_forward.13
= control target key start
LH: loop header
LB: loop body
LE: loop exit
PB: predicated region body
PF: predicated region fallthrough
CT: control target
= control target key end

     0   :  { %s8304_s18 = smov 0   ;;  %s10325_s0 = inlined_call_operand.vmem [shape: bf16[512,2688], index: 0, kind: input, shape index: {}]   ;;  %s10326_s1 = inlined_call_operand.vmem [shape: bf16[2688,128], index: 1, kind: input, shape index: {}]   ;;  %s10327_s2 = inlined_call_operand.vmem [shape: f32[1,128], index: 2, kind: input, shape index: {}]   ;;  %s10328_s3 = inlined_call_operand.vmem [shape: f32[512,1], index: 3, kind: input, shape index: {}]   ;;  %s10329_s4 = inlined_call_operand.vmem [shape: f32[512,128], index: 4, kind: output, shape index: {0}]   ;;  %s10330_s5 = inlined_call_operand.vmem [shape: f32[512,128], index: 5, kind: output, shape index: {1}]  }
   0x1 LB: > { %s5860_s19 = sadd.s32 4294967295, %s8271_s18   ;;  %p5864_p0 = scmp.ge.s32.totalorder %s8271_s18, 1  ;;  %s8271_s18 = sphi %s8304_s18, %s16_s18  }
   0x2   : > { %p203_p1 = scmp.lt.s32.totalorder %s8271_s18, 3 }
   0x4   : > { %p204_p2 = pnand %p5864_p0, %p203_p1 }
   0x5   : > { %v7600_v0 = vld [vmem:[%s10326_s1 + $0x40] sm:$0xff] (!%p204_p2)   ;;  %s5865_s22 = sshll.u32 (!%p204_p2), %s5860_s19, 5  ;;  %v7602_v2 = vld [vmem:[%s10326_s1 + $0x48] sm:$0xff] (!%p204_p2)   ;;  %v7604_v4 = vld [vmem:[%s10326_s1 + $0x50] sm:$0xff] (!%p204_p2)  }
   0x6   : > { %207 = sbr.rel (%p204_p2) target bundleno = 928 (0x3a0), region = 36  ;;  %v7601_v1 = vld [vmem:[%s10326_s1] sm:$0xff] (!%p204_p2)   ;;  %6380 = vmatprep.subr.bf16.mxu0 (!%p204_p2), %v7600_v0  ;;  %7572 = vmatprep.subr.bf16.mxu1 (!%p204_p2), %v7600_v0  ;;  %p243_p3 = scmp.lt.s32.totalorder (!%p204_p2), %s5865_s22, 63  ;;  %v7603_v3 = vld [vmem:[%s10326_s1 + $0x8] sm:$0xff] (!%p204_p2)   ;;  %v7605_v5 = vld [vmem:[%s10326_s1 + $0x10] sm:$0xff] (!%p204_p2)  }
   0x7   : > { %6381 = vmatpush3.bf16.msra.mxu0 (!%p204_p2), %v7601_v1  ;;  %7580 = vmatpush3.bf16.msra.mxu1 (!%p204_p2), %v7601_v1  ;;  %v7606_v6 = vld [vmem:[%s10326_s1 + $0x58] sm:$0xff] (!%p204_p2)   ;;  %v7608_v8 = vld [vmem:[%s10326_s1 + $0x60] sm:$0xff] (!%p204_p2)   ;;  %v7610_v10 = vld [vmem:[%s10326_s1 + $0x68] sm:$0xff] (!%p204_p2)  }
   0x8   : > { %6382 = vmatprep.subr.bf16.mxu0 (!%p204_p2), %v7602_v2  ;;  %7573 = vmatprep.subr.bf16.mxu1 (!%p204_p2), %v7602_v2  ;;  %v7607_v7 = vld [vmem:[%s10326_s1 + $0x18] sm:$0xff] (!%p204_p2)   ;;  %v7609_v9 = vld [vmem:[%s10326_s1 + $0x20] sm:$0xff] (!%p204_p2)   ;;  %v7611_v13 = vld [vmem:[%s10326_s1 + $0x28] sm:$0xff] (!%p204_p2)  }
   0x9   : > { %v7612_v14 = vld [vmem:[%s10326_s1 + $0x70] sm:$0xff] (!%p204_p2)   ;;  %v7614_v16 = vld [vmem:[%s10326_s1 + $0x78] sm:$0xff] (!%p204_p2)   ;;  %v7622_v18 = vld [vmem:[%s10326_s1 + $0xc0] sm:$0xff] (!%p204_p2)  }
   0xa   : > { %v7613_v15 = vld [vmem:[%s10326_s1 + $0x30] sm:$0xff] (!%p204_p2)   ;;  %v7615_v17 = vld [vmem:[%s10326_s1 + $0x38] sm:$0xff] (!%p204_p2)   ;;  %v7625_v21 = vld [vmem:[%s10326_s1 + $0x140] sm:$0xff] (!%p204_p2)  }
   0xb   : > { %6383 = vmatpush3.bf16.msra.mxu0 (!%p204_p2), %v7603_v3  ;;  %7581 = vmatpush3.bf16.msra.mxu1 (!%p204_p2), %v7603_v3  ;;  %v7623_v22 = vld [vmem:[%s10326_s1 + $0x80] sm:$0xff] (!%p204_p2)   ;;  %v7624_v23 = vld [vmem:[%s10326_s1 + $0xc8] sm:$0xff] (!%p204_p2)   ;;  %v7634_v31 = vld [vmem:[%s10326_s1 + $0xd0] sm:$0xff] (!%p204_p2)  }
   0xc   : > { %6384 = vmatprep.subr.bf16.mxu0 (!%p204_p2), %v7604_v4  ;;  %7574 = vmatprep.subr.bf16.mxu1 (!%p204_p2), %v7604_v4  ;;  %v7627_v24 = vld [vmem:[%s10326_s1 + $0x100] sm:$0xff] (!%p204_p2)   ;;  %v7626_v27 = vld [vmem:[%s10326_s1 + $0x88] sm:$0xff] (!%p204_p2)   ;;  %v7635_v32 = vld [vmem:[%s10326_s1 + $0x90] sm:$0xff] (!%p204_p2)  }
   0xd   : > { %s10332_s22 = smov (!%p243_p3, %s5865_s22), 63  ;;  %v7645_v28 = vld [vmem:[%s10326_s1 + $0x148] sm:$0xff]   ;;  %v7636_v34 = vld [vmem:[%s10326_s1 + $0xd8] sm:$0xff]   ;;  %v7644_v40 = vld [vmem:[%s10326_s1 + $0xe0] sm:$0xff]  }
   0xe   : > { %s7588_s10 = smul.u32 84, %s10332_s22  ;;  %v7647_v33 = vld [vmem:[%s10326_s1 + $0x108] sm:$0xff]   ;;  %v7637_v37 = vld [vmem:[%s10326_s1 + $0x98] sm:$0xff]   ;;  %v7646_v41 = vld [vmem:[%s10326_s1 + $0xa0] sm:$0xff]   ;;  %s9544_s9 = sshll.u32 %s10332_s22, 3 }
   0xf   : > { %6385 = vmatpush3.bf16.msra.mxu0 %v7605_v5  ;;  %7582 = vmatpush3.bf16.msra.mxu1 %v7605_v5  ;;  %v7648_v42 = vld [vmem:[%s10326_s1 + $0xe8] sm:$0xff]   ;;  %v7659_v43 = vld [vmem:[%s10326_s1 + $0x150] sm:$0xff]   ;;  %v7658_v52 = vld [vmem:[%s10326_s1 + $0xf8] sm:$0xff]   ;;  %s9551_s12 = scalar_lea.vmem %s10328_s3, %s9544_s9  ;;  %s10162_s13 = scalar_lea.vmem %s10329_s4, %s9544_s9 }
  0x10   : > { %6386 = vmatprep.subr.bf16.mxu0 %v7606_v6  ;;  %7575 = vmatprep.subr.bf16.mxu1 %v7606_v6  ;;  %s8345_s17 = scalar_lea.vmem %s10325_s0, %s7588_s10  ;;  %v7661_v46 = vld [vmem:[%s10326_s1 + $0x110] sm:$0xff]   ;;  %v7649_v47 = vld [vmem:[%s10326_s1 + $0xa8] sm:$0xff]   ;;  %v7676_v55 = vld [vmem:[%s10326_s1 + $0x158] sm:$0xff]   ;;  %s10170_s16 = scalar_lea.vmem %s10330_s5, %s9544_s9 }
  0x11   : > { %v7618_v11 = vld [vmem:[%s8345_s17 + $0x4] ss:$84 sps:$4 sm:$0xff]   ;;  %v7616_v19 = vld [vmem:[%s8345_s17] ss:$84 sps:$4 sm:$0xff]   ;;  %v7632_v29 = vld [vmem:[%s8345_s17 + $0xa8] ss:$84 sps:$4 sm:$0xff]  }
  0x12   : > { %v7621_v12 = vld [vmem:[%s8345_s17 + $0x7e4] ss:$84 sps:$4 sm:$0xff]   ;;  %3699 = vmatprep.mubr.bf16.mxu0 %v7618_v11  ;;  %v7619_v20 = vld [vmem:[%s8345_s17 + $0x7e0] ss:$84 sps:$4 sm:$0xff]   ;;  %v7633_v30 = vld [vmem:[%s8345_s17 + $0x888] ss:$84 sps:$4 sm:$0xff]  }
  0x13   : > { %6387 = vmatpush3.bf16.msra.mxu0 %v7607_v7  ;;  %7583 = vmatpush3.bf16.msra.mxu1 %v7607_v7  ;;  %v7628_v25 = vld [vmem:[%s8345_s17 + $0xac] ss:$84 sps:$4 sm:$0xff]   ;;  %v7638_v35 = vld [vmem:[%s8345_s17 + $0x154] ss:$84 sps:$4 sm:$0xff]   ;;  %v7642_v38 = vld [vmem:[%s8345_s17 + $0x150] ss:$84 sps:$4 sm:$0xff]  }
  0x14   : > { %6388 = vmatprep.subr.bf16.mxu0 %v7608_v8  ;;  %7576 = vmatprep.subr.bf16.mxu1 %v7608_v8  ;;  %v7630_v26 = vld [vmem:[%s8345_s17 + $0x88c] ss:$84 sps:$4 sm:$0xff]   ;;  %v7640_v36 = vld [vmem:[%s8345_s17 + $0x934] ss:$84 sps:$4 sm:$0xff]   ;;  %v7643_v39 = vld [vmem:[%s8345_s17 + $0x930] ss:$84 sps:$4 sm:$0xff]  }
  0x15   : > { %3795 = vmatprep.mubr.bf16.mxu1 %v7621_v12  ;;  %v7650_v44 = vld [vmem:[%s8345_s17 + $0x1fc] ss:$84 sps:$4 sm:$0xff]   ;;  %v7654_v49 = vld [vmem:[%s8345_s17 + $0x1f8] ss:$84 sps:$4 sm:$0xff]   ;;  %v7667_v59 = vld [vmem:[%s8345_s17 + $0x2a0] ss:$84 sps:$4 sm:$0xff]  }
  0x16   : > { %v7652_v45 = vld [vmem:[%s8345_s17 + $0x9dc] ss:$84 sps:$4 sm:$0xff]   ;;  %v7655_v50 = vld [vmem:[%s8345_s17 + $0x9d8] ss:$84 sps:$4 sm:$0xff]   ;;  %v7668_v60 = vld [vmem:[%s10326_s1 + $0x1c0] sm:$0xff]  }
  0x17   : > { %6389 = vmatpush3.bf16.msra.mxu0 %v7609_v9  ;;  %7584 = vmatpush3.bf16.msra.mxu1 %v7609_v9  ;;  %v7656_v48 = vld [vmem:[%s10326_s1 + $0xf0] sm:$0xff]   ;;  %v7662_v53 = vld [vmem:[%s8345_s17 + $0x2a4] ss:$84 sps:$4 sm:$0xff]   ;;  %v7666_v54 = vld [vmem:[%s8345_s17 + $0xc] ss:$84 sps:$4 sm:$0xff]  }
  0x18   : > { %6390 = vmatprep.subr.bf16.mxu0 %v7610_v10  ;;  %7577 = vmatprep.subr.bf16.mxu1 %v7610_v10  ;;  %v7657_v51 = vld [vmem:[%s10326_s1 + $0xb0] sm:$0xff]   ;;  %v7677_v56 = vld [vmem:[%s10326_s1 + $0x118] sm:$0xff]   ;;  %v7669_v61 = vld [vmem:[%s10326_s1 + $0x180] sm:$0xff]  }
  0x19   : > { %v7660_v57 = vld [vmem:[%s10326_s1 + $0xb8] sm:$0xff]   ;;  %v7670_v62 = vld [vmem:[%s8345_s17 + $0x34c] ss:$84 sps:$4 sm:$0xff]   ;;  %v7672_v63 = vld [vmem:[%s8345_s17 + $0xb4] ss:$84 sps:$4 sm:$0xff]  }
  0x1a   : > { %v7664_v58 = vld [vmem:[%s8345_s17 + $0x8] ss:$84 sps:$4 sm:$0xff]   ;;  %v7686_v0 = vld [vmem:[%s10326_s1 + $0x160] sm:$0xff]   ;;  %v7701_v9 = vld [vmem:[%s10326_s1 + $0x1d0] sm:$0xff]  }
  0x1b   : > { %6391 = vmatpush3.bf16.msra.mxu0 %v7611_v13  ;;  %7585 = vmatpush3.bf16.msra.mxu1 %v7611_v13  ;;  %v7684_v1 = vld [vmem:[%s10326_s1 + $0x1c8] sm:$0xff]   ;;  %v7687_v2 = vld [vmem:[%s10326_s1 + $0x120] sm:$0xff]   ;;  %v7680_v7 = vld [vmem:[%s8345_s17 + $0x15c] ss:$84 sps:$4 sm:$0xff]  }
  0x1c   : > { %6392 = vmatprep.subr.bf16.mxu0 %v7612_v14  ;;  %7578 = vmatprep.subr.bf16.mxu1 %v7612_v14  ;;  %v7685_v3 = vld [vmem:[%s10326_s1 + $0x188] sm:$0xff]   ;;  %v7675_v5 = vld [vmem:[%s8345_s17 + $0xb0] ss:$84 sps:$4 sm:$0xff]  }
  0x1d   : > { %v7674_v4 = vld [vmem:[%s8345_s17 + $0x348] ss:$84 sps:$4 sm:$0xff]   ;;  %v7703_v11 = vld [vmem:[%s10326_s1 + $0x190] sm:$0xff]   ;;  %v7683_v13 = vld [vmem:[%s8345_s17 + $0x158] ss:$84 sps:$4 sm:$0xff]  }
  0x1e   : > { %v7678_v6 = vld [vmem:[%s8345_s17 + $0x3f4] ss:$84 sps:$4 sm:$0xff]   ;;  %v7682_v12 = vld [vmem:[%s8345_s17 + $0x3f0] ss:$84 sps:$4 sm:$0xff]  }
  0x1f   : > { %6393 = vmatpush3.bf16.msra.mxu0 %v7613_v15  ;;  %7586 = vmatpush3.bf16.msra.mxu1 %v7613_v15  ;;  %v7700_v8 = vld [vmem:[%s10326_s1 + $0x168] sm:$0xff]   ;;  %v7688_v14 = vld [vmem:[%s8345_s17 + $0x49c] ss:$84 sps:$4 sm:$0xff]  }
  0x20   : > { %6394 = vmatprep.subr.bf16.mxu0 %v7614_v16  ;;  %7579 = vmatprep.subr.bf16.mxu1 %v7614_v16  ;;  %v7702_v10 = vld [vmem:[%s10326_s1 + $0x128] sm:$0xff]   ;;  %v7710_v15 = vld [vmem:[%s10326_s1 + $0x170] sm:$0xff]  }
  0x21   : > { %v7711_v16 = vld [vmem:[%s10326_s1 + $0x130] sm:$0xff]  }
  0x23   : > { %6395 = vmatpush3.bf16.msra.mxu0 %v7615_v17  ;;  %7587 = vmatpush3.bf16.msra.mxu1 %v7615_v17  ;;  %v7690_v17 = vld [vmem:[%s8345_s17 + $0x204] ss:$84 sps:$4 sm:$0xff]  }
  0x24   : > { %6492 = vmatprep.subr.bf16.mxu1 %v7622_v18  ;;  %6604 = vmatprep.subr.bf16.mxu0 %v7625_v21  ;;  %v7718_v18 = vld [vmem:[%s10326_s1 + $0x1d8] sm:$0xff]   ;;  %v7693_v21 = vld [vmem:[%s8345_s17 + $0x200] ss:$84 sps:$4 sm:$0xff]  }
  0x26   : > { %3700 = vmatmul.mubr.bf16.vlgmr.msra.gmra.mrb[0].mxu0 %v7616_v19  ;;  %3796 = vmatmul.mubr.bf16.vlgmr.msra.gmra.mrb[0].mxu1 %v7619_v20  ;;  %v7719_v19 = vld [vmem:[%s10326_s1 + $0x198] sm:$0xff]  }
  0x27   : > { %6493 = vmatpush3.bf16.msra.mxu1 %v7623_v22  ;;  %6605 = vmatpush3.bf16.msra.mxu0 %v7627_v24  ;;  %v7692_v20 = vld [vmem:[%s8345_s17 + $0x498] ss:$84 sps:$4 sm:$0xff]  }
  0x28   : > { %6494 = vmatprep.subr.bf16.mxu1 %v7624_v23  ;;  %3707 = vmatprep.mubr.bf16.mxu0 %v7628_v25  ;;  %v7694_v22 = vld [vmem:[%s8345_s17 + $0x544] ss:$84 sps:$4 sm:$0xff]   ;;  %v7696_v23 = vld [vmem:[%s8345_s17 + $0x2ac] ss:$84 sps:$4 sm:$0xff]  }
  0x29   : > { %3803 = vmatprep.mubr.bf16.mxu1 %v7630_v26  ;;  %6606 = vmatprep.subr.bf16.mxu0 %v7645_v28  ;;  %v7726_v24 = vld [vmem:[%s10326_s1 + $0x178] sm:$0xff]   ;;  %v7734_v26 = vld [vmem:[%s10326_s1 + $0x1e0] sm:$0xff]  }
  0x2a   : > { %v7727_v25 = vld [vmem:[%s10326_s1 + $0x138] sm:$0xff]  }
  0x2b   : > { %6495 = vmatpush3.bf16.msra.mxu1 %v7626_v27  ;;  %6607 = vmatpush3.bf16.msra.mxu0 %v7647_v33  ;;  %v7698_v27 = vld [vmem:[%s8345_s17 + $0x540] ss:$84 sps:$4 sm:$0xff]   ;;  %v7699_v28 = vld [vmem:[%s8345_s17 + $0x2a8] ss:$84 sps:$4 sm:$0xff]  }
  0x2c   : > { %6496 = vmatprep.subr.bf16.mxu1 %v7634_v31  ;;  %6608 = vmatprep.subr.bf16.mxu0 %v7659_v43  ;;  %v7704_v31 = vld [vmem:[%s8345_s17 + $0x5ec] ss:$84 sps:$4 sm:$0xff]   ;;  %v7708_v33 = vld [vmem:[%s8345_s17 + $0x5e8] ss:$84 sps:$4 sm:$0xff]   ;;  %v7766_v43 = vld [vmem:[%s10326_s1 + $0x1f0] sm:$0xff]  }
  0x2e   : > { %3708 = vmatmul.mubr.bf16.gmra.mrb[4].mxu0 %v7632_v29  ;;  %3804 = vmatmul.mubr.bf16.gmra.mrb[4].mxu1 %v7633_v30  ;;  %v7735_v29 = vld [vmem:[%s10326_s1 + $0x1a0] sm:$0xff]  }
  0x2f   : > { %6497 = vmatpush3.bf16.msra.mxu1 %v7635_v32  ;;  %3715 = vmatprep.mubr.bf16.mxu0 %v7638_v35  ;;  %v7736_v30 = vld [vmem:[%s10326_s1 + $0x240] sm:$0xff]   ;;  %v7706_v32 = vld [vmem:[%s8345_s17 + $0x354] ss:$84 sps:$4 sm:$0xff]  }
  0x30   : > { %6498 = vmatprep.subr.bf16.mxu1 %v7636_v34  ;;  %3811 = vmatprep.mubr.bf16.mxu1 %v7640_v36  ;;  %v7709_v34 = vld [vmem:[%s8345_s17 + $0x350] ss:$84 sps:$4 sm:$0xff]   ;;  %v7750_v35 = vld [vmem:[%s10326_s1 + $0x1e8] sm:$0xff]  }
  0x31   : > { %6609 = vmatpush3.bf16.msra.mxu0 %v7661_v46  ;;  %v7751_v36 = vld [vmem:[%s10326_s1 + $0x1a8] sm:$0xff]   ;;  %v7725_v46 = vld [vmem:[%s8345_s17 + $0x4a0] ss:$84 sps:$4 sm:$0xff]  }
  0x32   : > { %6610 = vmatprep.subr.bf16.mxu0 %v7676_v55  ;;  %v7740_v55 = vld [vmem:[%s8345_s17 + $0xbc] ss:$84 sps:$4 sm:$0xff]  }
  0x33   : > { %6499 = vmatpush3.bf16.msra.mxu1 %v7637_v37  ;;  %v7712_v37 = vld [vmem:[%s8345_s17 + $0x694] ss:$84 sps:$4 sm:$0xff]  }
  0x34   : > { %6500 = vmatprep.subr.bf16.mxu1 %v7644_v40  ;;  %v7717_v40 = vld [vmem:[%s8345_s17 + $0x3f8] ss:$84 sps:$4 sm:$0xff]  }
  0x35   : > { %6611 = vmatpush3.bf16.msra.mxu0 %v7677_v56  ;;  %v7752_v56 = vld [vmem:[%s10326_s1 + $0x248] sm:$0xff]  }
  0x36   : > { %3716 = vmatmul.mubr.bf16.gmra.mrb[8].mxu0 %v7642_v38  ;;  %3812 = vmatmul.mubr.bf16.gmra.mrb[8].mxu1 %v7643_v39  ;;  %v7714_v38 = vld [vmem:[%s8345_s17 + $0x3fc] ss:$84 sps:$4 sm:$0xff]  }
  0x37   : > { %6501 = vmatpush3.bf16.msra.mxu1 %v7646_v41  ;;  %3723 = vmatprep.mubr.bf16.mxu0 %v7650_v44  ;;  %v7716_v39 = vld [vmem:[%s8345_s17 + $0x690] ss:$84 sps:$4 sm:$0xff]  }
  0x38   : > { %6502 = vmatprep.subr.bf16.mxu1 %v7648_v42  ;;  %3819 = vmatprep.mubr.bf16.mxu1 %v7652_v45  ;;  %v7720_v41 = vld [vmem:[%s8345_s17 + $0x73c] ss:$84 sps:$4 sm:$0xff]   ;;  %v7722_v42 = vld [vmem:[%s8345_s17 + $0x4a4] ss:$84 sps:$4 sm:$0xff]  }
  0x39   : > { %6612 = vmatprep.subr.bf16.mxu0 %v7686_v0  ;;  %v7767_v44 = vld [vmem:[%s10326_s1 + $0x1b0] sm:$0xff]   ;;  %v7724_v45 = vld [vmem:[%s8345_s17 + $0x738] ss:$84 sps:$4 sm:$0xff]  }
  0x3a   : > { %6613 = vmatpush3.bf16.msra.mxu0 %v7687_v2  ;;  %v7769_v0 = vld [vmem:[%s10326_s1 + $0x210] sm:$0xff]   ;;  %v7748_v2 = vld [vmem:[%s8345_s17 + $0x698] ss:$84 sps:$4 sm:$0xff]  }
  0x3b   : > { %6503 = vmatpush3.bf16.msra.mxu1 %v7649_v47  ;;  %6614 = vmatprep.subr.bf16.mxu0 %v7700_v8  ;;  %v7728_v47 = vld [vmem:[%s8345_s17 + $0x54c] ss:$84 sps:$4 sm:$0xff]  }
  0x3c   : > { %6504 = vmatprep.subr.bf16.mxu1 %v7656_v48  ;;  %v7732_v48 = vld [vmem:[%s8345_s17 + $0x14] ss:$84 sps:$4 sm:$0xff]   ;;  %v7801_v8 = vld [vmem:[%s10326_s1 + $0x220] sm:$0xff]  }
  0x3e   : > { %3724 = vmatmul.mubr.bf16.gmra.mrb[12].mxu0 %v7654_v49  ;;  %3820 = vmatmul.mubr.bf16.gmra.mrb[12].mxu1 %v7655_v50  ;;  %v7782_v49 = vld [vmem:[%s10326_s1 + $0x1f8] sm:$0xff]  }
  0x3f   : > { %6505 = vmatpush3.bf16.msra.mxu1 %v7657_v51  ;;  %3731 = vmatprep.mubr.bf16.mxu0 %v7662_v53  ;;  %v7783_v50 = vld [vmem:[%s10326_s1 + $0x1b8] sm:$0xff]   ;;  %v7730_v51 = vld [vmem:[%s8345_s17 + $0x10] ss:$84 sps:$4 sm:$0xff]  }
  0x40   : > { %6506 = vmatprep.subr.bf16.mxu1 %v7658_v52  ;;  %3860 = vmatprep.mubr.bf16.mxu1 %v7666_v54  ;;  %v7733_v52 = vld [vmem:[%s8345_s17 + $0x548] ss:$84 sps:$4 sm:$0xff]   ;;  %v7737_v53 = vld [vmem:[%s10326_s1 + $0x200] sm:$0xff]  }
  0x41   : > { %6615 = vmatpush3.bf16.msra.mxu0 %v7702_v10  ;;  %v7738_v54 = vld [vmem:[%s8345_s17 + $0x5f4] ss:$84 sps:$4 sm:$0xff]  }
  0x42   : > { %6616 = vmatprep.subr.bf16.mxu0 %v7710_v15  ;;  %v7758_v10 = vld [vmem:[%s8345_s17 + $0x740] ss:$84 sps:$4 sm:$0xff]  }
  0x43   : > { %6507 = vmatpush3.bf16.msra.mxu1 %v7660_v57  ;;  %v7798_v57 = vld [vmem:[%s10326_s1 + $0x2c0] sm:$0xff]   ;;  %v7762_v15 = vld [vmem:[%s8345_s17 + $0x2b4] ss:$84 sps:$4 sm:$0xff]  }
  0x44   : > { %6716 = vmatprep.subr.bf16.mxu1 %v7668_v60  ;;  %v7742_v60 = vld [vmem:[%s8345_s17 + $0x5f0] ss:$84 sps:$4 sm:$0xff]  }
  0x45   : > { %6617 = vmatpush3.bf16.msra.mxu0 %v7711_v16  ;;  %v7833_v16 = vld [vmem:[%s10326_s1 + $0x230] sm:$0xff]  }
  0x46   : > { %3732 = vmatmul.mubr.bf16.gmra.mrb[16].mxu0 %v7667_v59  ;;  %3861 = vmatmul.mubr.bf16.vlgmr.msra.gmra.mrb[16].mxu1 %v7664_v58  ;;  %v7753_v58 = vld [vmem:[%s10326_s1 + $0x208] sm:$0xff]   ;;  %v7768_v59 = vld [vmem:[%s10326_s1 + $0x250] sm:$0xff]  }
  0x47   : > { %6717 = vmatpush3.bf16.msra.mxu1 %v7669_v61  ;;  %3739 = vmatprep.mubr.bf16.mxu0 %v7670_v62  ;;  %v7743_v61 = vld [vmem:[%s8345_s17 + $0xb8] ss:$84 sps:$4 sm:$0xff]   ;;  %v7744_v62 = vld [vmem:[%s8345_s17 + $0x69c] ss:$84 sps:$4 sm:$0xff]  }
  0x48   : > { %3868 = vmatprep.mubr.bf16.mxu1 %v7672_v63  ;;  %6718 = vmatprep.subr.bf16.mxu1 %v7684_v1  ;;  %v7746_v63 = vld [vmem:[%s8345_s17 + $0x164] ss:$84 sps:$4 sm:$0xff]  }
  0x49   : > { %6618 = vmatprep.subr.bf16.mxu0 %v7726_v24  ;;  %v7784_v1 = vld [vmem:[%s10326_s1 + $0x258] sm:$0xff]  }
  0x4a   : > { %6619 = vmatpush3.bf16.msra.mxu0 %v7727_v25  ;;  %v7775_v24 = vld [vmem:[%s8345_s17 + $0x358] ss:$84 sps:$4 sm:$0xff]   ;;  %v7776_v25 = vld [vmem:[%s8345_s17 + $0x93c] ss:$84 sps:$4 sm:$0xff]  }
  0x4b   : > { %6719 = vmatpush3.bf16.msra.mxu1 %v7685_v3  ;;  %6828 = vmatprep.subr.bf16.mxu0 %v7736_v30  ;;  %v7785_v3 = vld [vmem:[%s10326_s1 + $0x218] sm:$0xff]  }
  0x4c   : > { %6720 = vmatprep.subr.bf16.mxu1 %v7701_v9  ;;  %v7816_v9 = vld [vmem:[%s10326_s1 + $0x268] sm:$0xff]   ;;  %v7786_v30 = vld [vmem:[%s8345_s17 + $0x9e4] ss:$84 sps:$4 sm:$0xff]  }
  0x4e   : > { %3740 = vmatmul.mubr.bf16.gmra.mrb[20].mxu0 %v7674_v4  ;;  %3869 = vmatmul.mubr.bf16.gmra.mrb[20].mxu1 %v7675_v5  ;;  %v7800_v4 = vld [vmem:[%s10326_s1 + $0x260] sm:$0xff]  }
  0x4f   : > { %3747 = vmatprep.mubr.bf16.mxu0 %v7678_v6  ;;  %3876 = vmatprep.mubr.bf16.mxu1 %v7680_v7  ;;  %v7749_v5 = vld [vmem:[%s8345_s17 + $0x160] ss:$84 sps:$4 sm:$0xff]   ;;  %v7754_v6 = vld [vmem:[%s8345_s17 + $0x744] ss:$84 sps:$4 sm:$0xff]  }
  0x50   : > { %6721 = vmatpush3.bf16.msra.mxu1 %v7703_v11  ;;  %v7756_v7 = vld [vmem:[%s8345_s17 + $0x20c] ss:$84 sps:$4 sm:$0xff]   ;;  %v7759_v11 = vld [vmem:[%s8345_s17 + $0x208] ss:$84 sps:$4 sm:$0xff]  }
  0x51   : > { %6722 = vmatprep.subr.bf16.mxu1 %v7718_v18  ;;  %v7765_v18 = vld [vmem:[%s8345_s17 + $0x2b0] ss:$84 sps:$4 sm:$0xff]  }
  0x54   : > { %6723 = vmatpush3.bf16.msra.mxu1 %v7719_v19  ;;  %v7770_v19 = vld [vmem:[%s8345_s17 + $0x894] ss:$84 sps:$4 sm:$0xff]  }
  0x55   : > { %6724 = vmatprep.subr.bf16.mxu1 %v7734_v26  ;;  %v7778_v26 = vld [vmem:[%s8345_s17 + $0x404] ss:$84 sps:$4 sm:$0xff]  }
  0x56   : > { %3748 = vmatmul.mubr.bf16.gmra.mrb[24].mxu0 %v7682_v12  ;;  %3877 = vmatmul.mubr.bf16.gmra.mrb[24].mxu1 %v7683_v13  ;;  %v7817_v12 = vld [vmem:[%s10326_s1 + $0x228] sm:$0xff]   ;;  %v7832_v13 = vld [vmem:[%s10326_s1 + $0x270] sm:$0xff]  }
  0x57   : > { %3755 = vmatprep.mubr.bf16.mxu0 %v7688_v14  ;;  %3884 = vmatprep.mubr.bf16.mxu1 %v7690_v17  ;;  %v7760_v14 = vld [vmem:[%s8345_s17 + $0x7ec] ss:$84 sps:$4 sm:$0xff]   ;;  %v7764_v17 = vld [vmem:[%s8345_s17 + $0x7e8] ss:$84 sps:$4 sm:$0xff]  }
  0x58   : > { %6725 = vmatpush3.bf16.msra.mxu1 %v7735_v29  ;;  %v7781_v29 = vld [vmem:[%s8345_s17 + $0x400] ss:$84 sps:$4 sm:$0xff]  }
  0x59   : > { %6726 = vmatprep.subr.bf16.mxu1 %v7750_v35  ;;  %v7796_v35 = vld [vmem:[%s8345_s17 + $0x1c] ss:$84 sps:$4 sm:$0xff]  }
  0x5c   : > { %6727 = vmatpush3.bf16.msra.mxu1 %v7751_v36  ;;  %v7794_v36 = vld [vmem:[%s8345_s17 + $0x18] ss:$84 sps:$4 sm:$0xff]  }
  0x5d   : > { %6728 = vmatprep.subr.bf16.mxu1 %v7766_v43  ;;  %v7830_v43 = vld [vmem:[%s10326_s1 + $0x2d0] sm:$0xff]  }
  0x5e   : > { %3756 = vmatmul.mubr.bf16.gmra.mrb[28].mxu0 %v7692_v20  ;;  %3885 = vmatmul.mubr.bf16.gmra.mrb[28].mxu1 %v7693_v21  ;;  %v7772_v20 = vld [vmem:[%s8345_s17 + $0x35c] ss:$84 sps:$4 sm:$0xff]  }
  0x5f   : > { %3763 = vmatprep.mubr.bf16.mxu0 %v7694_v22  ;;  %3892 = vmatprep.mubr.bf16.mxu1 %v7696_v23  ;;  %v7848_v21 = vld [vmem:[%s10326_s1 + $0x278] sm:$0xff]   ;;  %v7774_v23 = vld [vmem:[%s8345_s17 + $0x890] ss:$84 sps:$4 sm:$0xff]  }
  0x60   : > { %6729 = vmatpush3.bf16.msra.mxu1 %v7767_v44  ;;  %v7849_v22 = vld [vmem:[%s10326_s1 + $0x238] sm:$0xff]  }
  0x61   : > { %6730 = vmatprep.subr.bf16.mxu1 %v7782_v49  ;;  %v7806_v44 = vld [vmem:[%s8345_s17 + $0x5f8] ss:$84 sps:$4 sm:$0xff]  }
  0x62   : > { %v7846_v49 = vld [vmem:[%s10326_s1 + $0x2d8] sm:$0xff]  }
  0x64   : > { %6731 = vmatpush3.bf16.msra.mxu1 %v7783_v50  ;;  %v7812_v50 = vld [vmem:[%s8345_s17 + $0x6a0] ss:$84 sps:$4 sm:$0xff]  }
  0x65   : > { %6940 = vmatprep.subr.bf16.mxu1 %v7798_v57  ;;  %v7878_v57 = vld [vmem:[%s10326_s1 + $0x2e8] sm:$0xff]  }
  0x66   : > { %3764 = vmatmul.mubr.bf16.gmra.mrb[32].mxu0 %v7698_v27  ;;  %3893 = vmatmul.mubr.bf16.gmra.mrb[32].mxu1 %v7699_v28  ;;  %v7864_v27 = vld [vmem:[%s10326_s1 + $0x340] sm:$0xff]   ;;  %v7780_v28 = vld [vmem:[%s8345_s17 + $0x938] ss:$84 sps:$4 sm:$0xff]  }
  0x67   : > { %3771 = vmatprep.mubr.bf16.mxu0 %v7704_v31  ;;  %3900 = vmatprep.mubr.bf16.mxu1 %v7706_v32  ;;  %v7788_v31 = vld [vmem:[%s8345_s17 + $0x4ac] ss:$84 sps:$4 sm:$0xff]  }
  0x68   : > { %v7790_v32 = vld [vmem:[%s8345_s17 + $0x9e0] ss:$84 sps:$4 sm:$0xff]  }
  0x6e   : > { %3772 = vmatmul.mubr.bf16.gmra.mrb[36].mxu0 %v7708_v33  ;;  %3901 = vmatmul.mubr.bf16.gmra.mrb[36].mxu1 %v7709_v34  ;;  %v7791_v33 = vld [vmem:[%s8345_s17 + $0x4a8] ss:$84 sps:$4 sm:$0xff]  }
  0x6f   : > { %3779 = vmatprep.mubr.bf16.mxu0 %v7712_v37  ;;  %3908 = vmatprep.mubr.bf16.mxu1 %v7714_v38  ;;  %v7792_v34 = vld [vmem:[%s8345_s17 + $0x554] ss:$84 sps:$4 sm:$0xff]   ;;  %v7797_v37 = vld [vmem:[%s8345_s17 + $0x550] ss:$84 sps:$4 sm:$0xff]  }
  0x70   : > { %v7799_v38 = vld [vmem:[%s10326_s1 + $0x280] sm:$0xff]  }
  0x76   : > { %3780 = vmatmul.mubr.bf16.gmra.mrb[40].mxu0 %v7716_v39  ;;  %3909 = vmatmul.mubr.bf16.gmra.mrb[40].mxu1 %v7717_v40  ;;  %v7802_v39 = vld [vmem:[%s8345_s17 + $0x5fc] ss:$84 sps:$4 sm:$0xff]   ;;  %v7804_v40 = vld [vmem:[%s8345_s17 + $0xc4] ss:$84 sps:$4 sm:$0xff]  }
  0x77   : > { %3787 = vmatprep.mubr.bf16.mxu0 %v7720_v41  ;;  %3916 = vmatprep.mubr.bf16.mxu1 %v7722_v42  ;;  %v7814_v41 = vld [vmem:[%s10326_s1 + $0x2c8] sm:$0xff]  }
  0x78   : > { %v7815_v42 = vld [vmem:[%s10326_s1 + $0x288] sm:$0xff]  }
  0x7e   : > { %3788 = vmatmul.mubr.bf16.gmra.mrb[44].mxu0 %v7724_v45  ;;  %3917 = vmatmul.mubr.bf16.gmra.mrb[44].mxu1 %v7725_v46  ;;  %v7807_v45 = vld [vmem:[%s8345_s17 + $0xc0] ss:$84 sps:$4 sm:$0xff]   ;;  %v7808_v46 = vld [vmem:[%s8345_s17 + $0x6a4] ss:$84 sps:$4 sm:$0xff]  }
  0x7f   : > { %3924 = vmatprep.mubr.bf16.mxu1 %v7728_v47  ;;  %4021 = vmatprep.mubr.bf16.mxu0 %v7732_v48  ;;  %v7810_v47 = vld [vmem:[%s8345_s17 + $0x16c] ss:$84 sps:$4 sm:$0xff]   ;;  %v7831_v48 = vld [vmem:[%s10326_s1 + $0x290] sm:$0xff]  }
  0x86   : > { %3925 = vmatmul.mubr.bf16.gmra.mrb[48].mxu1 %v7733_v52  ;;  %4022 = vmatmul.mubr.bf16.vlgmr.msra.gmra.mrb[48].mxu0 %v7730_v51  ;;  %v7813_v51 = vld [vmem:[%s8345_s17 + $0x168] ss:$84 sps:$4 sm:$0xff]  }
  0x87   : > { %6829 = vmatpush3.bf16.msra.mxu0 %v7737_v53  ;;  %3932 = vmatprep.mubr.bf16.mxu1 %v7738_v54  ;;  %v7847_v52 = vld [vmem:[%s10326_s1 + $0x298] sm:$0xff]   ;;  %v7862_v53 = vld [vmem:[%s10326_s1 + $0x2e0] sm:$0xff]  }
  0x88   : > { %4029 = vmatprep.mubr.bf16.mxu0 %v7740_v55  ;;  %6830 = vmatprep.subr.bf16.mxu0 %v7752_v56  ;;  %v7818_v54 = vld [vmem:[%s8345_s17 + $0x74c] ss:$84 sps:$4 sm:$0xff]   ;;  %v7820_v55 = vld [vmem:[%s8345_s17 + $0x214] ss:$84 sps:$4 sm:$0xff]  }
  0x89   : > { %v7863_v56 = vld [vmem:[%s10326_s1 + $0x2a0] sm:$0xff]  }
  0x8b   : > { %6831 = vmatpush3.bf16.msra.mxu0 %v7753_v58  ;;  %v7822_v58 = vld [vmem:[%s8345_s17 + $0x748] ss:$84 sps:$4 sm:$0xff]  }
  0x8c   : > { %6832 = vmatprep.subr.bf16.mxu0 %v7768_v59  ;;  %v7823_v59 = vld [vmem:[%s8345_s17 + $0x210] ss:$84 sps:$4 sm:$0xff]  }
  0x8e   : > { %3933 = vmatmul.mubr.bf16.gmra.mrb[52].mxu1 %v7742_v60  ;;  %4030 = vmatmul.mubr.bf16.gmra.mrb[52].mxu0 %v7743_v61  ;;  %v7879_v60 = vld [vmem:[%s10326_s1 + $0x2a8] sm:$0xff]   ;;  %v7894_v61 = vld [vmem:[%s10326_s1 + $0x2f0] sm:$0xff]  }
  0x8f   : > { %3940 = vmatprep.mubr.bf16.mxu1 %v7744_v62  ;;  %4037 = vmatprep.mubr.bf16.mxu0 %v7746_v63  ;;  %v7824_v62 = vld [vmem:[%s8345_s17 + $0x7f4] ss:$84 sps:$4 sm:$0xff]   ;;  %v7826_v63 = vld [vmem:[%s8345_s17 + $0x2bc] ss:$84 sps:$4 sm:$0xff]  }
  0x90   : > { %6833 = vmatpush3.bf16.msra.mxu0 %v7769_v0  ;;  %v7895_v0 = vld [vmem:[%s10326_s1 + $0x2b0] sm:$0xff]  }
  0x91   : > { %6834 = vmatprep.subr.bf16.mxu0 %v7784_v1  ;;  %v7910_v1 = vld [vmem:[%s10326_s1 + $0x2f8] sm:$0xff]  }
  0x94   : > { %6835 = vmatpush3.bf16.msra.mxu0 %v7785_v3  ;;  %v7926_v3 = vld [vmem:[%s10326_s1 + $0x3c0] sm:$0xff]  }
  0x95   : > { %6836 = vmatprep.subr.bf16.mxu0 %v7800_v4  ;;  %v7828_v4 = vld [vmem:[%s8345_s17 + $0x7f0] ss:$84 sps:$4 sm:$0xff]  }
  0x96   : > { %3941 = vmatmul.mubr.bf16.gmra.mrb[56].mxu1 %v7748_v2  ;;  %4038 = vmatmul.mubr.bf16.gmra.mrb[56].mxu0 %v7749_v5  ;;  %v7911_v2 = vld [vmem:[%s10326_s1 + $0x2b8] sm:$0xff]  }
  0x97   : > { %3948 = vmatprep.mubr.bf16.mxu1 %v7754_v6  ;;  %4045 = vmatprep.mubr.bf16.mxu0 %v7756_v7  ;;  %v7829_v5 = vld [vmem:[%s8345_s17 + $0x2b8] ss:$84 sps:$4 sm:$0xff]   ;;  %v7834_v6 = vld [vmem:[%s8345_s17 + $0x89c] ss:$84 sps:$4 sm:$0xff]  }
  0x98   : > { %6837 = vmatpush3.bf16.msra.mxu0 %v7801_v8  ;;  %v7836_v7 = vld [vmem:[%s8345_s17 + $0x364] ss:$84 sps:$4 sm:$0xff]  }
  0x99   : > { %6838 = vmatprep.subr.bf16.mxu0 %v7816_v9  ;;  %v7838_v8 = vld [vmem:[%s8345_s17 + $0x898] ss:$84 sps:$4 sm:$0xff]   ;;  %v7839_v9 = vld [vmem:[%s8345_s17 + $0x360] ss:$84 sps:$4 sm:$0xff]  }
  0x9c   : > { %6839 = vmatpush3.bf16.msra.mxu0 %v7817_v12  ;;  %v7844_v12 = vld [vmem:[%s8345_s17 + $0x940] ss:$84 sps:$4 sm:$0xff]  }
  0x9d   : > { %6840 = vmatprep.subr.bf16.mxu0 %v7832_v13  ;;  %v7845_v13 = vld [vmem:[%s8345_s17 + $0x408] ss:$84 sps:$4 sm:$0xff]  }
  0x9e   : > { %3949 = vmatmul.mubr.bf16.gmra.mrb[60].mxu1 %v7758_v10  ;;  %4046 = vmatmul.mubr.bf16.gmra.mrb[60].mxu0 %v7759_v11  ;;  %v7840_v10 = vld [vmem:[%s8345_s17 + $0x944] ss:$84 sps:$4 sm:$0xff]   ;;  %v7842_v11 = vld [vmem:[%s8345_s17 + $0x40c] ss:$84 sps:$4 sm:$0xff]  }
  0x9f   : > { %3956 = vmatprep.mubr.bf16.mxu1 %v7760_v14  ;;  %4053 = vmatprep.mubr.bf16.mxu0 %v7762_v15  ;;  %v7850_v14 = vld [vmem:[%s8345_s17 + $0x9ec] ss:$84 sps:$4 sm:$0xff]   ;;  %v7852_v15 = vld [vmem:[%s8345_s17 + $0x4b4] ss:$84 sps:$4 sm:$0xff]  }
  0xa0   : > { %6841 = vmatpush3.bf16.msra.mxu0 %v7833_v16  ;;  %v7854_v16 = vld [vmem:[%s8345_s17 + $0x9e8] ss:$84 sps:$4 sm:$0xff]  }
  0xa1   : > { %6842 = vmatprep.subr.bf16.mxu0 %v7848_v21 }
  0xa4   : > { %6843 = vmatpush3.bf16.msra.mxu0 %v7849_v22 }
  0xa5   : > { %7052 = vmatprep.subr.bf16.mxu0 %v7864_v27  ;;  %v7860_v27 = vld [vmem:[%s8345_s17 + $0x24] ss:$84 sps:$4 sm:$0xff]  }
  0xa6   : > { %3957 = vmatmul.mubr.bf16.gmra.mrb[64].mxu1 %v7764_v17  ;;  %4054 = vmatmul.mubr.bf16.gmra.mrb[64].mxu0 %v7765_v18  ;;  %v7855_v17 = vld [vmem:[%s8345_s17 + $0x4b0] ss:$84 sps:$4 sm:$0xff]  }
  0xa7   : > { %3964 = vmatprep.mubr.bf16.mxu1 %v7770_v19  ;;  %4061 = vmatprep.mubr.bf16.mxu0 %v7772_v20 }
  0xae   : > { %3965 = vmatmul.mubr.bf16.gmra.mrb[68].mxu1 %v7774_v23  ;;  %4062 = vmatmul.mubr.bf16.gmra.mrb[68].mxu0 %v7775_v24 }
  0xaf   : > { %3972 = vmatprep.mubr.bf16.mxu1 %v7776_v25  ;;  %4069 = vmatprep.mubr.bf16.mxu0 %v7778_v26  ;;  %v7856_v26 = vld [vmem:[%s8345_s17 + $0x55c] ss:$84 sps:$4 sm:$0xff]  }
  0xb6   : > { %3973 = vmatmul.mubr.bf16.gmra.mrb[72].mxu1 %v7780_v28  ;;  %4070 = vmatmul.mubr.bf16.gmra.mrb[72].mxu0 %v7781_v29 }
  0xb7   : > { %3980 = vmatprep.mubr.bf16.mxu1 %v7786_v30  ;;  %4077 = vmatprep.mubr.bf16.mxu0 %v7788_v31 }
  0xbe   : > { %3981 = vmatmul.mubr.bf16.gmra.mrb[76].mxu1 %v7790_v32  ;;  %4078 = vmatmul.mubr.bf16.gmra.mrb[76].mxu0 %v7791_v33  ;;  %v7858_v32 = vld [vmem:[%s8345_s17 + $0x20] ss:$84 sps:$4 sm:$0xff]   ;;  %v7861_v33 = vld [vmem:[%s8345_s17 + $0x558] ss:$84 sps:$4 sm:$0xff]  }
  0xbf   : > { %4085 = vmatprep.mubr.bf16.mxu0 %v7792_v34  ;;  %4182 = vmatprep.mubr.bf16.mxu1 %v7796_v35 }
  0xc6   : > { %4086 = vmatmul.mubr.bf16.gmra.mrb[80].mxu0 %v7797_v37  ;;  %4183 = vmatmul.mubr.bf16.vlgmr.msra.gmra.mrb[80].mxu1 %v7794_v36 }
  0xc7   : > { %6941 = vmatpush3.bf16.msra.mxu1 %v7799_v38  ;;  %4093 = vmatprep.mubr.bf16.mxu0 %v7802_v39 }
  0xc8   : > { %4190 = vmatprep.mubr.bf16.mxu1 %v7804_v40  ;;  %6942 = vmatprep.subr.bf16.mxu1 %v7814_v41 }
  0xcb   : > { %6943 = vmatpush3.bf16.msra.mxu1 %v7815_v42  ;;  %v7865_v42 = vld [vmem:[%s10326_s1 + $0x300] sm:$0xff]  }
  0xcc   : > { %6944 = vmatprep.subr.bf16.mxu1 %v7830_v43  ;;  %v7866_v43 = vld [vmem:[%s8345_s17 + $0x604] ss:$84 sps:$4 sm:$0xff]  }
  0xce   : > { %4094 = vmatmul.mubr.bf16.gmra.mrb[84].mxu0 %v7806_v44  ;;  %4191 = vmatmul.mubr.bf16.gmra.mrb[84].mxu1 %v7807_v45 }
  0xcf   : > { %4101 = vmatprep.mubr.bf16.mxu0 %v7808_v46  ;;  %4198 = vmatprep.mubr.bf16.mxu1 %v7810_v47  ;;  %v7868_v46 = vld [vmem:[%s8345_s17 + $0xcc] ss:$84 sps:$4 sm:$0xff]  }
  0xd0   : > { %6945 = vmatpush3.bf16.msra.mxu1 %v7831_v48  ;;  %v7880_v47 = vld [vmem:[%s10326_s1 + $0x348] sm:$0xff]  }
  0xd1   : > { %6946 = vmatprep.subr.bf16.mxu1 %v7846_v49 }
  0xd4   : > { %6947 = vmatpush3.bf16.msra.mxu1 %v7847_v52  ;;  %v7870_v52 = vld [vmem:[%s8345_s17 + $0x600] ss:$84 sps:$4 sm:$0xff]  }
  0xd5   : > { %6948 = vmatprep.subr.bf16.mxu1 %v7862_v53  ;;  %v7871_v53 = vld [vmem:[%s8345_s17 + $0xc8] ss:$84 sps:$4 sm:$0xff]  }
  0xd6   : > { %4102 = vmatmul.mubr.bf16.gmra.mrb[88].mxu0 %v7812_v50  ;;  %4199 = vmatmul.mubr.bf16.gmra.mrb[88].mxu1 %v7813_v51  ;;  %v7881_v50 = vld [vmem:[%s10326_s1 + $0x308] sm:$0xff]   ;;  %v7896_v51 = vld [vmem:[%s10326_s1 + $0x350] sm:$0xff]  }
  0xd7   : > { %4109 = vmatprep.mubr.bf16.mxu0 %v7818_v54  ;;  %4206 = vmatprep.mubr.bf16.mxu1 %v7820_v55 }
  0xd8   : > { %6949 = vmatpush3.bf16.msra.mxu1 %v7863_v56 }
  0xd9   : > { %6950 = vmatprep.subr.bf16.mxu1 %v7878_v57 }
  0xdc   : > { %6951 = vmatpush3.bf16.msra.mxu1 %v7879_v60 }
  0xdd   : > { %6952 = vmatprep.subr.bf16.mxu1 %v7894_v61 }
  0xde   : > { %4110 = vmatmul.mubr.bf16.gmra.mrb[92].mxu0 %v7822_v58  ;;  %4207 = vmatmul.mubr.bf16.gmra.mrb[92].mxu1 %v7823_v59 }
  0xdf   : > { %4117 = vmatprep.mubr.bf16.mxu0 %v7824_v62  ;;  %4214 = vmatprep.mubr.bf16.mxu1 %v7826_v63  ;;  %v7872_v62 = vld [vmem:[%s8345_s17 + $0x6ac] ss:$84 sps:$4 sm:$0xff]   ;;  %v7874_v63 = vld [vmem:[%s8345_s17 + $0x174] ss:$84 sps:$4 sm:$0xff]  }
  0xe0   : > { %6953 = vmatpush3.bf16.msra.mxu1 %v7895_v0 }
  0xe1   : > { %6954 = vmatprep.subr.bf16.mxu1 %v7910_v1 }
  0xe4   : > { %6955 = vmatpush3.bf16.msra.mxu1 %v7911_v2  ;;  %v7897_v2 = vld [vmem:[%s10326_s1 + $0x310] sm:$0xff]  }
  0xe5   : > { %7164 = vmatprep.subr.bf16.mxu1 %v7926_v3 }
  0xe6   : > { %4118 = vmatmul.mubr.bf16.gmra.mrb[96].mxu0 %v7828_v4  ;;  %4215 = vmatmul.mubr.bf16.gmra.mrb[96].mxu1 %v7829_v5  ;;  %v7912_v5 = vld [vmem:[%s10326_s1 + $0x358] sm:$0xff]  }
  0xe7   : > { %4125 = vmatprep.mubr.bf16.mxu0 %v7834_v6  ;;  %4222 = vmatprep.mubr.bf16.mxu1 %v7836_v7  ;;  %v7913_v6 = vld [vmem:[%s10326_s1 + $0x318] sm:$0xff]   ;;  %v7928_v7 = vld [vmem:[%s10326_s1 + $0x360] sm:$0xff]  }
  0xee   : > { %4126 = vmatmul.mubr.bf16.gmra.mrb[100].mxu0 %v7838_v8  ;;  %4223 = vmatmul.mubr.bf16.gmra.mrb[100].mxu1 %v7839_v9  ;;  %v7876_v8 = vld [vmem:[%s8345_s17 + $0x6a8] ss:$84 sps:$4 sm:$0xff]   ;;  %v7877_v9 = vld [vmem:[%s8345_s17 + $0x170] ss:$84 sps:$4 sm:$0xff]  }
  0xef   : > { %4133 = vmatprep.mubr.bf16.mxu0 %v7840_v10  ;;  %4230 = vmatprep.mubr.bf16.mxu1 %v7842_v11 }
  0xf6   : > { %4134 = vmatmul.mubr.bf16.gmra.mrb[104].mxu0 %v7844_v12  ;;  %4231 = vmatmul.mubr.bf16.gmra.mrb[104].mxu1 %v7845_v13 }
  0xf7   : > { %4141 = vmatprep.mubr.bf16.mxu0 %v7850_v14  ;;  %4238 = vmatprep.mubr.bf16.mxu1 %v7852_v15 }
  0xf9   : > { %v6468_v18 = vpop.f32.mrb[0].mxu1  ;;  %v6396_v19 = vpop.f32.mrb[0].mxu0 }
  0xfa   : > { %v6469_v20 = vpop.f32.mrb[1].mxu1  ;;  %v6397_v21 = vpop.f32.mrb[1].mxu0 }
  0xfb   : > { %v8726_v22 = vadd.f32 %v6469_v20, %v6468_v18  ;;  %v6471_v23 = vpop.f32.mrb[2].mxu1  ;;  %v8728_v24 = vadd.f32 %v6397_v21, %v6396_v19  ;;  %v6399_v25 = vpop.f32.mrb[2].mxu0  ;;  %v7882_v18 = vld [vmem:[%s8345_s17 + $0x754] ss:$84 sps:$4 sm:$0xff]   ;;  %v7884_v19 = vld [vmem:[%s8345_s17 + $0x21c] ss:$84 sps:$4 sm:$0xff]  }
  0xfc   : > { %v6472_v28 = vpop.f32.mrb[3].mxu1  ;;  %v6400_v29 = vpop.f32.mrb[3].mxu0 }
  0xfd   : > { %v8732_v30 = vadd.f32 %v6472_v28, %v6471_v23  ;;  %v8734_v31 = vadd.f32 %v6400_v29, %v6399_v25  ;;  %v7929_v23 = vld [vmem:[%s10326_s1 + $0x320] sm:$0xff]   ;;  %v7944_v25 = vld [vmem:[%s10326_s1 + $0x368] sm:$0xff]   ;;  %v7960_v29 = vld [vmem:[%s10326_s1 + $0x370] sm:$0xff]  }
  0xfe   : > { %4142 = vmatmul.mubr.bf16.gmra.mrb[108].mxu0 %v7854_v16  ;;  %4239 = vmatmul.mubr.bf16.gmra.mrb[108].mxu1 %v7855_v17  ;;  %v7945_v28 = vld [vmem:[%s10326_s1 + $0x328] sm:$0xff]  }
  0xff   : > { %4246 = vmatprep.mubr.bf16.mxu1 %v7856_v26  ;;  %4343 = vmatprep.mubr.bf16.mxu0 %v7860_v27 }
 0x101   : > { %v6474_v34 = vpop.f32.mrb[4].mxu1  ;;  %v6402_v35 = vpop.f32.mrb[4].mxu0 }
 0x102   : > { %v6475_v36 = vpop.f32.mrb[5].mxu1  ;;  %v6403_v37 = vpop.f32.mrb[5].mxu0 }
 0x103   : > { %v8738_v38 = vadd.f32 %v6475_v36, %v6474_v34  ;;  %v6477_v39 = vpop.f32.mrb[6].mxu1  ;;  %v8740_v40 = vadd.f32 %v6403_v37, %v6402_v35  ;;  %v6405_v41 = vpop.f32.mrb[6].mxu0  ;;  %v7887_v34 = vld [vmem:[%s8345_s17 + $0x218] ss:$84 sps:$4 sm:$0xff]  }
 0x104   : > { %v6478_v44 = vpop.f32.mrb[7].mxu1  ;;  %v6406_v45 = vpop.f32.mrb[7].mxu0 }
 0x105   : > { %v8750_v48 = vadd.f32 %v6478_v44, %v6477_v39  ;;  %v8752_v49 = vadd.f32 %v6406_v45, %v6405_v41 }
 0x106   : > { %4247 = vmatmul.mubr.bf16.gmra.mrb[112].mxu1 %v7861_v33  ;;  %4344 = vmatmul.mubr.bf16.vlgmr.msra.gmra.mrb[112].mxu0 %v7858_v32  ;;  %v8811_v32 = vld [vmem:[%s10327_s2] ss:$0 sm:$0xff]  ;;  %v7886_v33 = vld [vmem:[%s8345_s17 + $0x750] ss:$84 sps:$4 sm:$0xff]  }
 0x107   : > { %7053 = vmatpush3.bf16.msra.mxu0 %v7865_v42  ;;  %4254 = vmatprep.mubr.bf16.mxu1 %v7866_v43  ;;  %v3702_v41 = vadd.f32 %v8728_v24, %v8811_v32 }
 0x108   : > { %4351 = vmatprep.mubr.bf16.mxu0 %v7868_v46  ;;  %7054 = vmatprep.subr.bf16.mxu0 %v7880_v47  ;;  %v7888_v46 = vld [vmem:[%s8345_s17 + $0x7fc] ss:$84 sps:$4 sm:$0xff]   ;;  %v7890_v47 = vld [vmem:[%s8345_s17 + $0x2c4] ss:$84 sps:$4 sm:$0xff]  }
 0x109   : > { %v6480_v54 = vpop.f32.mrb[8].mxu1  ;;  %v6408_v55 = vpop.f32.mrb[8].mxu0 }
 0x10a   : > { %v6481_v56 = vpop.f32.mrb[9].mxu1  ;;  %v6409_v57 = vpop.f32.mrb[9].mxu0 }
 0x10b   : > { %v8762_v58 = vadd.f32 %v6481_v56, %v6480_v54  ;;  %v6483_v59 = vpop.f32.mrb[10].mxu1  ;;  %v8764_v60 = vadd.f32 %v6409_v57, %v6408_v55  ;;  %v6411_v61 = vpop.f32.mrb[10].mxu0  ;;  %7055 = vmatpush3.bf16.msra.mxu0 %v7881_v50  ;;  %v7976_v56 = vld [vmem:[%s10326_s1 + $0x378] sm:$0xff]  }
 0x10c   : > { %v6484_v0 = vpop.f32.mrb[11].mxu1  ;;  %v6412_v1 = vpop.f32.mrb[11].mxu0  ;;  %7056 = vmatprep.subr.bf16.mxu0 %v7896_v51  ;;  %v7977_v57 = vld [vmem:[%s10326_s1 + $0x338] sm:$0xff]  }
 0x10d   : > { %v8771_v3 = vadd.f32 %v6484_v0, %v6483_v59  ;;  %v8773_v4 = vadd.f32 %v6412_v1, %v6411_v61  ;;  %v7892_v61 = vld [vmem:[%s8345_s17 + $0x7f8] ss:$84 sps:$4 sm:$0xff]  }
 0x10e   : > { %4255 = vmatmul.mubr.bf16.gmra.mrb[116].mxu1 %v7870_v52  ;;  %4352 = vmatmul.mubr.bf16.gmra.mrb[116].mxu0 %v7871_v53  ;;  %v7961_v52 = vld [vmem:[%s10326_s1 + $0x330] sm:$0xff]   ;;  %v3705_v53 = vadd.f32 %v8734_v31, %v8811_v32  ;;  %v7992_v31 = vld [vmem:[%s10326_s1 + $0x440] sm:$0xff]  }
 0x10f   : > { %4262 = vmatprep.mubr.bf16.mxu1 %v7872_v62  ;;  %4359 = vmatprep.mubr.bf16.mxu0 %v7874_v63  ;;  %v7893_v62 = vld [vmem:[%s8345_s17 + $0x2c0] ss:$84 sps:$4 sm:$0xff]  }
 0x110   : > { %7057 = vmatpush3.bf16.msra.mxu0 %v7897_v2 }
 0x111   : > { %v6486_v10 = vpop.f32.mrb[12].mxu1  ;;  %v6414_v11 = vpop.f32.mrb[12].mxu0  ;;  %7058 = vmatprep.subr.bf16.mxu0 %v7912_v5  ;;  %v3710_v5 = vadd.f32 %v8740_v40, %v8811_v32 }
 0x112   : > { %v6487_v12 = vpop.f32.mrb[13].mxu1  ;;  %v6415_v13 = vpop.f32.mrb[13].mxu0 }
 0x113   : > { %v8786_v14 = vadd.f32 %v6487_v12, %v6486_v10  ;;  %v6489_v15 = vpop.f32.mrb[14].mxu1  ;;  %v8788_v16 = vadd.f32 %v6415_v13, %v6414_v11  ;;  %v6417_v17 = vpop.f32.mrb[14].mxu0  ;;  %v7898_v10 = vld [vmem:[%s8345_s17 + $0x8a4] ss:$84 sps:$4 sm:$0xff]   ;;  %v7900_v11 = vld [vmem:[%s8345_s17 + $0x36c] ss:$84 sps:$4 sm:$0xff]  }
 0x114   : > { %v6490_v20 = vpop.f32.mrb[15].mxu1  ;;  %v6418_v21 = vpop.f32.mrb[15].mxu0  ;;  %7059 = vmatpush3.bf16.msra.mxu0 %v7913_v6 }
 0x115   : > { %v8798_v26 = vadd.f32 %v6490_v20, %v6489_v15  ;;  %v8800_v27 = vadd.f32 %v6418_v21, %v6417_v17  ;;  %7060 = vmatprep.subr.bf16.mxu0 %v7928_v7  ;;  %v3713_v15 = vadd.f32 %v8752_v49, %v8811_v32  ;;  %v7902_v20 = vld [vmem:[%s8345_s17 + $0x8a0] ss:$84 sps:$4 sm:$0xff]   ;;  %v7903_v21 = vld [vmem:[%s8345_s17 + $0x368] ss:$84 sps:$4 sm:$0xff]  }
 0x116   : > { %4263 = vmatmul.mubr.bf16.gmra.mrb[120].mxu1 %v7876_v8  ;;  %4360 = vmatmul.mubr.bf16.gmra.mrb[120].mxu0 %v7877_v9 }
 0x117   : > { %4270 = vmatprep.mubr.bf16.mxu1 %v7882_v18  ;;  %4367 = vmatprep.mubr.bf16.mxu0 %v7884_v19 }
 0x118   : > { %7061 = vmatpush3.bf16.msra.mxu0 %v7929_v23 }
 0x119   : > { %v6508_v35 = vpop.f32.mrb[16].mxu1  ;;  %v6420_v36 = vpop.f32.mrb[16].mxu0  ;;  %7062 = vmatprep.subr.bf16.mxu0 %v7944_v25 }
 0x11a   : > { %v6509_v37 = vpop.f32.mrb[17].mxu1  ;;  %v6421_v39 = vpop.f32.mrb[17].mxu0 }
 0x11b   : > { %v6510_v42 = vadd.f32 %v6509_v37, %v6508_v35  ;;  %v6511_v43 = vpop.f32.mrb[18].mxu1  ;;  %v8817_v44 = vadd.f32 %v6421_v39, %v6420_v36  ;;  %v6423_v45 = vpop.f32.mrb[18].mxu0  ;;  %v7904_v37 = vld [vmem:[%s8345_s17 + $0x94c] ss:$84 sps:$4 sm:$0xff]   ;;  %v7906_v39 = vld [vmem:[%s8345_s17 + $0x414] ss:$84 sps:$4 sm:$0xff]  }
 0x11c   : > { %v6512_v50 = vpop.f32.mrb[19].mxu1  ;;  %v6424_v51 = vpop.f32.mrb[19].mxu0  ;;  %7063 = vmatpush3.bf16.msra.mxu0 %v7945_v28 }
 0x11d   : > { %v8826_v24 = vadd.f32 %v6510_v42, %v3702_v41  ;;  %v6513_v54 = vadd.f32 %v6512_v50, %v6511_v43  ;;  %v8828_v55 = vadd.f32 %v6424_v51, %v6423_v45  ;;  %7064 = vmatprep.subr.bf16.mxu0 %v7960_v29  ;;  %v3718_v29 = vadd.f32 %v8764_v60, %v8811_v32  ;;  %v7908_v50 = vld [vmem:[%s8345_s17 + $0x948] ss:$84 sps:$4 sm:$0xff]   ;;  %v7909_v51 = vld [vmem:[%s8345_s17 + $0x410] ss:$84 sps:$4 sm:$0xff]  }
 0x11e   : > { %4271 = vmatmul.mubr.bf16.gmra.mrb[124].mxu1 %v7886_v33  ;;  %4368 = vmatmul.mubr.bf16.gmra.mrb[124].mxu0 %v7887_v34  ;;  %v3721_v43 = vadd.f32 %v8773_v4, %v8811_v32  ;;  %v3726_v4 = vadd.f32 %v8788_v16, %v8811_v32 }
 0x11f   : > { %v8836_v59 = vadd.f32 %v6513_v54, %v3705_v53  ;;  %4278 = vmatprep.mubr.bf16.mxu1 %v7888_v46  ;;  %4375 = vmatprep.mubr.bf16.mxu0 %v7890_v47 }
 0x120   : > { %7065 = vmatpush3.bf16.msra.mxu0 %v7961_v52 }
 0x121   : > { %v6514_v63 = vpop.f32.mrb[20].mxu1  ;;  %v6426_v0 = vpop.f32.mrb[20].mxu0  ;;  %7066 = vmatprep.subr.bf16.mxu0 %v7976_v56 }
 0x122   : > { %v6515_v1 = vpop.f32.mrb[21].mxu1  ;;  %v6427_v2 = vpop.f32.mrb[21].mxu0 }
 0x123   : > { %v6516_v6 = vadd.f32 %v6515_v1, %v6514_v63  ;;  %v6517_v7 = vpop.f32.mrb[22].mxu1  ;;  %v8845_v8 = vadd.f32 %v6427_v2, %v6426_v0  ;;  %v6429_v9 = vpop.f32.mrb[22].mxu0  ;;  %v7914_v63 = vld [vmem:[%s8345_s17 + $0x9f4] ss:$84 sps:$4 sm:$0xff]   ;;  %v7916_v0 = vld [vmem:[%s8345_s17 + $0x4bc] ss:$84 sps:$4 sm:$0xff]  }
 0x124   : > { %v6518_v12 = vpop.f32.mrb[23].mxu1  ;;  %v6430_v13 = vpop.f32.mrb[23].mxu0  ;;  %7067 = vmatpush3.bf16.msra.mxu0 %v7977_v57 }
 0x125   : > { %v8851_v17 = vadd.f32 %v6516_v6, %v3710_v5  ;;  %v6519_v18 = vadd.f32 %v6518_v12, %v6517_v7  ;;  %v8853_v19 = vadd.f32 %v6430_v13, %v6429_v9  ;;  %7276 = vmatprep.subr.bf16.mxu0 %v7992_v31  ;;  %v3729_v5 = vadd.f32 %v8800_v27, %v8811_v32 }
 0x126   : > { %4279 = vmatmul.mubr.bf16.gmra.mrb[128].mxu1 %v7892_v61  ;;  %4376 = vmatmul.mubr.bf16.gmra.mrb[128].mxu0 %v7893_v62  ;;  %v3734_v27 = vadd.f32 %v8817_v44, %v8811_v32 }
 0x127   : > { %v8855_v40 = vadd.f32 %v6519_v18, %v3713_v15  ;;  %4286 = vmatprep.mubr.bf16.mxu1 %v7898_v10  ;;  %4383 = vmatprep.mubr.bf16.mxu0 %v7900_v11  ;;  %v7918_v10 = vld [vmem:[%s8345_s17 + $0x9f0] ss:$84 sps:$4 sm:$0xff]   ;;  %v7919_v11 = vld [vmem:[%s8345_s17 + $0x4b8] ss:$84 sps:$4 sm:$0xff]  }
 0x129   : > { %v6520_v23 = vpop.f32.mrb[24].mxu1  ;;  %v6432_v25 = vpop.f32.mrb[24].mxu0 }
 0x12a   : > { %v6521_v28 = vpop.f32.mrb[25].mxu1  ;;  %v6433_v49 = vpop.f32.mrb[25].mxu0 }
 0x12b   : > { %v6522_v33 = vadd.f32 %v6521_v28, %v6520_v23  ;;  %v6523_v34 = vpop.f32.mrb[26].mxu1  ;;  %v8861_v35 = vadd.f32 %v6433_v49, %v6432_v25  ;;  %v6435_v36 = vpop.f32.mrb[26].mxu0  ;;  %v7920_v28 = vld [vmem:[%s8345_s17 + $0x564] ss:$84 sps:$4 sm:$0xff]   ;;  %v7924_v49 = vld [vmem:[%s8345_s17 + $0x2c] ss:$84 sps:$4 sm:$0xff]  }
 0x12c   : > { %v6524_v41 = vpop.f32.mrb[27].mxu1  ;;  %v6436_v42 = vpop.f32.mrb[27].mxu0 }
 0x12d   : > { %v8867_v45 = vadd.f32 %v6522_v33, %v3718_v29  ;;  %v6525_v46 = vadd.f32 %v6524_v41, %v6523_v34  ;;  %v8869_v47 = vadd.f32 %v6436_v42, %v6435_v36  ;;  %v3737_v34 = vadd.f32 %v8828_v55, %v8811_v32  ;;  %v7922_v41 = vld [vmem:[%s8345_s17 + $0x28] ss:$84 sps:$4 sm:$0xff]   ;;  %v7925_v42 = vld [vmem:[%s8345_s17 + $0x560] ss:$84 sps:$4 sm:$0xff]  }
 0x12e   : > { %4287 = vmatmul.mubr.bf16.gmra.mrb[132].mxu1 %v7902_v20  ;;  %4384 = vmatmul.mubr.bf16.gmra.mrb[132].mxu0 %v7903_v21  ;;  %v3742_v55 = vadd.f32 %v8845_v8, %v8811_v32  ;;  %v3745_v8 = vadd.f32 %v8853_v19, %v8811_v32  ;;  %v7958_v19 = vld [vmem:[%s10326_s1 + $0x3d0] sm:$0xff]  }
 0x12f   : > { %v8871_v60 = vadd.f32 %v6525_v46, %v3721_v43  ;;  %4294 = vmatprep.mubr.bf16.mxu1 %v7904_v37  ;;  %4391 = vmatprep.mubr.bf16.mxu0 %v7906_v39 }
 0x131   : > { %v6526_v52 = vpop.f32.mrb[28].mxu1  ;;  %v6438_v53 = vpop.f32.mrb[28].mxu0 }
 0x132   : > { %v6527_v54 = vpop.f32.mrb[29].mxu1  ;;  %v6439_v56 = vpop.f32.mrb[29].mxu0 }
 0x133   : > { %v6528_v57 = vadd.f32 %v6527_v54, %v6526_v52  ;;  %v6529_v31 = vpop.f32.mrb[30].mxu1  ;;  %v8877_v61 = vadd.f32 %v6439_v56, %v6438_v53  ;;  %v6441_v62 = vpop.f32.mrb[30].mxu0 }
 0x134   : > { %v6530_v1 = vpop.f32.mrb[31].mxu1  ;;  %v6442_v2 = vpop.f32.mrb[31].mxu0 }
 0x135   : > { %v8883_v6 = vadd.f32 %v6528_v57, %v3726_v4  ;;  %v6531_v7 = vadd.f32 %v6530_v1, %v6529_v31  ;;  %v8885_v9 = vadd.f32 %v6442_v2, %v6441_v62  ;;  %v7927_v4 = vld [vmem:[%s10326_s1 + $0x380] sm:$0xff]  }
 0x136   : > { %4295 = vmatmul.mubr.bf16.gmra.mrb[136].mxu1 %v7908_v50  ;;  %4392 = vmatmul.mubr.bf16.gmra.mrb[136].mxu0 %v7909_v51  ;;  %v7930_v57 = vld [vmem:[%s8345_s17 + $0x60c] ss:$84 sps:$4 sm:$0xff]  }
 0x137   : > { %v8887_v16 = vadd.f32 %v6531_v7, %v3729_v5  ;;  %4302 = vmatprep.mubr.bf16.mxu1 %v7914_v63  ;;  %4399 = vmatprep.mubr.bf16.mxu0 %v7916_v0  ;;  %v7932_v63 = vld [vmem:[%s8345_s17 + $0xd4] ss:$84 sps:$4 sm:$0xff]  }
 0x138   : > { %v7942_v0 = vld [vmem:[%s10326_s1 + $0x3c8] sm:$0xff]  }
 0x139   : > { %v6532_v12 = vpop.f32.mrb[32].mxu1  ;;  %v6444_v13 = vpop.f32.mrb[32].mxu0 }
 0x13a   : > { %v6533_v15 = vpop.f32.mrb[33].mxu1  ;;  %v6445_v18 = vpop.f32.mrb[33].mxu0 }
 0x13b   : > { %v6534_v20 = vadd.f32 %v6533_v15, %v6532_v12  ;;  %v6535_v21 = vpop.f32.mrb[34].mxu1  ;;  %v8893_v23 = vadd.f32 %v6445_v18, %v6444_v13  ;;  %v6447_v25 = vpop.f32.mrb[34].mxu0  ;;  %v7935_v12 = vld [vmem:[%s8345_s17 + $0xd0] ss:$84 sps:$4 sm:$0xff]  }
 0x13c   : > { %v6536_v29 = vpop.f32.mrb[35].mxu1  ;;  %v6448_v33 = vpop.f32.mrb[35].mxu0 }
 0x13d   : > { %v8899_v36 = vadd.f32 %v6534_v20, %v3734_v27  ;;  %v6537_v37 = vadd.f32 %v6536_v29, %v6535_v21  ;;  %v8901_v39 = vadd.f32 %v6448_v33, %v6447_v25  ;;  %v3750_v20 = vadd.f32 %v8861_v35, %v8811_v32  ;;  %v7936_v29 = vld [vmem:[%s8345_s17 + $0x6b4] ss:$84 sps:$4 sm:$0xff]   ;;  %v7938_v33 = vld [vmem:[%s8345_s17 + $0x17c] ss:$84 sps:$4 sm:$0xff]  }
 0x13e   : > { %4303 = vmatmul.mubr.bf16.gmra.mrb[140].mxu1 %v7918_v10  ;;  %4400 = vmatmul.mubr.bf16.gmra.mrb[140].mxu0 %v7919_v11  ;;  %v7943_v10 = vld [vmem:[%s10326_s1 + $0x388] sm:$0xff]   ;;  %v3753_v35 = vadd.f32 %v8869_v47, %v8811_v32  ;;  %v7990_v47 = vld [vmem:[%s10326_s1 + $0x3e0] sm:$0xff]  }
 0x13f   : > { %v8903_v44 = vadd.f32 %v6537_v37, %v3737_v34  ;;  %4407 = vmatprep.mubr.bf16.mxu0 %v7920_v28  ;;  %4504 = vmatprep.mubr.bf16.mxu1 %v7924_v49  ;;  %v7934_v11 = vld [vmem:[%s8345_s17 + $0x608] ss:$84 sps:$4 sm:$0xff]  }
 0x141   : > { %v6538_v43 = vpop.f32.mrb[36].mxu1  ;;  %v6450_v46 = vpop.f32.mrb[36].mxu0 }
 0x142   : > { %v6539_v50 = vpop.f32.mrb[37].mxu1  ;;  %v6451_v51 = vpop.f32.mrb[37].mxu0 }
 0x143   : > { %v6540_v52 = vadd.f32 %v6539_v50, %v6538_v43  ;;  %v6541_v53 = vpop.f32.mrb[38].mxu1  ;;  %v8909_v54 = vadd.f32 %v6451_v51, %v6450_v46  ;;  %v6453_v56 = vpop.f32.mrb[38].mxu0  ;;  %v7974_v50 = vld [vmem:[%s10326_s1 + $0x3d8] sm:$0xff]  }
 0x144   : > { %v6542_v31 = vpop.f32.mrb[39].mxu1  ;;  %v6454_v62 = vpop.f32.mrb[39].mxu0  ;;  %v7975_v51 = vld [vmem:[%s10326_s1 + $0x398] sm:$0xff]  }
 0x145   : > { %v8921_v1 = vadd.f32 %v6540_v52, %v3742_v55  ;;  %v6543_v2 = vadd.f32 %v6542_v31, %v6541_v53  ;;  %v8923_v5 = vadd.f32 %v6454_v62, %v6453_v56  ;;  %v7940_v52 = vld [vmem:[%s8345_s17 + $0x6b0] ss:$84 sps:$4 sm:$0xff]   ;;  %v7941_v53 = vld [vmem:[%s8345_s17 + $0x178] ss:$84 sps:$4 sm:$0xff]   ;;  %v3758_v62 = vadd.f32 %v8877_v61, %v8811_v32 }
 0x146   : > { %4408 = vmatmul.mubr.bf16.gmra.mrb[144].mxu0 %v7925_v42  ;;  %4505 = vmatmul.mubr.bf16.vlgmr.msra.gmra.mrb[144].mxu1 %v7922_v41  ;;  %v7959_v41 = vld [vmem:[%s10326_s1 + $0x390] sm:$0xff]   ;;  %v8006_v61 = vld [vmem:[%s10326_s1 + $0x3e8] sm:$0xff]  }
 0x147   : > { %v8925_v7 = vadd.f32 %v6543_v2, %v3745_v8  ;;  %7165 = vmatpush3.bf16.msra.mxu1 %v7927_v4  ;;  %4415 = vmatprep.mubr.bf16.mxu0 %v7930_v57 }
 0x148   : > { %4512 = vmatprep.mubr.bf16.mxu1 %v7932_v63  ;;  %7166 = vmatprep.subr.bf16.mxu1 %v7942_v0 }
 0x149   : > { %v6544_v13 = vpop.f32.mrb[40].mxu1  ;;  %v6456_v15 = vpop.f32.mrb[40].mxu0 }
 0x14a   : > { %v6545_v18 = vpop.f32.mrb[41].mxu1  ;;  %v6457_v27 = vpop.f32.mrb[41].mxu0 }
 0x14b   : > { %v6546_v21 = vadd.f32 %v6545_v18, %v6544_v13  ;;  %v6547_v25 = vpop.f32.mrb[42].mxu1  ;;  %v8937_v28 = vadd.f32 %v6457_v27, %v6456_v15  ;;  %v6459_v49 = vpop.f32.mrb[42].mxu0  ;;  %7167 = vmatpush3.bf16.msra.mxu1 %v7943_v10  ;;  %v7946_v10 = vld [vmem:[%s8345_s17 + $0x75c] ss:$84 sps:$4 sm:$0xff]   ;;  %v7991_v13 = vld [vmem:[%s10326_s1 + $0x3a0] sm:$0xff]   ;;  %v3761_v15 = vadd.f32 %v8885_v9, %v8811_v32 }
 0x14c   : > { %v6548_v34 = vpop.f32.mrb[43].mxu1  ;;  %v6460_v37 = vpop.f32.mrb[43].mxu0  ;;  %7168 = vmatprep.subr.bf16.mxu1 %v7958_v19  ;;  %v7948_v19 = vld [vmem:[%s8345_s17 + $0x224] ss:$84 sps:$4 sm:$0xff]   ;;  %v8022_v9 = vld [vmem:[%s10326_s1 + $0x3f0] sm:$0xff]  }
 0x14d   : > { %v8946_v42 = vadd.f32 %v6546_v21, %v3750_v20  ;;  %v6549_v43 = vadd.f32 %v6548_v34, %v6547_v25  ;;  %v8948_v46 = vadd.f32 %v6460_v37, %v6459_v49  ;;  %v8007_v25 = vld [vmem:[%s10326_s1 + $0x3a8] sm:$0xff]  }
 0x14e   : > { %4416 = vmatmul.mubr.bf16.gmra.mrb[148].mxu0 %v7934_v11  ;;  %4513 = vmatmul.mubr.bf16.gmra.mrb[148].mxu1 %v7935_v12  ;;  %v7950_v49 = vld [vmem:[%s8345_s17 + $0x758] ss:$84 sps:$4 sm:$0xff]  }
 0x14f   : > { %v8956_v55 = vadd.f32 %v6549_v43, %v3753_v35  ;;  %4423 = vmatprep.mubr.bf16.mxu0 %v7936_v29  ;;  %4520 = vmatprep.mubr.bf16.mxu1 %v7938_v33  ;;  %v7951_v29 = vld [vmem:[%s8345_s17 + $0x220] ss:$84 sps:$4 sm:$0xff]   ;;  %v3766_v35 = vadd.f32 %v8893_v23, %v8811_v32 }
 0x150   : > { %7169 = vmatpush3.bf16.msra.mxu1 %v7959_v41 }
 0x151   : > { %v6550_v56 = vpop.f32.mrb[44].mxu1  ;;  %v6462_v4 = vpop.f32.mrb[44].mxu0  ;;  %7170 = vmatprep.subr.bf16.mxu1 %v7974_v50 }
 0x152   : > { %v6551_v57 = vpop.f32.mrb[45].mxu1  ;;  %v6463_v31 = vpop.f32.mrb[45].mxu0 }
 0x153   : > { %v6552_v63 = vadd.f32 %v6551_v57, %v6550_v56  ;;  %v6553_v0 = vpop.f32.mrb[46].mxu1  ;;  %v8965_v8 = vadd.f32 %v6463_v31, %v6462_v4  ;;  %v6465_v2 = vpop.f32.mrb[46].mxu0  ;;  %v3769_v56 = vadd.f32 %v8901_v39, %v8811_v32  ;;  %v8023_v31 = vld [vmem:[%s10326_s1 + $0x3b0] sm:$0xff]   ;;  %v8038_v39 = vld [vmem:[%s10326_s1 + $0x3f8] sm:$0xff]  }
 0x154   : > { %v6554_v11 = vpop.f32.mrb[47].mxu1  ;;  %v6466_v12 = vpop.f32.mrb[47].mxu0  ;;  %7171 = vmatpush3.bf16.msra.mxu1 %v7975_v51 }
 0x155   : > { %v8977_v18 = vadd.f32 %v6552_v63, %v3758_v62  ;;  %v6555_v27 = vadd.f32 %v6554_v11, %v6553_v0  ;;  %v8979_v20 = vadd.f32 %v6466_v12, %v6465_v2  ;;  %7172 = vmatprep.subr.bf16.mxu1 %v7990_v47  ;;  %v8039_v2 = vld [vmem:[%s10326_s1 + $0x3b8] sm:$0xff]   ;;  %v7956_v11 = vld [vmem:[%s8345_s17 + $0x800] ss:$84 sps:$4 sm:$0xff]  }
 0x156   : > { %4424 = vmatmul.mubr.bf16.gmra.mrb[152].mxu0 %v7940_v52  ;;  %4521 = vmatmul.mubr.bf16.gmra.mrb[152].mxu1 %v7941_v53  ;;  %v7952_v52 = vld [vmem:[%s8345_s17 + $0x804] ss:$84 sps:$4 sm:$0xff]   ;;  %v7954_v53 = vld [vmem:[%s8345_s17 + $0x2cc] ss:$84 sps:$4 sm:$0xff]   ;;  %v7957_v12 = vld [vmem:[%s8345_s17 + $0x2c8] ss:$84 sps:$4 sm:$0xff]  }
 0x157   : > { %v8981_v21 = vadd.f32 %v6555_v27, %v3761_v15  ;;  %4431 = vmatprep.mubr.bf16.mxu0 %v7946_v10  ;;  %4528 = vmatprep.mubr.bf16.mxu1 %v7948_v19 }
 0x158   : > { %7173 = vmatpush3.bf16.msra.mxu1 %v7991_v13 }
 0x159   : > { %v6556_v33 = vpop.f32.mrb[48].mxu1  ;;  %v6620_v34 = vpop.f32.mrb[48].mxu0  ;;  %7174 = vmatprep.subr.bf16.mxu1 %v8006_v61 }
 0x15a   : > { %v6557_v37 = vpop.f32.mrb[49].mxu1  ;;  %v6621_v41 = vpop.f32.mrb[49].mxu0 }
 0x15b   : > { %v6558_v43 = vadd.f32 %v6557_v37, %v6556_v33  ;;  %v6622_v50 = vadd.f32 %v6621_v41, %v6620_v34  ;;  %v6559_v51 = vpop.f32.mrb[50].mxu1  ;;  %v6623_v47 = vpop.f32.mrb[50].mxu0  ;;  %v7962_v33 = vld [vmem:[%s8345_s17 + $0x8ac] ss:$84 sps:$4 sm:$0xff]   ;;  %v7964_v34 = vld [vmem:[%s8345_s17 + $0x374] ss:$84 sps:$4 sm:$0xff]   ;;  %v3777_v37 = vadd.f32 %v8923_v5, %v8811_v32 }
 0x15c   : > { %v6560_v4 = vpop.f32.mrb[51].mxu1  ;;  %v6624_v57 = vpop.f32.mrb[51].mxu0  ;;  %7175 = vmatpush3.bf16.msra.mxu1 %v8007_v25  ;;  %v3774_v25 = vadd.f32 %v8909_v54, %v8811_v32 }
 0x15d   : > { %v6561_v62 = vadd.f32 %v6560_v4, %v6559_v51  ;;  %v6625_v23 = vadd.f32 %v6624_v57, %v6623_v47  ;;  %v9000_v63 = vadd.f32 %v6558_v43, %v3766_v35  ;;  %v9003_v0 = vadd.f32 %v6622_v50, %v8826_v24  ;;  %7176 = vmatprep.subr.bf16.mxu1 %v8022_v9  ;;  %v8054_v24 = vld [vmem:[%s10326_s1 + $0x4c0] sm:$0xff]  }
 0x15e   : > { %4432 = vmatmul.mubr.bf16.gmra.mrb[156].mxu0 %v7950_v49  ;;  %4529 = vmatmul.mubr.bf16.gmra.mrb[156].mxu1 %v7951_v29 }
 0x15f   : > { %4439 = vmatprep.mubr.bf16.mxu0 %v7952_v52  ;;  %4536 = vmatprep.mubr.bf16.mxu1 %v7954_v53  ;;  %v9011_v10 = vadd.f32 %v6561_v62, %v3769_v56  ;;  %v9014_v19 = vadd.f32 %v6625_v23, %v8836_v59  ;;  %v7966_v52 = vld [vmem:[%s8345_s17 + $0x8a8] ss:$84 sps:$4 sm:$0xff]   ;;  %v7967_v53 = vld [vmem:[%s8345_s17 + $0x370] ss:$84 sps:$4 sm:$0xff]  }
 0x160   : > { %7177 = vmatpush3.bf16.msra.mxu1 %v8023_v31 }
 0x161   : > { %v6562_v13 = vpop.f32.mrb[52].mxu1  ;;  %v6626_v61 = vpop.f32.mrb[52].mxu0  ;;  %7178 = vmatprep.subr.bf16.mxu1 %v8038_v39 }
 0x162   : > { %v6563_v15 = vpop.f32.mrb[53].mxu1  ;;  %v6627_v27 = vpop.f32.mrb[53].mxu0 }
 0x163   : > { %v6564_v9 = vadd.f32 %v6563_v15, %v6562_v13  ;;  %v6628_v49 = vadd.f32 %v6627_v27, %v6626_v61  ;;  %v6565_v59 = vpop.f32.mrb[54].mxu1  ;;  %v6629_v29 = vpop.f32.mrb[54].mxu0 }
 0x164   : > { %v6566_v41 = vpop.f32.mrb[55].mxu1  ;;  %v6630_v35 = vpop.f32.mrb[55].mxu0  ;;  %7179 = vmatpush3.bf16.msra.mxu1 %v8039_v2 }
 0x165   : > { %v6567_v43 = vadd.f32 %v6566_v41, %v6565_v59  ;;  %v6631_v50 = vadd.f32 %v6630_v35, %v6629_v29  ;;  %v9027_v51 = vadd.f32 %v6564_v9, %v3774_v25  ;;  %v9030_v54 = vadd.f32 %v6628_v49, %v8851_v17  ;;  %7388 = vmatprep.subr.bf16.mxu1 %v8054_v24  ;;  %v7968_v24 = vld [vmem:[%s8345_s17 + $0x954] ss:$84 sps:$4 sm:$0xff]   ;;  %v7973_v49 = vld [vmem:[%s8345_s17 + $0x418] ss:$84 sps:$4 sm:$0xff]  }
 0x166   : > { %4440 = vmatmul.mubr.bf16.gmra.mrb[160].mxu0 %v7956_v11  ;;  %4537 = vmatmul.mubr.bf16.gmra.mrb[160].mxu1 %v7957_v12  ;;  %v3782_v17 = vadd.f32 %v8937_v28, %v8811_v32  ;;  %v7970_v11 = vld [vmem:[%s8345_s17 + $0x41c] ss:$84 sps:$4 sm:$0xff]  }
 0x167   : > { %4447 = vmatprep.mubr.bf16.mxu0 %v7962_v33  ;;  %4544 = vmatprep.mubr.bf16.mxu1 %v7964_v34  ;;  %v9032_v47 = vadd.f32 %v6567_v43, %v3777_v37  ;;  %v9035_v5 = vadd.f32 %v6631_v50, %v8855_v40  ;;  %v3785_v40 = vadd.f32 %v8948_v46, %v8811_v32  ;;  %v7972_v46 = vld [vmem:[%s8345_s17 + $0x950] ss:$84 sps:$4 sm:$0xff]  }
 0x168   : > { %v7978_v50 = vld [vmem:[%s8345_s17 + $0x9fc] ss:$84 sps:$4 sm:$0xff]  }
 0x169   : > { %v6568_v56 = vpop.f32.mrb[56].mxu1  ;;  %v6632_v4 = vpop.f32.mrb[56].mxu0 }
 0x16a   : > { %v6569_v57 = vpop.f32.mrb[57].mxu1  ;;  %v6633_v31 = vpop.f32.mrb[57].mxu0 }
 0x16b   : > { %v6570_v62 = vadd.f32 %v6569_v57, %v6568_v56  ;;  %v6634_v23 = vadd.f32 %v6633_v31, %v6632_v4  ;;  %v6571_v39 = vpop.f32.mrb[58].mxu1  ;;  %v6635_v2 = vpop.f32.mrb[58].mxu0 }
 0x16c   : > { %v6572_v12 = vpop.f32.mrb[59].mxu1  ;;  %v6636_v13 = vpop.f32.mrb[59].mxu0 }
 0x16d   : > { %v6573_v61 = vadd.f32 %v6572_v12, %v6571_v39  ;;  %v6637_v15 = vadd.f32 %v6636_v13, %v6635_v2  ;;  %v9045_v27 = vadd.f32 %v6570_v62, %v3782_v17  ;;  %v9048_v25 = vadd.f32 %v6634_v23, %v8867_v45  ;;  %v7982_v2 = vld [vmem:[%s8345_s17 + $0x9f8] ss:$84 sps:$4 sm:$0xff]  }
 0x16e   : > { %4448 = vmatmul.mubr.bf16.gmra.mrb[164].mxu0 %v7966_v52  ;;  %4545 = vmatmul.mubr.bf16.gmra.mrb[164].mxu1 %v7967_v53  ;;  %v3790_v45 = vadd.f32 %v8965_v8, %v8811_v32  ;;  %v7980_v52 = vld [vmem:[%s8345_s17 + $0x4c4] ss:$84 sps:$4 sm:$0xff]   ;;  %v3793_v53 = vadd.f32 %v8979_v20, %v8811_v32 }
 0x16f   : > { %4455 = vmatprep.mubr.bf16.mxu0 %v7968_v24  ;;  %4552 = vmatprep.mubr.bf16.mxu1 %v7970_v11  ;;  %v9050_v28 = vadd.f32 %v6573_v61, %v3785_v40  ;;  %v9053_v9 = vadd.f32 %v6637_v15, %v8871_v60  ;;  %v7983_v24 = vld [vmem:[%s8345_s17 + $0x4c0] ss:$84 sps:$4 sm:$0xff]  }
 0x170   : > { %v7988_v15 = vld [vmem:[%s8345_s17 + $0x34] ss:$84 sps:$4 sm:$0xff]  }
 0x171   : > { %v6574_v59 = vpop.f32.mrb[60].mxu1  ;;  %v6638_v29 = vpop.f32.mrb[60].mxu0 }
 0x172   : > { %v6575_v33 = vpop.f32.mrb[61].mxu1  ;;  %v6639_v34 = vpop.f32.mrb[61].mxu0 }
 0x173   : > { %v6576_v37 = vadd.f32 %v6575_v33, %v6574_v59  ;;  %v6640_v41 = vadd.f32 %v6639_v34, %v6638_v29  ;;  %v6577_v35 = vpop.f32.mrb[62].mxu1  ;;  %v6641_v43 = vpop.f32.mrb[62].mxu0 }
 0x174   : > { %v6578_v60 = vpop.f32.mrb[63].mxu1  ;;  %v6642_v56 = vpop.f32.mrb[63].mxu0 }
 0x175   : > { %v6579_v4 = vadd.f32 %v6578_v60, %v6577_v35  ;;  %v6643_v57 = vadd.f32 %v6642_v56, %v6641_v43  ;;  %v9063_v31 = vadd.f32 %v6576_v37, %v3790_v45  ;;  %v9066_v17 = vadd.f32 %v6640_v41, %v8883_v6  ;;  %v9078_v6 = vld [vmem:[%s10327_s2] ss:$0 sm:$0xff] }
 0x176   : > { %4456 = vmatmul.mubr.bf16.gmra.mrb[168].mxu0 %v7972_v46  ;;  %4553 = vmatmul.mubr.bf16.gmra.mrb[168].mxu1 %v7973_v49  ;;  %v3798_v11 = vadd.f32 %v9078_v6, %v8726_v22  ;;  %v3801_v46 = vadd.f32 %v9078_v6, %v8732_v30 }
 0x177   : > { %4463 = vmatprep.mubr.bf16.mxu0 %v7978_v50  ;;  %4560 = vmatprep.mubr.bf16.mxu1 %v7980_v52  ;;  %v9068_v8 = vadd.f32 %v6579_v4, %v3793_v53  ;;  %v9071_v32 = vadd.f32 %v6643_v57, %v8887_v16  ;;  %v7984_v16 = vld [vmem:[%s8345_s17 + $0x56c] ss:$84 sps:$4 sm:$0xff]   ;;  %v7986_v50 = vld [vmem:[%s8345_s17 + $0x30] ss:$84 sps:$4 sm:$0xff]   ;;  %v7989_v52 = vld [vmem:[%s8345_s17 + $0x568] ss:$84 sps:$4 sm:$0xff]  }
 0x178   : > { %v7993_v57 = vld [vmem:[%s10326_s1 + $0x400] sm:$0xff]  }
 0x179   : > { %v6580_v20 = vpop.f32.mrb[64].mxu1  ;;  %v6644_v62 = vpop.f32.mrb[64].mxu0 }
 0x17a   : > { %v6581_v23 = vpop.f32.mrb[65].mxu1  ;;  %v6645_v39 = vpop.f32.mrb[65].mxu0 }
 0x17b   : > { %v6582_v40 = vadd.f32 %v6581_v23, %v6580_v20  ;;  %v6646_v12 = vadd.f32 %v6645_v39, %v6644_v62  ;;  %v6583_v13 = vpop.f32.mrb[66].mxu1  ;;  %v6647_v61 = vpop.f32.mrb[66].mxu0  ;;  %v3809_v20 = vadd.f32 %v9078_v6, %v8750_v48  ;;  %v7996_v39 = vld [vmem:[%s8345_s17 + $0xdc] ss:$84 sps:$4 sm:$0xff]   ;;  %v8009_v48 = vld [vmem:[%s10326_s1 + $0x408] sm:$0xff]  }
 0x17c   : > { %v6584_v49 = vpop.f32.mrb[67].mxu1  ;;  %v6648_v59 = vpop.f32.mrb[67].mxu0 }
 0x17d   : > { %v6585_v29 = vadd.f32 %v6584_v49, %v6583_v13  ;;  %v6649_v33 = vadd.f32 %v6648_v59, %v6647_v61  ;;  %v9086_v34 = vadd.f32 %v6582_v40, %v3798_v11  ;;  %v9089_v45 = vadd.f32 %v6646_v12, %v8899_v36  ;;  %v7998_v49 = vld [vmem:[%s8345_s17 + $0x610] ss:$84 sps:$4 sm:$0xff]   ;;  %v7999_v59 = vld [vmem:[%s8345_s17 + $0xd8] ss:$84 sps:$4 sm:$0xff]  }
 0x17e   : > { %4464 = vmatmul.mubr.bf16.gmra.mrb[172].mxu0 %v7982_v2  ;;  %4561 = vmatmul.mubr.bf16.gmra.mrb[172].mxu1 %v7983_v24  ;;  %v3806_v36 = vadd.f32 %v9078_v6, %v8738_v38  ;;  %v8008_v2 = vld [vmem:[%s10326_s1 + $0x448] sm:$0xff]  }
 0x17f   : > { %4568 = vmatprep.mubr.bf16.mxu1 %v7984_v16  ;;  %4665 = vmatprep.mubr.bf16.mxu0 %v7988_v15  ;;  %v9091_v22 = vadd.f32 %v6585_v29, %v3801_v46  ;;  %v9094_v30 = vadd.f32 %v6649_v33, %v8903_v44  ;;  %v7994_v44 = vld [vmem:[%s8345_s17 + $0x614] ss:$84 sps:$4 sm:$0xff]   ;;  %v3814_v29 = vadd.f32 %v9078_v6, %v8762_v58  ;;  %v8040_v58 = vld [vmem:[%s10326_s1 + $0x458] sm:$0xff]  }
 0x181   : > { %v6586_v37 = vpop.f32.mrb[68].mxu1  ;;  %v6650_v41 = vpop.f32.mrb[68].mxu0 }
 0x182   : > { %v6587_v35 = vpop.f32.mrb[69].mxu1  ;;  %v6651_v43 = vpop.f32.mrb[69].mxu0 }
 0x183   : > { %v6588_v53 = vadd.f32 %v6587_v35, %v6586_v37  ;;  %v6652_v60 = vadd.f32 %v6651_v43, %v6650_v41  ;;  %v6589_v56 = vpop.f32.mrb[70].mxu1  ;;  %v6653_v4 = vpop.f32.mrb[70].mxu0  ;;  %v8000_v35 = vld [vmem:[%s8345_s17 + $0x6bc] ss:$84 sps:$4 sm:$0xff]   ;;  %v8002_v43 = vld [vmem:[%s8345_s17 + $0x184] ss:$84 sps:$4 sm:$0xff]  }
 0x184   : > { %v6590_v62 = vpop.f32.mrb[71].mxu1  ;;  %v6654_v23 = vpop.f32.mrb[71].mxu0 }
 0x185   : > { %v6591_v38 = vadd.f32 %v6590_v62, %v6589_v56  ;;  %v6655_v24 = vadd.f32 %v6654_v23, %v6653_v4  ;;  %v9110_v11 = vadd.f32 %v6588_v53, %v3806_v36  ;;  %v9113_v40 = vadd.f32 %v6652_v60, %v8921_v1  ;;  %v8024_v1 = vld [vmem:[%s10326_s1 + $0x450] sm:$0xff]   ;;  %v8056_v23 = vld [vmem:[%s10326_s1 + $0x460] sm:$0xff]  }
 0x186   : > { %4569 = vmatmul.mubr.bf16.gmra.mrb[176].mxu1 %v7989_v52  ;;  %4666 = vmatmul.mubr.bf16.vlgmr.msra.gmra.mrb[176].mxu0 %v7986_v50  ;;  %v3817_v50 = vadd.f32 %v9078_v6, %v8771_v3  ;;  %v8025_v53 = vld [vmem:[%s10326_s1 + $0x410] sm:$0xff]  }
 0x187   : > { %7277 = vmatpush3.bf16.msra.mxu0 %v7993_v57  ;;  %4576 = vmatprep.mubr.bf16.mxu1 %v7994_v44  ;;  %v9118_v12 = vadd.f32 %v6591_v38, %v3809_v20  ;;  %v9121_v13 = vadd.f32 %v6655_v24, %v8925_v7  ;;  %v8041_v20 = vld [vmem:[%s10326_s1 + $0x418] sm:$0xff]   ;;  %v8005_v24 = vld [vmem:[%s8345_s17 + $0x180] ss:$84 sps:$4 sm:$0xff]  }
 0x188   : > { %4673 = vmatprep.mubr.bf16.mxu0 %v7996_v39  ;;  %7278 = vmatprep.subr.bf16.mxu0 %v8008_v2  ;;  %v8004_v38 = vld [vmem:[%s8345_s17 + $0x6b8] ss:$84 sps:$4 sm:$0xff]  }
 0x189   : > { %v6592_v61 = vpop.f32.mrb[72].mxu1  ;;  %v6656_v16 = vpop.f32.mrb[72].mxu0 }
 0x18a   : > { %v6593_v15 = vpop.f32.mrb[73].mxu1  ;;  %v6657_v46 = vpop.f32.mrb[73].mxu0 }
 0x18b   : > { %v6594_v33 = vadd.f32 %v6593_v15, %v6592_v61  ;;  %v6658_v37 = vadd.f32 %v6657_v46, %v6656_v16  ;;  %v6595_v7 = vpop.f32.mrb[74].mxu1  ;;  %v6659_v41 = vpop.f32.mrb[74].mxu0  ;;  %7279 = vmatpush3.bf16.msra.mxu0 %v8009_v48  ;;  %v8010_v15 = vld [vmem:[%s8345_s17 + $0x764] ss:$84 sps:$4 sm:$0xff]   ;;  %v8012_v46 = vld [vmem:[%s8345_s17 + $0x22c] ss:$84 sps:$4 sm:$0xff]  }
 0x18c   : > { %v6596_v52 = vpop.f32.mrb[75].mxu1  ;;  %v6660_v36 = vpop.f32.mrb[75].mxu0  ;;  %7280 = vmatprep.subr.bf16.mxu0 %v8024_v1 }
 0x18d   : > { %v6597_v60 = vadd.f32 %v6596_v52, %v6595_v7  ;;  %v6661_v56 = vadd.f32 %v6660_v36, %v6659_v41  ;;  %v9140_v4 = vadd.f32 %v6594_v33, %v3814_v29  ;;  %v9143_v57 = vadd.f32 %v6658_v37, %v8946_v42  ;;  %v8057_v33 = vld [vmem:[%s10326_s1 + $0x420] sm:$0xff]   ;;  %v8088_v52 = vld [vmem:[%s10326_s1 + $0x470] sm:$0xff]  }
 0x18e   : > { %4577 = vmatmul.mubr.bf16.gmra.mrb[180].mxu1 %v7998_v49  ;;  %4674 = vmatmul.mubr.bf16.gmra.mrb[180].mxu0 %v7999_v59  ;;  %v3825_v49 = vadd.f32 %v9078_v6, %v8798_v26  ;;  %v8072_v26 = vld [vmem:[%s10326_s1 + $0x468] sm:$0xff]  }
 0x18f   : > { %4584 = vmatprep.mubr.bf16.mxu1 %v8000_v35  ;;  %4681 = vmatprep.mubr.bf16.mxu0 %v8002_v43  ;;  %v9145_v3 = vadd.f32 %v6597_v60, %v3817_v50  ;;  %v9148_v44 = vadd.f32 %v6661_v56, %v8956_v55  ;;  %v3822_v55 = vadd.f32 %v9078_v6, %v8786_v14  ;;  %v8014_v60 = vld [vmem:[%s8345_s17 + $0x760] ss:$84 sps:$4 sm:$0xff]   ;;  %v8015_v56 = vld [vmem:[%s8345_s17 + $0x228] ss:$84 sps:$4 sm:$0xff]  }
 0x190   : > { %7281 = vmatpush3.bf16.msra.mxu0 %v8025_v53 }
 0x191   : > { %v6598_v62 = vpop.f32.mrb[76].mxu1  ;;  %v6662_v42 = vpop.f32.mrb[76].mxu0  ;;  %7282 = vmatprep.subr.bf16.mxu0 %v8040_v58 }
 0x192   : > { %v6599_v39 = vpop.f32.mrb[77].mxu1  ;;  %v6663_v2 = vpop.f32.mrb[77].mxu0 }
 0x193   : > { %v6600_v48 = vadd.f32 %v6599_v39, %v6598_v62  ;;  %v6664_v1 = vadd.f32 %v6663_v2, %v6662_v42  ;;  %v6601_v61 = vpop.f32.mrb[78].mxu1  ;;  %v6665_v16 = vpop.f32.mrb[78].mxu0  ;;  %v8016_v42 = vld [vmem:[%s8345_s17 + $0x80c] ss:$84 sps:$4 sm:$0xff]  }
 0x194   : > { %v6602_v59 = vpop.f32.mrb[79].mxu1  ;;  %v6666_v29 = vpop.f32.mrb[79].mxu0  ;;  %7283 = vmatpush3.bf16.msra.mxu0 %v8041_v20 }
 0x195   : > { %v6603_v37 = vadd.f32 %v6602_v59, %v6601_v61  ;;  %v6667_v7 = vadd.f32 %v6666_v29, %v6665_v16  ;;  %7284 = vmatprep.subr.bf16.mxu0 %v8056_v23  ;;  %v9167_v14 = vadd.f32 %v6600_v48, %v3822_v55  ;;  %v9170_v41 = vadd.f32 %v6664_v1, %v8977_v18  ;;  %v8073_v18 = vld [vmem:[%s10326_s1 + $0x428] sm:$0xff]   ;;  %v8104_v61 = vld [vmem:[%s10326_s1 + $0x478] sm:$0xff]   ;;  %v8021_v29 = vld [vmem:[%s8345_s17 + $0x2d0] ss:$84 sps:$4 sm:$0xff]  }
 0x196   : > { %4585 = vmatmul.mubr.bf16.gmra.mrb[184].mxu1 %v8004_v38  ;;  %4682 = vmatmul.mubr.bf16.gmra.mrb[184].mxu0 %v8005_v24  ;;  %v8018_v23 = vld [vmem:[%s8345_s17 + $0x2d4] ss:$84 sps:$4 sm:$0xff]  }
 0x197   : > { %4592 = vmatprep.mubr.bf16.mxu1 %v8010_v15  ;;  %4689 = vmatprep.mubr.bf16.mxu0 %v8012_v46  ;;  %v9175_v6 = vadd.f32 %v6603_v37, %v3825_v49  ;;  %v9178_v35 = vadd.f32 %v6667_v7, %v8981_v21  ;;  %v8089_v38 = vld [vmem:[%s10326_s1 + $0x430] sm:$0xff]   ;;  %v8020_v59 = vld [vmem:[%s8345_s17 + $0x808] ss:$84 sps:$4 sm:$0xff]  }
 0x198   : > { %7285 = vmatpush3.bf16.msra.mxu0 %v8057_v33 }
 0x199   : > { %v6668_v43 = vpop.f32.mrb[80].mxu0  ;;  %v6732_v50 = vpop.f32.mrb[80].mxu1  ;;  %7286 = vmatprep.subr.bf16.mxu0 %v8072_v26 }
 0x19a   : > { %v6669_v36 = vpop.f32.mrb[81].mxu0  ;;  %v6733_v53 = vpop.f32.mrb[81].mxu1 }
 0x19b   : > { %v6670_v58 = vadd.f32 %v6669_v36, %v6668_v43  ;;  %v6734_v21 = vadd.f32 %v6733_v53, %v6732_v50  ;;  %v6671_v20 = vpop.f32.mrb[82].mxu0  ;;  %v6735_v62 = vpop.f32.mrb[82].mxu1  ;;  %v8028_v43 = vld [vmem:[%s8345_s17 + $0x37c] ss:$84 sps:$4 sm:$0xff]  }
 0x19c   : > { %v6672_v39 = vpop.f32.mrb[83].mxu0  ;;  %v6736_v2 = vpop.f32.mrb[83].mxu1  ;;  %7287 = vmatpush3.bf16.msra.mxu0 %v8073_v18  ;;  %v8026_v18 = vld [vmem:[%s8345_s17 + $0x8b4] ss:$84 sps:$4 sm:$0xff]  }
 0x19d   : > { %v9194_v24 = vadd.f32 %v6670_v58, %v9000_v63  ;;  %v9197_v55 = vadd.f32 %v6734_v21, %v9003_v0  ;;  %v6673_v48 = vadd.f32 %v6672_v39, %v6671_v20  ;;  %v6737_v1 = vadd.f32 %v6736_v2, %v6735_v62  ;;  %7288 = vmatprep.subr.bf16.mxu0 %v8088_v52  ;;  %v8105_v0 = vld [vmem:[%s10326_s1 + $0x438] sm:$0xff]  }
 0x19e   : > { %4593 = vmatmul.mubr.bf16.gmra.mrb[188].mxu1 %v8014_v60  ;;  %4690 = vmatmul.mubr.bf16.gmra.mrb[188].mxu0 %v8015_v56 }
 0x19f   : > { %v9203_v16 = vadd.f32 %v6673_v48, %v9011_v10  ;;  %v9206_v63 = vadd.f32 %v6737_v1, %v9014_v19  ;;  %4600 = vmatprep.mubr.bf16.mxu1 %v8016_v42  ;;  %4697 = vmatprep.mubr.bf16.mxu0 %v8018_v23  ;;  %v9214_v10 = vld [vmem:[%s10326_s1 + $0x500] sm:$0xff]   ;;  %v8031_v23 = vld [vmem:[%s8345_s17 + $0x378] ss:$84 sps:$4 sm:$0xff]   ;;  %v8032_v1 = vld [vmem:[%s8345_s17 + $0x95c] ss:$84 sps:$4 sm:$0xff]  }
 0x1a0   : > { %7289 = vmatpush3.bf16.msra.mxu0 %v8089_v38  ;;  %v8030_v42 = vld [vmem:[%s8345_s17 + $0x8b0] ss:$84 sps:$4 sm:$0xff]  }
 0x1a1   : > { %v6674_v15 = vpop.f32.mrb[84].mxu0  ;;  %v6738_v46 = vpop.f32.mrb[84].mxu1  ;;  %7290 = vmatprep.subr.bf16.mxu0 %v8104_v61  ;;  %v8034_v61 = vld [vmem:[%s8345_s17 + $0x424] ss:$84 sps:$4 sm:$0xff]  }
 0x1a2   : > { %v6675_v49 = vpop.f32.mrb[85].mxu0  ;;  %v6739_v19 = vpop.f32.mrb[85].mxu1 }
 0x1a3   : > { %v6676_v33 = vadd.f32 %v6675_v49, %v6674_v15  ;;  %v6740_v37 = vadd.f32 %v6739_v19, %v6738_v46  ;;  %v6677_v7 = vpop.f32.mrb[86].mxu0  ;;  %v6741_v26 = vpop.f32.mrb[86].mxu1 }
 0x1a4   : > { %v6678_v50 = vpop.f32.mrb[87].mxu0  ;;  %v6742_v52 = vpop.f32.mrb[87].mxu1  ;;  %7291 = vmatpush3.bf16.msra.mxu0 %v8105_v0 }
 0x1a5   : > { %v9221_v36 = vadd.f32 %v6676_v33, %v9027_v51  ;;  %v9224_v53 = vadd.f32 %v6740_v37, %v9030_v54  ;;  %v6679_v60 = vadd.f32 %v6678_v50, %v6677_v7  ;;  %v6743_v56 = vadd.f32 %v6742_v52, %v6741_v26  ;;  %7524 = vmatprep.subr.bf16.mxu0 %v9214_v10  ;;  %v8037_v7 = vld [vmem:[%s8345_s17 + $0x420] ss:$84 sps:$4 sm:$0xff]   ;;  %v8042_v52 = vld [vmem:[%s8345_s17 + $0xa04] ss:$84 sps:$4 sm:$0xff]  }
 0x1a6   : > { %4601 = vmatmul.mubr.bf16.gmra.mrb[192].mxu1 %v8020_v59  ;;  %4698 = vmatmul.mubr.bf16.gmra.mrb[192].mxu0 %v8021_v29 }
 0x1a7   : > { %v9228_v58 = vadd.f32 %v6679_v60, %v9032_v47  ;;  %v9231_v21 = vadd.f32 %v6743_v56, %v9035_v5  ;;  %4608 = vmatprep.mubr.bf16.mxu1 %v8026_v18  ;;  %4705 = vmatprep.mubr.bf16.mxu0 %v8028_v43  ;;  %v8044_v60 = vld [vmem:[%s8345_s17 + $0x4cc] ss:$84 sps:$4 sm:$0xff]  }
 0x1a9   : > { %v6680_v51 = vpop.f32.mrb[88].mxu0  ;;  %v6744_v20 = vpop.f32.mrb[88].mxu1 }
 0x1aa   : > { %v6681_v54 = vpop.f32.mrb[89].mxu0  ;;  %v6745_v62 = vpop.f32.mrb[89].mxu1 }
 0x1ab   : > { %v6682_v39 = vadd.f32 %v6681_v54, %v6680_v51  ;;  %v6746_v2 = vadd.f32 %v6745_v62, %v6744_v20  ;;  %v6683_v38 = vpop.f32.mrb[90].mxu0  ;;  %v6747_v48 = vpop.f32.mrb[90].mxu1 }
 0x1ac   : > { %v6684_v0 = vpop.f32.mrb[91].mxu0  ;;  %v6748_v47 = vpop.f32.mrb[91].mxu1 }
 0x1ad   : > { %v9238_v5 = vadd.f32 %v6682_v39, %v9045_v27  ;;  %v9241_v15 = vadd.f32 %v6746_v2, %v9048_v25  ;;  %v6685_v46 = vadd.f32 %v6684_v0, %v6683_v38  ;;  %v6749_v49 = vadd.f32 %v6748_v47, %v6747_v48  ;;  %v8036_v25 = vld [vmem:[%s8345_s17 + $0x958] ss:$84 sps:$4 sm:$0xff]   ;;  %v8047_v38 = vld [vmem:[%s8345_s17 + $0x4c8] ss:$84 sps:$4 sm:$0xff]  }
 0x1ae   : > { %4609 = vmatmul.mubr.bf16.gmra.mrb[196].mxu1 %v8030_v42  ;;  %4706 = vmatmul.mubr.bf16.gmra.mrb[196].mxu0 %v8031_v23  ;;  %v8048_v47 = vld [vmem:[%s8345_s17 + $0x574] ss:$84 sps:$4 sm:$0xff]  }
 0x1af   : > { %v9244_v19 = vadd.f32 %v6685_v46, %v9050_v28  ;;  %v9247_v59 = vadd.f32 %v6749_v49, %v9053_v9  ;;  %4616 = vmatprep.mubr.bf16.mxu1 %v8032_v1  ;;  %4713 = vmatprep.mubr.bf16.mxu0 %v8034_v61  ;;  %v8052_v46 = vld [vmem:[%s8345_s17 + $0x3c] ss:$84 sps:$4 sm:$0xff]  }
 0x1b1   : > { %v6686_v29 = vpop.f32.mrb[92].mxu0  ;;  %v6750_v27 = vpop.f32.mrb[92].mxu1 }
 0x1b2   : > { %v6687_v33 = vpop.f32.mrb[93].mxu0  ;;  %v6751_v37 = vpop.f32.mrb[93].mxu1 }
 0x1b3   : > { %v6688_v26 = vadd.f32 %v6687_v33, %v6686_v29  ;;  %v6752_v18 = vadd.f32 %v6751_v37, %v6750_v27  ;;  %v6689_v43 = vpop.f32.mrb[94].mxu0  ;;  %v6753_v50 = vpop.f32.mrb[94].mxu1 }
 0x1b4   : > { %v6690_v56 = vpop.f32.mrb[95].mxu0  ;;  %v6754_v28 = vpop.f32.mrb[95].mxu1 }
 0x1b5   : > { %v9254_v9 = vadd.f32 %v6688_v26, %v9063_v31  ;;  %v9257_v51 = vadd.f32 %v6752_v18, %v9066_v17  ;;  %v6691_v20 = vadd.f32 %v6690_v56, %v6689_v43  ;;  %v6755_v54 = vadd.f32 %v6754_v28, %v6753_v50  ;;  %v8046_v17 = vld [vmem:[%s8345_s17 + $0xa00] ss:$84 sps:$4 sm:$0xff]   ;;  %v8053_v43 = vld [vmem:[%s8345_s17 + $0x570] ss:$84 sps:$4 sm:$0xff]  }
 0x1b6   : > { %4617 = vmatmul.mubr.bf16.gmra.mrb[200].mxu1 %v8036_v25  ;;  %4714 = vmatmul.mubr.bf16.gmra.mrb[200].mxu0 %v8037_v7  ;;  %v8058_v28 = vld [vmem:[%s8345_s17 + $0x61c] ss:$84 sps:$4 sm:$0xff]  }
 0x1b7   : > { %v9260_v62 = vadd.f32 %v6691_v20, %v9068_v8  ;;  %v9263_v42 = vadd.f32 %v6755_v54, %v9071_v32  ;;  %4624 = vmatprep.mubr.bf16.mxu1 %v8042_v52  ;;  %4721 = vmatprep.mubr.bf16.mxu0 %v8044_v60  ;;  %v8060_v54 = vld [vmem:[%s8345_s17 + $0xe4] ss:$84 sps:$4 sm:$0xff]  }
 0x1b9   : > { %v6692_v23 = vpop.f32.mrb[96].mxu0  ;;  %v6756_v31 = vpop.f32.mrb[96].mxu1 }
 0x1ba   : > { %v6693_v39 = vpop.f32.mrb[97].mxu0  ;;  %v6757_v2 = vpop.f32.mrb[97].mxu1 }
 0x1bb   : > { %v6694_v48 = vadd.f32 %v6693_v39, %v6692_v23  ;;  %v6758_v1 = vadd.f32 %v6757_v2, %v6756_v31  ;;  %v6695_v61 = vpop.f32.mrb[98].mxu0  ;;  %v6759_v0 = vpop.f32.mrb[98].mxu1  ;;  %v8070_v23 = vld [vmem:[%s10326_s1 + $0x4c8] sm:$0xff]  }
 0x1bc   : > { %v6696_v49 = vpop.f32.mrb[99].mxu0  ;;  %v6760_v8 = vpop.f32.mrb[99].mxu1 }
 0x1bd   : > { %v9270_v32 = vadd.f32 %v6694_v48, %v9086_v34  ;;  %v9273_v29 = vadd.f32 %v6758_v1, %v9089_v45  ;;  %v6697_v27 = vadd.f32 %v6696_v49, %v6695_v61  ;;  %v6761_v33 = vadd.f32 %v6760_v8, %v6759_v0  ;;  %v8050_v45 = vld [vmem:[%s8345_s17 + $0x38] ss:$84 sps:$4 sm:$0xff]  }
 0x1be   : > { %4625 = vmatmul.mubr.bf16.gmra.mrb[204].mxu1 %v8046_v17  ;;  %4722 = vmatmul.mubr.bf16.gmra.mrb[204].mxu0 %v8047_v38 }
 0x1bf   : > { %v9276_v37 = vadd.f32 %v6697_v27, %v9091_v22  ;;  %v9279_v25 = vadd.f32 %v6761_v33, %v9094_v30  ;;  %4729 = vmatprep.mubr.bf16.mxu0 %v8048_v47  ;;  %4826 = vmatprep.mubr.bf16.mxu1 %v8052_v46  ;;  %v8055_v22 = vld [vmem:[%s10326_s1 + $0x480] sm:$0xff]  }
 0x1c0   : > { %v8063_v47 = vld [vmem:[%s8345_s17 + $0xe0] ss:$84 sps:$4 sm:$0xff]   ;;  %v8064_v33 = vld [vmem:[%s8345_s17 + $0x6c4] ss:$84 sps:$4 sm:$0xff]  }
 0x1c1   : > { %v6698_v7 = vpop.f32.mrb[100].mxu0  ;;  %v6762_v34 = vpop.f32.mrb[100].mxu1 }
 0x1c2   : > { %v6699_v26 = vpop.f32.mrb[101].mxu0  ;;  %v6763_v18 = vpop.f32.mrb[101].mxu1 }
 0x1c3   : > { %v6700_v50 = vadd.f32 %v6699_v26, %v6698_v7  ;;  %v6764_v52 = vadd.f32 %v6763_v18, %v6762_v34  ;;  %v6701_v60 = vpop.f32.mrb[102].mxu0  ;;  %v6765_v56 = vpop.f32.mrb[102].mxu1  ;;  %v8066_v7 = vld [vmem:[%s8345_s17 + $0x18c] ss:$84 sps:$4 sm:$0xff]   ;;  %v8087_v18 = vld [vmem:[%s10326_s1 + $0x490] sm:$0xff]  }
 0x1c4   : > { %v6702_v30 = vpop.f32.mrb[103].mxu0  ;;  %v6766_v20 = vpop.f32.mrb[103].mxu1 }
 0x1c5   : > { %v9292_v31 = vadd.f32 %v6700_v50, %v9110_v11  ;;  %v9295_v39 = vadd.f32 %v6764_v52, %v9113_v40  ;;  %v6703_v2 = vadd.f32 %v6702_v30, %v6701_v60  ;;  %v6767_v17 = vadd.f32 %v6766_v20, %v6765_v56  ;;  %v8071_v11 = vld [vmem:[%s10326_s1 + $0x488] sm:$0xff]   ;;  %v8086_v40 = vld [vmem:[%s10326_s1 + $0x4d0] sm:$0xff]   ;;  %v8102_v60 = vld [vmem:[%s10326_s1 + $0x4d8] sm:$0xff]  }
 0x1c6   : > { %4730 = vmatmul.mubr.bf16.gmra.mrb[208].mxu0 %v8053_v43  ;;  %4827 = vmatmul.mubr.bf16.vlgmr.msra.gmra.mrb[208].mxu1 %v8050_v45 }
 0x1c7   : > { %v9298_v38 = vadd.f32 %v6703_v2, %v9118_v12  ;;  %v9301_v48 = vadd.f32 %v6767_v17, %v9121_v13  ;;  %7389 = vmatpush3.bf16.msra.mxu1 %v8055_v22  ;;  %4737 = vmatprep.mubr.bf16.mxu0 %v8058_v28  ;;  %v8062_v13 = vld [vmem:[%s8345_s17 + $0x618] ss:$84 sps:$4 sm:$0xff]  }
 0x1c8   : > { %4834 = vmatprep.mubr.bf16.mxu1 %v8060_v54  ;;  %7390 = vmatprep.subr.bf16.mxu1 %v8070_v23  ;;  %v8069_v54 = vld [vmem:[%s8345_s17 + $0x188] ss:$84 sps:$4 sm:$0xff]  }
 0x1c9   : > { %v6704_v1 = vpop.f32.mrb[104].mxu0  ;;  %v6768_v12 = vpop.f32.mrb[104].mxu1 }
 0x1ca   : > { %v6705_v61 = vpop.f32.mrb[105].mxu0  ;;  %v6769_v0 = vpop.f32.mrb[105].mxu1 }
 0x1cb   : > { %v6706_v46 = vadd.f32 %v6705_v61, %v6704_v1  ;;  %v6770_v49 = vadd.f32 %v6769_v0, %v6768_v12  ;;  %v6707_v8 = vpop.f32.mrb[106].mxu0  ;;  %v6771_v27 = vpop.f32.mrb[106].mxu1  ;;  %7391 = vmatpush3.bf16.msra.mxu1 %v8071_v11  ;;  %v8076_v1 = vld [vmem:[%s8345_s17 + $0x234] ss:$84 sps:$4 sm:$0xff]   ;;  %v8119_v0 = vld [vmem:[%s10326_s1 + $0x4a0] sm:$0xff]  }
 0x1cc   : > { %v6708_v34 = vpop.f32.mrb[107].mxu0  ;;  %v6772_v26 = vpop.f32.mrb[107].mxu1  ;;  %7392 = vmatprep.subr.bf16.mxu1 %v8086_v40  ;;  %v8074_v40 = vld [vmem:[%s8345_s17 + $0x76c] ss:$84 sps:$4 sm:$0xff]  }
 0x1cd   : > { %v9317_v45 = vadd.f32 %v6706_v46, %v9140_v4  ;;  %v9320_v43 = vadd.f32 %v6770_v49, %v9143_v57  ;;  %v6709_v50 = vadd.f32 %v6708_v34, %v6707_v8  ;;  %v6773_v52 = vadd.f32 %v6772_v26, %v6771_v27  ;;  %v8103_v4 = vld [vmem:[%s10326_s1 + $0x498] sm:$0xff]   ;;  %v8133_v8 = vld [vmem:[%s10326_s1 + $0x4e8] sm:$0xff]  }
 0x1ce   : > { %4738 = vmatmul.mubr.bf16.gmra.mrb[212].mxu0 %v8062_v13  ;;  %4835 = vmatmul.mubr.bf16.gmra.mrb[212].mxu1 %v8063_v47 }
 0x1cf   : > { %v9326_v56 = vadd.f32 %v6709_v50, %v9145_v3  ;;  %v9329_v22 = vadd.f32 %v6773_v52, %v9148_v44  ;;  %4745 = vmatprep.mubr.bf16.mxu0 %v8064_v33  ;;  %4842 = vmatprep.mubr.bf16.mxu1 %v8066_v7  ;;  %v8118_v3 = vld [vmem:[%s10326_s1 + $0x4e0] sm:$0xff]  }
 0x1d0   : > { %7393 = vmatpush3.bf16.msra.mxu1 %v8087_v18  ;;  %v8068_v44 = vld [vmem:[%s8345_s17 + $0x6c0] ss:$84 sps:$4 sm:$0xff]   ;;  %v8079_v18 = vld [vmem:[%s8345_s17 + $0x230] ss:$84 sps:$4 sm:$0xff]  }
 0x1d1   : > { %v6710_v57 = vpop.f32.mrb[108].mxu0  ;;  %v6774_v28 = vpop.f32.mrb[108].mxu1  ;;  %7394 = vmatprep.subr.bf16.mxu1 %v8102_v60 }
 0x1d2   : > { %v6711_v30 = vpop.f32.mrb[109].mxu0  ;;  %v6775_v20 = vpop.f32.mrb[109].mxu1 }
 0x1d3   : > { %v6712_v23 = vadd.f32 %v6711_v30, %v6710_v57  ;;  %v6776_v2 = vadd.f32 %v6775_v20, %v6774_v28  ;;  %v6713_v17 = vpop.f32.mrb[110].mxu0  ;;  %v6777_v11 = vpop.f32.mrb[110].mxu1  ;;  %v8080_v57 = vld [vmem:[%s8345_s17 + $0x814] ss:$84 sps:$4 sm:$0xff]   ;;  %v8082_v28 = vld [vmem:[%s8345_s17 + $0x2dc] ss:$84 sps:$4 sm:$0xff]  }
 0x1d4   : > { %v6714_v12 = vpop.f32.mrb[111].mxu0  ;;  %v6778_v61 = vpop.f32.mrb[111].mxu1  ;;  %7395 = vmatpush3.bf16.msra.mxu1 %v8103_v4  ;;  %v8149_v20 = vld [vmem:[%s10326_s1 + $0x4b0] sm:$0xff]  }
 0x1d5   : > { %v9345_v13 = vadd.f32 %v6712_v23, %v9167_v14  ;;  %v9348_v47 = vadd.f32 %v6776_v2, %v9170_v41  ;;  %v6715_v46 = vadd.f32 %v6714_v12, %v6713_v17  ;;  %v6779_v49 = vadd.f32 %v6778_v61, %v6777_v11  ;;  %7396 = vmatprep.subr.bf16.mxu1 %v8118_v3  ;;  %v8134_v41 = vld [vmem:[%s10326_s1 + $0x4a8] sm:$0xff]   ;;  %v8163_v17 = vld [vmem:[%s10326_s1 + $0x4f8] sm:$0xff]  }
 0x1d6   : > { %4746 = vmatmul.mubr.bf16.gmra.mrb[216].mxu0 %v8068_v44  ;;  %4843 = vmatmul.mubr.bf16.gmra.mrb[216].mxu1 %v8069_v54 }
 0x1d7   : > { %v9354_v27 = vadd.f32 %v6715_v46, %v9175_v6  ;;  %v9357_v14 = vadd.f32 %v6779_v49, %v9178_v35  ;;  %4753 = vmatprep.mubr.bf16.mxu0 %v8074_v40  ;;  %4850 = vmatprep.mubr.bf16.mxu1 %v8076_v1  ;;  %v8148_v6 = vld [vmem:[%s10326_s1 + $0x4f0] sm:$0xff]   ;;  %v8078_v35 = vld [vmem:[%s8345_s17 + $0x768] ss:$84 sps:$4 sm:$0xff]  }
 0x1d8   : > { %7397 = vmatpush3.bf16.msra.mxu1 %v8119_v0  ;;  %v8084_v0 = vld [vmem:[%s8345_s17 + $0x810] ss:$84 sps:$4 sm:$0xff]  }
 0x1d9   : > { %v6780_v33 = vpop.f32.mrb[112].mxu1  ;;  %v6844_v7 = vpop.f32.mrb[112].mxu0  ;;  %7398 = vmatprep.subr.bf16.mxu1 %v8133_v8 }
 0x1da   : > { %v6781_v34 = vpop.f32.mrb[113].mxu1  ;;  %v6845_v26 = vpop.f32.mrb[113].mxu0 }
 0x1db   : > { %v6782_v50 = vadd.f32 %v6781_v34, %v6780_v33  ;;  %v6846_v52 = vadd.f32 %v6845_v26, %v6844_v7  ;;  %v6783_v60 = vpop.f32.mrb[114].mxu1  ;;  %v6847_v4 = vpop.f32.mrb[114].mxu0  ;;  %v8092_v33 = vld [vmem:[%s8345_s17 + $0x384] ss:$84 sps:$4 sm:$0xff]  }
 0x1dc   : > { %v6784_v3 = vpop.f32.mrb[115].mxu1  ;;  %v6848_v30 = vpop.f32.mrb[115].mxu0  ;;  %7399 = vmatpush3.bf16.msra.mxu1 %v8134_v41  ;;  %v8090_v41 = vld [vmem:[%s8345_s17 + $0x8bc] ss:$84 sps:$4 sm:$0xff]  }
 0x1dd   : > { %v9373_v44 = vadd.f32 %v6782_v50, %v9194_v24  ;;  %v9376_v54 = vadd.f32 %v6846_v52, %v9197_v55  ;;  %v6785_v23 = vadd.f32 %v6784_v3, %v6783_v60  ;;  %v6849_v2 = vadd.f32 %v6848_v30, %v6847_v4  ;;  %7400 = vmatprep.subr.bf16.mxu1 %v8148_v6  ;;  %v8164_v55 = vld [vmem:[%s10326_s1 + $0x4b8] sm:$0xff]  }
 0x1de   : > { %4754 = vmatmul.mubr.bf16.gmra.mrb[220].mxu0 %v8078_v35  ;;  %4851 = vmatmul.mubr.bf16.gmra.mrb[220].mxu1 %v8079_v18 }
 0x1df   : > { %v9382_v11 = vadd.f32 %v6785_v23, %v9203_v16  ;;  %v9385_v24 = vadd.f32 %v6849_v2, %v9206_v63  ;;  %4761 = vmatprep.mubr.bf16.mxu0 %v8080_v57  ;;  %4858 = vmatprep.mubr.bf16.mxu1 %v8082_v28  ;;  %v8085_v16 = vld [vmem:[%s8345_s17 + $0x2d8] ss:$84 sps:$4 sm:$0xff]   ;;  %v8095_v28 = vld [vmem:[%s8345_s17 + $0x380] ss:$84 sps:$4 sm:$0xff]  }
 0x1e0   : > { %7401 = vmatpush3.bf16.msra.mxu1 %v8149_v20  ;;  %v8096_v2 = vld [vmem:[%s8345_s17 + $0x964] ss:$84 sps:$4 sm:$0xff]  }
 0x1e1   : > { %v6786_v40 = vpop.f32.mrb[116].mxu1  ;;  %v6850_v1 = vpop.f32.mrb[116].mxu0  ;;  %7402 = vmatprep.subr.bf16.mxu1 %v8163_v17  ;;  %v8098_v17 = vld [vmem:[%s8345_s17 + $0x42c] ss:$84 sps:$4 sm:$0xff]  }
 0x1e2   : > { %v6787_v12 = vpop.f32.mrb[117].mxu1  ;;  %v6851_v61 = vpop.f32.mrb[117].mxu0 }
 0x1e3   : > { %v6788_v46 = vadd.f32 %v6787_v12, %v6786_v40  ;;  %v6852_v49 = vadd.f32 %v6851_v61, %v6850_v1  ;;  %v6789_v63 = vpop.f32.mrb[118].mxu1  ;;  %v6853_v8 = vpop.f32.mrb[118].mxu0 }
 0x1e4   : > { %v6790_v7 = vpop.f32.mrb[119].mxu1  ;;  %v6854_v6 = vpop.f32.mrb[119].mxu0  ;;  %7403 = vmatpush3.bf16.msra.mxu1 %v8164_v55 }
 0x1e5   : > { %v9395_v34 = vadd.f32 %v6788_v46, %v9221_v36  ;;  %v9398_v26 = vadd.f32 %v6852_v49, %v9224_v53  ;;  %v6791_v35 = vadd.f32 %v6790_v7, %v6789_v63  ;;  %v6855_v18 = vadd.f32 %v6854_v6, %v6853_v8  ;;  %v8094_v53 = vld [vmem:[%s8345_s17 + $0x8b8] ss:$84 sps:$4 sm:$0xff]   ;;  %v8101_v63 = vld [vmem:[%s8345_s17 + $0x428] ss:$84 sps:$4 sm:$0xff]  }
 0x1e6   : > { %4762 = vmatmul.mubr.bf16.gmra.mrb[224].mxu0 %v8084_v0  ;;  %4859 = vmatmul.mubr.bf16.gmra.mrb[224].mxu1 %v8085_v16  ;;  %v8106_v6 = vld [vmem:[%s8345_s17 + $0xa0c] ss:$84 sps:$4 sm:$0xff]  }
 0x1e7   : > { %v9401_v50 = vadd.f32 %v6791_v35, %v9228_v58  ;;  %v9404_v52 = vadd.f32 %v6855_v18, %v9231_v21  ;;  %4769 = vmatprep.mubr.bf16.mxu0 %v8090_v41  ;;  %4866 = vmatprep.mubr.bf16.mxu1 %v8092_v33  ;;  %v8108_v35 = vld [vmem:[%s8345_s17 + $0x4d4] ss:$84 sps:$4 sm:$0xff]  }
 0x1e9   : > { %v6792_v60 = vpop.f32.mrb[120].mxu1  ;;  %v6856_v36 = vpop.f32.mrb[120].mxu0 }
 0x1ea   : > { %v6793_v4 = vpop.f32.mrb[121].mxu1  ;;  %v6857_v57 = vpop.f32.mrb[121].mxu0 }
 0x1eb   : > { %v6794_v3 = vadd.f32 %v6793_v4, %v6792_v60  ;;  %v6858_v30 = vadd.f32 %v6857_v57, %v6856_v36  ;;  %v6795_v20 = vpop.f32.mrb[122].mxu1  ;;  %v6859_v23 = vpop.f32.mrb[122].mxu0 }
 0x1ec   : > { %v6796_v55 = vpop.f32.mrb[123].mxu1  ;;  %v6860_v58 = vpop.f32.mrb[123].mxu0 }
 0x1ed   : > { %v9411_v21 = vadd.f32 %v6794_v3, %v9238_v5  ;;  %v9414_v40 = vadd.f32 %v6858_v30, %v9241_v15  ;;  %v6797_v1 = vadd.f32 %v6796_v55, %v6795_v20  ;;  %v6861_v12 = vadd.f32 %v6860_v58, %v6859_v23  ;;  %v8100_v15 = vld [vmem:[%s8345_s17 + $0x960] ss:$84 sps:$4 sm:$0xff]   ;;  %v8111_v20 = vld [vmem:[%s8345_s17 + $0x4d0] ss:$84 sps:$4 sm:$0xff]  }
 0x1ee   : > { %4770 = vmatmul.mubr.bf16.gmra.mrb[228].mxu0 %v8094_v53  ;;  %4867 = vmatmul.mubr.bf16.gmra.mrb[228].mxu1 %v8095_v28  ;;  %v8112_v58 = vld [vmem:[%s8345_s17 + $0x57c] ss:$84 sps:$4 sm:$0xff]  }
 0x1ef   : > { %v9417_v61 = vadd.f32 %v6797_v1, %v9244_v19  ;;  %v9420_v0 = vadd.f32 %v6861_v12, %v9247_v59  ;;  %4777 = vmatprep.mubr.bf16.mxu0 %v8096_v2  ;;  %4874 = vmatprep.mubr.bf16.mxu1 %v8098_v17  ;;  %v8116_v1 = vld [vmem:[%s8345_s17 + $0x44] ss:$84 sps:$4 sm:$0xff]  }
 0x1f1   : > { %v6798_v16 = vpop.f32.mrb[124].mxu1  ;;  %v6862_v5 = vpop.f32.mrb[124].mxu0 }
 0x1f2   : > { %v6799_v46 = vpop.f32.mrb[125].mxu1  ;;  %v6863_v49 = vpop.f32.mrb[125].mxu0 }
 0x1f3   : > { %v6800_v8 = vadd.f32 %v6799_v46, %v6798_v16  ;;  %v6864_v41 = vadd.f32 %v6863_v49, %v6862_v5  ;;  %v6801_v33 = vpop.f32.mrb[126].mxu1  ;;  %v6865_v7 = vpop.f32.mrb[126].mxu0 }
 0x1f4   : > { %v6802_v18 = vpop.f32.mrb[127].mxu1  ;;  %v6866_v19 = vpop.f32.mrb[127].mxu0 }
 0x1f5   : > { %v9427_v59 = vadd.f32 %v6800_v8, %v9254_v9  ;;  %v9430_v60 = vadd.f32 %v6864_v41, %v9257_v51  ;;  %v6803_v36 = vadd.f32 %v6802_v18, %v6801_v33  ;;  %v6867_v4 = vadd.f32 %v6866_v19, %v6865_v7  ;;  %v8110_v51 = vld [vmem:[%s8345_s17 + $0xa08] ss:$84 sps:$4 sm:$0xff]   ;;  %v8117_v33 = vld [vmem:[%s8345_s17 + $0x578] ss:$84 sps:$4 sm:$0xff]  }
 0x1f6   : > { %4778 = vmatmul.mubr.bf16.gmra.mrb[232].mxu0 %v8100_v15  ;;  %4875 = vmatmul.mubr.bf16.gmra.mrb[232].mxu1 %v8101_v63  ;;  %v8121_v19 = vld [vmem:[%s8345_s17 + $0x624] ss:$84 sps:$4 sm:$0xff]  }
 0x1f7   : > { %v9433_v57 = vadd.f32 %v6803_v36, %v9260_v62  ;;  %v9436_v53 = vadd.f32 %v6867_v4, %v9263_v42  ;;  %4785 = vmatprep.mubr.bf16.mxu0 %v8106_v6  ;;  %4882 = vmatprep.mubr.bf16.mxu1 %v8108_v35  ;;  %v8123_v4 = vld [vmem:[%s8345_s17 + $0xec] ss:$84 sps:$4 sm:$0xff]  }
 0x1f9   : > { %v6804_v28 = vpop.f32.mrb[128].mxu1  ;;  %v6868_v9 = vpop.f32.mrb[128].mxu0 }
 0x1fa   : > { %v6805_v3 = vpop.f32.mrb[129].mxu1  ;;  %v6869_v30 = vpop.f32.mrb[129].mxu0 }
 0x1fb   : > { %v6806_v23 = vadd.f32 %v6805_v3, %v6804_v28  ;;  %v6870_v2 = vadd.f32 %v6869_v30, %v6868_v9  ;;  %v6807_v17 = vpop.f32.mrb[130].mxu1  ;;  %v6871_v55 = vpop.f32.mrb[130].mxu0 }
 0x1fc   : > { %v6808_v12 = vpop.f32.mrb[131].mxu1  ;;  %v6872_v62 = vpop.f32.mrb[131].mxu0 }
 0x1fd   : > { %v9443_v42 = vadd.f32 %v6806_v23, %v9270_v32  ;;  %v9446_v16 = vadd.f32 %v6870_v2, %v9273_v29  ;;  %v6809_v5 = vadd.f32 %v6808_v12, %v6807_v17  ;;  %v6873_v46 = vadd.f32 %v6872_v62, %v6871_v55  ;;  %v8114_v29 = vld [vmem:[%s8345_s17 + $0x40] ss:$84 sps:$4 sm:$0xff]   ;;  %v8126_v55 = vld [vmem:[%s8345_s17 + $0xe8] ss:$84 sps:$4 sm:$0xff]  }
 0x1fe   : > { %4786 = vmatmul.mubr.bf16.gmra.mrb[236].mxu0 %v8110_v51  ;;  %4883 = vmatmul.mubr.bf16.gmra.mrb[236].mxu1 %v8111_v20  ;;  %v8127_v62 = vld [vmem:[%s8345_s17 + $0x6cc] ss:$84 sps:$4 sm:$0xff]  }
 0x1ff   : > { %v9449_v49 = vadd.f32 %v6809_v5, %v9276_v37  ;;  %v9452_v15 = vadd.f32 %v6873_v46, %v9279_v25  ;;  %4890 = vmatprep.mubr.bf16.mxu1 %v8112_v58  ;;  %4987 = vmatprep.mubr.bf16.mxu0 %v8116_v1  ;;  %v8135_v25 = vld [vmem:[%s10326_s1 + $0x508] sm:$0xff]  }
 0x201   : > { %v6810_v63 = vpop.f32.mrb[132].mxu1  ;;  %v6874_v32 = vpop.f32.mrb[132].mxu0 }
 0x202   : > { %v6811_v8 = vpop.f32.mrb[133].mxu1  ;;  %v6875_v41 = vpop.f32.mrb[133].mxu0 }
 0x203   : > { %v6812_v7 = vadd.f32 %v6811_v8, %v6810_v63  ;;  %v6876_v6 = vadd.f32 %v6875_v41, %v6874_v32  ;;  %v6813_v35 = vpop.f32.mrb[134].mxu1  ;;  %v6877_v18 = vpop.f32.mrb[134].mxu0 }
 0x204   : > { %v6814_v36 = vpop.f32.mrb[135].mxu1  ;;  %v6878_v37 = vpop.f32.mrb[135].mxu0 }
 0x205   : > { %v9462_v28 = vadd.f32 %v6812_v7, %v9292_v31  ;;  %v9465_v9 = vadd.f32 %v6876_v6, %v9295_v39  ;;  %v6815_v3 = vadd.f32 %v6814_v36, %v6813_v35  ;;  %v6879_v30 = vadd.f32 %v6878_v37, %v6877_v18  ;;  %v8150_v31 = vld [vmem:[%s10326_s1 + $0x510] sm:$0xff]   ;;  %v8178_v6 = vld [vmem:[%s10326_s1 + $0x520] sm:$0xff]  }
 0x206   : > { %4891 = vmatmul.mubr.bf16.gmra.mrb[240].mxu1 %v8117_v33  ;;  %4988 = vmatmul.mubr.bf16.vlgmr.msra.gmra.mrb[240].mxu0 %v8114_v29  ;;  %v8165_v29 = vld [vmem:[%s10326_s1 + $0x518] sm:$0xff]  }
 0x207   : > { %v9468_v51 = vadd.f32 %v6815_v3, %v9298_v38  ;;  %v9471_v20 = vadd.f32 %v6879_v30, %v9301_v48  ;;  %7525 = vmatpush3.bf16.msra.mxu0 %v9214_v10  ;;  %4898 = vmatprep.mubr.bf16.mxu1 %v8121_v19  ;;  %v8125_v38 = vld [vmem:[%s8345_s17 + $0x620] ss:$84 sps:$4 sm:$0xff]   ;;  %v8131_v19 = vld [vmem:[%s8345_s17 + $0x6c8] ss:$84 sps:$4 sm:$0xff]  }
 0x208   : > { %4995 = vmatprep.mubr.bf16.mxu0 %v8123_v4  ;;  %7526 = vmatprep.subr.bf16.mxu0 %v8135_v25  ;;  %v8129_v10 = vld [vmem:[%s8345_s17 + $0x194] ss:$84 sps:$4 sm:$0xff]   ;;  %v8138_v3 = vld [vmem:[%s8345_s17 + $0x23c] ss:$84 sps:$4 sm:$0xff]  }
 0x209   : > { %v6816_v39 = vpop.f32.mrb[136].mxu1  ;;  %v6880_v23 = vpop.f32.mrb[136].mxu0 }
 0x20a   : > { %v6817_v2 = vpop.f32.mrb[137].mxu1  ;;  %v6881_v17 = vpop.f32.mrb[137].mxu0 }
 0x20b   : > { %v6818_v58 = vadd.f32 %v6817_v2, %v6816_v39  ;;  %v6882_v48 = vadd.f32 %v6881_v17, %v6880_v23  ;;  %v6819_v1 = vpop.f32.mrb[138].mxu1  ;;  %v6883_v12 = vpop.f32.mrb[138].mxu0  ;;  %7527 = vmatpush3.bf16.msra.mxu0 %v8135_v25  ;;  %v8136_v25 = vld [vmem:[%s8345_s17 + $0x774] ss:$84 sps:$4 sm:$0xff]  }
 0x20c   : > { %v6820_v5 = vpop.f32.mrb[139].mxu1  ;;  %v6884_v46 = vpop.f32.mrb[139].mxu0  ;;  %7528 = vmatprep.subr.bf16.mxu0 %v8150_v31 }
 0x20d   : > { %v9482_v63 = vadd.f32 %v6818_v58, %v9317_v45  ;;  %v9485_v32 = vadd.f32 %v6882_v48, %v9320_v43  ;;  %v6821_v8 = vadd.f32 %v6820_v5, %v6819_v1  ;;  %v6885_v41 = vadd.f32 %v6884_v46, %v6883_v12  ;;  %v8204_v48 = vld [vmem:[%s10326_s1 + $0x530] sm:$0xff]  }
 0x20e   : > { %4899 = vmatmul.mubr.bf16.gmra.mrb[244].mxu1 %v8125_v38  ;;  %4996 = vmatmul.mubr.bf16.gmra.mrb[244].mxu0 %v8126_v55  ;;  %v8191_v38 = vld [vmem:[%s10326_s1 + $0x528] sm:$0xff]  }
 0x20f   : > { %v9491_v33 = vadd.f32 %v6821_v8, %v9326_v56  ;;  %v9494_v7 = vadd.f32 %v6885_v41, %v9329_v22  ;;  %4906 = vmatprep.mubr.bf16.mxu1 %v8127_v62  ;;  %5003 = vmatprep.mubr.bf16.mxu0 %v8129_v10  ;;  %v8132_v56 = vld [vmem:[%s8345_s17 + $0x190] ss:$84 sps:$4 sm:$0xff]  }
 0x210   : > { %7529 = vmatpush3.bf16.msra.mxu0 %v8150_v31  ;;  %v8140_v62 = vld [vmem:[%s8345_s17 + $0x770] ss:$84 sps:$4 sm:$0xff]  }
 0x211   : > { %v6822_v45 = vpop.f32.mrb[140].mxu1  ;;  %v6886_v43 = vpop.f32.mrb[140].mxu0  ;;  %7530 = vmatprep.subr.bf16.mxu0 %v8165_v29  ;;  %v8144_v8 = vld [vmem:[%s8345_s17 + $0x81c] ss:$84 sps:$4 sm:$0xff]   ;;  %v8147_v41 = vld [vmem:[%s8345_s17 + $0x2e4] ss:$84 sps:$4 sm:$0xff]  }
 0x212   : > { %v6823_v35 = vpop.f32.mrb[141].mxu1  ;;  %v6887_v18 = vpop.f32.mrb[141].mxu0 }
 0x213   : > { %v6824_v36 = vadd.f32 %v6823_v35, %v6822_v45  ;;  %v6888_v37 = vadd.f32 %v6887_v18, %v6886_v43  ;;  %v6825_v22 = vpop.f32.mrb[142].mxu1  ;;  %v6889_v4 = vpop.f32.mrb[142].mxu0 }
 0x214   : > { %v6826_v30 = vpop.f32.mrb[143].mxu1  ;;  %v6890_v39 = vpop.f32.mrb[143].mxu0  ;;  %7531 = vmatpush3.bf16.msra.mxu0 %v8165_v29 }
 0x215   : > { %v9504_v31 = vadd.f32 %v6824_v36, %v9345_v13  ;;  %v9507_v23 = vadd.f32 %v6888_v37, %v9348_v47  ;;  %v6827_v2 = vadd.f32 %v6826_v30, %v6825_v22  ;;  %v6891_v17 = vadd.f32 %v6890_v39, %v6889_v4  ;;  %7532 = vmatprep.subr.bf16.mxu0 %v8178_v6  ;;  %v8142_v37 = vld [vmem:[%s8345_s17 + $0x818] ss:$84 sps:$4 sm:$0xff]   ;;  %v8145_v22 = vld [vmem:[%s8345_s17 + $0x2e0] ss:$84 sps:$4 sm:$0xff]  }
 0x216   : > { %4907 = vmatmul.mubr.bf16.gmra.mrb[248].mxu1 %v8131_v19  ;;  %5004 = vmatmul.mubr.bf16.gmra.mrb[248].mxu0 %v8132_v56  ;;  %v8217_v19 = vld [vmem:[%s10326_s1 + $0x538] sm:$0xff]  }
 0x217   : > { %v9513_v55 = vadd.f32 %v6827_v2, %v9354_v27  ;;  %v9516_v13 = vadd.f32 %v6891_v17, %v9357_v14  ;;  %4914 = vmatprep.mubr.bf16.mxu1 %v8136_v25  ;;  %5011 = vmatprep.mubr.bf16.mxu0 %v8138_v3  ;;  %v8141_v27 = vld [vmem:[%s8345_s17 + $0x238] ss:$84 sps:$4 sm:$0xff]  }
 0x218   : > { %7533 = vmatpush3.bf16.msra.mxu0 %v8178_v6  ;;  %v8153_v3 = vld [vmem:[%s8345_s17 + $0x8c4] ss:$84 sps:$4 sm:$0xff]   ;;  %v8156_v2 = vld [vmem:[%s8345_s17 + $0x38c] ss:$84 sps:$4 sm:$0xff]  }
 0x219   : > { %v6892_v47 = vpop.f32.mrb[144].mxu0  ;;  %v6956_v58 = vpop.f32.mrb[144].mxu1  ;;  %7534 = vmatprep.subr.bf16.mxu0 %v8191_v38 }
 0x21a   : > { %v6893_v1 = vpop.f32.mrb[145].mxu0  ;;  %v6957_v12 = vpop.f32.mrb[145].mxu1 }
 0x21b   : > { %v6894_v10 = vadd.f32 %v6893_v1, %v6892_v47  ;;  %v6958_v5 = vadd.f32 %v6957_v12, %v6956_v58  ;;  %v6895_v14 = vpop.f32.mrb[146].mxu0  ;;  %v6959_v46 = vpop.f32.mrb[146].mxu1  ;;  %v8273_v47 = vmov 0  }
 0x21c   : > { %v6896_v29 = vpop.f32.mrb[147].mxu0  ;;  %v6960_v45 = vpop.f32.mrb[147].mxu1  ;;  %7535 = vmatpush3.bf16.msra.mxu0 %v8191_v38  ;;  %7599 = vset.pattern.permute.xlu1 %v8273_v47 }
 0x21d   : > { %v9526_v43 = vadd.f32 %v6894_v10, %v9373_v44  ;;  %v9529_v6 = vadd.f32 %v6958_v5, %v9376_v54  ;;  %v6897_v35 = vadd.f32 %v6896_v29, %v6895_v14  ;;  %v6961_v18 = vadd.f32 %v6960_v45, %v6959_v46  ;;  %7536 = vmatprep.subr.bf16.mxu0 %v8204_v48  ;;  %v5505_v14 = vld [vmem:[%s9551_s12 + $0x18] sm:$0xff]  ;;  %v5503_v46 = vld [vmem:[%s9551_s12 + $0x8] sm:$0xff]  ;;  %v8151_v29 = vld [vmem:[%s8345_s17 + $0x8c0] ss:$84 sps:$4 sm:$0xff]  }
 0x21e   : > { %4915 = vmatmul.mubr.bf16.gmra.mrb[252].mxu1 %v8140_v62  ;;  %5012 = vmatmul.mubr.bf16.gmra.mrb[252].mxu0 %v8141_v27  ;;  %v5504_v62 = vld [vmem:[%s9551_s12 + $0x10] sm:$0xff]  ;;  %v5502_v27 = vld [vmem:[%s9551_s12] sm:$0xff]  ;;  %v8154_v45 = vld [vmem:[%s8345_s17 + $0x388] ss:$84 sps:$4 sm:$0xff]  }
 0x21f   : > { %v9535_v56 = vadd.f32 %v6897_v35, %v9382_v11  ;;  %v9538_v44 = vadd.f32 %v6961_v18, %v9385_v24  ;;  %4922 = vmatprep.mubr.bf16.mxu1 %v8144_v8  ;;  %5019 = vmatprep.mubr.bf16.mxu0 %v8147_v41 }
 0x220   : > { %7537 = vmatpush3.bf16.msra.mxu0 %v8204_v48  ;;  %7598 = vset.pattern.permute.xlu0 %v8273_v47 }
 0x221   : > { %v6898_v54 = vpop.f32.mrb[148].mxu0  ;;  %v6962_v36 = vpop.f32.mrb[148].mxu1  ;;  %7538 = vmatprep.subr.bf16.mxu0 %v8217_v19  ;;  %5546 = vperm.xlu1 %7599, %v5504_v62  }
 0x222   : > { %v6899_v4 = vpop.f32.mrb[149].mxu0  ;;  %v6963_v25 = vpop.f32.mrb[149].mxu1  ;;  %5536 = vperm.xlu0 %7598, %v5502_v27  }
 0x223   : > { %v6900_v11 = vadd.f32 %v6899_v4, %v6898_v54  ;;  %v6964_v30 = vadd.f32 %v6963_v25, %v6962_v36  ;;  %v6901_v39 = vpop.f32.mrb[150].mxu0  ;;  %v6965_v24 = vpop.f32.mrb[150].mxu1  ;;  %v8162_v54 = vld [vmem:[%s8345_s17 + $0x434] ss:$84 sps:$4 sm:$0xff]  }
 0x224   : > { %v6902_v17 = vpop.f32.mrb[151].mxu0  ;;  %v6966_v38 = vpop.f32.mrb[151].mxu1  ;;  %7539 = vmatpush3.bf16.msra.mxu0 %v8217_v19  ;;  %v8159_v19 = vld [vmem:[%s8345_s17 + $0x96c] ss:$84 sps:$4 sm:$0xff]  }
 0x225   : > { %v9554_v58 = vadd.f32 %v6900_v11, %v9395_v34  ;;  %v9557_v48 = vadd.f32 %v6964_v30, %v9398_v26  ;;  %v6903_v1 = vadd.f32 %v6902_v17, %v6901_v39  ;;  %v6967_v12 = vadd.f32 %v6966_v38, %v6965_v24  ;;  %5551 = vperm.xlu1 %7599, %v5505_v14   ;;  %v5507_v11 = vld [vmem:[%s9551_s12 + $0x28] sm:$0xff]  ;;  %v5506_v30 = vld [vmem:[%s9551_s12 + $0x20] sm:$0xff]  ;;  %v5508_v17 = vld [vmem:[%s9551_s12 + $0x30] sm:$0xff] }
 0x226   : > { %4923 = vmatmul.mubr.bf16.gmra.mrb[0].mxu1 %v8142_v37  ;;  %5020 = vmatmul.mubr.bf16.gmra.mrb[0].mxu0 %v8145_v22 }
 0x227   : > { %v9562_v10 = vadd.f32 %v6903_v1, %v9401_v50  ;;  %v9565_v34 = vadd.f32 %v6967_v12, %v9404_v52  ;;  %4930 = vmatprep.mubr.bf16.mxu1 %v8153_v3  ;;  %5027 = vmatprep.mubr.bf16.mxu0 %v8156_v2  ;;  %v5509_v2 = vld [vmem:[%s9551_s12 + $0x38] sm:$0xff]  ;;  %v8160_v12 = vld [vmem:[%s8345_s17 + $0x430] ss:$84 sps:$4 sm:$0xff]  }
 0x228   : > { %5541 = vperm.xlu0 %7598, %v5503_v46   ;;  %v8157_v1 = vld [vmem:[%s8345_s17 + $0x968] ss:$84 sps:$4 sm:$0xff]  }
 0x229   : > { %v6904_v26 = vpop.f32.mrb[152].mxu0  ;;  %v6968_v5 = vpop.f32.mrb[152].mxu1  ;;  %5561 = vperm.xlu1 %7599, %v5507_v11  }
 0x22a   : > { %v6905_v8 = vpop.f32.mrb[153].mxu0  ;;  %v6969_v41 = vpop.f32.mrb[153].mxu1 }
 0x22b   : > { %v6906_v50 = vadd.f32 %v6905_v8, %v6904_v26  ;;  %v6970_v35 = vadd.f32 %v6969_v41, %v6968_v5  ;;  %v6907_v52 = vpop.f32.mrb[154].mxu0  ;;  %v6971_v18 = vpop.f32.mrb[154].mxu1  ;;  %v8168_v26 = vld [vmem:[%s8345_s17 + $0xa14] ss:$84 sps:$4 sm:$0xff]   ;;  %v8171_v5 = vld [vmem:[%s8345_s17 + $0x4dc] ss:$84 sps:$4 sm:$0xff]  }
 0x22c   : > { %v6908_v36 = vpop.f32.mrb[155].mxu0  ;;  %v6972_v37 = vpop.f32.mrb[155].mxu1  ;;  %5556 = vperm.xlu0 %7598, %v5506_v30  }
 0x22d   : > { %v9574_v22 = vadd.f32 %v6906_v50, %v9411_v21  ;;  %v9577_v4 = vadd.f32 %v6970_v35, %v9414_v40  ;;  %v6909_v25 = vadd.f32 %v6908_v36, %v6907_v52  ;;  %v6973_v3 = vadd.f32 %v6972_v37, %v6971_v18  ;;  %5571 = vperm.xlu1 %7599, %v5509_v2   ;;  %v5511_v50 = vld [vmem:[%s9551_s12 + $0x48] sm:$0xff]  ;;  %v5510_v35 = vld [vmem:[%s9551_s12 + $0x40] sm:$0xff] }
 0x22e   : > { %4931 = vmatmul.mubr.bf16.gmra.mrb[4].mxu1 %v8151_v29  ;;  %5028 = vmatmul.mubr.bf16.gmra.mrb[4].mxu0 %v8154_v45 }
 0x22f   : > { %v9582_v39 = vadd.f32 %v6909_v25, %v9417_v61  ;;  %v9585_v24 = vadd.f32 %v6973_v3, %v9420_v0  ;;  %4938 = vmatprep.mubr.bf16.mxu1 %v8159_v19  ;;  %5035 = vmatprep.mubr.bf16.mxu0 %v8162_v54  ;;  %v5513_v19 = vld [vmem:[%s9551_s12 + $0x58] sm:$0xff]  ;;  %v5512_v54 = vld [vmem:[%s9551_s12 + $0x50] sm:$0xff] }
 0x230   : > { %5566 = vperm.xlu0 %7598, %v5508_v17   ;;  %v8166_v25 = vld [vmem:[%s8345_s17 + $0xa10] ss:$84 sps:$4 sm:$0xff]   ;;  %v8169_v3 = vld [vmem:[%s8345_s17 + $0x4d8] ss:$84 sps:$4 sm:$0xff]  }
 0x231   : > { %v6910_v21 = vpop.f32.mrb[156].mxu0  ;;  %v6974_v40 = vpop.f32.mrb[156].mxu1  ;;  %5581 = vperm.xlu1 %7599, %v5511_v50  }
 0x232   : > { %v6911_v38 = vpop.f32.mrb[157].mxu0  ;;  %v6975_v47 = vpop.f32.mrb[157].mxu1 }
 0x233   : > { %v6912_v61 = vadd.f32 %v6911_v38, %v6910_v21  ;;  %v6976_v62 = vadd.f32 %v6975_v47, %v6974_v40  ;;  %v6913_v0 = vpop.f32.mrb[158].mxu0  ;;  %v6977_v27 = vpop.f32.mrb[158].mxu1  ;;  %v8174_v21 = vld [vmem:[%s8345_s17 + $0x584] ss:$84 sps:$4 sm:$0xff]   ;;  %v8177_v40 = vld [vmem:[%s8345_s17 + $0x4c] ss:$84 sps:$4 sm:$0xff]  }
 0x234   : > { %v6914_v14 = vpop.f32.mrb[159].mxu0  ;;  %v6978_v46 = vpop.f32.mrb[159].mxu1  ;;  %5576 = vperm.xlu0 %7598, %v5510_v35  }
 0x235   : > { %v9594_v8 = vadd.f32 %v6912_v61, %v9427_v59  ;;  %v9597_v41 = vadd.f32 %v6976_v62, %v9430_v60  ;;  %v6915_v29 = vadd.f32 %v6914_v14, %v6913_v0  ;;  %v6979_v45 = vadd.f32 %v6978_v46, %v6977_v27  ;;  %5591 = vperm.xlu1 %7599, %v5513_v19   ;;  %v5515_v61 = vld [vmem:[%s9551_s12 + $0x68] sm:$0xff]  ;;  %v5514_v62 = vld [vmem:[%s9551_s12 + $0x60] sm:$0xff] }
 0x236   : > { %4939 = vmatmul.mubr.bf16.gmra.mrb[8].mxu1 %v8157_v1  ;;  %5036 = vmatmul.mubr.bf16.gmra.mrb[8].mxu0 %v8160_v12 }
 0x237   : > { %v9602_v52 = vadd.f32 %v6915_v29, %v9433_v57  ;;  %v9605_v18 = vadd.f32 %v6979_v45, %v9436_v53  ;;  %4946 = vmatprep.mubr.bf16.mxu1 %v8168_v26  ;;  %5043 = vmatprep.mubr.bf16.mxu0 %v8171_v5  ;;  %v5517_v26 = vld [vmem:[%s9551_s12 + $0x78] sm:$0xff]  ;;  %v5516_v5 = vld [vmem:[%s9551_s12 + $0x70] sm:$0xff] }
 0x238   : > { %5586 = vperm.xlu0 %7598, %v5512_v54   ;;  %v8172_v29 = vld [vmem:[%s8345_s17 + $0x580] ss:$84 sps:$4 sm:$0xff]   ;;  %v8175_v45 = vld [vmem:[%s8345_s17 + $0x48] ss:$84 sps:$4 sm:$0xff]  }
 0x239   : > { %v6916_v59 = vpop.f32.mrb[160].mxu0  ;;  %v6980_v60 = vpop.f32.mrb[160].mxu1  ;;  %5601 = vperm.xlu1 %7599, %v5515_v61  }
 0x23a   : > { %v6917_v36 = vpop.f32.mrb[161].mxu0  ;;  %v6981_v37 = vpop.f32.mrb[161].mxu1 }
 0x23b   : > { %v6918_v57 = vadd.f32 %v6917_v36, %v6916_v59  ;;  %v6982_v11 = vadd.f32 %v6981_v37, %v6980_v60  ;;  %v6919_v53 = vpop.f32.mrb[162].mxu0  ;;  %v6983_v30 = vpop.f32.mrb[162].mxu1  ;;  %v8181_v59 = vld [vmem:[%s8345_s17 + $0x62c] ss:$84 sps:$4 sm:$0xff]   ;;  %v8184_v60 = vld [vmem:[%s8345_s17 + $0xf4] ss:$84 sps:$4 sm:$0xff]  }
 0x23c   : > { %v6920_v2 = vpop.f32.mrb[163].mxu0  ;;  %v6984_v17 = vpop.f32.mrb[163].mxu1  ;;  %5596 = vperm.xlu0 %7598, %v5514_v62  }
 0x23d   : > { %v9614_v38 = vadd.f32 %v6918_v57, %v9443_v42  ;;  %v9617_v47 = vadd.f32 %v6982_v11, %v9446_v16  ;;  %v6921_v1 = vadd.f32 %v6920_v2, %v6919_v53  ;;  %v6985_v12 = vadd.f32 %v6984_v17, %v6983_v30  ;;  %5611 = vperm.xlu1 %7599, %v5517_v26   ;;  %v5519_v57 = vld [vmem:[%s9551_s12 + $0x88] sm:$0xff]  ;;  %v5518_v11 = vld [vmem:[%s9551_s12 + $0x80] sm:$0xff] }
 0x23e   : > { %4947 = vmatmul.mubr.bf16.gmra.mrb[12].mxu1 %v8166_v25  ;;  %5044 = vmatmul.mubr.bf16.gmra.mrb[12].mxu0 %v8169_v3 }
 0x23f   : > { %v9622_v0 = vadd.f32 %v6921_v1, %v9449_v49  ;;  %v9625_v27 = vadd.f32 %v6985_v12, %v9452_v15  ;;  %5051 = vmatprep.mubr.bf16.mxu0 %v8174_v21  ;;  %5148 = vmatprep.mubr.bf16.mxu1 %v8177_v40  ;;  %v5521_v21 = vld [vmem:[%s9551_s12 + $0x98] sm:$0xff]  ;;  %v5520_v40 = vld [vmem:[%s9551_s12 + $0x90] sm:$0xff] }
 0x240   : > { %5606 = vperm.xlu0 %7598, %v5516_v5   ;;  %v8179_v1 = vld [vmem:[%s8345_s17 + $0x628] ss:$84 sps:$4 sm:$0xff]   ;;  %v8182_v12 = vld [vmem:[%s8345_s17 + $0xf0] ss:$84 sps:$4 sm:$0xff]  }
 0x241   : > { %v6922_v42 = vpop.f32.mrb[164].mxu0  ;;  %v6986_v16 = vpop.f32.mrb[164].mxu1  ;;  %5621 = vperm.xlu1 %7599, %v5519_v57  }
 0x242   : > { %v6923_v14 = vpop.f32.mrb[165].mxu0  ;;  %v6987_v46 = vpop.f32.mrb[165].mxu1 }
 0x243   : > { %v6924_v49 = vadd.f32 %v6923_v14, %v6922_v42  ;;  %v6988_v50 = vadd.f32 %v6987_v46, %v6986_v16  ;;  %v6925_v15 = vpop.f32.mrb[166].mxu0  ;;  %v6989_v35 = vpop.f32.mrb[166].mxu1  ;;  %v8187_v42 = vld [vmem:[%s8345_s17 + $0x6d4] ss:$84 sps:$4 sm:$0xff]   ;;  %v8190_v16 = vld [vmem:[%s8345_s17 + $0x19c] ss:$84 sps:$4 sm:$0xff]  }
 0x244   : > { %v6926_v19 = vpop.f32.mrb[167].mxu0  ;;  %v6990_v54 = vpop.f32.mrb[167].mxu1  ;;  %5616 = vperm.xlu0 %7598, %v5518_v11  }
 0x245   : > { %v9634_v36 = vadd.f32 %v6924_v49, %v9462_v28  ;;  %v9637_v37 = vadd.f32 %v6988_v50, %v9465_v9  ;;  %v6927_v25 = vadd.f32 %v6926_v19, %v6925_v15  ;;  %v6991_v3 = vadd.f32 %v6990_v54, %v6989_v35  ;;  %5631 = vperm.xlu1 %7599, %v5521_v21   ;;  %v5523_v49 = vld [vmem:[%s9551_s12 + $0xa8] sm:$0xff]  ;;  %v5522_v50 = vld [vmem:[%s9551_s12 + $0xa0] sm:$0xff] }
 0x246   : > { %5052 = vmatmul.mubr.bf16.gmra.mrb[16].mxu0 %v8172_v29  ;;  %5149 = vmatmul.mubr.bf16.vlgmr.msra.gmra.mrb[16].mxu1 %v8175_v45 }
 0x247   : > { %v9642_v53 = vadd.f32 %v6927_v25, %v9468_v51  ;;  %v9645_v30 = vadd.f32 %v6991_v3, %v9471_v20  ;;  %5059 = vmatprep.mubr.bf16.mxu0 %v8181_v59  ;;  %5156 = vmatprep.mubr.bf16.mxu1 %v8184_v60  ;;  %v5525_v59 = vld [vmem:[%s9551_s12 + $0xb8] sm:$0xff]  ;;  %v5524_v60 = vld [vmem:[%s9551_s12 + $0xb0] sm:$0xff] }
 0x248   : > { %5626 = vperm.xlu0 %7598, %v5520_v40   ;;  %v8185_v25 = vld [vmem:[%s8345_s17 + $0x6d0] ss:$84 sps:$4 sm:$0xff]   ;;  %v8188_v3 = vld [vmem:[%s8345_s17 + $0x198] ss:$84 sps:$4 sm:$0xff]  }
 0x249   : > { %v6928_v28 = vpop.f32.mrb[168].mxu0  ;;  %v6992_v9 = vpop.f32.mrb[168].mxu1  ;;  %5641 = vperm.xlu1 %7599, %v5523_v49  }
 0x24a   : > { %v6929_v2 = vpop.f32.mrb[169].mxu0  ;;  %v6993_v17 = vpop.f32.mrb[169].mxu1 }
 0x24b   : > { %v6930_v51 = vadd.f32 %v6929_v2, %v6928_v28  ;;  %v6994_v61 = vadd.f32 %v6993_v17, %v6992_v9  ;;  %v6931_v20 = vpop.f32.mrb[170].mxu0  ;;  %v6995_v62 = vpop.f32.mrb[170].mxu1  ;;  %v8194_v28 = vld [vmem:[%s8345_s17 + $0x77c] ss:$84 sps:$4 sm:$0xff]   ;;  %v8197_v9 = vld [vmem:[%s8345_s17 + $0x244] ss:$84 sps:$4 sm:$0xff]  }
 0x24c   : > { %v6932_v26 = vpop.f32.mrb[171].mxu0  ;;  %v6996_v5 = vpop.f32.mrb[171].mxu1  ;;  %5636 = vperm.xlu0 %7598, %v5522_v50  }
 0x24d   : > { %v9654_v14 = vadd.f32 %v6930_v51, %v9482_v63  ;;  %v9657_v46 = vadd.f32 %v6994_v61, %v9485_v32  ;;  %v6933_v29 = vadd.f32 %v6932_v26, %v6931_v20  ;;  %v6997_v45 = vadd.f32 %v6996_v5, %v6995_v62  ;;  %5651 = vperm.xlu1 %7599, %v5525_v59   ;;  %v5527_v51 = vld [vmem:[%s9551_s12 + $0xc8] sm:$0xff]  ;;  %v5526_v61 = vld [vmem:[%s9551_s12 + $0xc0] sm:$0xff] }
 0x24e   : > { %5060 = vmatmul.mubr.bf16.gmra.mrb[20].mxu0 %v8179_v1  ;;  %5157 = vmatmul.mubr.bf16.gmra.mrb[20].mxu1 %v8182_v12 }
 0x24f   : > { %v9662_v15 = vadd.f32 %v6933_v29, %v9491_v33  ;;  %v9665_v35 = vadd.f32 %v6997_v45, %v9494_v7  ;;  %5067 = vmatprep.mubr.bf16.mxu0 %v8187_v42  ;;  %5164 = vmatprep.mubr.bf16.mxu1 %v8190_v16  ;;  %v5529_v42 = vld [vmem:[%s9551_s12 + $0xd8] sm:$0xff]  ;;  %v5528_v16 = vld [vmem:[%s9551_s12 + $0xd0] sm:$0xff] }
 0x250   : > { %5646 = vperm.xlu0 %7598, %v5524_v60   ;;  %v8192_v29 = vld [vmem:[%s8345_s17 + $0x778] ss:$84 sps:$4 sm:$0xff]   ;;  %v8195_v45 = vld [vmem:[%s8345_s17 + $0x240] ss:$84 sps:$4 sm:$0xff]  }
 0x251   : > { %v6934_v63 = vpop.f32.mrb[172].mxu0  ;;  %v6998_v32 = vpop.f32.mrb[172].mxu1  ;;  %5661 = vperm.xlu1 %7599, %v5527_v51  }
 0x252   : > { %v6935_v19 = vpop.f32.mrb[173].mxu0  ;;  %v6999_v54 = vpop.f32.mrb[173].mxu1 }
 0x253   : > { %v6936_v33 = vadd.f32 %v6935_v19, %v6934_v63  ;;  %v7000_v57 = vadd.f32 %v6999_v54, %v6998_v32  ;;  %v6937_v7 = vpop.f32.mrb[174].mxu0  ;;  %v7001_v11 = vpop.f32.mrb[174].mxu1  ;;  %v8200_v63 = vld [vmem:[%s8345_s17 + $0x824] ss:$84 sps:$4 sm:$0xff]   ;;  %v8203_v32 = vld [vmem:[%s8345_s17 + $0x2ec] ss:$84 sps:$4 sm:$0xff]  }
 0x254   : > { %v6938_v21 = vpop.f32.mrb[175].mxu0  ;;  %v7002_v40 = vpop.f32.mrb[175].mxu1  ;;  %5656 = vperm.xlu0 %7598, %v5526_v61  }
 0x255   : > { %v9674_v2 = vadd.f32 %v6936_v33, %v9504_v31  ;;  %v9677_v17 = vadd.f32 %v7000_v57, %v9507_v23  ;;  %v6939_v1 = vadd.f32 %v6938_v21, %v6937_v7  ;;  %v7003_v12 = vadd.f32 %v7002_v40, %v7001_v11  ;;  %5671 = vperm.xlu1 %7599, %v5529_v42   ;;  %v5531_v33 = vld [vmem:[%s9551_s12 + $0xe8] sm:$0xff]  ;;  %v5530_v57 = vld [vmem:[%s9551_s12 + $0xe0] sm:$0xff] }
 0x256   : > { %5068 = vmatmul.mubr.bf16.gmra.mrb[24].mxu0 %v8185_v25  ;;  %5165 = vmatmul.mubr.bf16.gmra.mrb[24].mxu1 %v8188_v3 }
 0x257   : > { %v9682_v20 = vadd.f32 %v6939_v1, %v9513_v55  ;;  %v9685_v62 = vadd.f32 %v7003_v12, %v9516_v13  ;;  %5075 = vmatprep.mubr.bf16.mxu0 %v8194_v28  ;;  %5172 = vmatprep.mubr.bf16.mxu1 %v8197_v9  ;;  %v5533_v28 = vld [vmem:[%s9551_s12 + $0xf8] sm:$0xff]  ;;  %v5532_v9 = vld [vmem:[%s9551_s12 + $0xf0] sm:$0xff] }
 0x258   : > { %5666 = vperm.xlu0 %7598, %v5528_v16   ;;  %v8198_v1 = vld [vmem:[%s8345_s17 + $0x820] ss:$84 sps:$4 sm:$0xff]   ;;  %v8201_v12 = vld [vmem:[%s8345_s17 + $0x2e8] ss:$84 sps:$4 sm:$0xff]  }
 0x259   : > { %v7004_v31 = vpop.f32.mrb[176].mxu1  ;;  %v7068_v23 = vpop.f32.mrb[176].mxu0  ;;  %5681 = vperm.xlu1 %7599, %v5531_v33   ;;  %v8213_v33 = vld [vmem:[%s8345_s17 + $0x974] ss:$84 sps:$4 sm:$0xff]  }
 0x25a   : > { %v7005_v26 = vpop.f32.mrb[177].mxu1  ;;  %v7069_v5 = vpop.f32.mrb[177].mxu0 }
 0x25b   : > { %v7006_v55 = vadd.f32 %v7005_v26, %v7004_v31  ;;  %v7070_v49 = vadd.f32 %v7069_v5, %v7068_v23  ;;  %v7007_v13 = vpop.f32.mrb[178].mxu1  ;;  %v7071_v50 = vpop.f32.mrb[178].mxu0  ;;  %v8210_v23 = vld [vmem:[%s8345_s17 + $0x394] ss:$84 sps:$4 sm:$0xff]  }
 0x25c   : > { %v7008_v59 = vpop.f32.mrb[179].mxu1  ;;  %v7072_v60 = vpop.f32.mrb[179].mxu0  ;;  %5676 = vperm.xlu0 %7598, %v5530_v57   ;;  %v8216_v57 = vld [vmem:[%s8345_s17 + $0x43c] ss:$84 sps:$4 sm:$0xff]  }
 0x25d   : > { %v9694_v19 = vadd.f32 %v7006_v55, %v9526_v43  ;;  %v9697_v54 = vadd.f32 %v7070_v49, %v9529_v6  ;;  %v7009_v25 = vadd.f32 %v7008_v59, %v7007_v13  ;;  %v7073_v3 = vadd.f32 %v7072_v60, %v7071_v50  ;;  %5691 = vperm.xlu1 %7599, %v5533_v28  }
 0x25e   : > { %5076 = vmatmul.mubr.bf16.gmra.mrb[28].mxu0 %v8192_v29  ;;  %5173 = vmatmul.mubr.bf16.gmra.mrb[28].mxu1 %v8195_v45 }
 0x25f   : > { %v9702_v7 = vadd.f32 %v7009_v25, %v9535_v56  ;;  %v9705_v11 = vadd.f32 %v7073_v3, %v9538_v44  ;;  %5083 = vmatprep.mubr.bf16.mxu0 %v8200_v63  ;;  %5180 = vmatprep.mubr.bf16.mxu1 %v8203_v32  ;;  %v8207_v44 = vld [vmem:[%s8345_s17 + $0x8cc] ss:$84 sps:$4 sm:$0xff]   ;;  %v8208_v32 = vld [vmem:[%s8345_s17 + $0x390] ss:$84 sps:$4 sm:$0xff]  }
 0x260   : > { %5686 = vperm.xlu0 %7598, %v5532_v9  }
 0x261   : > { %v7010_v43 = vpop.f32.mrb[180].mxu1  ;;  %v7074_v6 = vpop.f32.mrb[180].mxu0 }
 0x262   : > { %v7011_v21 = vpop.f32.mrb[181].mxu1  ;;  %v7075_v40 = vpop.f32.mrb[181].mxu0 }
 0x263   : > { %v7012_v51 = vadd.f32 %v7011_v21, %v7010_v43  ;;  %v7076_v56 = vadd.f32 %v7075_v40, %v7074_v6  ;;  %v7013_v61 = vpop.f32.mrb[182].mxu1  ;;  %v7077_v31 = vpop.f32.mrb[182].mxu0 }
 0x264   : > { %v7014_v42 = vpop.f32.mrb[183].mxu1  ;;  %v7078_v16 = vpop.f32.mrb[183].mxu0 }
 0x265   : > { %v9714_v26 = vadd.f32 %v7012_v51, %v9554_v58  ;;  %v9717_v5 = vadd.f32 %v7076_v56, %v9557_v48  ;;  %v7015_v29 = vadd.f32 %v7014_v42, %v7013_v61  ;;  %v7079_v45 = vadd.f32 %v7078_v16, %v7077_v31  ;;  %v8205_v48 = vld [vmem:[%s8345_s17 + $0x8c8] ss:$84 sps:$4 sm:$0xff]   ;;  %v8214_v56 = vld [vmem:[%s8345_s17 + $0x438] ss:$84 sps:$4 sm:$0xff]  }
 0x266   : > { %5084 = vmatmul.mubr.bf16.gmra.mrb[32].mxu0 %v8198_v1  ;;  %5181 = vmatmul.mubr.bf16.gmra.mrb[32].mxu1 %v8201_v12  ;;  %v8220_v42 = vld [vmem:[%s8345_s17 + $0xa1c] ss:$84 sps:$4 sm:$0xff]   ;;  %v8223_v16 = vld [vmem:[%s8345_s17 + $0x4e4] ss:$84 sps:$4 sm:$0xff]  }
 0x267   : > { %v9720_v55 = vadd.f32 %v7015_v29, %v9562_v10  ;;  %v9723_v49 = vadd.f32 %v7079_v45, %v9565_v34  ;;  %5091 = vmatprep.mubr.bf16.mxu0 %v8207_v44  ;;  %5188 = vmatprep.mubr.bf16.mxu1 %v8210_v23 }
 0x269   : > { %v7016_v13 = vpop.f32.mrb[184].mxu1  ;;  %v7080_v58 = vpop.f32.mrb[184].mxu0 }
 0x26a   : > { %v7017_v50 = vpop.f32.mrb[185].mxu1  ;;  %v7081_v63 = vpop.f32.mrb[185].mxu0 }
 0x26b   : > { %v7018_v59 = vadd.f32 %v7017_v50, %v7016_v13  ;;  %v7082_v60 = vadd.f32 %v7081_v63, %v7080_v58  ;;  %v7019_v25 = vpop.f32.mrb[186].mxu1  ;;  %v7083_v3 = vpop.f32.mrb[186].mxu0 }
 0x26c   : > { %v7020_v43 = vpop.f32.mrb[187].mxu1  ;;  %v7084_v10 = vpop.f32.mrb[187].mxu0 }
 0x26d   : > { %v9730_v34 = vadd.f32 %v7018_v59, %v9574_v22  ;;  %v9733_v6 = vadd.f32 %v7082_v60, %v9577_v4  ;;  %v7021_v28 = vadd.f32 %v7020_v43, %v7019_v25  ;;  %v7085_v9 = vadd.f32 %v7084_v10, %v7083_v3  ;;  %v8211_v4 = vld [vmem:[%s8345_s17 + $0x970] ss:$84 sps:$4 sm:$0xff]   ;;  %v8221_v60 = vld [vmem:[%s8345_s17 + $0x4e0] ss:$84 sps:$4 sm:$0xff]  }
 0x26e   : > { %5092 = vmatmul.mubr.bf16.gmra.mrb[36].mxu0 %v8205_v48  ;;  %5189 = vmatmul.mubr.bf16.gmra.mrb[36].mxu1 %v8208_v32  ;;  %v8226_v43 = vld [vmem:[%s8345_s17 + $0x58c] ss:$84 sps:$4 sm:$0xff]   ;;  %v8227_v10 = vld [vmem:[%s8345_s17 + $0x50] ss:$84 sps:$4 sm:$0xff]  }
 0x26f   : > { %v9736_v21 = vadd.f32 %v7021_v28, %v9582_v39  ;;  %v9739_v40 = vadd.f32 %v7085_v9, %v9585_v24  ;;  %5099 = vmatprep.mubr.bf16.mxu0 %v8213_v33  ;;  %5196 = vmatprep.mubr.bf16.mxu1 %v8216_v57 }
 0x271   : > { %v7022_v1 = vpop.f32.mrb[188].mxu1  ;;  %v7086_v22 = vpop.f32.mrb[188].mxu0 }
 0x272   : > { %v7023_v12 = vpop.f32.mrb[189].mxu1  ;;  %v7087_v51 = vpop.f32.mrb[189].mxu0 }
 0x273   : > { %v7024_v61 = vadd.f32 %v7023_v12, %v7022_v1  ;;  %v7088_v31 = vadd.f32 %v7087_v51, %v7086_v22  ;;  %v7025_v44 = vpop.f32.mrb[190].mxu1  ;;  %v7089_v23 = vpop.f32.mrb[190].mxu0 }
 0x274   : > { %v7026_v29 = vpop.f32.mrb[191].mxu1  ;;  %v7090_v39 = vpop.f32.mrb[191].mxu0 }
 0x275   : > { %v9746_v24 = vadd.f32 %v7024_v61, %v9594_v8  ;;  %v9749_v45 = vadd.f32 %v7088_v31, %v9597_v41  ;;  %v7027_v13 = vadd.f32 %v7026_v29, %v7025_v44  ;;  %v7091_v58 = vadd.f32 %v7090_v39, %v7089_v23  ;;  %v8218_v41 = vld [vmem:[%s8345_s17 + $0xa18] ss:$84 sps:$4 sm:$0xff]   ;;  %v8231_v29 = vld [vmem:[%s8345_s17 + $0x634] ss:$84 sps:$4 sm:$0xff]  }
 0x276   : > { %5100 = vmatmul.mubr.bf16.gmra.mrb[40].mxu0 %v8211_v4  ;;  %5197 = vmatmul.mubr.bf16.gmra.mrb[40].mxu1 %v8214_v56  ;;  %v8228_v31 = vld [vmem:[%s8345_s17 + $0xf8] ss:$84 sps:$4 sm:$0xff]   ;;  %v8232_v39 = vld [vmem:[%s8345_s17 + $0x1a0] ss:$84 sps:$4 sm:$0xff]  }
 0x277   : > { %v9752_v50 = vadd.f32 %v7027_v13, %v9602_v52  ;;  %v9755_v63 = vadd.f32 %v7091_v58, %v9605_v18  ;;  %5107 = vmatprep.mubr.bf16.mxu0 %v8220_v42  ;;  %5204 = vmatprep.mubr.bf16.mxu1 %v8223_v16 }
 0x279   : > { %v7028_v48 = vpop.f32.mrb[192].mxu1  ;;  %v7092_v8 = vpop.f32.mrb[192].mxu0 }
 0x27a   : > { %v7029_v32 = vpop.f32.mrb[193].mxu1  ;;  %v7093_v59 = vpop.f32.mrb[193].mxu0 }
 0x27b   : > { %v7030_v25 = vadd.f32 %v7029_v32, %v7028_v48  ;;  %v7094_v3 = vadd.f32 %v7093_v59, %v7092_v8  ;;  %v7031_v33 = vpop.f32.mrb[194].mxu1  ;;  %v7095_v57 = vpop.f32.mrb[194].mxu0 }
 0x27c   : > { %v7032_v28 = vpop.f32.mrb[195].mxu1  ;;  %v7096_v52 = vpop.f32.mrb[195].mxu0 }
 0x27d   : > { %v9762_v18 = vadd.f32 %v7030_v25, %v9614_v38  ;;  %v9765_v9 = vadd.f32 %v7094_v3, %v9617_v47  ;;  %v7033_v1 = vadd.f32 %v7032_v28, %v7031_v33  ;;  %v7097_v22 = vadd.f32 %v7096_v52, %v7095_v57  ;;  %v8224_v47 = vld [vmem:[%s8345_s17 + $0x588] ss:$84 sps:$4 sm:$0xff]   ;;  %v8237_v52 = vld [vmem:[%s8345_s17 + $0x2f0] ss:$84 sps:$4 sm:$0xff]  }
 0x27e   : > { %5108 = vmatmul.mubr.bf16.gmra.mrb[44].mxu0 %v8218_v41  ;;  %5205 = vmatmul.mubr.bf16.gmra.mrb[44].mxu1 %v8221_v60  ;;  %v8233_v3 = vld [vmem:[%s8345_s17 + $0x248] ss:$84 sps:$4 sm:$0xff]  }
 0x27f   : > { %v9768_v12 = vadd.f32 %v7033_v1, %v9622_v0  ;;  %v9771_v51 = vadd.f32 %v7097_v22, %v9625_v27  ;;  %5212 = vmatprep.mubr.bf16.mxu1 %v8226_v43  ;;  %7540 = vmatprep.mubr.bf16.mxu0 %v8227_v10  ;;  %v8236_v28 = vld [vmem:[%s8345_s17 + $0x6dc] ss:$84 sps:$4 sm:$0xff]  }
 0x281   : > { %v7034_v4 = vpop.f32.mrb[196].mxu1  ;;  %v7098_v38 = vpop.f32.mrb[196].mxu0 }
 0x282   : > { %v7035_v56 = vpop.f32.mrb[197].mxu1  ;;  %v7099_v61 = vpop.f32.mrb[197].mxu0 }
 0x283   : > { %v7036_v44 = vadd.f32 %v7035_v56, %v7034_v4  ;;  %v7100_v23 = vadd.f32 %v7099_v61, %v7098_v38  ;;  %v7037_v42 = vpop.f32.mrb[198].mxu1  ;;  %v7101_v16 = vpop.f32.mrb[198].mxu0 }
 0x284   : > { %v7038_v13 = vpop.f32.mrb[199].mxu1  ;;  %v7102_v0 = vpop.f32.mrb[199].mxu0 }
 0x285   : > { %v9778_v27 = vadd.f32 %v7036_v44, %v9634_v36  ;;  %v9781_v58 = vadd.f32 %v7100_v23, %v9637_v37  ;;  %v7039_v48 = vadd.f32 %v7038_v13, %v7037_v42  ;;  %v7103_v8 = vadd.f32 %v7102_v0, %v7101_v16  ;;  %v8229_v37 = vld [vmem:[%s8345_s17 + $0x630] ss:$84 sps:$4 sm:$0xff]   ;;  %v8238_v23 = vld [vmem:[%s8345_s17 + $0x398] ss:$84 sps:$4 sm:$0xff]   ;;  %v8242_v0 = vld [vmem:[%s8345_s17 + $0x440] ss:$84 sps:$4 sm:$0xff]  }
 0x286   : > { %5213 = vmatmul.mubr.bf16.gmra.mrb[48].mxu1 %v8224_v47  ;;  %7541 = vmatmul.mubr.bf16.vlgmr.msra.gmra.mrb[48].mxu0 %v8228_v31  ;;  %v8241_v13 = vld [vmem:[%s8345_s17 + $0x784] ss:$84 sps:$4 sm:$0xff]  }
 0x287   : > { %v9784_v32 = vadd.f32 %v7039_v48, %v9642_v53  ;;  %v9787_v59 = vadd.f32 %v7103_v8, %v9645_v30  ;;  %5220 = vmatprep.mubr.bf16.mxu1 %v8231_v29  ;;  %7544 = vmatprep.mubr.bf16.mxu0 %v8232_v39 }
 0x289   : > { %v7040_v41 = vpop.f32.mrb[200].mxu1  ;;  %v7104_v36 = vpop.f32.mrb[200].mxu0 }
 0x28a   : > { %v7041_v60 = vpop.f32.mrb[201].mxu1  ;;  %v7105_v25 = vpop.f32.mrb[201].mxu0 }
 0x28b   : > { %v7042_v33 = vadd.f32 %v7041_v60, %v7040_v41  ;;  %v7106_v57 = vadd.f32 %v7105_v25, %v7104_v36  ;;  %v7043_v43 = vpop.f32.mrb[202].mxu1  ;;  %v7107_v10 = vpop.f32.mrb[202].mxu0 }
 0x28c   : > { %v7044_v1 = vpop.f32.mrb[203].mxu1  ;;  %v7108_v53 = vpop.f32.mrb[203].mxu0 }
 0x28d   : > { %v9794_v30 = vadd.f32 %v7042_v33, %v9654_v14  ;;  %v9797_v22 = vadd.f32 %v7106_v57, %v9657_v46  ;;  %v7045_v4 = vadd.f32 %v7044_v1, %v7043_v43  ;;  %v7109_v38 = vadd.f32 %v7108_v53, %v7107_v10  ;;  %v8234_v46 = vld [vmem:[%s8345_s17 + $0x6d8] ss:$84 sps:$4 sm:$0xff]   ;;  %v8243_v57 = vld [vmem:[%s8345_s17 + $0x4e8] ss:$84 sps:$4 sm:$0xff]   ;;  %v8247_v53 = vld [vmem:[%s8345_s17 + $0x590] ss:$84 sps:$4 sm:$0xff]  }
 0x28e   : > { %5221 = vmatmul.mubr.bf16.gmra.mrb[52].mxu1 %v8229_v37  ;;  %7545 = vmatmul.mubr.bf16.gmra.mrb[52].mxu0 %v8233_v3  ;;  %v8246_v1 = vld [vmem:[%s8345_s17 + $0x82c] ss:$84 sps:$4 sm:$0xff]  }
 0x28f   : > { %v9800_v56 = vadd.f32 %v7045_v4, %v9662_v15  ;;  %v9803_v61 = vadd.f32 %v7109_v38, %v9665_v35  ;;  %5228 = vmatprep.mubr.bf16.mxu1 %v8236_v28  ;;  %7548 = vmatprep.mubr.bf16.mxu0 %v8237_v52 }
 0x291   : > { %v7046_v47 = vpop.f32.mrb[204].mxu1  ;;  %v7110_v14 = vpop.f32.mrb[204].mxu0 }
 0x292   : > { %v7047_v31 = vpop.f32.mrb[205].mxu1  ;;  %v7111_v44 = vpop.f32.mrb[205].mxu0 }
 0x293   : > { %v7048_v42 = vadd.f32 %v7047_v31, %v7046_v47  ;;  %v7112_v16 = vadd.f32 %v7111_v44, %v7110_v14  ;;  %v7049_v29 = vpop.f32.mrb[206].mxu1  ;;  %v7113_v39 = vpop.f32.mrb[206].mxu0 }
 0x294   : > { %v7050_v48 = vpop.f32.mrb[207].mxu1  ;;  %v7114_v15 = vpop.f32.mrb[207].mxu0 }
 0x295   : > { %v9810_v35 = vadd.f32 %v7048_v42, %v9674_v2  ;;  %v9813_v8 = vadd.f32 %v7112_v16, %v9677_v17  ;;  %v7051_v41 = vadd.f32 %v7050_v48, %v7049_v29  ;;  %v7115_v36 = vadd.f32 %v7114_v15, %v7113_v39  ;;  %v8239_v17 = vld [vmem:[%s8345_s17 + $0x780] ss:$84 sps:$4 sm:$0xff]   ;;  %v8248_v16 = vld [vmem:[%s8345_s17 + $0x638] ss:$84 sps:$4 sm:$0xff]  }
 0x296   : > { %5229 = vmatmul.mubr.bf16.gmra.mrb[56].mxu1 %v8234_v46  ;;  %7549 = vmatmul.mubr.bf16.gmra.mrb[56].mxu0 %v8238_v23  ;;  %v8251_v48 = vld [vmem:[%s8345_s17 + $0x8d4] ss:$84 sps:$4 sm:$0xff]  }
 0x297   : > { %v9816_v60 = vadd.f32 %v7051_v41, %v9682_v20  ;;  %v9819_v25 = vadd.f32 %v7115_v36, %v9685_v62  ;;  %5236 = vmatprep.mubr.bf16.mxu1 %v8241_v13  ;;  %7552 = vmatprep.mubr.bf16.mxu0 %v8242_v0  ;;  %v8252_v15 = vld [vmem:[%s8345_s17 + $0x6e0] ss:$84 sps:$4 sm:$0xff]  }
 0x299   : > { %v7116_v37 = vpop.f32.mrb[208].mxu0  ;;  %v7180_v2 = vpop.f32.mrb[208].mxu1 }
 0x29a   : > { %v7117_v3 = vpop.f32.mrb[209].mxu0  ;;  %v7181_v33 = vpop.f32.mrb[209].mxu1 }
 0x29b   : > { %v7118_v43 = vadd.f32 %v7117_v3, %v7116_v37  ;;  %v7182_v10 = vadd.f32 %v7181_v33, %v7180_v2  ;;  %v7119_v28 = vpop.f32.mrb[210].mxu0  ;;  %v7183_v52 = vpop.f32.mrb[210].mxu1 }
 0x29c   : > { %v7120_v4 = vpop.f32.mrb[211].mxu0  ;;  %v7184_v20 = vpop.f32.mrb[211].mxu1 }
 0x29d   : > { %v9826_v62 = vadd.f32 %v7118_v43, %v9694_v19  ;;  %v9829_v38 = vadd.f32 %v7182_v10, %v9697_v54  ;;  %v7121_v47 = vadd.f32 %v7120_v4, %v7119_v28  ;;  %v7185_v14 = vadd.f32 %v7184_v20, %v7183_v52  ;;  %v8244_v54 = vld [vmem:[%s8345_s17 + $0x828] ss:$84 sps:$4 sm:$0xff]   ;;  %v8257_v20 = vld [vmem:[%s8345_s17 + $0x830] ss:$84 sps:$4 sm:$0xff]  }
 0x29e   : > { %5237 = vmatmul.mubr.bf16.gmra.mrb[60].mxu1 %v8239_v17  ;;  %7553 = vmatmul.mubr.bf16.gmra.mrb[60].mxu0 %v8243_v57  ;;  %v8253_v10 = vld [vmem:[%s8345_s17 + $0x788] ss:$84 sps:$4 sm:$0xff]  }
 0x29f   : > { %v9832_v31 = vadd.f32 %v7121_v47, %v9702_v7  ;;  %v9835_v44 = vadd.f32 %v7185_v14, %v9705_v11  ;;  %5244 = vmatprep.mubr.bf16.mxu1 %v8246_v1  ;;  %7556 = vmatprep.mubr.bf16.mxu0 %v8247_v53  ;;  %v8256_v4 = vld [vmem:[%s8345_s17 + $0x97c] ss:$84 sps:$4 sm:$0xff]  }
 0x2a1   : > { %v7122_v46 = vpop.f32.mrb[212].mxu0  ;;  %v7186_v19 = vpop.f32.mrb[212].mxu1 }
 0x2a2   : > { %v7123_v23 = vpop.f32.mrb[213].mxu0  ;;  %v7187_v42 = vpop.f32.mrb[213].mxu1 }
 0x2a3   : > { %v7124_v29 = vadd.f32 %v7123_v23, %v7122_v46  ;;  %v7188_v39 = vadd.f32 %v7187_v42, %v7186_v19  ;;  %v7125_v13 = vpop.f32.mrb[214].mxu0  ;;  %v7189_v0 = vpop.f32.mrb[214].mxu1 }
 0x2a4   : > { %v7126_v41 = vpop.f32.mrb[215].mxu0  ;;  %v7190_v7 = vpop.f32.mrb[215].mxu1 }
 0x2a5   : > { %v9842_v11 = vadd.f32 %v7124_v29, %v9714_v26  ;;  %v9845_v36 = vadd.f32 %v7188_v39, %v9717_v5  ;;  %v7127_v37 = vadd.f32 %v7126_v41, %v7125_v13  ;;  %v7191_v2 = vadd.f32 %v7190_v7, %v7189_v0  ;;  %v8249_v5 = vld [vmem:[%s8345_s17 + $0x8d0] ss:$84 sps:$4 sm:$0xff]   ;;  %v8258_v39 = vld [vmem:[%s8345_s17 + $0x8d8] ss:$84 sps:$4 sm:$0xff]   ;;  %v8262_v7 = vld [vmem:[%s8345_s17 + $0x980] ss:$84 sps:$4 sm:$0xff]  }
 0x2a6   : > { %5245 = vmatmul.mubr.bf16.gmra.mrb[64].mxu1 %v8244_v54  ;;  %7557 = vmatmul.mubr.bf16.gmra.mrb[64].mxu0 %v8248_v16  ;;  %v8261_v41 = vld [vmem:[%s8345_s17 + $0xa24] ss:$84 sps:$4 sm:$0xff]  }
 0x2a7   : > { %v9848_v3 = vadd.f32 %v7127_v37, %v9720_v55  ;;  %v9851_v33 = vadd.f32 %v7191_v2, %v9723_v49  ;;  %5252 = vmatprep.mubr.bf16.mxu1 %v8251_v48  ;;  %7560 = vmatprep.mubr.bf16.mxu0 %v8252_v15 }
 0x2a9   : > { %v7128_v17 = vpop.f32.mrb[216].mxu0  ;;  %v7192_v26 = vpop.f32.mrb[216].mxu1 }
 0x2aa   : > { %v7129_v57 = vpop.f32.mrb[217].mxu0  ;;  %v7193_v43 = vpop.f32.mrb[217].mxu1 }
 0x2ab   : > { %v7130_v28 = vadd.f32 %v7129_v57, %v7128_v17  ;;  %v7194_v52 = vadd.f32 %v7193_v43, %v7192_v26  ;;  %v7131_v1 = vpop.f32.mrb[218].mxu0  ;;  %v7195_v53 = vpop.f32.mrb[218].mxu1 }
 0x2ac   : > { %v7132_v47 = vpop.f32.mrb[219].mxu0  ;;  %v7196_v55 = vpop.f32.mrb[219].mxu1 }
 0x2ad   : > { %v9858_v49 = vadd.f32 %v7130_v28, %v9730_v34  ;;  %v9861_v14 = vadd.f32 %v7194_v52, %v9733_v6  ;;  %v7133_v46 = vadd.f32 %v7132_v47, %v7131_v1  ;;  %v7197_v19 = vadd.f32 %v7196_v55, %v7195_v53  ;;  %v8254_v6 = vld [vmem:[%s8345_s17 + $0x978] ss:$84 sps:$4 sm:$0xff]   ;;  %v8259_v52 = vld [vmem:[%s8345_s17 + $0xa20] ss:$84 sps:$4 sm:$0xff]   ;;  %v8263_v1 = vld [vmem:[%s8345_s17 + $0xa28] ss:$84 sps:$4 sm:$0xff]  }
 0x2ae   : > { %5253 = vmatmul.mubr.bf16.gmra.mrb[68].mxu1 %v8249_v5  ;;  %7561 = vmatmul.mubr.bf16.gmra.mrb[68].mxu0 %v8253_v10 }
 0x2af   : > { %v9864_v23 = vadd.f32 %v7133_v46, %v9736_v21  ;;  %v9867_v42 = vadd.f32 %v7197_v19, %v9739_v40  ;;  %5260 = vmatprep.mubr.bf16.mxu1 %v8256_v4  ;;  %7564 = vmatprep.mubr.bf16.mxu0 %v8257_v20 }
 0x2b1   : > { %v7134_v54 = vpop.f32.mrb[220].mxu0  ;;  %v7198_v34 = vpop.f32.mrb[220].mxu1 }
 0x2b2   : > { %v7135_v16 = vpop.f32.mrb[221].mxu0  ;;  %v7199_v29 = vpop.f32.mrb[221].mxu1 }
 0x2b3   : > { %v7136_v13 = vadd.f32 %v7135_v16, %v7134_v54  ;;  %v7200_v0 = vadd.f32 %v7199_v29, %v7198_v34  ;;  %v7137_v48 = vpop.f32.mrb[222].mxu0  ;;  %v7201_v15 = vpop.f32.mrb[222].mxu1 }
 0x2b4   : > { %v7138_v37 = vpop.f32.mrb[223].mxu0  ;;  %v7202_v21 = vpop.f32.mrb[223].mxu1 }
 0x2b5   : > { %v9874_v40 = vadd.f32 %v7136_v13, %v9746_v24  ;;  %v9877_v2 = vadd.f32 %v7200_v0, %v9749_v45  ;;  %v7139_v17 = vadd.f32 %v7138_v37, %v7137_v48  ;;  %v7203_v26 = vadd.f32 %v7202_v21, %v7201_v15 }
 0x2b6   : > { %5261 = vmatmul.mubr.bf16.gmra.mrb[72].mxu1 %v8254_v6  ;;  %7565 = vmatmul.mubr.bf16.gmra.mrb[72].mxu0 %v8258_v39 }
 0x2b7   : > { %v9880_v57 = vadd.f32 %v7139_v17, %v9752_v50  ;;  %v9883_v43 = vadd.f32 %v7203_v26, %v9755_v63  ;;  %5268 = vmatprep.mubr.bf16.mxu1 %v8261_v41  ;;  %7568 = vmatprep.mubr.bf16.mxu0 %v8262_v7 }
 0x2b9   : > { %v7140_v5 = vpop.f32.mrb[224].mxu0  ;;  %v7204_v10 = vpop.f32.mrb[224].mxu1 }
 0x2ba   : > { %v7141_v28 = vpop.f32.mrb[225].mxu0  ;;  %v7205_v24 = vpop.f32.mrb[225].mxu1 }
 0x2bb   : > { %v7142_v45 = vadd.f32 %v7141_v28, %v7140_v5  ;;  %v7206_v53 = vadd.f32 %v7205_v24, %v7204_v10  ;;  %v7143_v4 = vpop.f32.mrb[226].mxu0  ;;  %v7207_v20 = vpop.f32.mrb[226].mxu1 }
 0x2bc   : > { %v7144_v47 = vpop.f32.mrb[227].mxu0  ;;  %v7208_v55 = vpop.f32.mrb[227].mxu1 }
 0x2bd   : > { %v9888_v50 = vadd.f32 %v7142_v45, %v9762_v18  ;;  %v9891_v63 = vadd.f32 %v7206_v53, %v9765_v9  ;;  %v7145_v46 = vadd.f32 %v7144_v47, %v7143_v4  ;;  %v7209_v19 = vadd.f32 %v7208_v55, %v7207_v20 }
 0x2be   : > { %5269 = vmatmul.mubr.bf16.gmra.mrb[76].mxu1 %v8259_v52  ;;  %7569 = vmatmul.mubr.bf16.gmra.mrb[76].mxu0 %v8263_v1 }
 0x2bf   : > { %v9894_v54 = vadd.f32 %v7145_v46, %v9768_v12  ;;  %v9897_v34 = vadd.f32 %v7209_v19, %v9771_v51 }
 0x2c1   : > { %v7146_v16 = vpop.f32.mrb[228].mxu0  ;;  %v7210_v29 = vpop.f32.mrb[228].mxu1 }
 0x2c2   : > { %v7147_v6 = vpop.f32.mrb[229].mxu0  ;;  %v7211_v39 = vpop.f32.mrb[229].mxu1 }
 0x2c3   : > { %v7148_v13 = vadd.f32 %v7147_v6, %v7146_v16  ;;  %v7212_v18 = vadd.f32 %v7211_v39, %v7210_v29  ;;  %v7149_v0 = vpop.f32.mrb[230].mxu0  ;;  %v7213_v48 = vpop.f32.mrb[230].mxu1 }
 0x2c4   : > { %v7150_v9 = vpop.f32.mrb[231].mxu0  ;;  %v7214_v15 = vpop.f32.mrb[231].mxu1 }
 0x2c5   : > { %v9900_v41 = vadd.f32 %v7148_v13, %v9778_v27  ;;  %v9903_v7 = vadd.f32 %v7212_v18, %v9781_v58  ;;  %v7151_v12 = vadd.f32 %v7150_v9, %v7149_v0  ;;  %v7215_v37 = vadd.f32 %v7214_v15, %v7213_v48 }
 0x2c7   : > { %v9906_v51 = vadd.f32 %v7151_v12, %v9784_v32  ;;  %v9909_v21 = vadd.f32 %v7215_v37, %v9787_v59 }
 0x2c9   : > { %v7152_v17 = vpop.f32.mrb[232].mxu0  ;;  %v7216_v26 = vpop.f32.mrb[232].mxu1 }
 0x2ca   : > { %v7153_v5 = vpop.f32.mrb[233].mxu0  ;;  %v7217_v10 = vpop.f32.mrb[233].mxu1 }
 0x2cb   : > { %v7154_v28 = vadd.f32 %v7153_v5, %v7152_v17  ;;  %v7218_v24 = vadd.f32 %v7217_v10, %v7216_v26  ;;  %v7155_v52 = vpop.f32.mrb[234].mxu0  ;;  %v7219_v27 = vpop.f32.mrb[234].mxu1 }
 0x2cc   : > { %v7156_v1 = vpop.f32.mrb[235].mxu0  ;;  %v7220_v45 = vpop.f32.mrb[235].mxu1 }
 0x2cd   : > { %v9912_v58 = vadd.f32 %v7154_v28, %v9794_v30  ;;  %v9915_v53 = vadd.f32 %v7218_v24, %v9797_v22  ;;  %v7157_v32 = vadd.f32 %v7156_v1, %v7155_v52  ;;  %v7221_v4 = vadd.f32 %v7220_v45, %v7219_v27 }
 0x2cf   : > { %v9918_v59 = vadd.f32 %v7157_v32, %v9800_v56  ;;  %v9921_v20 = vadd.f32 %v7221_v4, %v9803_v61 }
 0x2d1   : > { %v7158_v47 = vpop.f32.mrb[236].mxu0  ;;  %v7222_v55 = vpop.f32.mrb[236].mxu1 }
 0x2d2   : > { %v7159_v46 = vpop.f32.mrb[237].mxu0  ;;  %v7223_v19 = vpop.f32.mrb[237].mxu1 }
 0x2d3   : > { %v7160_v16 = vadd.f32 %v7159_v46, %v7158_v47  ;;  %v7224_v29 = vadd.f32 %v7223_v19, %v7222_v55  ;;  %v7161_v6 = vpop.f32.mrb[238].mxu0  ;;  %v7225_v30 = vpop.f32.mrb[238].mxu1 }
 0x2d4   : > { %v7162_v39 = vpop.f32.mrb[239].mxu0  ;;  %v7226_v13 = vpop.f32.mrb[239].mxu1 }
 0x2d5   : > { %v9924_v22 = vadd.f32 %v7160_v16, %v9810_v35  ;;  %v9927_v18 = vadd.f32 %v7224_v29, %v9813_v8  ;;  %v7163_v56 = vadd.f32 %v7162_v39, %v7161_v6  ;;  %v7227_v0 = vadd.f32 %v7226_v13, %v7225_v30 }
 0x2d7   : > { %v9930_v61 = vadd.f32 %v7163_v56, %v9816_v60  ;;  %v9933_v48 = vadd.f32 %v7227_v0, %v9819_v25 }
 0x2d9   : > { %v7228_v9 = vpop.f32.mrb[240].mxu1  ;;  %v7292_v15 = vpop.f32.mrb[240].mxu0 }
 0x2da   : > { %v7229_v12 = vpop.f32.mrb[241].mxu1  ;;  %v7293_v37 = vpop.f32.mrb[241].mxu0 }
 0x2db   : > { %v7230_v17 = vadd.f32 %v7229_v12, %v7228_v9  ;;  %v7294_v26 = vadd.f32 %v7293_v37, %v7292_v15  ;;  %v7231_v5 = vpop.f32.mrb[242].mxu1  ;;  %v7295_v35 = vpop.f32.mrb[242].mxu0 }
 0x2dc   : > { %v7232_v10 = vpop.f32.mrb[243].mxu1  ;;  %v7296_v28 = vpop.f32.mrb[243].mxu0 }
 0x2dd   : > { %v9936_v8 = vadd.f32 %v7230_v17, %v9826_v62  ;;  %v9939_v24 = vadd.f32 %v7294_v26, %v9829_v38  ;;  %v7233_v60 = vadd.f32 %v7232_v10, %v7231_v5  ;;  %v7297_v52 = vadd.f32 %v7296_v28, %v7295_v35 }
 0x2df   : > { %v9942_v25 = vadd.f32 %v7233_v60, %v9832_v31  ;;  %v9945_v27 = vadd.f32 %v7297_v52, %v9835_v44 }
 0x2e1   : > { %v7234_v1 = vpop.f32.mrb[244].mxu1  ;;  %v7298_v45 = vpop.f32.mrb[244].mxu0 }
 0x2e2   : > { %v7235_v32 = vpop.f32.mrb[245].mxu1  ;;  %v7299_v4 = vpop.f32.mrb[245].mxu0 }
 0x2e3   : > { %v7236_v47 = vadd.f32 %v7235_v32, %v7234_v1  ;;  %v7300_v55 = vadd.f32 %v7299_v4, %v7298_v45  ;;  %v7237_v46 = vpop.f32.mrb[246].mxu1  ;;  %v7301_v62 = vpop.f32.mrb[246].mxu0 }
 0x2e4   : > { %v7238_v19 = vpop.f32.mrb[247].mxu1  ;;  %v7302_v16 = vpop.f32.mrb[247].mxu0 }
 0x2e5   : > { %v9948_v38 = vadd.f32 %v7236_v47, %v9842_v11  ;;  %v9951_v29 = vadd.f32 %v7300_v55, %v9845_v36  ;;  %v7239_v31 = vadd.f32 %v7238_v19, %v7237_v46  ;;  %v7303_v6 = vadd.f32 %v7302_v16, %v7301_v62 }
 0x2e7   : > { %v9954_v44 = vadd.f32 %v7239_v31, %v9848_v3  ;;  %v9957_v30 = vadd.f32 %v7303_v6, %v9851_v33 }
 0x2e9   : > { %v7240_v39 = vpop.f32.mrb[248].mxu1  ;;  %v7304_v13 = vpop.f32.mrb[248].mxu0 }
 0x2ea   : > { %v7241_v56 = vpop.f32.mrb[249].mxu1  ;;  %v7305_v0 = vpop.f32.mrb[249].mxu0 }
 0x2eb   : > { %v7242_v9 = vadd.f32 %v7241_v56, %v7240_v39  ;;  %v7306_v15 = vadd.f32 %v7305_v0, %v7304_v13  ;;  %v7243_v12 = vpop.f32.mrb[250].mxu1  ;;  %v7307_v11 = vpop.f32.mrb[250].mxu0 }
 0x2ec   : > { %v7244_v37 = vpop.f32.mrb[251].mxu1  ;;  %v7308_v17 = vpop.f32.mrb[251].mxu0 }
 0x2ed   : > { %v9960_v36 = vadd.f32 %v7242_v9, %v9858_v49  ;;  %v9963_v26 = vadd.f32 %v7306_v15, %v9861_v14  ;;  %v7245_v3 = vadd.f32 %v7244_v37, %v7243_v12  ;;  %v7309_v5 = vadd.f32 %v7308_v17, %v7307_v11 }
 0x2ef   : > { %v9966_v33 = vadd.f32 %v7245_v3, %v9864_v23  ;;  %v9969_v35 = vadd.f32 %v7309_v5, %v9867_v42 }
 0x2f1   : > { %v7246_v10 = vpop.f32.mrb[252].mxu1  ;;  %v7310_v28 = vpop.f32.mrb[252].mxu0 }
 0x2f2   : > { %v7247_v60 = vpop.f32.mrb[253].mxu1  ;;  %v7311_v52 = vpop.f32.mrb[253].mxu0 }
 0x2f3   : > { %v7248_v1 = vadd.f32 %v7247_v60, %v7246_v10  ;;  %v7312_v45 = vadd.f32 %v7311_v52, %v7310_v28  ;;  %v7249_v32 = vpop.f32.mrb[254].mxu1  ;;  %v7313_v49 = vpop.f32.mrb[254].mxu0 }
 0x2f4   : > { %v7250_v4 = vpop.f32.mrb[255].mxu1  ;;  %v7314_v47 = vpop.f32.mrb[255].mxu0 }
 0x2f5   : > { %v9972_v14 = vadd.f32 %v7248_v1, %v9874_v40  ;;  %v9975_v55 = vadd.f32 %v7312_v45, %v9877_v2  ;;  %v7251_v23 = vadd.f32 %v7250_v4, %v7249_v32  ;;  %v7315_v46 = vadd.f32 %v7314_v47, %v7313_v49 }
 0x2f7   : > { %v9978_v42 = vadd.f32 %v7251_v23, %v9880_v57  ;;  %v9981_v62 = vadd.f32 %v7315_v46, %v9883_v43 }
 0x2f9   : > { %v7252_v19 = vpop.f32.mrb[0].mxu1  ;;  %v7316_v16 = vpop.f32.mrb[0].mxu0 }
 0x2fa   : > { %v7253_v31 = vpop.f32.mrb[1].mxu1  ;;  %v7317_v6 = vpop.f32.mrb[1].mxu0 }
 0x2fb   : > { %v7254_v39 = vadd.f32 %v7253_v31, %v7252_v19  ;;  %v7318_v13 = vadd.f32 %v7317_v6, %v7316_v16  ;;  %v7255_v56 = vpop.f32.mrb[2].mxu1  ;;  %v7319_v40 = vpop.f32.mrb[2].mxu0 }
 0x2fc   : > { %v7256_v0 = vpop.f32.mrb[3].mxu1  ;;  %v7320_v9 = vpop.f32.mrb[3].mxu0 }
 0x2fd   : > { %v9984_v2 = vadd.f32 %v7254_v39, %v9888_v50  ;;  %v9987_v15 = vadd.f32 %v7318_v13, %v9891_v63  ;;  %v7257_v57 = vadd.f32 %v7256_v0, %v7255_v56  ;;  %v7321_v12 = vadd.f32 %v7320_v9, %v7319_v40 }
 0x2ff   : > { %v9990_v43 = vadd.f32 %v7257_v57, %v9894_v54  ;;  %v9993_v11 = vadd.f32 %v7321_v12, %v9897_v34 }
 0x301   : > { %v7258_v37 = vpop.f32.mrb[4].mxu1  ;;  %v7322_v17 = vpop.f32.mrb[4].mxu0 }
 0x302   : > { %v7259_v3 = vpop.f32.mrb[5].mxu1  ;;  %v7323_v5 = vpop.f32.mrb[5].mxu0 }
 0x303   : > { %v7260_v10 = vadd.f32 %v7259_v3, %v7258_v37  ;;  %v7324_v28 = vadd.f32 %v7323_v5, %v7322_v17  ;;  %v7261_v60 = vpop.f32.mrb[6].mxu1  ;;  %v7325_v50 = vpop.f32.mrb[6].mxu0 }
 0x304   : > { %v7262_v52 = vpop.f32.mrb[7].mxu1  ;;  %v7326_v1 = vpop.f32.mrb[7].mxu0 }
 0x305   : > { %v9996_v63 = vadd.f32 %v7260_v10, %v9900_v41  ;;  %v9999_v45 = vadd.f32 %v7324_v28, %v9903_v7  ;;  %v7263_v54 = vadd.f32 %v7262_v52, %v7261_v60  ;;  %v7327_v32 = vadd.f32 %v7326_v1, %v7325_v50 }
 0x307   : > { %v10002_v34 = vadd.f32 %v7263_v54, %v9906_v51  ;;  %v10005_v49 = vadd.f32 %v7327_v32, %v9909_v21 }
 0x309   : > { %v7264_v4 = vpop.f32.mrb[8].mxu1  ;;  %v7328_v47 = vpop.f32.mrb[8].mxu0 }
 0x30a   : > { %v7265_v23 = vpop.f32.mrb[9].mxu1  ;;  %v7329_v46 = vpop.f32.mrb[9].mxu0 }
 0x30b   : > { %v7266_v19 = vadd.f32 %v7265_v23, %v7264_v4  ;;  %v7330_v16 = vadd.f32 %v7329_v46, %v7328_v47  ;;  %v7267_v31 = vpop.f32.mrb[10].mxu1  ;;  %v7331_v41 = vpop.f32.mrb[10].mxu0 }
 0x30c   : > { %v7268_v6 = vpop.f32.mrb[11].mxu1  ;;  %v7332_v39 = vpop.f32.mrb[11].mxu0 }
 0x30d   : > { %v10008_v7 = vadd.f32 %v7266_v19, %v9912_v58  ;;  %v10011_v13 = vadd.f32 %v7330_v16, %v9915_v53  ;;  %v7269_v51 = vadd.f32 %v7268_v6, %v7267_v31  ;;  %v7333_v56 = vadd.f32 %v7332_v39, %v7331_v41  ;;  %v10043_v6 = vpop.permute.xlu0 %5536 }
 0x30f   : > { %v10014_v21 = vadd.f32 %v7269_v51, %v9918_v59  ;;  %v10017_v40 = vadd.f32 %v7333_v56, %v9921_v20 }
 0x311   : > { %v7270_v0 = vpop.f32.mrb[12].mxu1  ;;  %v7334_v9 = vpop.f32.mrb[12].mxu0 }
 0x312   : > { %v7271_v57 = vpop.f32.mrb[13].mxu1  ;;  %v7335_v12 = vpop.f32.mrb[13].mxu0 }
 0x313   : > { %v7272_v37 = vadd.f32 %v7271_v57, %v7270_v0  ;;  %v7336_v17 = vadd.f32 %v7335_v12, %v7334_v9  ;;  %v7273_v3 = vpop.f32.mrb[14].mxu1  ;;  %v7337_v58 = vpop.f32.mrb[14].mxu0 }
 0x314   : > { %v7274_v5 = vpop.f32.mrb[15].mxu1  ;;  %v7338_v10 = vpop.f32.mrb[15].mxu0 }
 0x315   : > { %v10020_v53 = vadd.f32 %v7272_v37, %v9924_v22  ;;  %v10023_v28 = vadd.f32 %v7336_v17, %v9927_v18  ;;  %v7275_v59 = vadd.f32 %v7274_v5, %v7273_v3  ;;  %v7339_v60 = vadd.f32 %v7338_v10, %v7337_v58  ;;  %v10057_v10 = vpop.permute.xlu1 %5546 }
 0x317   : > { %v10026_v20 = vadd.f32 %v7275_v59, %v9930_v61  ;;  %v10029_v50 = vadd.f32 %v7339_v60, %v9933_v48  ;;  %v10059_v59 = vpop.permute.xlu0 %5541 }
 0x319   : > { %v7340_v52 = vpop.f32.mrb[16].mxu0  ;;  %v7404_v1 = vpop.f32.mrb[16].mxu1 }
 0x31a   : > { %v7341_v54 = vpop.f32.mrb[17].mxu0  ;;  %v7405_v32 = vpop.f32.mrb[17].mxu1 }
 0x31b   : > { %v7342_v4 = vadd.f32 %v7341_v54, %v7340_v52  ;;  %v7406_v47 = vadd.f32 %v7405_v32, %v7404_v1  ;;  %v7343_v23 = vpop.f32.mrb[18].mxu0  ;;  %v7407_v22 = vpop.f32.mrb[18].mxu1 }
 0x31c   : > { %v7344_v46 = vpop.f32.mrb[19].mxu0  ;;  %v7408_v19 = vpop.f32.mrb[19].mxu1 }
 0x31d   : > { %v10032_v18 = vadd.f32 %v7342_v4, %v9936_v8  ;;  %v7345_v16 = vadd.f32 %v7344_v46, %v7343_v23  ;;  %v7409_v31 = vadd.f32 %v7408_v19, %v7407_v22  ;;  %v10035_v61 = vadd.f32 %v7406_v47, %v9939_v24 }
 0x31f   : > { %v10038_v48 = vadd.f32 %v7345_v16, %v9942_v25  ;;  %v10041_v41 = vadd.f32 %v7409_v31, %v9945_v27  ;;  %v10073_v31 = vpop.permute.xlu1 %5551 }
 0x321   : > { %v7346_v39 = vpop.f32.mrb[20].mxu0  ;;  %v7410_v51 = vpop.f32.mrb[20].mxu1 }
 0x322   : > { %v7347_v56 = vpop.f32.mrb[21].mxu0  ;;  %v7411_v0 = vpop.f32.mrb[21].mxu1 }
 0x323   : > { %v7348_v9 = vadd.f32 %v7347_v56, %v7346_v39  ;;  %v7412_v8 = vadd.f32 %v7411_v0, %v7410_v51  ;;  %v7349_v57 = vpop.f32.mrb[22].mxu0  ;;  %v7413_v12 = vpop.f32.mrb[22].mxu1 }
 0x324   : > { %v7350_v37 = vpop.f32.mrb[23].mxu0  ;;  %v7414_v17 = vpop.f32.mrb[23].mxu1 }
 0x325   : > { %v10046_v24 = vadd.f32 %v7348_v9, %v9948_v38  ;;  %v7351_v25 = vadd.f32 %v7350_v37, %v7349_v57  ;;  %v7415_v3 = vadd.f32 %v7414_v17, %v7413_v12  ;;  %v10049_v27 = vadd.f32 %v7412_v8, %v9951_v29  ;;  %v10075_v39 = vpop.permute.xlu0 %5556 }
 0x327   : > { %v10052_v58 = vadd.f32 %v7351_v25, %v9954_v44  ;;  %v10055_v5 = vadd.f32 %v7415_v3, %v9957_v30 }
 0x329   : > { %v7352_v60 = vpop.f32.mrb[24].mxu0  ;;  %v7416_v52 = vpop.f32.mrb[24].mxu1 }
 0x32a   : > { %v7353_v1 = vpop.f32.mrb[25].mxu0  ;;  %v7417_v38 = vpop.f32.mrb[25].mxu1 }
 0x32b   : > { %v7354_v54 = vadd.f32 %v7353_v1, %v7352_v60  ;;  %v7418_v32 = vadd.f32 %v7417_v38, %v7416_v52  ;;  %v7355_v4 = vpop.f32.mrb[26].mxu0  ;;  %v7419_v47 = vpop.f32.mrb[26].mxu1 }
 0x32c   : > { %v7356_v29 = vpop.f32.mrb[27].mxu0  ;;  %v7420_v23 = vpop.f32.mrb[27].mxu1 }
 0x32d   : > { %v10062_v44 = vadd.f32 %v7354_v54, %v9960_v36  ;;  %v7357_v22 = vadd.f32 %v7356_v29, %v7355_v4  ;;  %v7421_v30 = vadd.f32 %v7420_v23, %v7419_v47  ;;  %v10065_v46 = vadd.f32 %v7418_v32, %v9963_v26  ;;  %v10089_v52 = vpop.permute.xlu1 %5561  ;;  %v10091_v1 = vpop.permute.xlu0 %5566 }
 0x32f   : > { %v10068_v19 = vadd.f32 %v7357_v22, %v9966_v33  ;;  %v10071_v16 = vadd.f32 %v7421_v30, %v9969_v35 }
 0x331   : > { %v7358_v51 = vpop.f32.mrb[28].mxu0  ;;  %v7422_v56 = vpop.f32.mrb[28].mxu1 }
 0x332   : > { %v7359_v0 = vpop.f32.mrb[29].mxu0  ;;  %v7423_v36 = vpop.f32.mrb[29].mxu1 }
 0x333   : > { %v7360_v9 = vadd.f32 %v7359_v0, %v7358_v51  ;;  %v7424_v8 = vadd.f32 %v7423_v36, %v7422_v56  ;;  %v7361_v57 = vpop.f32.mrb[30].mxu0  ;;  %v7425_v12 = vpop.f32.mrb[30].mxu1 }
 0x334   : > { %v7362_v26 = vpop.f32.mrb[31].mxu0  ;;  %v7426_v37 = vpop.f32.mrb[31].mxu1 }
 0x335   : > { %v10078_v33 = vadd.f32 %v7360_v9, %v9972_v14  ;;  %v7363_v17 = vadd.f32 %v7362_v26, %v7361_v57  ;;  %v7427_v35 = vadd.f32 %v7426_v37, %v7425_v12  ;;  %v10081_v25 = vadd.f32 %v7424_v8, %v9975_v55  ;;  %v10105_v36 = vpop.permute.xlu1 %5571  ;;  %v10107_v9 = vpop.permute.xlu0 %5576 }
 0x337   : > { %v10084_v3 = vadd.f32 %v7363_v17, %v9978_v42  ;;  %v10087_v60 = vadd.f32 %v7427_v35, %v9981_v62 }
 0x339   : > { %v7364_v38 = vpop.f32.mrb[32].mxu0  ;;  %v7428_v54 = vpop.f32.mrb[32].mxu1 }
 0x33a   : > { %v7365_v32 = vpop.f32.mrb[33].mxu0  ;;  %v7429_v14 = vpop.f32.mrb[33].mxu1 }
 0x33b   : > { %v7366_v4 = vadd.f32 %v7365_v32, %v7364_v38  ;;  %v7430_v47 = vadd.f32 %v7429_v14, %v7428_v54  ;;  %v7367_v29 = vpop.f32.mrb[34].mxu0  ;;  %v7431_v23 = vpop.f32.mrb[34].mxu1 }
 0x33c   : > { %v7368_v55 = vpop.f32.mrb[35].mxu0  ;;  %v7432_v22 = vpop.f32.mrb[35].mxu1 }
 0x33d   : > { %v10094_v42 = vadd.f32 %v7366_v4, %v9984_v2  ;;  %v7369_v30 = vadd.f32 %v7368_v55, %v7367_v29  ;;  %v7433_v62 = vadd.f32 %v7432_v22, %v7431_v23  ;;  %v10097_v51 = vadd.f32 %v7430_v47, %v9987_v15  ;;  %v10121_v47 = vpop.permute.xlu1 %5581  ;;  %v10123_v29 = vpop.permute.xlu0 %5586 }
 0x33f   : > { %v10100_v56 = vadd.f32 %v7369_v30, %v9990_v43  ;;  %v10103_v0 = vadd.f32 %v7433_v62, %v9993_v11 }
 0x341   : > { %v7370_v8 = vpop.f32.mrb[36].mxu0  ;;  %v7434_v57 = vpop.f32.mrb[36].mxu1 }
 0x342   : > { %v7371_v12 = vpop.f32.mrb[37].mxu0  ;;  %v7435_v2 = vpop.f32.mrb[37].mxu1 }
 0x343   : > { %v7372_v26 = vadd.f32 %v7371_v12, %v7370_v8  ;;  %v7436_v37 = vadd.f32 %v7435_v2, %v7434_v57  ;;  %v7373_v17 = vpop.f32.mrb[38].mxu0  ;;  %v7437_v35 = vpop.f32.mrb[38].mxu1 }
 0x344   : > { %v7374_v15 = vpop.f32.mrb[39].mxu0  ;;  %v7438_v38 = vpop.f32.mrb[39].mxu1 }
 0x345   : > { %v10110_v43 = vadd.f32 %v7372_v26, %v9996_v63  ;;  %v7375_v54 = vadd.f32 %v7374_v15, %v7373_v17  ;;  %v7439_v11 = vadd.f32 %v7438_v38, %v7437_v35  ;;  %v10113_v32 = vadd.f32 %v7436_v37, %v9999_v45  ;;  %v10137_v35 = vpop.permute.xlu1 %5591  ;;  %v10139_v15 = vpop.permute.xlu0 %5596 }
 0x347   : > { %v10116_v14 = vadd.f32 %v7375_v54, %v10002_v34  ;;  %v10119_v4 = vadd.f32 %v7439_v11, %v10005_v49 }
 0x349   : > { %v7376_v23 = vpop.f32.mrb[40].mxu0  ;;  %v7440_v55 = vpop.f32.mrb[40].mxu1 }
 0x34a   : > { %v7377_v22 = vpop.f32.mrb[41].mxu0  ;;  %v7441_v63 = vpop.f32.mrb[41].mxu1 }
 0x34b   : > { %v7378_v30 = vadd.f32 %v7377_v22, %v7376_v23  ;;  %v7442_v62 = vadd.f32 %v7441_v63, %v7440_v55  ;;  %v7379_v8 = vpop.f32.mrb[42].mxu0  ;;  %v7443_v57 = vpop.f32.mrb[42].mxu1 }
 0x34c   : > { %v7380_v45 = vpop.f32.mrb[43].mxu0  ;;  %v7444_v12 = vpop.f32.mrb[43].mxu1 }
 0x34d   : > { %v10126_v34 = vadd.f32 %v7378_v30, %v10008_v7  ;;  %v7381_v2 = vadd.f32 %v7380_v45, %v7379_v8  ;;  %v7445_v49 = vadd.f32 %v7444_v12, %v7443_v57  ;;  %v10129_v26 = vadd.f32 %v7442_v62, %v10011_v13  ;;  %v10153_v12 = vpop.permute.xlu1 %5601 }
 0x34f   : > { %v10132_v37 = vadd.f32 %v7381_v2, %v10014_v21  ;;  %v10135_v17 = vadd.f32 %v7445_v49, %v10017_v40  ;;  %v10155_v2 = vpop.permute.xlu0 %5606 }
 0x351   : > { %v7382_v38 = vpop.f32.mrb[44].mxu0  ;;  %v7446_v54 = vpop.f32.mrb[44].mxu1 }
 0x352   : > { %v7383_v11 = vpop.f32.mrb[45].mxu0  ;;  %v7447_v7 = vpop.f32.mrb[45].mxu1 }
 0x353   : > { %v7384_v23 = vadd.f32 %v7383_v11, %v7382_v38  ;;  %v7448_v55 = vadd.f32 %v7447_v7, %v7446_v54  ;;  %v7385_v22 = vpop.f32.mrb[46].mxu0  ;;  %v7449_v63 = vpop.f32.mrb[46].mxu1 }
 0x354   : > { %v7386_v13 = vpop.f32.mrb[47].mxu0  ;;  %v7450_v30 = vpop.f32.mrb[47].mxu1 }
 0x355   : > { %v10142_v21 = vadd.f32 %v7384_v23, %v10020_v53  ;;  %v7387_v40 = vadd.f32 %v7386_v13, %v7385_v22  ;;  %v7451_v62 = vadd.f32 %v7450_v30, %v7449_v63  ;;  %v10145_v8 = vadd.f32 %v7448_v55, %v10023_v28 }
 0x357   : > { %v10148_v57 = vadd.f32 %v7387_v40, %v10026_v20  ;;  %v10151_v45 = vadd.f32 %v7451_v62, %v10029_v50 }
 0x359   : > { %v7452_v49 = vpop.f32.mrb[48].mxu1  ;;  %v7542_v38 = vpop.f32.mrb[48].mxu0 }
 0x35a   : > { %v5320_v53 = vadd.f32 %v7542_v38, %v10049_v27  ;;  %v7453_v54 = vpop.f32.mrb[49].mxu1  ;;  %v5311_v11 = vpop.f32.mrb[49].mxu0 }
 0x35b   : > { %v7454_v28 = vadd.f32 %v7453_v54, %v7452_v49  ;;  %v5312_v20 = vadd.f32 %v5311_v11, %v10035_v61  ;;  %v7455_v50 = vpop.f32.mrb[50].mxu1  ;;  %v7543_v7 = vpop.f32.mrb[50].mxu0 }
 0x35c   : > { %v5440_v23 = vmax.f32 %v5320_v53, 0.0  ;;  %v5323_v55 = vadd.f32 %v7543_v7, %v10055_v5  ;;  %v7456_v22 = vpop.f32.mrb[51].mxu1  ;;  %v5314_v63 = vpop.f32.mrb[51].mxu0 }
 0x35d   : > { %v5438_v27 = vmax.f32 %v5312_v20, 0.0  ;;  %v7457_v13 = vadd.f32 %v7456_v22, %v7455_v50  ;;  %v5315_v61 = vadd.f32 %v5314_v63, %v10041_v41  ;;  %v10174_v30 = vadd.f32 %v7454_v28, %v10032_v18  ;;  %v10183_v53 = vpop.permute.xlu1 %5611  ;;  %v10185_v54 = vpop.permute.xlu0 %5616 }
 0x35e   : > { %5472 = vst [vmem:[%s10162_s13 + $0x10] sm:$0xff] %v5440_v23  ;;  %v5696_v5 = vmul.f32 %v10057_v10, %v5440_v23  ;;  %v5441_v40 = vmax.f32 %v5323_v55, 0.0 }
 0x35f   : > { %5470 = vst [vmem:[%s10162_s13] sm:$0xff] %v5438_v27  ;;  %v5694_v62 = vmul.f32 %v10043_v6, %v5438_v27  ;;  %v5439_v49 = vmax.f32 %v5315_v61, 0.0  ;;  %v10181_v38 = vadd.f32 %v7457_v13, %v10038_v48 }
 0x360   : > { %5728 = vst [vmem:[%s10170_s16 + $0x10] sm:$0xff] %v5696_v5  ;;  %5473 = vst [vmem:[%s10162_s13 + $0x18] sm:$0xff] %v5441_v40  ;;  %v5697_v18 = vmul.f32 %v10073_v31, %v5441_v40 }
 0x361   : > { %5726 = vst [vmem:[%s10170_s16] sm:$0xff] %v5694_v62  ;;  %5471 = vst [vmem:[%s10162_s13 + $0x8] sm:$0xff] %v5439_v49  ;;  %v5695_v41 = vmul.f32 %v10059_v59, %v5439_v49  ;;  %v7458_v10 = vpop.f32.mrb[52].mxu1  ;;  %v7546_v11 = vpop.f32.mrb[52].mxu0 }
 0x362   : > { %5729 = vst [vmem:[%s10170_s16 + $0x18] sm:$0xff] %v5697_v18  ;;  %v5336_v6 = vadd.f32 %v7546_v11, %v10081_v25  ;;  %v7459_v48 = vpop.f32.mrb[53].mxu1  ;;  %v5327_v28 = vpop.f32.mrb[53].mxu0 }
 0x363   : > { %5727 = vst [vmem:[%s10170_s16 + $0x8] sm:$0xff] %v5695_v41  ;;  %v7460_v20 = vadd.f32 %v7459_v48, %v7458_v10  ;;  %v5328_v50 = vadd.f32 %v5327_v28, %v10065_v46  ;;  %v7461_v7 = vpop.f32.mrb[54].mxu1  ;;  %v7547_v23 = vpop.f32.mrb[54].mxu0 }
 0x364   : > { %v5444_v31 = vmax.f32 %v5336_v6, 0.0  ;;  %v5339_v55 = vadd.f32 %v7547_v23, %v10087_v60  ;;  %v7462_v59 = vpop.f32.mrb[55].mxu1  ;;  %v5330_v22 = vpop.f32.mrb[55].mxu0 }
 0x365   : > { %v5442_v63 = vmax.f32 %v5328_v50, 0.0  ;;  %v7463_v25 = vadd.f32 %v7462_v59, %v7461_v7  ;;  %v5331_v27 = vadd.f32 %v5330_v22, %v10071_v16  ;;  %v10200_v13 = vadd.f32 %v7460_v20, %v10046_v24  ;;  %v10209_v62 = vpop.permute.xlu1 %5621  ;;  %v10211_v49 = vpop.permute.xlu0 %5626 }
 0x366   : > { %5476 = vst [vmem:[%s10162_s13 + $0x30] sm:$0xff] %v5444_v31  ;;  %v5700_v46 = vmul.f32 %v10091_v1, %v5444_v31  ;;  %v5445_v61 = vmax.f32 %v5339_v55, 0.0 }
 0x367   : > { %5474 = vst [vmem:[%s10162_s13 + $0x20] sm:$0xff] %v5442_v63  ;;  %v5698_v60 = vmul.f32 %v10075_v39, %v5442_v63  ;;  %v5443_v5 = vmax.f32 %v5331_v27, 0.0  ;;  %v10207_v40 = vadd.f32 %v7463_v25, %v10052_v58 }
 0x368   : > { %5732 = vst [vmem:[%s10170_s16 + $0x30] sm:$0xff] %v5700_v46  ;;  %5477 = vst [vmem:[%s10162_s13 + $0x38] sm:$0xff] %v5445_v61  ;;  %v5701_v24 = vmul.f32 %v10105_v36, %v5445_v61 }
 0x369   : > { %5730 = vst [vmem:[%s10170_s16 + $0x20] sm:$0xff] %v5698_v60  ;;  %5475 = vst [vmem:[%s10162_s13 + $0x28] sm:$0xff] %v5443_v5  ;;  %v5699_v16 = vmul.f32 %v10089_v52, %v5443_v5  ;;  %v7464_v1 = vpop.f32.mrb[56].mxu1  ;;  %v7550_v18 = vpop.f32.mrb[56].mxu0 }
 0x36a   : > { %5733 = vst [vmem:[%s10170_s16 + $0x38] sm:$0xff] %v5701_v24  ;;  %v5352_v39 = vadd.f32 %v7550_v18, %v10113_v32  ;;  %v7465_v58 = vpop.f32.mrb[57].mxu1  ;;  %v5343_v41 = vpop.f32.mrb[57].mxu0 }
 0x36b   : > { %5731 = vst [vmem:[%s10170_s16 + $0x28] sm:$0xff] %v5699_v16  ;;  %v7466_v10 = vadd.f32 %v7465_v58, %v7464_v1  ;;  %v5344_v11 = vadd.f32 %v5343_v41, %v10097_v51  ;;  %v7467_v6 = vpop.f32.mrb[58].mxu1  ;;  %v7551_v48 = vpop.f32.mrb[58].mxu0 }
 0x36c   : > { %v5448_v36 = vmax.f32 %v5352_v39, 0.0  ;;  %v5355_v28 = vadd.f32 %v7551_v48, %v10119_v4  ;;  %v7468_v52 = vpop.f32.mrb[59].mxu1  ;;  %v5346_v20 = vpop.f32.mrb[59].mxu0 }
 0x36d   : > { %v5446_v50 = vmax.f32 %v5344_v11, 0.0  ;;  %v7469_v32 = vadd.f32 %v7468_v52, %v7467_v6  ;;  %v5347_v7 = vadd.f32 %v5346_v20, %v10103_v0  ;;  %v10226_v23 = vadd.f32 %v7466_v10, %v10062_v44  ;;  %v10235_v22 = vpop.permute.xlu1 %5631  ;;  %v10237_v63 = vpop.permute.xlu0 %5636 }
 0x36e   : > { %5480 = vst [vmem:[%s10162_s13 + $0x50] sm:$0xff] %v5448_v36  ;;  %v5704_v51 = vmul.f32 %v10123_v29, %v5448_v36  ;;  %v5449_v31 = vmax.f32 %v5355_v28, 0.0 }
 0x36f   : > { %5478 = vst [vmem:[%s10162_s13 + $0x40] sm:$0xff] %v5446_v50  ;;  %v5702_v4 = vmul.f32 %v10107_v9, %v5446_v50  ;;  %v5447_v55 = vmax.f32 %v5347_v7, 0.0  ;;  %v10233_v59 = vadd.f32 %v7469_v32, %v10068_v19 }
 0x370   : > { %5736 = vst [vmem:[%s10170_s16 + $0x50] sm:$0xff] %v5704_v51  ;;  %5481 = vst [vmem:[%s10162_s13 + $0x58] sm:$0xff] %v5449_v31  ;;  %v5705_v44 = vmul.f32 %v10137_v35, %v5449_v31 }
 0x371   : > { %5734 = vst [vmem:[%s10170_s16 + $0x40] sm:$0xff] %v5702_v4  ;;  %5479 = vst [vmem:[%s10162_s13 + $0x48] sm:$0xff] %v5447_v55  ;;  %v5703_v0 = vmul.f32 %v10121_v47, %v5447_v55  ;;  %v7470_v29 = vpop.f32.mrb[60].mxu1  ;;  %v7554_v25 = vpop.f32.mrb[60].mxu0 }
 0x372   : > { %5737 = vst [vmem:[%s10170_s16 + $0x58] sm:$0xff] %v5705_v44  ;;  %v5368_v9 = vadd.f32 %v7554_v25, %v10145_v8  ;;  %v7471_v19 = vpop.f32.mrb[61].mxu1  ;;  %v5359_v27 = vpop.f32.mrb[61].mxu0 }
 0x373   : > { %5735 = vst [vmem:[%s10170_s16 + $0x48] sm:$0xff] %v5703_v0  ;;  %v7472_v46 = vadd.f32 %v7471_v19, %v7470_v29  ;;  %v5360_v61 = vadd.f32 %v5359_v27, %v10129_v26  ;;  %v7473_v60 = vpop.f32.mrb[62].mxu1  ;;  %v7555_v5 = vpop.f32.mrb[62].mxu0 }
 0x374   : > { %v5452_v35 = vmax.f32 %v5368_v9, 0.0  ;;  %v5371_v24 = vadd.f32 %v7555_v5, %v10151_v45  ;;  %v7474_v47 = vpop.f32.mrb[63].mxu1  ;;  %v5362_v16 = vpop.f32.mrb[63].mxu0 }
 0x375   : > { %v5450_v1 = vmax.f32 %v5360_v61, 0.0  ;;  %v7475_v8 = vadd.f32 %v7474_v47, %v7473_v60  ;;  %v5363_v18 = vadd.f32 %v5362_v16, %v10135_v17  ;;  %v5239_v39 = vadd.f32 %v7472_v46, %v10078_v33  ;;  %v10257_v11 = vpop.permute.xlu1 %5641  ;;  %v5647_v6 = vpop.permute.xlu0 %5646 }
 0x376   : > { %5484 = vst [vmem:[%s10162_s13 + $0x70] sm:$0xff] %v5452_v35  ;;  %v5708_v26 = vmul.f32 %v10155_v2, %v5452_v35  ;;  %v5453_v58 = vmax.f32 %v5371_v24, 0.0 }
 0x377   : > { %5482 = vst [vmem:[%s10162_s13 + $0x60] sm:$0xff] %v5450_v1  ;;  %v5706_v45 = vmul.f32 %v10139_v15, %v5450_v1  ;;  %v5451_v41 = vmax.f32 %v5363_v18, 0.0  ;;  %v5242_v10 = vadd.f32 %v7475_v8, %v10084_v3 }
 0x378   : > { %5740 = vst [vmem:[%s10170_s16 + $0x70] sm:$0xff] %v5708_v26  ;;  %5485 = vst [vmem:[%s10162_s13 + $0x78] sm:$0xff] %v5453_v58  ;;  %v5709_v17 = vmul.f32 %v10183_v53, %v5453_v58 }
 0x379   : > { %5738 = vst [vmem:[%s10170_s16 + $0x60] sm:$0xff] %v5706_v45  ;;  %5483 = vst [vmem:[%s10162_s13 + $0x68] sm:$0xff] %v5451_v41  ;;  %v5707_v33 = vmul.f32 %v10153_v12, %v5451_v41  ;;  %v7476_v2 = vpop.f32.mrb[64].mxu1  ;;  %v7558_v48 = vpop.f32.mrb[64].mxu0 }
 0x37a   : > { %5741 = vst [vmem:[%s10170_s16 + $0x78] sm:$0xff] %v5709_v17  ;;  %v5384_v15 = vadd.f32 %v7558_v48, %v10200_v13  ;;  %v7477_v36 = vpop.f32.mrb[65].mxu1  ;;  %v5375_v28 = vpop.f32.mrb[65].mxu0 }
 0x37b   : > { %5739 = vst [vmem:[%s10170_s16 + $0x68] sm:$0xff] %v5707_v33  ;;  %v7478_v3 = vadd.f32 %v7477_v36, %v7476_v2  ;;  %v5376_v52 = vadd.f32 %v5375_v28, %v10174_v30  ;;  %v7479_v20 = vpop.f32.mrb[66].mxu1  ;;  %v7559_v50 = vpop.f32.mrb[66].mxu0 }
 0x37c   : > { %v5456_v53 = vmax.f32 %v5384_v15, 0.0  ;;  %v5387_v32 = vadd.f32 %v7559_v50, %v10207_v40  ;;  %v7480_v12 = vpop.f32.mrb[67].mxu1  ;;  %v5378_v7 = vpop.f32.mrb[67].mxu0 }
 0x37d   : > { %v5454_v51 = vmax.f32 %v5376_v52, 0.0  ;;  %v7481_v13 = vadd.f32 %v7480_v12, %v7479_v20  ;;  %v5379_v31 = vadd.f32 %v5378_v7, %v10181_v38  ;;  %v5247_v4 = vadd.f32 %v7478_v3, %v10094_v42  ;;  %v5652_v29 = vpop.permute.xlu1 %5651  ;;  %v10277_v25 = vpop.permute.xlu0 %5656 }
 0x37e   : > { %5488 = vst [vmem:[%s10162_s13 + $0x90] sm:$0xff] %v5456_v53  ;;  %v5712_v30 = vmul.f32 %v10211_v49, %v5456_v53  ;;  %v5457_v55 = vmax.f32 %v5387_v32, 0.0 }
 0x37f   : > { %5486 = vst [vmem:[%s10162_s13 + $0x80] sm:$0xff] %v5454_v51  ;;  %v5710_v40 = vmul.f32 %v10185_v54, %v5454_v51  ;;  %v5455_v44 = vmax.f32 %v5379_v31, 0.0  ;;  %v5250_v0 = vadd.f32 %v7481_v13, %v10100_v56 }
 0x380   : > { %5744 = vst [vmem:[%s10170_s16 + $0x90] sm:$0xff] %v5712_v30  ;;  %5489 = vst [vmem:[%s10162_s13 + $0x98] sm:$0xff] %v5457_v55  ;;  %v5713_v38 = vmul.f32 %v10235_v22, %v5457_v55 }
 0x381   : > { %5742 = vst [vmem:[%s10170_s16 + $0x80] sm:$0xff] %v5710_v40  ;;  %5487 = vst [vmem:[%s10162_s13 + $0x88] sm:$0xff] %v5455_v44  ;;  %v5711_v42 = vmul.f32 %v10209_v62, %v5455_v44  ;;  %v7482_v49 = vpop.f32.mrb[68].mxu1  ;;  %v7562_v9 = vpop.f32.mrb[68].mxu0 }
 0x382   : > { %5745 = vst [vmem:[%s10170_s16 + $0x98] sm:$0xff] %v5713_v38  ;;  %v5400_v19 = vadd.f32 %v7562_v9, %v5239_v39  ;;  %v7483_v54 = vpop.f32.mrb[69].mxu1  ;;  %v5391_v27 = vpop.f32.mrb[69].mxu0 }
 0x383   : > { %5743 = vst [vmem:[%s10170_s16 + $0x88] sm:$0xff] %v5711_v42  ;;  %v7484_v56 = vadd.f32 %v7483_v54, %v7482_v49  ;;  %v5392_v46 = vadd.f32 %v5391_v27, %v10226_v23  ;;  %v7485_v61 = vpop.f32.mrb[70].mxu1  ;;  %v7563_v60 = vpop.f32.mrb[70].mxu0 }
 0x384   : > { %v5460_v5 = vmax.f32 %v5400_v19, 0.0  ;;  %v5403_v22 = vadd.f32 %v7563_v60, %v5242_v10  ;;  %v7486_v35 = vpop.f32.mrb[71].mxu1  ;;  %v5394_v62 = vpop.f32.mrb[71].mxu0 }
 0x385   : > { %v5458_v24 = vmax.f32 %v5392_v46, 0.0  ;;  %v7487_v47 = vadd.f32 %v7486_v35, %v7485_v61  ;;  %v5395_v16 = vadd.f32 %v5394_v62, %v10233_v59  ;;  %v5255_v1 = vadd.f32 %v7484_v56, %v10110_v43  ;;  %v5662_v58 = vpop.permute.xlu1 %5661  ;;  %v5667_v45 = vpop.permute.xlu0 %5666 }
 0x386   : > { %5492 = vst [vmem:[%s10162_s13 + $0xb0] sm:$0xff] %v5460_v5  ;;  %v5716_v8 = vmul.f32 %v5647_v6, %v5460_v5  ;;  %v5461_v23 = vmax.f32 %v5403_v22, 0.0 }
 0x387   : > { %5490 = vst [vmem:[%s10162_s13 + $0xa0] sm:$0xff] %v5458_v24  ;;  %v5714_v18 = vmul.f32 %v10237_v63, %v5458_v24  ;;  %v5459_v39 = vmax.f32 %v5395_v16, 0.0  ;;  %v5258_v26 = vadd.f32 %v7487_v47, %v10116_v14 }
 0x388   : > { %5748 = vst [vmem:[%s10170_s16 + $0xb0] sm:$0xff] %v5716_v8  ;;  %5493 = vst [vmem:[%s10162_s13 + $0xb8] sm:$0xff] %v5461_v23  ;;  %v5717_v41 = vmul.f32 %v5652_v29, %v5461_v23 }
 0x389   : > { %5746 = vst [vmem:[%s10170_s16 + $0xa0] sm:$0xff] %v5714_v18  ;;  %5491 = vst [vmem:[%s10162_s13 + $0xa8] sm:$0xff] %v5459_v39  ;;  %v5715_v43 = vmul.f32 %v10257_v11, %v5459_v39  ;;  %v7488_v59 = vpop.f32.mrb[72].mxu1  ;;  %v7566_v10 = vpop.f32.mrb[72].mxu0 }
 0x38a   : > { %5749 = vst [vmem:[%s10170_s16 + $0xb8] sm:$0xff] %v5717_v41  ;;  %v5416_v6 = vadd.f32 %v7566_v10, %v5255_v1  ;;  %v7489_v17 = vpop.f32.mrb[73].mxu1  ;;  %v5407_v63 = vpop.f32.mrb[73].mxu0 }
 0x38b   : > { %5747 = vst [vmem:[%s10170_s16 + $0xa8] sm:$0xff] %v5715_v43  ;;  %v7490_v33 = vadd.f32 %v7489_v17, %v7488_v59  ;;  %v5408_v14 = vadd.f32 %v5407_v63, %v5247_v4  ;;  %v7491_v2 = vpop.f32.mrb[74].mxu1  ;;  %v7567_v48 = vpop.f32.mrb[74].mxu0 }
 0x38c   : > { %v5464_v15 = vmax.f32 %v5416_v6, 0.0  ;;  %v5419_v36 = vadd.f32 %v7567_v48, %v5258_v26  ;;  %v7492_v28 = vpop.f32.mrb[75].mxu1  ;;  %v5410_v3 = vpop.f32.mrb[75].mxu0 }
 0x38d   : > { %v5462_v11 = vmax.f32 %v5408_v14, 0.0  ;;  %v7493_v52 = vadd.f32 %v7492_v28, %v7491_v2  ;;  %v5411_v20 = vadd.f32 %v5410_v3, %v5250_v0  ;;  %v5263_v50 = vadd.f32 %v7490_v33, %v10126_v34  ;;  %v5672_v12 = vpop.permute.xlu1 %5671  ;;  %v5677_v31 = vpop.permute.xlu0 %5676 }
 0x38e   : > { %5496 = vst [vmem:[%s10162_s13 + $0xd0] sm:$0xff] %v5464_v15  ;;  %v5720_v53 = vmul.f32 %v5667_v45, %v5464_v15  ;;  %v5465_v32 = vmax.f32 %v5419_v36, 0.0 }
 0x38f   : > { %5494 = vst [vmem:[%s10162_s13 + $0xc0] sm:$0xff] %v5462_v11  ;;  %v5718_v7 = vmul.f32 %v10277_v25, %v5462_v11  ;;  %v5463_v51 = vmax.f32 %v5411_v20, 0.0  ;;  %v5266_v13 = vadd.f32 %v7493_v52, %v10132_v37 }
 0x390   : > { %5752 = vst [vmem:[%s10170_s16 + $0xd0] sm:$0xff] %v5720_v53  ;;  %5497 = vst [vmem:[%s10162_s13 + $0xd8] sm:$0xff] %v5465_v32  ;;  %v5721_v4 = vmul.f32 %v5672_v12, %v5465_v32 }
 0x391   : > { %5750 = vst [vmem:[%s10170_s16 + $0xc0] sm:$0xff] %v5718_v7  ;;  %5495 = vst [vmem:[%s10162_s13 + $0xc8] sm:$0xff] %v5463_v51  ;;  %v5719_v30 = vmul.f32 %v5662_v58, %v5463_v51  ;;  %v7494_v34 = vpop.f32.mrb[76].mxu1  ;;  %v7570_v55 = vpop.f32.mrb[76].mxu0 }
 0x392   : > { %5753 = vst [vmem:[%s10170_s16 + $0xd8] sm:$0xff] %v5721_v4  ;;  %v7495_v40 = vpop.f32.mrb[77].mxu1  ;;  %v5423_v44 = vpop.f32.mrb[77].mxu0 }
 0x393   : > { %5751 = vst [vmem:[%s10170_s16 + $0xc8] sm:$0xff] %v5719_v30  ;;  %v7496_v0 = vadd.f32 %v7495_v40, %v7494_v34  ;;  %v5424_v29 = vadd.f32 %v5423_v44, %v5263_v50  ;;  %v7497_v25 = vpop.f32.mrb[78].mxu1  ;;  %v7571_v38 = vpop.f32.mrb[78].mxu0 }
 0x394   : > { %v7498_v37 = vpop.f32.mrb[79].mxu1  ;;  %v5426_v42 = vpop.f32.mrb[79].mxu0 }
 0x395   : > { %v5271_v49 = vadd.f32 %v7496_v0, %v10142_v21  ;;  %v5466_v9 = vmax.f32 %v5424_v29, 0.0  ;;  %v7499_v19 = vadd.f32 %v7498_v37, %v7497_v25  ;;  %v5427_v54 = vadd.f32 %v5426_v42, %v5266_v13  ;;  %v5682_v27 = vpop.permute.xlu1 %5681  ;;  %v5687_v35 = vpop.permute.xlu0 %5686 }
 0x397   : > { %v5432_v56 = vadd.f32 %v7570_v55, %v5271_v49  ;;  %5498 = vst [vmem:[%s10162_s13 + $0xe0] sm:$0xff] %v5466_v9  ;;  %v5722_v46 = vmul.f32 %v5677_v31, %v5466_v9  ;;  %v5274_v61 = vadd.f32 %v7499_v19, %v10148_v57  ;;  %v5467_v60 = vmax.f32 %v5427_v54, 0.0 }
 0x399   : > { %v5468_v5 = vmax.f32 %v5432_v56, 0.0  ;;  %5754 = vst [vmem:[%s10170_s16 + $0xe0] sm:$0xff] %v5722_v46  ;;  %v5435_v22 = vadd.f32 %v7571_v38, %v5274_v61  ;;  %5499 = vst [vmem:[%s10162_s13 + $0xe8] sm:$0xff] %v5467_v60  ;;  %v5723_v21 = vmul.f32 %v5682_v27, %v5467_v60  ;;  %v5692_v47 = vpop.permute.xlu1 %5691 }
 0x39b   : > { %5500 = vst [vmem:[%s10162_s13 + $0xf0] sm:$0xff] %v5468_v5  ;;  %v5724_v62 = vmul.f32 %v5687_v35, %v5468_v5  ;;  %v5469_v24 = vmax.f32 %v5435_v22, 0.0  ;;  %5755 = vst [vmem:[%s10170_s16 + $0xe8] sm:$0xff] %v5723_v21 }
 0x39d   : > { %5756 = vst [vmem:[%s10170_s16 + $0xf0] sm:$0xff] %v5724_v62  ;;  %5501 = vst [vmem:[%s10162_s13 + $0xf8] sm:$0xff] %v5469_v24  ;;  %v5725_v16 = vmul.f32 %v5692_v47, %v5469_v24 }
 0x39f   : > { %5757 = vst [vmem:[%s10170_s16 + $0xf8] sm:$0xff] %v5725_v16 }
 0x3a0 PF: > { %s16_s18 = sadd.s32 1, %s8271_s18  }
 0x3a1   : > { %p13_p4 = scmp.ge.s32.totalorder %s16_s18, 4  }
 0x3a3   :  { %15 = sbr.rel (!%p13_p4) target bundleno = 1 (0x1), region = 81 }

</bundles_post_ra>
